<compile_context>
chip_gen: v7x
topology: tpu7x:2x2x1
jax: 0.10.0
libtpu: 0.0.40
codegen_flags: <defaults>
</compile_context>

<pallas_src>
import functools

import jax
import jax.numpy as jnp
from jax.experimental import pallas as pl
from jax.experimental.pallas import tpu as pltpu

_BN_EPS = 1e-5
_BN_SCALE = (1.0 + _BN_EPS) ** -0.5   # eval-mode BatchNorm with default init
_TK = 9                               # temporal kernel size
_TPAD = 4                             # temporal padding


# ----------------------------------------------------------------------------
# In-kernel building blocks (single sample; everything stays in VMEM).
# ----------------------------------------------------------------------------
def _stgcn_block(x_nm, x_tm, w_refs, hpad_ref, *, Tin, V, Cout, stride, build_tm):
    """One ST-GCN block on one sample.

    x_nm : (V*Tin, Cin)  bf16 value, node-major rows ordered (node, time).
    x_tm : (Tin, V*Cin)  bf16 value, time-major rows; cols ordered (node, chan).
    w_refs: [wg (V*Cin,V*Cout), bg (1,V*Cout), wr (Cin,Cout), br (1,Cout),
             wt (9*Cout,Cout),  bt (1,Cout), (sub (V*Tout,V*Tin) if stride>1)]
    hpad_ref: (V, Tin+8, Cout) bf16 scratch - zero-padded gcn activation.
    Returns (out_nm (V*Tout, Cout) bf16, out_tm (Tout, V*Cout) bf16 or None).
    """
    D = Cout
    Tout = Tin // stride
    if stride > 1:
        wg_ref, bg_ref, wr_ref, br_ref, wt_ref, bt_ref, sub_ref = w_refs
    else:
        wg_ref, bg_ref, wr_ref, br_ref, wt_ref, bt_ref = w_refs

    # graph conv: adjacency + BN folded into one weight -> one matmul (M=Tin)
    y = jnp.dot(x_tm, wg_ref[...], preferred_element_type=jnp.float32) + bg_ref[...]
    h = jnp.maximum(y, 0.0).astype(jnp.bfloat16)     # tcn BN->ReLU (scale in wt)

    # write the relu'd activation node-major into the zero-padded scratch
    zpad = jnp.zeros((V, _TPAD, D), jnp.bfloat16)
    hpad_ref[:, 0:_TPAD, :] = zpad
    hpad_ref[:, _TPAD + Tin:_TPAD + Tin + _TPAD, :] = zpad
    for v in range(V):
        hpad_ref[v, _TPAD:_TPAD + Tin, :] = h[:, v * D:(v + 1) * D]

    # temporal (9,1) conv as ONE im2col matmul: (V*Tin, 9D) @ (9D, D)
    col = jnp.concatenate(
        [hpad_ref[:, tau:tau + Tin, :] for tau in range(_TK)], axis=2
    ).reshape(V * Tin, _TK * D)
    tc = jnp.dot(col, wt_ref[...], preferred_element_type=jnp.float32) + bt_ref[...]

    # dense residual 1x1 conv on node-major rows: (V*Tin, Cin) @ (Cin, D)
    res = jnp.dot(x_nm, wr_ref[...], preferred_element_type=jnp.float32) + br_ref[...]

    out = jnp.maximum(tc + res, 0.0).astype(jnp.bfloat16)          # (V*Tin, D)

    # temporal stride: exact 0/1 row-selection matmul keeps rows t = 0, s, 2s...
    if stride > 1:
        out = jnp.dot(sub_ref[...], out,
                      preferred_element_type=jnp.float32).astype(jnp.bfloat16)

    # time-major copy of the output for the next block's graph conv
    out_tm = None
    if build_tm:
        out_tm = jnp.concatenate(
            [out[v * Tout:(v + 1) * Tout, :] for v in range(V)], axis=1)
    return out, out_tm


def _attention_head(x_nm, head_refs):
    """avg-pool over time + spatial attention + fcn, one sample.

    x_nm : (V*Tq, z) bf16, node-major.  Returns ((1,z) feature, (V,1) beta).
    """
    pool_ref, wa1_ref, ba1_ref, wa2_ref, ba2_ref, wf_ref, bf_ref = head_refs
    # mean over time per node via a tiny constant matmul (V, V*Tq)@(V*Tq, z)
    feat = jnp.dot(pool_ref[...], x_nm, preferred_element_type=jnp.float32)   # (V,z)
    h = jnp.tanh(jnp.dot(feat.astype(jnp.bfloat16), wa1_ref[...],
                         preferred_element_type=jnp.float32) + ba1_ref[...])  # (V,hid)
    e = (jnp.dot(h.astype(jnp.bfloat16), wa2_ref[...],
                 preferred_element_type=jnp.float32) + ba2_ref[...])          # (V,1)
    m = jnp.max(e, axis=0, keepdims=True)
    p = jnp.exp(e - m)
    beta = p / jnp.sum(p, axis=0, keepdims=True)                              # (V,1)
    pooled = jnp.sum(beta * feat, axis=0, keepdims=True)                      # (1,z)
    out = (jnp.dot(pooled.astype(jnp.bfloat16), wf_ref[...],
                   preferred_element_type=jnp.float32) + bf_ref[...])         # (1,z)
    return out, beta


def _sag_kernel(cfg, *refs):
    V, z = cfg["V"], cfg["z_dim"]
    it = iter(refs)
    xtm_ref = next(it)
    xnm_ref = next(it)
    blk_refs = []
    for b in cfg["blocks"]:
        cnt = 7 if b["stride"] > 1 else 6
        blk_refs.append([next(it) for _ in range(cnt)])
    head_refs = [next(it) for _ in range(7)]
    feat_ref = next(it)
    beta_ref = next(it)
    hpad_refs = list(it)

    x_tm = xtm_ref[0]                    # (T, V*Cin)  bf16
    x_nm = xnm_ref[0]                    # (V*T, Cin)  bf16
    nb = len(cfg["blocks"])
    for bi, b in enumerate(cfg["blocks"]):
        x_nm, x_tm = _stgcn_block(
            x_nm, x_tm, blk_refs[bi], hpad_refs[bi],
            Tin=b["T"], V=V, Cout=b["Cout"], stride=b["stride"],
            build_tm=(bi + 1 < nb))

    out, beta = _attention_head(x_nm, head_refs)
    feat_ref[...] = out.reshape(1, 1, z)
    beta_ref[...] = beta.reshape(1, V, 1)


# ----------------------------------------------------------------------------
# Deterministic graph / parameter construction and weight fusion.
# ----------------------------------------------------------------------------
def build_graph(V=8, K=3):
    """K=3 spatial partitions (self / inward / outward) of a chain graph."""
    I = jnp.eye(V, dtype=jnp.float32)
    adj = jnp.zeros((V, V), jnp.float32)
    for i in range(V - 1):
        adj = adj.at[i, i + 1].set(1.0).at[i + 1, i].set(1.0)
    deg = adj.sum(axis=1)
    dinv = jnp.where(deg > 0, 1.0 / deg, 0.0)
    inward = jnp.tril(adj, -1) * dinv[:, None]
    outward = jnp.triu(adj, 1) * dinv[:, None]
    return jnp.stack([I, inward, outward])[:K]


def build_config(N, in_dim, T, V, z_dim, beta_dim):
    chans = [(in_dim, 64, 1), (64, 128, 2), (128, z_dim, 2)]
    blocks, t = [], T
    for cin, cout, s in chans:
        blocks.append(dict(Cin=cin, Cout=cout, stride=s, T=t))
        t //= s
    return dict(N=N, in_dim=in_dim, T=T, V=V, z_dim=z_dim, beta_dim=beta_dim,
                blocks=blocks, T_out=t)


def init_params(key, in_dim, z_dim, beta_dim, K):
    keys = jax.random.split(key, 16)

    def rn(k, shape, scale=0.1):
        return scale * jax.random.normal(k, shape, jnp.float32)

    cfgs = [(in_dim, 64, 1), (64, 128, 2), (128, z_dim, 2)]
    blocks, ki = [], 0
    for (cin, cout, stride) in cfgs:
        blocks.append(dict(
            stride=stride,
            gcn_w=rn(keys[ki], (K, cin, cout)),
            gcn_b=jnp.zeros((K, cout), jnp.float32),
            tcn_w=rn(keys[ki + 1], (_TK, cout, cout)),
            tcn_b=jnp.zeros((cout,), jnp.float32),
            res_w=rn(keys[ki + 2], (cin, cout)),
            res_b=jnp.zeros((cout,), jnp.float32),
        ))
        ki += 3
    return dict(
        blocks=blocks,
        attn_w1=rn(keys[ki], (z_dim, beta_dim)),
        attn_b1=jnp.zeros((beta_dim,), jnp.float32),
        attn_w2=rn(keys[ki + 1], (beta_dim, 1)),
        attn_b2=jnp.zeros((1,), jnp.float32),
        fcn_w=rn(keys[ki + 2], (z_dim, z_dim)),
        fcn_b=jnp.zeros((z_dim,), jnp.float32),
    )


def _subsample_matrix(V, Tin, stride):
    """0/1 matrix selecting node-major rows at t = 0, stride, 2*stride, ..."""
    Tout = Tin // stride
    rows = jnp.arange(V * Tout)
    src = (rows // Tout) * Tin + (rows % Tout) * stride
    cols = jnp.arange(V * Tin)
    return (cols[None, :] == src[:, None]).astype(jnp.bfloat16)


def _pool_matrix(V, Tq):
    """(V, V*Tq) matrix averaging node-major rows over time per node."""
    rows = jnp.arange(V)
    cols = jnp.arange(V * Tq)
    sel = ((cols[None, :] // Tq) == rows[:, None]).astype(jnp.float32) / float(Tq)
    return sel.astype(jnp.bfloat16)


def fuse_params(params, A, cfg):
    """Fold adjacency, eval-mode BatchNorm scales and data_bn into the conv
    weights; lay everything out for the fused kernel (done once at build)."""
    V, z, hid = cfg["V"], cfg["z_dim"], cfg["beta_dim"]
    c1 = _BN_SCALE

    flat = []
    in_scale = c1                       # data_bn feeds the first block
    for blk, bcfg in zip(params["blocks"], cfg["blocks"]):
        gcn_w, gcn_b = blk["gcn_w"], blk["gcn_b"]      # (K,Cin,Cout), (K,Cout)
        res_w, res_b = blk["res_w"], blk["res_b"]      # (Cin,Cout),   (Cout,)
        tcn_w, tcn_b = blk["tcn_w"], blk["tcn_b"]      # (9,Cout,Cout),(Cout,)
        cin, cout = gcn_w.shape[1], gcn_w.shape[2]

        # gcn 1x1 conv + einsum('nkctv,kvw->nctw') fused into one weight
        wg = (jnp.einsum("kvw,kio->viwo", A, gcn_w)
              .reshape(V * cin, V * cout) * in_scale)
        bg = jnp.einsum("kw,ko->wo", A.sum(axis=1), gcn_b).reshape(1, V * cout)
        # dense residual 1x1 conv (applied node-major), residual BN folded
        wr = res_w * (in_scale * c1)
        br = (c1 * res_b).reshape(1, cout)
        # temporal conv: fold pre-conv BN (via relu positive-homogeneity) and
        # post-conv BN scales; laid out (tau*Cout + cin, cout) for the im2col
        wt = (tcn_w * (c1 * c1)).reshape(_TK * cout, cout)
        bt = (c1 * tcn_b).reshape(1, cout)

        flat += [wg.astype(jnp.bfloat16), bg.astype(jnp.float32),
                 wr.astype(jnp.bfloat16), br.astype(jnp.float32),
                 wt.astype(jnp.bfloat16), bt.astype(jnp.float32)]
        if bcfg["stride"] > 1:
            flat.append(_subsample_matrix(V, bcfg["T"], bcfg["stride"]))
        in_scale = 1.0

    # spatial attention + fcn (dense, vectorized over nodes)
    flat += [_pool_matrix(V, cfg["T_out"]),
             params["attn_w1"].astype(jnp.bfloat16),
             params["attn_b1"].reshape(1, hid).astype(jnp.float32),
             params["attn_w2"].astype(jnp.bfloat16),
             params["attn_b2"].reshape(1, 1).astype(jnp.float32),
             params["fcn_w"].astype(jnp.bfloat16),
             params["fcn_b"].reshape(1, z).astype(jnp.float32)]
    return flat


# ----------------------------------------------------------------------------
# Wrapper: one pallas_call for the whole forward.
# ----------------------------------------------------------------------------
def _const_index_map(ndim):
    return lambda n: (0,) * ndim


def make_sag_forward(cfg, weights):
    N, T, V = cfg["N"], cfg["T"], cfg["V"]
    cin, z = cfg["in_dim"], cfg["z_dim"]

    xtm_spec = pl.BlockSpec((1, T, V * cin), lambda n: (n, 0, 0))
    xnm_spec = pl.BlockSpec((1, V * T, cin), lambda n: (n, 0, 0))
    w_specs = [pl.BlockSpec(w.shape, _const_index_map(w.ndim)) for w in weights]
    out_shape = (jax.ShapeDtypeStruct((N, 1, z), jnp.float32),
                 jax.ShapeDtypeStruct((N, V, 1), jnp.float32))
    out_specs = [pl.BlockSpec((1, 1, z), lambda n: (n, 0, 0)),
                 pl.BlockSpec((1, V, 1), lambda n: (n, 0, 0))]

    # per-block zero-padded gcn activation scratch, node-major, bf16
    scratch = [pltpu.VMEM((V, b["T"] + 2 * _TPAD, b["Cout"]), jnp.bfloat16)
               for b in cfg["blocks"]]

    call = pl.pallas_call(
        functools.partial(_sag_kernel, cfg),
        out_shape=out_shape,
        grid_spec=pltpu.PrefetchScalarGridSpec(
            num_scalar_prefetch=0,
            grid=(N,),
            in_specs=[xtm_spec, xnm_spec] + w_specs,
            out_specs=out_specs,
            scratch_shapes=scratch),
        compiler_params=pltpu.CompilerParams(
            dimension_semantics=("parallel",)),
    )

    def forward(x):
        # x: (N, C, T, V) (PyTorch NCHW)
        #   -> time-major rows (n,t), cols (v,c)   for the graph-conv matmul
        #   -> node-major rows (n,v,t), cols (c)   for residual / tcn / attention
        x_tm = (jnp.transpose(x, (0, 2, 3, 1))
                .reshape(N, T, V * cin).astype(jnp.bfloat16))
        x_nm = (jnp.transpose(x, (0, 3, 2, 1))
                .reshape(N, V * T, cin).astype(jnp.bfloat16))
        feat3, beta3 = call(x_tm, x_nm, *weights)
        return feat3.reshape(N, z), beta3

    return jax.jit(forward)


if __name__ == "__main__":
    N, C, T, V = 2, 4, 16, 8
    K, z_dim, beta_dim = 3, 32, 16

    key = jax.random.PRNGKey(0)
    kx, kp = jax.random.split(key)
    x = jax.random.normal(kx, (N, C, T, V), jnp.float32)

    A = build_graph(V, K)
    cfg = build_config(N, C, T, V, z_dim, beta_dim)
    raw_params = init_params(kp, C, z_dim, beta_dim, K)
    weights = fuse_params(raw_params, A, cfg)

    fwd = make_sag_forward(cfg, weights)
    feature, beta = fwd(x)
    jax.block_until_ready((feature, beta))

    assert feature.shape == (N, z_dim), feature.shape
    assert beta.shape == (N, V, 1), beta.shape
    assert bool(jnp.all(jnp.isfinite(feature)))
    assert bool(jnp.all(jnp.isfinite(beta)))
    print("KERNEL_OK")
</pallas_src>

<mosaic_0001>
module attributes {stable_mosaic.version = 11 : i64} {
  func.func @_sag_kernel(%arg0: i32, %arg1: memref<1x16x32xbf16, #tpu.memory_space<vmem>>, %arg2: memref<1x128x4xbf16, #tpu.memory_space<vmem>>, %arg3: memref<32x512xbf16, #tpu.memory_space<vmem>>, %arg4: memref<1x512xf32, #tpu.memory_space<vmem>>, %arg5: memref<4x64xbf16, #tpu.memory_space<vmem>>, %arg6: memref<1x64xf32, #tpu.memory_space<vmem>>, %arg7: memref<576x64xbf16, #tpu.memory_space<vmem>>, %arg8: memref<1x64xf32, #tpu.memory_space<vmem>>, %arg9: memref<512x1024xbf16, #tpu.memory_space<vmem>>, %arg10: memref<1x1024xf32, #tpu.memory_space<vmem>>, %arg11: memref<64x128xbf16, #tpu.memory_space<vmem>>, %arg12: memref<1x128xf32, #tpu.memory_space<vmem>>, %arg13: memref<1152x128xbf16, #tpu.memory_space<vmem>>, %arg14: memref<1x128xf32, #tpu.memory_space<vmem>>, %arg15: memref<64x128xbf16, #tpu.memory_space<vmem>>, %arg16: memref<1024x256xbf16, #tpu.memory_space<vmem>>, %arg17: memref<1x256xf32, #tpu.memory_space<vmem>>, %arg18: memref<128x32xbf16, #tpu.memory_space<vmem>>, %arg19: memref<1x32xf32, #tpu.memory_space<vmem>>, %arg20: memref<288x32xbf16, #tpu.memory_space<vmem>>, %arg21: memref<1x32xf32, #tpu.memory_space<vmem>>, %arg22: memref<32x64xbf16, #tpu.memory_space<vmem>>, %arg23: memref<8x32xbf16, #tpu.memory_space<vmem>>, %arg24: memref<32x16xbf16, #tpu.memory_space<vmem>>, %arg25: memref<1x16xf32, #tpu.memory_space<vmem>>, %arg26: memref<16x1xbf16, #tpu.memory_space<vmem>>, %arg27: memref<1x1xf32, #tpu.memory_space<vmem>>, %arg28: memref<32x32xbf16, #tpu.memory_space<vmem>>, %arg29: memref<1x32xf32, #tpu.memory_space<vmem>>, %arg30: memref<1x1x32xf32, #tpu.memory_space<vmem>>, %arg31: memref<1x8x1xf32, #tpu.memory_space<vmem>>, %arg32: memref<8x24x64xbf16, #tpu.memory_space<vmem>>, %arg33: memref<8x24x128xbf16, #tpu.memory_space<vmem>>, %arg34: memref<8x16x32xbf16, #tpu.memory_space<vmem>>) attributes {dimension_semantics = [#tpu.dimension_semantics<parallel>], iteration_bounds = array<i64: 2>, scalar_prefetch = 0 : i64, scratch_operands = 3 : i64, tpu.core_type = #tpu.core_type<tc>, window_params = [{transform_indices = @transform_0, window_bounds = array<i64: 1, 16, 32>}, {transform_indices = @transform_1, window_bounds = array<i64: 1, 128, 4>}, {pipeline_mode = #tpu.pipeline_mode<synchronous>, transform_indices = @transform_2, window_bounds = array<i64: 32, 512>}, {pipeline_mode = #tpu.pipeline_mode<synchronous>, transform_indices = @transform_3, window_bounds = array<i64: 1, 512>}, {pipeline_mode = #tpu.pipeline_mode<synchronous>, transform_indices = @transform_4, window_bounds = array<i64: 4, 64>}, {pipeline_mode = #tpu.pipeline_mode<synchronous>, transform_indices = @transform_5, window_bounds = array<i64: 1, 64>}, {pipeline_mode = #tpu.pipeline_mode<synchronous>, transform_indices = @transform_6, window_bounds = array<i64: 576, 64>}, {pipeline_mode = #tpu.pipeline_mode<synchronous>, transform_indices = @transform_7, window_bounds = array<i64: 1, 64>}, {pipeline_mode = #tpu.pipeline_mode<synchronous>, transform_indices = @transform_8, window_bounds = array<i64: 512, 1024>}, {pipeline_mode = #tpu.pipeline_mode<synchronous>, transform_indices = @transform_9, window_bounds = array<i64: 1, 1024>}, {pipeline_mode = #tpu.pipeline_mode<synchronous>, transform_indices = @transform_10, window_bounds = array<i64: 64, 128>}, {pipeline_mode = #tpu.pipeline_mode<synchronous>, transform_indices = @transform_11, window_bounds = array<i64: 1, 128>}, {pipeline_mode = #tpu.pipeline_mode<synchronous>, transform_indices = @transform_12, window_bounds = array<i64: 1152, 128>}, {pipeline_mode = #tpu.pipeline_mode<synchronous>, transform_indices = @transform_13, window_bounds = array<i64: 1, 128>}, {pipeline_mode = #tpu.pipeline_mode<synchronous>, transform_indices = @transform_14, window_bounds = array<i64: 64, 128>}, {pipeline_mode = #tpu.pipeline_mode<synchronous>, transform_indices = @transform_15, window_bounds = array<i64: 1024, 256>}, {pipeline_mode = #tpu.pipeline_mode<synchronous>, transform_indices = @transform_16, window_bounds = array<i64: 1, 256>}, {pipeline_mode = #tpu.pipeline_mode<synchronous>, transform_indices = @transform_17, window_bounds = array<i64: 128, 32>}, {pipeline_mode = #tpu.pipeline_mode<synchronous>, transform_indices = @transform_18, window_bounds = array<i64: 1, 32>}, {pipeline_mode = #tpu.pipeline_mode<synchronous>, transform_indices = @transform_19, window_bounds = array<i64: 288, 32>}, {pipeline_mode = #tpu.pipeline_mode<synchronous>, transform_indices = @transform_20, window_bounds = array<i64: 1, 32>}, {pipeline_mode = #tpu.pipeline_mode<synchronous>, transform_indices = @transform_21, window_bounds = array<i64: 32, 64>}, {pipeline_mode = #tpu.pipeline_mode<synchronous>, transform_indices = @transform_22, window_bounds = array<i64: 8, 32>}, {pipeline_mode = #tpu.pipeline_mode<synchronous>, transform_indices = @transform_23, window_bounds = array<i64: 32, 16>}, {pipeline_mode = #tpu.pipeline_mode<synchronous>, transform_indices = @transform_24, window_bounds = array<i64: 1, 16>}, {pipeline_mode = #tpu.pipeline_mode<synchronous>, transform_indices = @transform_25, window_bounds = array<i64: 16, 1>}, {pipeline_mode = #tpu.pipeline_mode<synchronous>, transform_indices = @transform_26, window_bounds = array<i64: 1, 1>}, {pipeline_mode = #tpu.pipeline_mode<synchronous>, transform_indices = @transform_27, window_bounds = array<i64: 32, 32>}, {pipeline_mode = #tpu.pipeline_mode<synchronous>, transform_indices = @transform_28, window_bounds = array<i64: 1, 32>}, {transform_indices = @transform_29, window_bounds = array<i64: 1, 1, 32>}, {transform_indices = @transform_30, window_bounds = array<i64: 1, 8, 1>}]} {
    %c0 = arith.constant 0 : index
    %c0_0 = arith.constant 0 : index
    %c0_1 = arith.constant 0 : index
    %0 = vector.load %arg1[%c0, %c0_0, %c0_1] : memref<1x16x32xbf16, #tpu.memory_space<vmem>>, vector<1x16x32xbf16>
    %1 = vector.shape_cast %0 : vector<1x16x32xbf16> to vector<16x32xbf16>
    %c0_2 = arith.constant 0 : index
    %c0_3 = arith.constant 0 : index
    %c0_4 = arith.constant 0 : index
    %2 = vector.load %arg2[%c0_2, %c0_3, %c0_4] : memref<1x128x4xbf16, #tpu.memory_space<vmem>>, vector<1x128x4xbf16>
    %3 = vector.shape_cast %2 : vector<1x128x4xbf16> to vector<128x4xbf16>
    %c0_5 = arith.constant 0 : index
    %c0_6 = arith.constant 0 : index
    %4 = vector.load %arg3[%c0_5, %c0_6] : memref<32x512xbf16, #tpu.memory_space<vmem>>, vector<32x512xbf16>
    %cst = arith.constant dense<0.000000e+00> : vector<16x512xf32>
    %5 = tpu.matmul %1, %4, %cst {dimension_numbers = #tpu.dot_dimension_numbers<[1], [0], [0], [1], [0, 0, 1, 1], [], []>} : vector<16x32xbf16>, vector<32x512xbf16>, vector<16x512xf32> -> vector<16x512xf32>
    %c0_7 = arith.constant 0 : index
    %c0_8 = arith.constant 0 : index
    %6 = vector.load %arg4[%c0_7, %c0_8] : memref<1x512xf32, #tpu.memory_space<vmem>>, vector<1x512xf32>
    %7 = vector.broadcast %6 : vector<1x512xf32> to vector<16x512xf32>
    %8 = arith.addf %5, %7 : vector<16x512xf32>
    %cst_9 = arith.constant 0.000000e+00 : f32
    %9 = vector.broadcast %cst_9 : f32 to vector<16x512xf32>
    %10 = arith.maximumf %8, %9 : vector<16x512xf32>
    %11 = arith.truncf %10 : vector<16x512xf32> to vector<16x512xbf16>
    %cst_10 = arith.constant 0.000000e+00 : bf16
    %12 = vector.broadcast %cst_10 : bf16 to vector<8x4x64xbf16>
    %c0_11 = arith.constant 0 : index
    %c0_12 = arith.constant 0 : index
    %c0_13 = arith.constant 0 : index
    %13 = vector.load %arg32[%c0_11, %c0_12, %c0_13] : memref<8x24x64xbf16, #tpu.memory_space<vmem>>, vector<8x4x64xbf16>
    tpu.vector_store %arg32[%c0_11, %c0_12, %c0_13], %12 {strides = array<i32>} : memref<8x24x64xbf16, #tpu.memory_space<vmem>>, vector<8x4x64xbf16>,
    %c0_14 = arith.constant 0 : index
    %c20 = arith.constant 20 : index
    %c0_15 = arith.constant 0 : index
    %14 = vector.load %arg32[%c0_14, %c20, %c0_15] : memref<8x24x64xbf16, #tpu.memory_space<vmem>>, vector<8x4x64xbf16>
    tpu.vector_store %arg32[%c0_14, %c20, %c0_15], %12 {strides = array<i32>} : memref<8x24x64xbf16, #tpu.memory_space<vmem>>, vector<8x4x64xbf16>,
    %15 = vector.extract_strided_slice %11 {offsets = [0, 0], sizes = [16, 64], strides = [1, 1]} : vector<16x512xbf16> to vector<16x64xbf16>
    %c0_16 = arith.constant 0 : index
    %c4 = arith.constant 4 : index
    %c0_17 = arith.constant 0 : index
    %16 = vector.load %arg32[%c0_16, %c4, %c0_17] : memref<8x24x64xbf16, #tpu.memory_space<vmem>>, vector<1x16x64xbf16>
    %17 = vector.shape_cast %16 : vector<1x16x64xbf16> to vector<16x64xbf16>
    %18 = vector.shape_cast %15 : vector<16x64xbf16> to vector<1x16x64xbf16>
    tpu.vector_store %arg32[%c0_16, %c4, %c0_17], %18 {strides = array<i32>} : memref<8x24x64xbf16, #tpu.memory_space<vmem>>, vector<1x16x64xbf16>,
    %19 = vector.extract_strided_slice %11 {offsets = [0, 64], sizes = [16, 64], strides = [1, 1]} : vector<16x512xbf16> to vector<16x64xbf16>
    %c1 = arith.constant 1 : index
    %c4_18 = arith.constant 4 : index
    %c0_19 = arith.constant 0 : index
    %20 = vector.load %arg32[%c1, %c4_18, %c0_19] : memref<8x24x64xbf16, #tpu.memory_space<vmem>>, vector<1x16x64xbf16>
    %21 = vector.shape_cast %20 : vector<1x16x64xbf16> to vector<16x64xbf16>
    %22 = vector.shape_cast %19 : vector<16x64xbf16> to vector<1x16x64xbf16>
    tpu.vector_store %arg32[%c1, %c4_18, %c0_19], %22 {strides = array<i32>} : memref<8x24x64xbf16, #tpu.memory_space<vmem>>, vector<1x16x64xbf16>,
    %23 = vector.extract_strided_slice %11 {offsets = [0, 128], sizes = [16, 64], strides = [1, 1]} : vector<16x512xbf16> to vector<16x64xbf16>
    %c2 = arith.constant 2 : index
    %c4_20 = arith.constant 4 : index
    %c0_21 = arith.constant 0 : index
    %24 = vector.load %arg32[%c2, %c4_20, %c0_21] : memref<8x24x64xbf16, #tpu.memory_space<vmem>>, vector<1x16x64xbf16>
    %25 = vector.shape_cast %24 : vector<1x16x64xbf16> to vector<16x64xbf16>
    %26 = vector.shape_cast %23 : vector<16x64xbf16> to vector<1x16x64xbf16>
    tpu.vector_store %arg32[%c2, %c4_20, %c0_21], %26 {strides = array<i32>} : memref<8x24x64xbf16, #tpu.memory_space<vmem>>, vector<1x16x64xbf16>,
    %27 = vector.extract_strided_slice %11 {offsets = [0, 192], sizes = [16, 64], strides = [1, 1]} : vector<16x512xbf16> to vector<16x64xbf16>
    %c3 = arith.constant 3 : index
    %c4_22 = arith.constant 4 : index
    %c0_23 = arith.constant 0 : index
    %28 = vector.load %arg32[%c3, %c4_22, %c0_23] : memref<8x24x64xbf16, #tpu.memory_space<vmem>>, vector<1x16x64xbf16>
    %29 = vector.shape_cast %28 : vector<1x16x64xbf16> to vector<16x64xbf16>
    %30 = vector.shape_cast %27 : vector<16x64xbf16> to vector<1x16x64xbf16>
    tpu.vector_store %arg32[%c3, %c4_22, %c0_23], %30 {strides = array<i32>} : memref<8x24x64xbf16, #tpu.memory_space<vmem>>, vector<1x16x64xbf16>,
    %31 = vector.extract_strided_slice %11 {offsets = [0, 256], sizes = [16, 64], strides = [1, 1]} : vector<16x512xbf16> to vector<16x64xbf16>
    %c4_24 = arith.constant 4 : index
    %c4_25 = arith.constant 4 : index
    %c0_26 = arith.constant 0 : index
    %32 = vector.load %arg32[%c4_24, %c4_25, %c0_26] : memref<8x24x64xbf16, #tpu.memory_space<vmem>>, vector<1x16x64xbf16>
    %33 = vector.shape_cast %32 : vector<1x16x64xbf16> to vector<16x64xbf16>
    %34 = vector.shape_cast %31 : vector<16x64xbf16> to vector<1x16x64xbf16>
    tpu.vector_store %arg32[%c4_24, %c4_25, %c0_26], %34 {strides = array<i32>} : memref<8x24x64xbf16, #tpu.memory_space<vmem>>, vector<1x16x64xbf16>,
    %35 = vector.extract_strided_slice %11 {offsets = [0, 320], sizes = [16, 64], strides = [1, 1]} : vector<16x512xbf16> to vector<16x64xbf16>
    %c5 = arith.constant 5 : index
    %c4_27 = arith.constant 4 : index
    %c0_28 = arith.constant 0 : index
    %36 = vector.load %arg32[%c5, %c4_27, %c0_28] : memref<8x24x64xbf16, #tpu.memory_space<vmem>>, vector<1x16x64xbf16>
    %37 = vector.shape_cast %36 : vector<1x16x64xbf16> to vector<16x64xbf16>
    %38 = vector.shape_cast %35 : vector<16x64xbf16> to vector<1x16x64xbf16>
    tpu.vector_store %arg32[%c5, %c4_27, %c0_28], %38 {strides = array<i32>} : memref<8x24x64xbf16, #tpu.memory_space<vmem>>, vector<1x16x64xbf16>,
    %39 = vector.extract_strided_slice %11 {offsets = [0, 384], sizes = [16, 64], strides = [1, 1]} : vector<16x512xbf16> to vector<16x64xbf16>
    %c6 = arith.constant 6 : index
    %c4_29 = arith.constant 4 : index
    %c0_30 = arith.constant 0 : index
    %40 = vector.load %arg32[%c6, %c4_29, %c0_30] : memref<8x24x64xbf16, #tpu.memory_space<vmem>>, vector<1x16x64xbf16>
    %41 = vector.shape_cast %40 : vector<1x16x64xbf16> to vector<16x64xbf16>
    %42 = vector.shape_cast %39 : vector<16x64xbf16> to vector<1x16x64xbf16>
    tpu.vector_store %arg32[%c6, %c4_29, %c0_30], %42 {strides = array<i32>} : memref<8x24x64xbf16, #tpu.memory_space<vmem>>, vector<1x16x64xbf16>,
    %43 = vector.extract_strided_slice %11 {offsets = [0, 448], sizes = [16, 64], strides = [1, 1]} : vector<16x512xbf16> to vector<16x64xbf16>
    %c7 = arith.constant 7 : index
    %c4_31 = arith.constant 4 : index
    %c0_32 = arith.constant 0 : index
    %44 = vector.load %arg32[%c7, %c4_31, %c0_32] : memref<8x24x64xbf16, #tpu.memory_space<vmem>>, vector<1x16x64xbf16>
    %45 = vector.shape_cast %44 : vector<1x16x64xbf16> to vector<16x64xbf16>
    %46 = vector.shape_cast %43 : vector<16x64xbf16> to vector<1x16x64xbf16>
    tpu.vector_store %arg32[%c7, %c4_31, %c0_32], %46 {strides = array<i32>} : memref<8x24x64xbf16, #tpu.memory_space<vmem>>, vector<1x16x64xbf16>,
    %c0_33 = arith.constant 0 : index
    %c0_34 = arith.constant 0 : index
    %c0_35 = arith.constant 0 : index
    %47 = vector.load %arg32[%c0_33, %c0_34, %c0_35] : memref<8x24x64xbf16, #tpu.memory_space<vmem>>, vector<8x16x64xbf16>
    %c0_36 = arith.constant 0 : index
    %c1_37 = arith.constant 1 : index
    %c0_38 = arith.constant 0 : index
    %48 = vector.load %arg32[%c0_36, %c1_37, %c0_38] : memref<8x24x64xbf16, #tpu.memory_space<vmem>>, vector<8x16x64xbf16>
    %c0_39 = arith.constant 0 : index
    %c2_40 = arith.constant 2 : index
    %c0_41 = arith.constant 0 : index
    %49 = vector.load %arg32[%c0_39, %c2_40, %c0_41] : memref<8x24x64xbf16, #tpu.memory_space<vmem>>, vector<8x16x64xbf16>
    %c0_42 = arith.constant 0 : index
    %c3_43 = arith.constant 3 : index
    %c0_44 = arith.constant 0 : index
    %50 = vector.load %arg32[%c0_42, %c3_43, %c0_44] : memref<8x24x64xbf16, #tpu.memory_space<vmem>>, vector<8x16x64xbf16>
    %c0_45 = arith.constant 0 : index
    %c4_46 = arith.constant 4 : index
    %c0_47 = arith.constant 0 : index
    %51 = vector.load %arg32[%c0_45, %c4_46, %c0_47] : memref<8x24x64xbf16, #tpu.memory_space<vmem>>, vector<8x16x64xbf16>
    %c0_48 = arith.constant 0 : index
    %c5_49 = arith.constant 5 : index
    %c0_50 = arith.constant 0 : index
    %52 = vector.load %arg32[%c0_48, %c5_49, %c0_50] : memref<8x24x64xbf16, #tpu.memory_space<vmem>>, vector<8x16x64xbf16>
    %c0_51 = arith.constant 0 : index
    %c6_52 = arith.constant 6 : index
    %c0_53 = arith.constant 0 : index
    %53 = vector.load %arg32[%c0_51, %c6_52, %c0_53] : memref<8x24x64xbf16, #tpu.memory_space<vmem>>, vector<8x16x64xbf16>
    %c0_54 = arith.constant 0 : index
    %c7_55 = arith.constant 7 : index
    %c0_56 = arith.constant 0 : index
    %54 = vector.load %arg32[%c0_54, %c7_55, %c0_56] : memref<8x24x64xbf16, #tpu.memory_space<vmem>>, vector<8x16x64xbf16>
    %c0_57 = arith.constant 0 : index
    %c8 = arith.constant 8 : index
    %c0_58 = arith.constant 0 : index
    %55 = vector.load %arg32[%c0_57, %c8, %c0_58] : memref<8x24x64xbf16, #tpu.memory_space<vmem>>, vector<8x16x64xbf16>
    %56 = tpu.concatenate %47, %48, %49, %50, %51, %52, %53, %54, %55 in 2 : vector<8x16x64xbf16>, vector<8x16x64xbf16>, vector<8x16x64xbf16>, vector<8x16x64xbf16>, vector<8x16x64xbf16>, vector<8x16x64xbf16>, vector<8x16x64xbf16>, vector<8x16x64xbf16>, vector<8x16x64xbf16> -> vector<8x16x576xbf16>
    %57 = vector.shape_cast %56 : vector<8x16x576xbf16> to vector<128x576xbf16>
    %c0_59 = arith.constant 0 : index
    %c0_60 = arith.constant 0 : index
    %58 = vector.load %arg7[%c0_59, %c0_60] : memref<576x64xbf16, #tpu.memory_space<vmem>>, vector<576x64xbf16>
    %cst_61 = arith.constant dense<0.000000e+00> : vector<128x64xf32>
    %59 = tpu.matmul %57, %58, %cst_61 {dimension_numbers = #tpu.dot_dimension_numbers<[1], [0], [0], [1], [0, 0, 1, 1], [], []>} : vector<128x576xbf16>, vector<576x64xbf16>, vector<128x64xf32> -> vector<128x64xf32>
    %c0_62 = arith.constant 0 : index
    %c0_63 = arith.constant 0 : index
    %60 = vector.load %arg8[%c0_62, %c0_63] : memref<1x64xf32, #tpu.memory_space<vmem>>, vector<1x64xf32>
    %61 = vector.broadcast %60 : vector<1x64xf32> to vector<128x64xf32>
    %62 = arith.addf %59, %61 : vector<128x64xf32>
    %c0_64 = arith.constant 0 : index
    %c0_65 = arith.constant 0 : index
    %63 = vector.load %arg5[%c0_64, %c0_65] : memref<4x64xbf16, #tpu.memory_space<vmem>>, vector<4x64xbf16>
    %cst_66 = arith.constant dense<0.000000e+00> : vector<128x64xf32>
    %64 = tpu.matmul %3, %63, %cst_66 {dimension_numbers = #tpu.dot_dimension_numbers<[1], [0], [0], [1], [0, 0, 1, 1], [], []>} : vector<128x4xbf16>, vector<4x64xbf16>, vector<128x64xf32> -> vector<128x64xf32>
    %c0_67 = arith.constant 0 : index
    %c0_68 = arith.constant 0 : index
    %65 = vector.load %arg6[%c0_67, %c0_68] : memref<1x64xf32, #tpu.memory_space<vmem>>, vector<1x64xf32>
    %66 = vector.broadcast %65 : vector<1x64xf32> to vector<128x64xf32>
    %67 = arith.addf %64, %66 : vector<128x64xf32>
    %68 = arith.addf %62, %67 : vector<128x64xf32>
    %cst_69 = arith.constant 0.000000e+00 : f32
    %69 = vector.broadcast %cst_69 : f32 to vector<128x64xf32>
    %70 = arith.maximumf %68, %69 : vector<128x64xf32>
    %71 = arith.truncf %70 : vector<128x64xf32> to vector<128x64xbf16>
    %72 = vector.extract_strided_slice %71 {offsets = [0, 0], sizes = [16, 64], strides = [1, 1]} : vector<128x64xbf16> to vector<16x64xbf16>
    %73 = vector.extract_strided_slice %71 {offsets = [16, 0], sizes = [16, 64], strides = [1, 1]} : vector<128x64xbf16> to vector<16x64xbf16>
    %74 = vector.extract_strided_slice %71 {offsets = [32, 0], sizes = [16, 64], strides = [1, 1]} : vector<128x64xbf16> to vector<16x64xbf16>
    %75 = vector.extract_strided_slice %71 {offsets = [48, 0], sizes = [16, 64], strides = [1, 1]} : vector<128x64xbf16> to vector<16x64xbf16>
    %76 = vector.extract_strided_slice %71 {offsets = [64, 0], sizes = [16, 64], strides = [1, 1]} : vector<128x64xbf16> to vector<16x64xbf16>
    %77 = vector.extract_strided_slice %71 {offsets = [80, 0], sizes = [16, 64], strides = [1, 1]} : vector<128x64xbf16> to vector<16x64xbf16>
    %78 = vector.extract_strided_slice %71 {offsets = [96, 0], sizes = [16, 64], strides = [1, 1]} : vector<128x64xbf16> to vector<16x64xbf16>
    %79 = vector.extract_strided_slice %71 {offsets = [112, 0], sizes = [16, 64], strides = [1, 1]} : vector<128x64xbf16> to vector<16x64xbf16>
    %80 = tpu.concatenate %72, %73, %74, %75, %76, %77, %78, %79 in 1 : vector<16x64xbf16>, vector<16x64xbf16>, vector<16x64xbf16>, vector<16x64xbf16>, vector<16x64xbf16>, vector<16x64xbf16>, vector<16x64xbf16>, vector<16x64xbf16> -> vector<16x512xbf16>
    %c0_70 = arith.constant 0 : index
    %c0_71 = arith.constant 0 : index
    %81 = vector.load %arg9[%c0_70, %c0_71] : memref<512x1024xbf16, #tpu.memory_space<vmem>>, vector<512x1024xbf16>
    %cst_72 = arith.constant dense<0.000000e+00> : vector<16x1024xf32>
    %82 = tpu.matmul %80, %81, %cst_72 {dimension_numbers = #tpu.dot_dimension_numbers<[1], [0], [0], [1], [0, 0, 1, 1], [], []>} : vector<16x512xbf16>, vector<512x1024xbf16>, vector<16x1024xf32> -> vector<16x1024xf32>
    %c0_73 = arith.constant 0 : index
    %c0_74 = arith.constant 0 : index
    %83 = vector.load %arg10[%c0_73, %c0_74] : memref<1x1024xf32, #tpu.memory_space<vmem>>, vector<1x1024xf32>
    %84 = vector.broadcast %83 : vector<1x1024xf32> to vector<16x1024xf32>
    %85 = arith.addf %82, %84 : vector<16x1024xf32>
    %cst_75 = arith.constant 0.000000e+00 : f32
    %86 = vector.broadcast %cst_75 : f32 to vector<16x1024xf32>
    %87 = arith.maximumf %85, %86 : vector<16x1024xf32>
    %88 = arith.truncf %87 : vector<16x1024xf32> to vector<16x1024xbf16>
    %cst_76 = arith.constant 0.000000e+00 : bf16
    %89 = vector.broadcast %cst_76 : bf16 to vector<8x4x128xbf16>
    %c0_77 = arith.constant 0 : index
    %c0_78 = arith.constant 0 : index
    %c0_79 = arith.constant 0 : index
    %90 = vector.load %arg33[%c0_77, %c0_78, %c0_79] : memref<8x24x128xbf16, #tpu.memory_space<vmem>>, vector<8x4x128xbf16>
    tpu.vector_store %arg33[%c0_77, %c0_78, %c0_79], %89 {strides = array<i32>} : memref<8x24x128xbf16, #tpu.memory_space<vmem>>, vector<8x4x128xbf16>,
    %c0_80 = arith.constant 0 : index
    %c20_81 = arith.constant 20 : index
    %c0_82 = arith.constant 0 : index
    %91 = vector.load %arg33[%c0_80, %c20_81, %c0_82] : memref<8x24x128xbf16, #tpu.memory_space<vmem>>, vector<8x4x128xbf16>
    tpu.vector_store %arg33[%c0_80, %c20_81, %c0_82], %89 {strides = array<i32>} : memref<8x24x128xbf16, #tpu.memory_space<vmem>>, vector<8x4x128xbf16>,
    %92 = vector.extract_strided_slice %88 {offsets = [0, 0], sizes = [16, 128], strides = [1, 1]} : vector<16x1024xbf16> to vector<16x128xbf16>
    %c0_83 = arith.constant 0 : index
    %c4_84 = arith.constant 4 : index
    %c0_85 = arith.constant 0 : index
    %93 = vector.load %arg33[%c0_83, %c4_84, %c0_85] : memref<8x24x128xbf16, #tpu.memory_space<vmem>>, vector<1x16x128xbf16>
    %94 = vector.shape_cast %93 : vector<1x16x128xbf16> to vector<16x128xbf16>
    %95 = vector.shape_cast %92 : vector<16x128xbf16> to vector<1x16x128xbf16>
    tpu.vector_store %arg33[%c0_83, %c4_84, %c0_85], %95 {strides = array<i32>} : memref<8x24x128xbf16, #tpu.memory_space<vmem>>, vector<1x16x128xbf16>,
    %96 = vector.extract_strided_slice %88 {offsets = [0, 128], sizes = [16, 128], strides = [1, 1]} : vector<16x1024xbf16> to vector<16x128xbf16>
    %c1_86 = arith.constant 1 : index
    %c4_87 = arith.constant 4 : index
    %c0_88 = arith.constant 0 : index
    %97 = vector.load %arg33[%c1_86, %c4_87, %c0_88] : memref<8x24x128xbf16, #tpu.memory_space<vmem>>, vector<1x16x128xbf16>
    %98 = vector.shape_cast %97 : vector<1x16x128xbf16> to vector<16x128xbf16>
    %99 = vector.shape_cast %96 : vector<16x128xbf16> to vector<1x16x128xbf16>
    tpu.vector_store %arg33[%c1_86, %c4_87, %c0_88], %99 {strides = array<i32>} : memref<8x24x128xbf16, #tpu.memory_space<vmem>>, vector<1x16x128xbf16>,
    %100 = vector.extract_strided_slice %88 {offsets = [0, 256], sizes = [16, 128], strides = [1, 1]} : vector<16x1024xbf16> to vector<16x128xbf16>
    %c2_89 = arith.constant 2 : index
    %c4_90 = arith.constant 4 : index
    %c0_91 = arith.constant 0 : index
    %101 = vector.load %arg33[%c2_89, %c4_90, %c0_91] : memref<8x24x128xbf16, #tpu.memory_space<vmem>>, vector<1x16x128xbf16>
    %102 = vector.shape_cast %101 : vector<1x16x128xbf16> to vector<16x128xbf16>
    %103 = vector.shape_cast %100 : vector<16x128xbf16> to vector<1x16x128xbf16>
    tpu.vector_store %arg33[%c2_89, %c4_90, %c0_91], %103 {strides = array<i32>} : memref<8x24x128xbf16, #tpu.memory_space<vmem>>, vector<1x16x128xbf16>,
    %104 = vector.extract_strided_slice %88 {offsets = [0, 384], sizes = [16, 128], strides = [1, 1]} : vector<16x1024xbf16> to vector<16x128xbf16>
    %c3_92 = arith.constant 3 : index
    %c4_93 = arith.constant 4 : index
    %c0_94 = arith.constant 0 : index
    %105 = vector.load %arg33[%c3_92, %c4_93, %c0_94] : memref<8x24x128xbf16, #tpu.memory_space<vmem>>, vector<1x16x128xbf16>
    %106 = vector.shape_cast %105 : vector<1x16x128xbf16> to vector<16x128xbf16>
    %107 = vector.shape_cast %104 : vector<16x128xbf16> to vector<1x16x128xbf16>
    tpu.vector_store %arg33[%c3_92, %c4_93, %c0_94], %107 {strides = array<i32>} : memref<8x24x128xbf16, #tpu.memory_space<vmem>>, vector<1x16x128xbf16>,
    %108 = vector.extract_strided_slice %88 {offsets = [0, 512], sizes = [16, 128], strides = [1, 1]} : vector<16x1024xbf16> to vector<16x128xbf16>
    %c4_95 = arith.constant 4 : index
    %c4_96 = arith.constant 4 : index
    %c0_97 = arith.constant 0 : index
    %109 = vector.load %arg33[%c4_95, %c4_96, %c0_97] : memref<8x24x128xbf16, #tpu.memory_space<vmem>>, vector<1x16x128xbf16>
    %110 = vector.shape_cast %109 : vector<1x16x128xbf16> to vector<16x128xbf16>
    %111 = vector.shape_cast %108 : vector<16x128xbf16> to vector<1x16x128xbf16>
    tpu.vector_store %arg33[%c4_95, %c4_96, %c0_97], %111 {strides = array<i32>} : memref<8x24x128xbf16, #tpu.memory_space<vmem>>, vector<1x16x128xbf16>,
    %112 = vector.extract_strided_slice %88 {offsets = [0, 640], sizes = [16, 128], strides = [1, 1]} : vector<16x1024xbf16> to vector<16x128xbf16>
    %c5_98 = arith.constant 5 : index
    %c4_99 = arith.constant 4 : index
    %c0_100 = arith.constant 0 : index
    %113 = vector.load %arg33[%c5_98, %c4_99, %c0_100] : memref<8x24x128xbf16, #tpu.memory_space<vmem>>, vector<1x16x128xbf16>
    %114 = vector.shape_cast %113 : vector<1x16x128xbf16> to vector<16x128xbf16>
    %115 = vector.shape_cast %112 : vector<16x128xbf16> to vector<1x16x128xbf16>
    tpu.vector_store %arg33[%c5_98, %c4_99, %c0_100], %115 {strides = array<i32>} : memref<8x24x128xbf16, #tpu.memory_space<vmem>>, vector<1x16x128xbf16>,
    %116 = vector.extract_strided_slice %88 {offsets = [0, 768], sizes = [16, 128], strides = [1, 1]} : vector<16x1024xbf16> to vector<16x128xbf16>
    %c6_101 = arith.constant 6 : index
    %c4_102 = arith.constant 4 : index
    %c0_103 = arith.constant 0 : index
    %117 = vector.load %arg33[%c6_101, %c4_102, %c0_103] : memref<8x24x128xbf16, #tpu.memory_space<vmem>>, vector<1x16x128xbf16>
    %118 = vector.shape_cast %117 : vector<1x16x128xbf16> to vector<16x128xbf16>
    %119 = vector.shape_cast %116 : vector<16x128xbf16> to vector<1x16x128xbf16>
    tpu.vector_store %arg33[%c6_101, %c4_102, %c0_103], %119 {strides = array<i32>} : memref<8x24x128xbf16, #tpu.memory_space<vmem>>, vector<1x16x128xbf16>,
    %120 = vector.extract_strided_slice %88 {offsets = [0, 896], sizes = [16, 128], strides = [1, 1]} : vector<16x1024xbf16> to vector<16x128xbf16>
    %c7_104 = arith.constant 7 : index
    %c4_105 = arith.constant 4 : index
    %c0_106 = arith.constant 0 : index
    %121 = vector.load %arg33[%c7_104, %c4_105, %c0_106] : memref<8x24x128xbf16, #tpu.memory_space<vmem>>, vector<1x16x128xbf16>
    %122 = vector.shape_cast %121 : vector<1x16x128xbf16> to vector<16x128xbf16>
    %123 = vector.shape_cast %120 : vector<16x128xbf16> to vector<1x16x128xbf16>
    tpu.vector_store %arg33[%c7_104, %c4_105, %c0_106], %123 {strides = array<i32>} : memref<8x24x128xbf16, #tpu.memory_space<vmem>>, vector<1x16x128xbf16>,
    %c0_107 = arith.constant 0 : index
    %c0_108 = arith.constant 0 : index
    %c0_109 = arith.constant 0 : index
    %124 = vector.load %arg33[%c0_107, %c0_108, %c0_109] : memref<8x24x128xbf16, #tpu.memory_space<vmem>>, vector<8x16x128xbf16>
    %c0_110 = arith.constant 0 : index
    %c1_111 = arith.constant 1 : index
    %c0_112 = arith.constant 0 : index
    %125 = vector.load %arg33[%c0_110, %c1_111, %c0_112] : memref<8x24x128xbf16, #tpu.memory_space<vmem>>, vector<8x16x128xbf16>
    %c0_113 = arith.constant 0 : index
    %c2_114 = arith.constant 2 : index
    %c0_115 = arith.constant 0 : index
    %126 = vector.load %arg33[%c0_113, %c2_114, %c0_115] : memref<8x24x128xbf16, #tpu.memory_space<vmem>>, vector<8x16x128xbf16>
    %c0_116 = arith.constant 0 : index
    %c3_117 = arith.constant 3 : index
    %c0_118 = arith.constant 0 : index
    %127 = vector.load %arg33[%c0_116, %c3_117, %c0_118] : memref<8x24x128xbf16, #tpu.memory_space<vmem>>, vector<8x16x128xbf16>
    %c0_119 = arith.constant 0 : index
    %c4_120 = arith.constant 4 : index
    %c0_121 = arith.constant 0 : index
    %128 = vector.load %arg33[%c0_119, %c4_120, %c0_121] : memref<8x24x128xbf16, #tpu.memory_space<vmem>>, vector<8x16x128xbf16>
    %c0_122 = arith.constant 0 : index
    %c5_123 = arith.constant 5 : index
    %c0_124 = arith.constant 0 : index
    %129 = vector.load %arg33[%c0_122, %c5_123, %c0_124] : memref<8x24x128xbf16, #tpu.memory_space<vmem>>, vector<8x16x128xbf16>
    %c0_125 = arith.constant 0 : index
    %c6_126 = arith.constant 6 : index
    %c0_127 = arith.constant 0 : index
    %130 = vector.load %arg33[%c0_125, %c6_126, %c0_127] : memref<8x24x128xbf16, #tpu.memory_space<vmem>>, vector<8x16x128xbf16>
    %c0_128 = arith.constant 0 : index
    %c7_129 = arith.constant 7 : index
    %c0_130 = arith.constant 0 : index
    %131 = vector.load %arg33[%c0_128, %c7_129, %c0_130] : memref<8x24x128xbf16, #tpu.memory_space<vmem>>, vector<8x16x128xbf16>
    %c0_131 = arith.constant 0 : index
    %c8_132 = arith.constant 8 : index
    %c0_133 = arith.constant 0 : index
    %132 = vector.load %arg33[%c0_131, %c8_132, %c0_133] : memref<8x24x128xbf16, #tpu.memory_space<vmem>>, vector<8x16x128xbf16>
    %133 = tpu.concatenate %124, %125, %126, %127, %128, %129, %130, %131, %132 in 2 : vector<8x16x128xbf16>, vector<8x16x128xbf16>, vector<8x16x128xbf16>, vector<8x16x128xbf16>, vector<8x16x128xbf16>, vector<8x16x128xbf16>, vector<8x16x128xbf16>, vector<8x16x128xbf16>, vector<8x16x128xbf16> -> vector<8x16x1152xbf16>
    %134 = vector.shape_cast %133 : vector<8x16x1152xbf16> to vector<128x1152xbf16>
    %c0_134 = arith.constant 0 : index
    %c0_135 = arith.constant 0 : index
    %135 = vector.load %arg13[%c0_134, %c0_135] : memref<1152x128xbf16, #tpu.memory_space<vmem>>, vector<1152x128xbf16>
    %cst_136 = arith.constant dense<0.000000e+00> : vector<128x128xf32>
    %136 = tpu.matmul %134, %135, %cst_136 {dimension_numbers = #tpu.dot_dimension_numbers<[1], [0], [0], [1], [0, 0, 1, 1], [], []>} : vector<128x1152xbf16>, vector<1152x128xbf16>, vector<128x128xf32> -> vector<128x128xf32>
    %c0_137 = arith.constant 0 : index
    %c0_138 = arith.constant 0 : index
    %137 = vector.load %arg14[%c0_137, %c0_138] : memref<1x128xf32, #tpu.memory_space<vmem>>, vector<1x128xf32>
    %138 = vector.broadcast %137 : vector<1x128xf32> to vector<128x128xf32>
    %139 = arith.addf %136, %138 : vector<128x128xf32>
    %c0_139 = arith.constant 0 : index
    %c0_140 = arith.constant 0 : index
    %140 = vector.load %arg11[%c0_139, %c0_140] : memref<64x128xbf16, #tpu.memory_space<vmem>>, vector<64x128xbf16>
    %cst_141 = arith.constant dense<0.000000e+00> : vector<128x128xf32>
    %141 = tpu.matmul %71, %140, %cst_141 {dimension_numbers = #tpu.dot_dimension_numbers<[1], [0], [0], [1], [0, 0, 1, 1], [], []>} : vector<128x64xbf16>, vector<64x128xbf16>, vector<128x128xf32> -> vector<128x128xf32>
    %c0_142 = arith.constant 0 : index
    %c0_143 = arith.constant 0 : index
    %142 = vector.load %arg12[%c0_142, %c0_143] : memref<1x128xf32, #tpu.memory_space<vmem>>, vector<1x128xf32>
    %143 = vector.broadcast %142 : vector<1x128xf32> to vector<128x128xf32>
    %144 = arith.addf %141, %143 : vector<128x128xf32>
    %145 = arith.addf %139, %144 : vector<128x128xf32>
    %cst_144 = arith.constant 0.000000e+00 : f32
    %146 = vector.broadcast %cst_144 : f32 to vector<128x128xf32>
    %147 = arith.maximumf %145, %146 : vector<128x128xf32>
    %148 = arith.truncf %147 : vector<128x128xf32> to vector<128x128xbf16>
    %c0_145 = arith.constant 0 : index
    %c0_146 = arith.constant 0 : index
    %149 = vector.load %arg15[%c0_145, %c0_146] : memref<64x128xbf16, #tpu.memory_space<vmem>>, vector<64x128xbf16>
    %cst_147 = arith.constant dense<0.000000e+00> : vector<64x128xf32>
    %150 = tpu.matmul %149, %148, %cst_147 {dimension_numbers = #tpu.dot_dimension_numbers<[1], [0], [0], [1], [0, 0, 1, 1], [], []>} : vector<64x128xbf16>, vector<128x128xbf16>, vector<64x128xf32> -> vector<64x128xf32>
    %151 = arith.truncf %150 : vector<64x128xf32> to vector<64x128xbf16>
    %152 = vector.extract_strided_slice %151 {offsets = [0, 0], sizes = [8, 128], strides = [1, 1]} : vector<64x128xbf16> to vector<8x128xbf16>
    %153 = vector.extract_strided_slice %151 {offsets = [8, 0], sizes = [8, 128], strides = [1, 1]} : vector<64x128xbf16> to vector<8x128xbf16>
    %154 = vector.extract_strided_slice %151 {offsets = [16, 0], sizes = [8, 128], strides = [1, 1]} : vector<64x128xbf16> to vector<8x128xbf16>
    %155 = vector.extract_strided_slice %151 {offsets = [24, 0], sizes = [8, 128], strides = [1, 1]} : vector<64x128xbf16> to vector<8x128xbf16>
    %156 = vector.extract_strided_slice %151 {offsets = [32, 0], sizes = [8, 128], strides = [1, 1]} : vector<64x128xbf16> to vector<8x128xbf16>
    %157 = vector.extract_strided_slice %151 {offsets = [40, 0], sizes = [8, 128], strides = [1, 1]} : vector<64x128xbf16> to vector<8x128xbf16>
    %158 = vector.extract_strided_slice %151 {offsets = [48, 0], sizes = [8, 128], strides = [1, 1]} : vector<64x128xbf16> to vector<8x128xbf16>
    %159 = vector.extract_strided_slice %151 {offsets = [56, 0], sizes = [8, 128], strides = [1, 1]} : vector<64x128xbf16> to vector<8x128xbf16>
    %160 = tpu.concatenate %152, %153, %154, %155, %156, %157, %158, %159 in 1 : vector<8x128xbf16>, vector<8x128xbf16>, vector<8x128xbf16>, vector<8x128xbf16>, vector<8x128xbf16>, vector<8x128xbf16>, vector<8x128xbf16>, vector<8x128xbf16> -> vector<8x1024xbf16>
    %c0_148 = arith.constant 0 : index
    %c0_149 = arith.constant 0 : index
    %161 = vector.load %arg16[%c0_148, %c0_149] : memref<1024x256xbf16, #tpu.memory_space<vmem>>, vector<1024x256xbf16>
    %cst_150 = arith.constant dense<0.000000e+00> : vector<8x256xf32>
    %162 = tpu.matmul %160, %161, %cst_150 {dimension_numbers = #tpu.dot_dimension_numbers<[1], [0], [0], [1], [0, 0, 1, 1], [], []>} : vector<8x1024xbf16>, vector<1024x256xbf16>, vector<8x256xf32> -> vector<8x256xf32>
    %c0_151 = arith.constant 0 : index
    %c0_152 = arith.constant 0 : index
    %163 = vector.load %arg17[%c0_151, %c0_152] : memref<1x256xf32, #tpu.memory_space<vmem>>, vector<1x256xf32>
    %164 = vector.broadcast %163 : vector<1x256xf32> to vector<8x256xf32>
    %165 = arith.addf %162, %164 : vector<8x256xf32>
    %cst_153 = arith.constant 0.000000e+00 : f32
    %166 = vector.broadcast %cst_153 : f32 to vector<8x256xf32>
    %167 = arith.maximumf %165, %166 : vector<8x256xf32>
    %168 = arith.truncf %167 : vector<8x256xf32> to vector<8x256xbf16>
    %cst_154 = arith.constant 0.000000e+00 : bf16
    %169 = vector.broadcast %cst_154 : bf16 to vector<8x4x32xbf16>
    %c0_155 = arith.constant 0 : index
    %c0_156 = arith.constant 0 : index
    %c0_157 = arith.constant 0 : index
    %170 = vector.load %arg34[%c0_155, %c0_156, %c0_157] : memref<8x16x32xbf16, #tpu.memory_space<vmem>>, vector<8x4x32xbf16>
    tpu.vector_store %arg34[%c0_155, %c0_156, %c0_157], %169 {strides = array<i32>} : memref<8x16x32xbf16, #tpu.memory_space<vmem>>, vector<8x4x32xbf16>,
    %c0_158 = arith.constant 0 : index
    %c12 = arith.constant 12 : index
    %c0_159 = arith.constant 0 : index
    %171 = vector.load %arg34[%c0_158, %c12, %c0_159] : memref<8x16x32xbf16, #tpu.memory_space<vmem>>, vector<8x4x32xbf16>
    tpu.vector_store %arg34[%c0_158, %c12, %c0_159], %169 {strides = array<i32>} : memref<8x16x32xbf16, #tpu.memory_space<vmem>>, vector<8x4x32xbf16>,
    %172 = vector.extract_strided_slice %168 {offsets = [0, 0], sizes = [8, 32], strides = [1, 1]} : vector<8x256xbf16> to vector<8x32xbf16>
    %c0_160 = arith.constant 0 : index
    %c4_161 = arith.constant 4 : index
    %c0_162 = arith.constant 0 : index
    %173 = vector.load %arg34[%c0_160, %c4_161, %c0_162] : memref<8x16x32xbf16, #tpu.memory_space<vmem>>, vector<1x8x32xbf16>
    %174 = vector.shape_cast %173 : vector<1x8x32xbf16> to vector<8x32xbf16>
    %175 = vector.shape_cast %172 : vector<8x32xbf16> to vector<1x8x32xbf16>
    tpu.vector_store %arg34[%c0_160, %c4_161, %c0_162], %175 {strides = array<i32>} : memref<8x16x32xbf16, #tpu.memory_space<vmem>>, vector<1x8x32xbf16>,
    %176 = vector.extract_strided_slice %168 {offsets = [0, 32], sizes = [8, 32], strides = [1, 1]} : vector<8x256xbf16> to vector<8x32xbf16>
    %c1_163 = arith.constant 1 : index
    %c4_164 = arith.constant 4 : index
    %c0_165 = arith.constant 0 : index
    %177 = vector.load %arg34[%c1_163, %c4_164, %c0_165] : memref<8x16x32xbf16, #tpu.memory_space<vmem>>, vector<1x8x32xbf16>
    %178 = vector.shape_cast %177 : vector<1x8x32xbf16> to vector<8x32xbf16>
    %179 = vector.shape_cast %176 : vector<8x32xbf16> to vector<1x8x32xbf16>
    tpu.vector_store %arg34[%c1_163, %c4_164, %c0_165], %179 {strides = array<i32>} : memref<8x16x32xbf16, #tpu.memory_space<vmem>>, vector<1x8x32xbf16>,
    %180 = vector.extract_strided_slice %168 {offsets = [0, 64], sizes = [8, 32], strides = [1, 1]} : vector<8x256xbf16> to vector<8x32xbf16>
    %c2_166 = arith.constant 2 : index
    %c4_167 = arith.constant 4 : index
    %c0_168 = arith.constant 0 : index
    %181 = vector.load %arg34[%c2_166, %c4_167, %c0_168] : memref<8x16x32xbf16, #tpu.memory_space<vmem>>, vector<1x8x32xbf16>
    %182 = vector.shape_cast %181 : vector<1x8x32xbf16> to vector<8x32xbf16>
    %183 = vector.shape_cast %180 : vector<8x32xbf16> to vector<1x8x32xbf16>
    tpu.vector_store %arg34[%c2_166, %c4_167, %c0_168], %183 {strides = array<i32>} : memref<8x16x32xbf16, #tpu.memory_space<vmem>>, vector<1x8x32xbf16>,
    %184 = vector.extract_strided_slice %168 {offsets = [0, 96], sizes = [8, 32], strides = [1, 1]} : vector<8x256xbf16> to vector<8x32xbf16>
    %c3_169 = arith.constant 3 : index
    %c4_170 = arith.constant 4 : index
    %c0_171 = arith.constant 0 : index
    %185 = vector.load %arg34[%c3_169, %c4_170, %c0_171] : memref<8x16x32xbf16, #tpu.memory_space<vmem>>, vector<1x8x32xbf16>
    %186 = vector.shape_cast %185 : vector<1x8x32xbf16> to vector<8x32xbf16>
    %187 = vector.shape_cast %184 : vector<8x32xbf16> to vector<1x8x32xbf16>
    tpu.vector_store %arg34[%c3_169, %c4_170, %c0_171], %187 {strides = array<i32>} : memref<8x16x32xbf16, #tpu.memory_space<vmem>>, vector<1x8x32xbf16>,
    %188 = vector.extract_strided_slice %168 {offsets = [0, 128], sizes = [8, 32], strides = [1, 1]} : vector<8x256xbf16> to vector<8x32xbf16>
    %c4_172 = arith.constant 4 : index
    %c4_173 = arith.constant 4 : index
    %c0_174 = arith.constant 0 : index
    %189 = vector.load %arg34[%c4_172, %c4_173, %c0_174] : memref<8x16x32xbf16, #tpu.memory_space<vmem>>, vector<1x8x32xbf16>
    %190 = vector.shape_cast %189 : vector<1x8x32xbf16> to vector<8x32xbf16>
    %191 = vector.shape_cast %188 : vector<8x32xbf16> to vector<1x8x32xbf16>
    tpu.vector_store %arg34[%c4_172, %c4_173, %c0_174], %191 {strides = array<i32>} : memref<8x16x32xbf16, #tpu.memory_space<vmem>>, vector<1x8x32xbf16>,
    %192 = vector.extract_strided_slice %168 {offsets = [0, 160], sizes = [8, 32], strides = [1, 1]} : vector<8x256xbf16> to vector<8x32xbf16>
    %c5_175 = arith.constant 5 : index
    %c4_176 = arith.constant 4 : index
    %c0_177 = arith.constant 0 : index
    %193 = vector.load %arg34[%c5_175, %c4_176, %c0_177] : memref<8x16x32xbf16, #tpu.memory_space<vmem>>, vector<1x8x32xbf16>
    %194 = vector.shape_cast %193 : vector<1x8x32xbf16> to vector<8x32xbf16>
    %195 = vector.shape_cast %192 : vector<8x32xbf16> to vector<1x8x32xbf16>
    tpu.vector_store %arg34[%c5_175, %c4_176, %c0_177], %195 {strides = array<i32>} : memref<8x16x32xbf16, #tpu.memory_space<vmem>>, vector<1x8x32xbf16>,
    %196 = vector.extract_strided_slice %168 {offsets = [0, 192], sizes = [8, 32], strides = [1, 1]} : vector<8x256xbf16> to vector<8x32xbf16>
    %c6_178 = arith.constant 6 : index
    %c4_179 = arith.constant 4 : index
    %c0_180 = arith.constant 0 : index
    %197 = vector.load %arg34[%c6_178, %c4_179, %c0_180] : memref<8x16x32xbf16, #tpu.memory_space<vmem>>, vector<1x8x32xbf16>
    %198 = vector.shape_cast %197 : vector<1x8x32xbf16> to vector<8x32xbf16>
    %199 = vector.shape_cast %196 : vector<8x32xbf16> to vector<1x8x32xbf16>
    tpu.vector_store %arg34[%c6_178, %c4_179, %c0_180], %199 {strides = array<i32>} : memref<8x16x32xbf16, #tpu.memory_space<vmem>>, vector<1x8x32xbf16>,
    %200 = vector.extract_strided_slice %168 {offsets = [0, 224], sizes = [8, 32], strides = [1, 1]} : vector<8x256xbf16> to vector<8x32xbf16>
    %c7_181 = arith.constant 7 : index
    %c4_182 = arith.constant 4 : index
    %c0_183 = arith.constant 0 : index
    %201 = vector.load %arg34[%c7_181, %c4_182, %c0_183] : memref<8x16x32xbf16, #tpu.memory_space<vmem>>, vector<1x8x32xbf16>
    %202 = vector.shape_cast %201 : vector<1x8x32xbf16> to vector<8x32xbf16>
    %203 = vector.shape_cast %200 : vector<8x32xbf16> to vector<1x8x32xbf16>
    tpu.vector_store %arg34[%c7_181, %c4_182, %c0_183], %203 {strides = array<i32>} : memref<8x16x32xbf16, #tpu.memory_space<vmem>>, vector<1x8x32xbf16>,
    %c0_184 = arith.constant 0 : index
    %c0_185 = arith.constant 0 : index
    %c0_186 = arith.constant 0 : index
    %204 = vector.load %arg34[%c0_184, %c0_185, %c0_186] : memref<8x16x32xbf16, #tpu.memory_space<vmem>>, vector<8x8x32xbf16>
    %c0_187 = arith.constant 0 : index
    %c1_188 = arith.constant 1 : index
    %c0_189 = arith.constant 0 : index
    %205 = vector.load %arg34[%c0_187, %c1_188, %c0_189] : memref<8x16x32xbf16, #tpu.memory_space<vmem>>, vector<8x8x32xbf16>
    %c0_190 = arith.constant 0 : index
    %c2_191 = arith.constant 2 : index
    %c0_192 = arith.constant 0 : index
    %206 = vector.load %arg34[%c0_190, %c2_191, %c0_192] : memref<8x16x32xbf16, #tpu.memory_space<vmem>>, vector<8x8x32xbf16>
    %c0_193 = arith.constant 0 : index
    %c3_194 = arith.constant 3 : index
    %c0_195 = arith.constant 0 : index
    %207 = vector.load %arg34[%c0_193, %c3_194, %c0_195] : memref<8x16x32xbf16, #tpu.memory_space<vmem>>, vector<8x8x32xbf16>
    %c0_196 = arith.constant 0 : index
    %c4_197 = arith.constant 4 : index
    %c0_198 = arith.constant 0 : index
    %208 = vector.load %arg34[%c0_196, %c4_197, %c0_198] : memref<8x16x32xbf16, #tpu.memory_space<vmem>>, vector<8x8x32xbf16>
    %c0_199 = arith.constant 0 : index
    %c5_200 = arith.constant 5 : index
    %c0_201 = arith.constant 0 : index
    %209 = vector.load %arg34[%c0_199, %c5_200, %c0_201] : memref<8x16x32xbf16, #tpu.memory_space<vmem>>, vector<8x8x32xbf16>
    %c0_202 = arith.constant 0 : index
    %c6_203 = arith.constant 6 : index
    %c0_204 = arith.constant 0 : index
    %210 = vector.load %arg34[%c0_202, %c6_203, %c0_204] : memref<8x16x32xbf16, #tpu.memory_space<vmem>>, vector<8x8x32xbf16>
    %c0_205 = arith.constant 0 : index
    %c7_206 = arith.constant 7 : index
    %c0_207 = arith.constant 0 : index
    %211 = vector.load %arg34[%c0_205, %c7_206, %c0_207] : memref<8x16x32xbf16, #tpu.memory_space<vmem>>, vector<8x8x32xbf16>
    %c0_208 = arith.constant 0 : index
    %c8_209 = arith.constant 8 : index
    %c0_210 = arith.constant 0 : index
    %212 = vector.load %arg34[%c0_208, %c8_209, %c0_210] : memref<8x16x32xbf16, #tpu.memory_space<vmem>>, vector<8x8x32xbf16>
    %213 = tpu.concatenate %204, %205, %206, %207, %208, %209, %210, %211, %212 in 2 : vector<8x8x32xbf16>, vector<8x8x32xbf16>, vector<8x8x32xbf16>, vector<8x8x32xbf16>, vector<8x8x32xbf16>, vector<8x8x32xbf16>, vector<8x8x32xbf16>, vector<8x8x32xbf16>, vector<8x8x32xbf16> -> vector<8x8x288xbf16>
    %214 = vector.shape_cast %213 : vector<8x8x288xbf16> to vector<64x288xbf16>
    %c0_211 = arith.constant 0 : index
    %c0_212 = arith.constant 0 : index
    %215 = vector.load %arg20[%c0_211, %c0_212] : memref<288x32xbf16, #tpu.memory_space<vmem>>, vector<288x32xbf16>
    %cst_213 = arith.constant dense<0.000000e+00> : vector<64x32xf32>
    %216 = tpu.matmul %214, %215, %cst_213 {dimension_numbers = #tpu.dot_dimension_numbers<[1], [0], [0], [1], [0, 0, 1, 1], [], []>} : vector<64x288xbf16>, vector<288x32xbf16>, vector<64x32xf32> -> vector<64x32xf32>
    %c0_214 = arith.constant 0 : index
    %c0_215 = arith.constant 0 : index
    %217 = vector.load %arg21[%c0_214, %c0_215] : memref<1x32xf32, #tpu.memory_space<vmem>>, vector<1x32xf32>
    %218 = vector.broadcast %217 : vector<1x32xf32> to vector<64x32xf32>
    %219 = arith.addf %216, %218 : vector<64x32xf32>
    %c0_216 = arith.constant 0 : index
    %c0_217 = arith.constant 0 : index
    %220 = vector.load %arg18[%c0_216, %c0_217] : memref<128x32xbf16, #tpu.memory_space<vmem>>, vector<128x32xbf16>
    %cst_218 = arith.constant dense<0.000000e+00> : vector<64x32xf32>
    %221 = tpu.matmul %151, %220, %cst_218 {dimension_numbers = #tpu.dot_dimension_numbers<[1], [0], [0], [1], [0, 0, 1, 1], [], []>} : vector<64x128xbf16>, vector<128x32xbf16>, vector<64x32xf32> -> vector<64x32xf32>
    %c0_219 = arith.constant 0 : index
    %c0_220 = arith.constant 0 : index
    %222 = vector.load %arg19[%c0_219, %c0_220] : memref<1x32xf32, #tpu.memory_space<vmem>>, vector<1x32xf32>
    %223 = vector.broadcast %222 : vector<1x32xf32> to vector<64x32xf32>
    %224 = arith.addf %221, %223 : vector<64x32xf32>
    %225 = arith.addf %219, %224 : vector<64x32xf32>
    %cst_221 = arith.constant 0.000000e+00 : f32
    %226 = vector.broadcast %cst_221 : f32 to vector<64x32xf32>
    %227 = arith.maximumf %225, %226 : vector<64x32xf32>
    %228 = arith.truncf %227 : vector<64x32xf32> to vector<64x32xbf16>
    %c0_222 = arith.constant 0 : index
    %c0_223 = arith.constant 0 : index
    %229 = vector.load %arg22[%c0_222, %c0_223] : memref<32x64xbf16, #tpu.memory_space<vmem>>, vector<32x64xbf16>
    %cst_224 = arith.constant dense<0.000000e+00> : vector<32x32xf32>
    %230 = tpu.matmul %229, %228, %cst_224 {dimension_numbers = #tpu.dot_dimension_numbers<[1], [0], [0], [1], [0, 0, 1, 1], [], []>} : vector<32x64xbf16>, vector<64x32xbf16>, vector<32x32xf32> -> vector<32x32xf32>
    %231 = arith.truncf %230 : vector<32x32xf32> to vector<32x32xbf16>
    %c0_225 = arith.constant 0 : index
    %c0_226 = arith.constant 0 : index
    %232 = vector.load %arg23[%c0_225, %c0_226] : memref<8x32xbf16, #tpu.memory_space<vmem>>, vector<8x32xbf16>
    %cst_227 = arith.constant dense<0.000000e+00> : vector<8x32xf32>
    %233 = tpu.matmul %232, %231, %cst_227 {dimension_numbers = #tpu.dot_dimension_numbers<[1], [0], [0], [1], [0, 0, 1, 1], [], []>} : vector<8x32xbf16>, vector<32x32xbf16>, vector<8x32xf32> -> vector<8x32xf32>
    %234 = arith.truncf %233 : vector<8x32xf32> to vector<8x32xbf16>
    %c0_228 = arith.constant 0 : index
    %c0_229 = arith.constant 0 : index
    %235 = vector.load %arg24[%c0_228, %c0_229] : memref<32x16xbf16, #tpu.memory_space<vmem>>, vector<32x16xbf16>
    %cst_230 = arith.constant dense<0.000000e+00> : vector<8x16xf32>
    %236 = tpu.matmul %234, %235, %cst_230 {dimension_numbers = #tpu.dot_dimension_numbers<[1], [0], [0], [1], [0, 0, 1, 1], [], []>} : vector<8x32xbf16>, vector<32x16xbf16>, vector<8x16xf32> -> vector<8x16xf32>
    %c0_231 = arith.constant 0 : index
    %c0_232 = arith.constant 0 : index
    %237 = vector.load %arg25[%c0_231, %c0_232] : memref<1x16xf32, #tpu.memory_space<vmem>>, vector<1x16xf32>
    %238 = vector.broadcast %237 : vector<1x16xf32> to vector<8x16xf32>
    %239 = arith.addf %236, %238 : vector<8x16xf32>
    %240 = math.tanh %239 : vector<8x16xf32>
    %241 = arith.truncf %240 : vector<8x16xf32> to vector<8x16xbf16>
    %c0_233 = arith.constant 0 : index
    %c0_234 = arith.constant 0 : index
    %242 = vector.load %arg26[%c0_233, %c0_234] : memref<16x1xbf16, #tpu.memory_space<vmem>>, vector<16x1xbf16>
    %cst_235 = arith.constant dense<0.000000e+00> : vector<8x1xf32>
    %243 = tpu.matmul %241, %242, %cst_235 {dimension_numbers = #tpu.dot_dimension_numbers<[1], [0], [0], [1], [0, 0, 1, 1], [], []>} : vector<8x16xbf16>, vector<16x1xbf16>, vector<8x1xf32> -> vector<8x1xf32>
    %c0_236 = arith.constant 0 : index
    %c0_237 = arith.constant 0 : index
    %244 = vector.load %arg27[%c0_236, %c0_237] : memref<1x1xf32, #tpu.memory_space<vmem>>, vector<1x1xf32>
    %245 = vector.broadcast %244 : vector<1x1xf32> to vector<8x1xf32>
    %246 = arith.addf %243, %245 : vector<8x1xf32>
    %cst_238 = arith.constant dense<0xFF800000> : vector<1xf32>
    %247 = vector.multi_reduction <maximumf>, %246, %cst_238 [0] : vector<8x1xf32> to vector<1xf32>
    %248 = vector.shape_cast %247 : vector<1xf32> to vector<1x1xf32>
    %249 = vector.broadcast %248 : vector<1x1xf32> to vector<8x1xf32>
    %250 = arith.subf %246, %249 : vector<8x1xf32>
    %251 = math.exp %250 : vector<8x1xf32>
    %cst_239 = arith.constant dense<0.000000e+00> : vector<1xf32>
    %252 = vector.multi_reduction <add>, %251, %cst_239 [0] : vector<8x1xf32> to vector<1xf32>
    %253 = vector.shape_cast %252 : vector<1xf32> to vector<1x1xf32>
    %254 = vector.broadcast %253 : vector<1x1xf32> to vector<8x1xf32>
    %255 = arith.divf %251, %254 : vector<8x1xf32>
    %256 = vector.broadcast %255 : vector<8x1xf32> to vector<8x32xf32>
    %257 = arith.mulf %256, %233 : vector<8x32xf32>
    %cst_240 = arith.constant dense<0.000000e+00> : vector<32xf32>
    %258 = vector.multi_reduction <add>, %257, %cst_240 [0] : vector<8x32xf32> to vector<32xf32>
    %259 = vector.shape_cast %258 : vector<32xf32> to vector<1x32xf32>
    %260 = arith.truncf %259 : vector<1x32xf32> to vector<1x32xbf16>
    %c0_241 = arith.constant 0 : index
    %c0_242 = arith.constant 0 : index
    %261 = vector.load %arg28[%c0_241, %c0_242] : memref<32x32xbf16, #tpu.memory_space<vmem>>, vector<32x32xbf16>
    %cst_243 = arith.constant dense<0.000000e+00> : vector<1x32xf32>
    %262 = tpu.matmul %260, %261, %cst_243 {dimension_numbers = #tpu.dot_dimension_numbers<[1], [0], [0], [1], [0, 0, 1, 1], [], []>} : vector<1x32xbf16>, vector<32x32xbf16>, vector<1x32xf32> -> vector<1x32xf32>
    %c0_244 = arith.constant 0 : index
    %c0_245 = arith.constant 0 : index
    %263 = vector.load %arg29[%c0_244, %c0_245] : memref<1x32xf32, #tpu.memory_space<vmem>>, vector<1x32xf32>
    %264 = arith.addf %262, %263 : vector<1x32xf32>
    %265 = vector.shape_cast %264 : vector<1x32xf32> to vector<1x1x32xf32>
    %c0_246 = arith.constant 0 : index
    %c0_247 = arith.constant 0 : index
    %c0_248 = arith.constant 0 : index
    %266 = vector.load %arg30[%c0_246, %c0_247, %c0_248] : memref<1x1x32xf32, #tpu.memory_space<vmem>>, vector<1x1x32xf32>
    tpu.vector_store %arg30[%c0_246, %c0_247, %c0_248], %265 {strides = array<i32>} : memref<1x1x32xf32, #tpu.memory_space<vmem>>, vector<1x1x32xf32>,
    %267 = vector.shape_cast %255 : vector<8x1xf32> to vector<1x8x1xf32>
    %c0_249 = arith.constant 0 : index
    %c0_250 = arith.constant 0 : index
    %c0_251 = arith.constant 0 : index
    %268 = vector.load %arg31[%c0_249, %c0_250, %c0_251] : memref<1x8x1xf32, #tpu.memory_space<vmem>>, vector<1x8x1xf32>
    tpu.vector_store %arg31[%c0_249, %c0_250, %c0_251], %267 {strides = array<i32>} : memref<1x8x1xf32, #tpu.memory_space<vmem>>, vector<1x8x1xf32>,
    return
  }
  func.func @transform_0(%arg0: i32) -> (i32, i32, i32) {
    %c0_i32 = arith.constant 0 : i32
    %c0_i32_0 = arith.constant 0 : i32
    %c0_i32_1 = arith.constant 0 : i32
    return %arg0, %c0_i32, %c0_i32_0 : i32, i32, i32
  }
  func.func @transform_1(%arg0: i32) -> (i32, i32, i32) {
    %c0_i32 = arith.constant 0 : i32
    %c0_i32_0 = arith.constant 0 : i32
    %c0_i32_1 = arith.constant 0 : i32
    return %arg0, %c0_i32, %c0_i32_0 : i32, i32, i32
  }
  func.func @transform_2(%arg0: i32) -> (i32, i32) {
    %c0_i32 = arith.constant 0 : i32
    %c0_i32_0 = arith.constant 0 : i32
    %c0_i32_1 = arith.constant 0 : i32
    return %c0_i32, %c0_i32_0 : i32, i32
  }
  func.func @transform_3(%arg0: i32) -> (i32, i32) {
    %c0_i32 = arith.constant 0 : i32
    %c0_i32_0 = arith.constant 0 : i32
    %c0_i32_1 = arith.constant 0 : i32
    return %c0_i32, %c0_i32_0 : i32, i32
  }
  func.func @transform_4(%arg0: i32) -> (i32, i32) {
    %c0_i32 = arith.constant 0 : i32
    %c0_i32_0 = arith.constant 0 : i32
    %c0_i32_1 = arith.constant 0 : i32
    return %c0_i32, %c0_i32_0 : i32, i32
  }
  func.func @transform_5(%arg0: i32) -> (i32, i32) {
    %c0_i32 = arith.constant 0 : i32
    %c0_i32_0 = arith.constant 0 : i32
    %c0_i32_1 = arith.constant 0 : i32
    return %c0_i32, %c0_i32_0 : i32, i32
  }
  func.func @transform_6(%arg0: i32) -> (i32, i32) {
    %c0_i32 = arith.constant 0 : i32
    %c0_i32_0 = arith.constant 0 : i32
    %c0_i32_1 = arith.constant 0 : i32
    return %c0_i32, %c0_i32_0 : i32, i32
  }
  func.func @transform_7(%arg0: i32) -> (i32, i32) {
    %c0_i32 = arith.constant 0 : i32
    %c0_i32_0 = arith.constant 0 : i32
    %c0_i32_1 = arith.constant 0 : i32
    return %c0_i32, %c0_i32_0 : i32, i32
  }
  func.func @transform_8(%arg0: i32) -> (i32, i32) {
    %c0_i32 = arith.constant 0 : i32
    %c0_i32_0 = arith.constant 0 : i32
    %c0_i32_1 = arith.constant 0 : i32
    return %c0_i32, %c0_i32_0 : i32, i32
  }
  func.func @transform_9(%arg0: i32) -> (i32, i32) {
    %c0_i32 = arith.constant 0 : i32
    %c0_i32_0 = arith.constant 0 : i32
    %c0_i32_1 = arith.constant 0 : i32
    return %c0_i32, %c0_i32_0 : i32, i32
  }
  func.func @transform_10(%arg0: i32) -> (i32, i32) {
    %c0_i32 = arith.constant 0 : i32
    %c0_i32_0 = arith.constant 0 : i32
    %c0_i32_1 = arith.constant 0 : i32
    return %c0_i32, %c0_i32_0 : i32, i32
  }
  func.func @transform_11(%arg0: i32) -> (i32, i32) {
    %c0_i32 = arith.constant 0 : i32
    %c0_i32_0 = arith.constant 0 : i32
    %c0_i32_1 = arith.constant 0 : i32
    return %c0_i32, %c0_i32_0 : i32, i32
  }
  func.func @transform_12(%arg0: i32) -> (i32, i32) {
    %c0_i32 = arith.constant 0 : i32
    %c0_i32_0 = arith.constant 0 : i32
    %c0_i32_1 = arith.constant 0 : i32
    return %c0_i32, %c0_i32_0 : i32, i32
  }
  func.func @transform_13(%arg0: i32) -> (i32, i32) {
    %c0_i32 = arith.constant 0 : i32
    %c0_i32_0 = arith.constant 0 : i32
    %c0_i32_1 = arith.constant 0 : i32
    return %c0_i32, %c0_i32_0 : i32, i32
  }
  func.func @transform_14(%arg0: i32) -> (i32, i32) {
    %c0_i32 = arith.constant 0 : i32
    %c0_i32_0 = arith.constant 0 : i32
    %c0_i32_1 = arith.constant 0 : i32
    return %c0_i32, %c0_i32_0 : i32, i32
  }
  func.func @transform_15(%arg0: i32) -> (i32, i32) {
    %c0_i32 = arith.constant 0 : i32
    %c0_i32_0 = arith.constant 0 : i32
    %c0_i32_1 = arith.constant 0 : i32
    return %c0_i32, %c0_i32_0 : i32, i32
  }
  func.func @transform_16(%arg0: i32) -> (i32, i32) {
    %c0_i32 = arith.constant 0 : i32
    %c0_i32_0 = arith.constant 0 : i32
    %c0_i32_1 = arith.constant 0 : i32
    return %c0_i32, %c0_i32_0 : i32, i32
  }
  func.func @transform_17(%arg0: i32) -> (i32, i32) {
    %c0_i32 = arith.constant 0 : i32
    %c0_i32_0 = arith.constant 0 : i32
    %c0_i32_1 = arith.constant 0 : i32
    return %c0_i32, %c0_i32_0 : i32, i32
  }
  func.func @transform_18(%arg0: i32) -> (i32, i32) {
    %c0_i32 = arith.constant 0 : i32
    %c0_i32_0 = arith.constant 0 : i32
    %c0_i32_1 = arith.constant 0 : i32
    return %c0_i32, %c0_i32_0 : i32, i32
  }
  func.func @transform_19(%arg0: i32) -> (i32, i32) {
    %c0_i32 = arith.constant 0 : i32
    %c0_i32_0 = arith.constant 0 : i32
    %c0_i32_1 = arith.constant 0 : i32
    return %c0_i32, %c0_i32_0 : i32, i32
  }
  func.func @transform_20(%arg0: i32) -> (i32, i32) {
    %c0_i32 = arith.constant 0 : i32
    %c0_i32_0 = arith.constant 0 : i32
    %c0_i32_1 = arith.constant 0 : i32
    return %c0_i32, %c0_i32_0 : i32, i32
  }
  func.func @transform_21(%arg0: i32) -> (i32, i32) {
    %c0_i32 = arith.constant 0 : i32
    %c0_i32_0 = arith.constant 0 : i32
    %c0_i32_1 = arith.constant 0 : i32
    return %c0_i32, %c0_i32_0 : i32, i32
  }
  func.func @transform_22(%arg0: i32) -> (i32, i32) {
    %c0_i32 = arith.constant 0 : i32
    %c0_i32_0 = arith.constant 0 : i32
    %c0_i32_1 = arith.constant 0 : i32
    return %c0_i32, %c0_i32_0 : i32, i32
  }
  func.func @transform_23(%arg0: i32) -> (i32, i32) {
    %c0_i32 = arith.constant 0 : i32
    %c0_i32_0 = arith.constant 0 : i32
    %c0_i32_1 = arith.constant 0 : i32
    return %c0_i32, %c0_i32_0 : i32, i32
  }
  func.func @transform_24(%arg0: i32) -> (i32, i32) {
    %c0_i32 = arith.constant 0 : i32
    %c0_i32_0 = arith.constant 0 : i32
    %c0_i32_1 = arith.constant 0 : i32
    return %c0_i32, %c0_i32_0 : i32, i32
  }
  func.func @transform_25(%arg0: i32) -> (i32, i32) {
    %c0_i32 = arith.constant 0 : i32
    %c0_i32_0 = arith.constant 0 : i32
    %c0_i32_1 = arith.constant 0 : i32
    return %c0_i32, %c0_i32_0 : i32, i32
  }
  func.func @transform_26(%arg0: i32) -> (i32, i32) {
    %c0_i32 = arith.constant 0 : i32
    %c0_i32_0 = arith.constant 0 : i32
    %c0_i32_1 = arith.constant 0 : i32
    return %c0_i32, %c0_i32_0 : i32, i32
  }
  func.func @transform_27(%arg0: i32) -> (i32, i32) {
    %c0_i32 = arith.constant 0 : i32
    %c0_i32_0 = arith.constant 0 : i32
    %c0_i32_1 = arith.constant 0 : i32
    return %c0_i32, %c0_i32_0 : i32, i32
  }
  func.func @transform_28(%arg0: i32) -> (i32, i32) {
    %c0_i32 = arith.constant 0 : i32
    %c0_i32_0 = arith.constant 0 : i32
    %c0_i32_1 = arith.constant 0 : i32
    return %c0_i32, %c0_i32_0 : i32, i32
  }
  func.func @transform_29(%arg0: i32) -> (i32, i32, i32) {
    %c0_i32 = arith.constant 0 : i32
    %c0_i32_0 = arith.constant 0 : i32
    %c0_i32_1 = arith.constant 0 : i32
    return %arg0, %c0_i32, %c0_i32_0 : i32, i32, i32
  }
  func.func @transform_30(%arg0: i32) -> (i32, i32, i32) {
    %c0_i32 = arith.constant 0 : i32
    %c0_i32_0 = arith.constant 0 : i32
    %c0_i32_1 = arith.constant 0 : i32
    return %arg0, %c0_i32, %c0_i32_0 : i32, i32, i32
  }
}

</mosaic_0001>

<bundles_post_ra>
// kernel: forward.1
= control target key start
LH: loop header
LB: loop body
LE: loop exit
PB: predicated region body
PF: predicated region fallthrough
CT: control target
= control target key end

     0   :  { %s12614_s6 = smov 1   ;;  %s12615_s10 = smov 2   ;;  %s15528_s0 = inlined_call_operand.smem [shape: u32[31], index: -1, kind: input, shape index: {}] }
   0x1   :  { %s12659_s5 = sld [smem:[%s15528_s0]]   ;;  %s12616_s14 = smov 3  }
   0x2   :  { %s12664_s9 = sld [smem:[%s15528_s0 + %s12614_s6]]   ;;  %s12617_s18 = smov 4  }
   0x3   :  { %s12669_s13 = sld [smem:[%s15528_s0 + %s12615_s10]]   ;;  %s12618_s22 = smov 5  }
   0x4   :  { %s12674_s17 = sld [smem:[%s15528_s0 + %s12616_s14]]   ;;  %s12619_s26 = smov 6  }
   0x5   :  { %s12679_s21 = sld [smem:[%s15528_s0 + %s12617_s18]]   ;;  %s12620_s30 = smov 7  }
   0x6   :  { %s12684_s25 = sld [smem:[%s15528_s0 + %s12618_s22]]   ;;  %s12621_s4 = smov 8  }
   0x7   :  { %15573 = sst [smem:[#allocation9_spill]] %s12659_s5  ;;  %s12622_s10 = smov 9  }
   0x8   :  { %15574 = sst [smem:[#allocation10_spill]] %s12664_s9  ;;  %s12623_s15 = smov 10  }
   0x9   :  { %s12689_s29 = sld [smem:[%s15528_s0 + %s12619_s26]]   ;;  %s12624_s20 = smov 11  }
   0xa   :  { %s12694_s3 = sld [smem:[%s15528_s0 + %s12620_s30]]   ;;  %s12625_s26 = smov 12  }
   0xb   :  { %s12699_s8 = sld [smem:[%s15528_s0 + %s12621_s4]]   ;;  %s12626_s1 = smov 13  }
   0xc   :  { %s12704_s14 = sld [smem:[%s15528_s0 + %s12622_s10]]   ;;  %s12627_s7 = smov 14  }
   0xd   :  { %s12709_s19 = sld [smem:[%s15528_s0 + %s12623_s15]]   ;;  %s12628_s15 = smov 15  }
   0xe   :  { %s12714_s24 = sld [smem:[%s15528_s0 + %s12624_s20]]   ;;  %s12629_s22 = smov 16  }
   0xf   :  { %s12719_s30 = sld [smem:[%s15528_s0 + %s12625_s26]]   ;;  %s12630_s28 = smov 17  }
  0x10   :  { %15575 = sst [smem:[#allocation11_spill]] %s12694_s3  ;;  %s12640_s16 = smov 27  }
  0x11   :  { %15576 = sst [smem:[#allocation12_spill]] %s12699_s8  ;;  %s12641_s23 = smov 28  }
  0x12   :  { %s12724_s6 = sld [smem:[%s15528_s0 + %s12626_s1]]   ;;  %s12642_s1 = smov 29  }
  0x13   :  { %s12729_s12 = sld [smem:[%s15528_s0 + %s12627_s7]]   ;;  %s12631_s7 = smov 18  }
  0x14   :  { %15577 = sst [smem:[#allocation13_spill]] %s12714_s24  ;;  %s12643_s10 = smov 30  }
  0x15   :  { %s12734_s20 = sld [smem:[%s15528_s0 + %s12628_s15]]   ;;  %s12632_s15 = smov 19  }
  0x16   :  { %s12739_s27 = sld [smem:[%s15528_s0 + %s12629_s22]]   ;;  %s12633_s22 = smov 20  }
  0x17   :  { %s12744_s4 = sld [smem:[%s15528_s0 + %s12630_s28]]   ;;  %s12634_s28 = smov 21  }
  0x18   :  { %15578 = sst [smem:[#allocation14_spill]] %s12724_s6 }
  0x19   :  { %15579 = sst [smem:[#allocation15_spill]] %s12729_s12 }
  0x1a   :  { %s12749_s24 = sld [smem:[%s15528_s0 + %s12631_s7]]   ;;  %s12635_s7 = smov 22  }
  0x1b   :  { %15580 = sst [smem:[#allocation16_spill]] %s12734_s20 }
  0x1c   :  { %15581 = sst [smem:[#allocation17_spill]] %s12739_s27 }
  0x1d   :  { %15582 = sst [smem:[#allocation18_spill]] %s12744_s4 }
  0x1e   :  { %s12754_s20 = sld [smem:[%s15528_s0 + %s12632_s15]]   ;;  %s12636_s15 = smov 23  }
  0x1f   :  { %s12759_s27 = sld [smem:[%s15528_s0 + %s12633_s22]]   ;;  %s12637_s22 = smov 24  }
  0x20   :  { %15583 = sst [smem:[#allocation19_spill]] %s12749_s24 }
  0x21   :  { %s12764_s4 = sld [smem:[%s15528_s0 + %s12634_s28]]   ;;  %s12638_s28 = smov 25  }
  0x22   :  { %s12769_s24 = sld [smem:[%s15528_s0 + %s12635_s7]]   ;;  %s12639_s7 = smov 26  }
  0x23   :  { %s12807_s12 = sld [smem:[%s15528_s0 + %s12643_s10]]  }
  0x24   :  { %15584 = sst [smem:[#allocation20_spill]] %s12754_s20 }
  0x25   :  { %15585 = sst [smem:[#allocation21_spill]] %s12759_s27 }
  0x26   :  { %s12774_s20 = sld [smem:[%s15528_s0 + %s12636_s15]]  }
  0x27   :  { %15586 = sst [smem:[#allocation22_spill]] %s12764_s4 }
  0x28   :  { %15587 = sst [smem:[#allocation23_spill]] %s12769_s24 }
  0x29   :  { %s12779_s27 = sld [smem:[%s15528_s0 + %s12637_s22]]  }
  0x2a   :  { %s12784_s4 = sld [smem:[%s15528_s0 + %s12638_s28]]  }
  0x2b   :  { %s10255_s24 = sld [smem:[%s15528_s0 + %s12639_s7]]  }
  0x2c   :  { %15588 = sst [smem:[#allocation24_spill]] %s12774_s20 }
  0x2d   :  { %s12792_s20 = sld [smem:[%s15528_s0 + %s12640_s16]]  }
  0x2e   :  { %15591 = sst [smem:[#allocation27_spill]] %s12807_s12 }
  0x2f   :  { %15589 = sst [smem:[#allocation25_spill]] %s12779_s27 }
  0x30   :  { %15590 = sst [smem:[#allocation26_spill]] %s12784_s4 }
  0x31   :  { %s12797_s27 = sld [smem:[%s15528_s0 + %s12641_s23]]   ;;  %v67_v0 = vstv %s10255_s24 }
  0x32   :  { %s12802_s4 = sld [smem:[%s15528_s0 + %s12642_s1]]   ;;  %68 = vst [vmem:[#allocation5] sm:$0x1] %v67_v0 }
  0x33   :  { %69 = vsyncpa [#allocation7], 0 }
  0x34   :  { %71 = vsyncpa [#allocation7 + $0x1], 0  ;;  %s12809_s16 = smov 0   ;;  %s12811_s15 = smov 0  }
  0x35   :  { %s12813_s18 = smov 0   ;;  %s12815_s23 = smov 0  }
  0x36 LB: > { %s15592_s8 = sld [smem:[#allocation12_spill]]  ;;  %s12830_s0 = sadd.s32 4294967295, %s12612_s23   ;;  %s12600_s16 = sphi %s12809_s16, %s15715_s16   ;;  %s12612_s23 = sphi %s12815_s23, %s15718_s23   ;;  %s12608_s18 = sphi %s12813_s18, %s15717_s18   ;;  %s12604_s15 = sphi %s12811_s15, %s15716_s15  }
  0x37   : > { %s10261_s24 = sadd.s32 4294967294, %s12612_s23   ;;  %s12834_s22 = sadd.s32 1, %s12612_s23  }
  0x38   : > { %s703_s26 = sadd.s32 1, %s12608_s18  ;;  %s700_s1 = ssub.s32 %s12612_s23, %s12834_s22 }
  0x39   : > { %p713_p0 = scmp.ne.s32.totalorder %s12608_s18, %s12604_s15  ;;  %p701_p1 = scmp.eq.s32.totalorder %s700_s1, 0 }
  0x3a   : > { %p714_p2 = scmp.eq.s32.totalorder %s12830_s0, 1  ;;  %p719_p3 = scmp.ne.s32.totalorder %s12604_s15, %s12600_s16 }
  0x3b   : > { %p720_p4 = scmp.eq.s32.totalorder %s10261_s24, 1  ;;  %p10264_p7 = scmp.ge.s32.totalorder %s12612_s23, 1 }
  0x3c   : > { %s12845_s28 = scalar_select %p701_p1, %s12608_s18, %s703_s26  }
  0x3d   : > { %p12847_p5 = por %p714_p2, %p713_p0  ;;  %p12851_p6 = por %p720_p4, %p719_p3 }
  0x3e   : > { %p861_p8 = scmp.lt.s32.totalorder %s12612_s23, 3 }
  0x40   : > { %p862_p9 = pnand %p10264_p7, %p861_p8 }
  0x42   : > { %865 = sbr.rel (%p862_p9) target bundleno = 4316 (0x10dc), region = 136 }
  0x49   : > { %v12044_v1 = vld [vmem:[%s12669_s13 + $0x4] ss:$16 sps:$4 sm:$0xff]   ;;  %p947_p10 = scmp.lt.s32.totalorder %s12830_s0, 1  ;;  %v12046_v2 = vld [vmem:[%s12669_s13] ss:$16 sps:$4 sm:$0xff]   ;;  %v15535_v3 = vmov 0   ;;  %v990_v14 = vlaneseq }
  0x4a   : > { %1091 = vmatprep.mubr.bf16.mxu1 %v15535_v3  ;;  %5152 = vst [vmem:[#allocation3] sm:$0x3] %v15535_v3  ;;  %5153 = vst [vmem:[#allocation3 + $0xc] sm:$0x3] %v15535_v3  ;;  %s15595_s5 = sld [smem:[#allocation9_spill]]  ;;  %12043 = vset.pattern.permute.xlu0 %v15535_v3  ;;  %s15596_s9 = sld [smem:[#allocation10_spill]] }
  0x4b   : > { %5154 = vst [vmem:[#allocation3 + $0x18] sm:$0x3] %v15535_v3  ;;  %5155 = vst [vmem:[#allocation3 + $0x24] sm:$0x3] %v15535_v3  ;;  %1059 = vmatprep.subr.bf16.mxu1 %v12044_v1  ;;  %v12047_v4 = vld [vmem:[%s12669_s13 + $0x24] ss:$16 sps:$4 sm:$0xff]  }
  0x4c   : > { %5156 = vst [vmem:[#allocation3 + $0x30] sm:$0x3] %v15535_v3  ;;  %5157 = vst [vmem:[#allocation3 + $0x3c] sm:$0x3] %v15535_v3  ;;  %s12882_s7 = scalar_select %p947_p10, %s12830_s0, 1  ;;  %1060 = vmatpush1.bf16.msra.mxu1 %v12046_v2  ;;  %vm1055_vm0 = vcmask 261120  }
  0x4d   : > { %5158 = vst [vmem:[#allocation3 + $0x48] sm:$0x3] %v15535_v3  ;;  %5159 = vst [vmem:[#allocation3 + $0x54] sm:$0x3] %v15535_v3  ;;  %v12049_v5 = vld [vmem:[%s12669_s13 + $0x20] ss:$16 sps:$4 sm:$0xff]   ;;  %1061 = vmatprep.subr.bf16.mxu1 %v12047_v4 }
  0x4e   : > { %5160 = vst [vmem:[#allocation3 + $0x8] sm:$0xc] %v15535_v3  ;;  %5161 = vst [vmem:[#allocation3 + $0x14] sm:$0xc] %v15535_v3  ;;  %s15565_s11 = sshll.u32 %s12882_s7, 3  ;;  %s11056_s26 = sshll.u32 %s12882_s7, 6 }
  0x4f   : > { %5162 = vst [vmem:[#allocation3 + $0x20] sm:$0xc] %v15535_v3  ;;  %5163 = vst [vmem:[#allocation3 + $0x2c] sm:$0xc] %v15535_v3  ;;  %v12053_v6 = vld [vmem:[%s12669_s13 + $0xc] ss:$16 sps:$4 sm:$0xff]  }
  0x50   : > { %5164 = vst [vmem:[#allocation3 + $0x38] sm:$0xc] %v15535_v3  ;;  %5165 = vst [vmem:[#allocation3 + $0x44] sm:$0xc] %v15535_v3  ;;  %s951_s24 = scalar_lea.vmem %s15595_s5, %s15565_s11  ;;  %v12051_v7 = vld [vmem:[%s12669_s13 + $0x8] ss:$16 sps:$4 sm:$0xff]   ;;  %1062 = vmatpush1.bf16.msra.mxu1 %v12049_v5  ;;  %s12898_s1 = scalar_lea.vmem %s15596_s9, %s11056_s26 }
  0x51   : > { %5166 = vst [vmem:[#allocation3 + $0x50] sm:$0xc] %v15535_v3  ;;  %5167 = vst [vmem:[#allocation3 + $0x5c] sm:$0xc] %v15535_v3  ;;  %v12050_v8 = vld [vmem:[%s951_s24] sm:$0xff]   ;;  %1102 = vmatprep.subr.bf16.mxu1 %v12053_v6  ;;  %vm1166_vm1 = vcmask 519170  }
  0x52   : > { %v12056_v9 = vld [vmem:[%s12669_s13 + $0x2c] ss:$16 sps:$4 sm:$0xff]   ;;  %v12054_v10 = vld [vmem:[%s12669_s13 + $0x28] ss:$16 sps:$4 sm:$0xff]   ;;  %1167 = vst.msk [vmem:[#allocation2 + $0x8] sm:$0xc] %vm1166_vm1, %v15535_v3 }
  0x53   : > { %10279 = vmatmul.mubr.msk.bf16.vlgmr.msra.gmra.mrb[0].mxu1 %vm1055_vm0, %v12050_v8  ;;  %1168 = vst.msk [vmem:[#allocation2 + $0x14] sm:$0xc] %vm1166_vm1, %v15535_v3  ;;  %1169 = vst.msk [vmem:[#allocation2 + $0x20] sm:$0xc] %vm1166_vm1, %v15535_v3  ;;  %vm1157_vm2 = vcmask 517120   ;;  %v12061_v11 = vld [vmem:[%s12689_s29 + $0x40] sm:$0xff]  }
  0x54   : > { %1103 = vmatpush1.bf16.msra.mxu1 %v12051_v7  ;;  %1134 = vmatprep.mubr.bf16.mxu1 %v15535_v3  ;;  %1170 = vst.msk [vmem:[#allocation2 + $0x2c] sm:$0xc] %vm1166_vm1, %v15535_v3  ;;  %1171 = vst.msk [vmem:[#allocation2 + $0x38] sm:$0xc] %vm1166_vm1, %v15535_v3  ;;  %v12062_v12 = vld [vmem:[%s12689_s29] sm:$0xff]   ;;  %v12935_v15 = vshrl.u32 %v990_v14, 7 }
  0x55   : > { %1104 = vmatprep.subr.bf16.mxu1 %v12056_v9  ;;  %1172 = vst.msk [vmem:[#allocation2 + $0x44] sm:$0xc] %vm1166_vm1, %v15535_v3  ;;  %1173 = vst.msk [vmem:[#allocation2 + $0x50] sm:$0xc] %vm1166_vm1, %v15535_v3  ;;  %v12063_v13 = vld [vmem:[%s12689_s29 + $0x100] sm:$0xff]   ;;  %v12064_v19 = vld [vmem:[%s12689_s29 + $0x48] sm:$0xff]  }
  0x56   : > { %1174 = vst.msk [vmem:[#allocation2 + $0x5c] sm:$0xc] %vm1166_vm1, %v15535_v3  ;;  %11601 = vmatprep.subr.bf16.mxu0 %v12063_v13  ;;  %15597 = vst [vmem:[#allocation28_spill] sm:$0xff] %v12935_v15  ;;  %v12938_v16 = vsub.s32 0, %v12935_v15  ;;  %v988_v17 = vld [vmem:[%s12674_s17] sm:$0xf] }
  0x57   : > { %1158 = vst.msk [vmem:[#allocation2] sm:$0x3] %vm1157_vm2, %v15535_v3  ;;  %1159 = vst.msk [vmem:[#allocation2 + $0xc] sm:$0x3] %vm1157_vm2, %v15535_v3  ;;  %11602 = vmatpush3.bf16.msra.mxu0 %v12063_v13  ;;  %v12942_v18 = vsub.s32 1, %v12935_v15  ;;  %v12065_v20 = vld [vmem:[%s12689_s29 + $0x8] sm:$0xff]  }
  0x58   : > { %1105 = vmatpush1.bf16.msra.mxu1 %v12054_v10  ;;  %1160 = vst.msk [vmem:[#allocation2 + $0x18] sm:$0x3] %vm1157_vm2, %v15535_v3  ;;  %1161 = vst.msk [vmem:[#allocation2 + $0x24] sm:$0x3] %vm1157_vm2, %v15535_v3  ;;  %v12066_v21 = vld [vmem:[%s12689_s29 + $0x108] sm:$0xff]   ;;  %v993_v22 = vrot.slane %v988_v17, %v12938_v16  ;;  %v12067_v25 = vld [vmem:[%s12689_s29 + $0x50] sm:$0xff]  }
  0x59   : > { %1162 = vst.msk [vmem:[#allocation2 + $0x30] sm:$0x3] %vm1157_vm2, %v15535_v3  ;;  %1163 = vst.msk [vmem:[#allocation2 + $0x3c] sm:$0x3] %vm1157_vm2, %v15535_v3  ;;  %11081 = vmatprep.subr.bf16.mxu1 %v12061_v11  ;;  %v997_v23 = vrot.slane %v988_v17, %v12942_v18  ;;  %11603 = vmatprep.subr.bf16.mxu0 %v12066_v21  ;;  %v12068_v26 = vld [vmem:[%s12689_s29 + $0x10] sm:$0xff]   ;;  %v15538_v30 = vsub.s32 2, %v12935_v15 }
  0x5a   : > { %1164 = vst.msk [vmem:[#allocation2 + $0x48] sm:$0x3] %vm1157_vm2, %v15535_v3  ;;  %1165 = vst.msk [vmem:[#allocation2 + $0x54] sm:$0x3] %vm1157_vm2, %v15535_v3  ;;  %v12069_v27 = vld [vmem:[%s12689_s29 + $0x110] sm:$0xff]   ;;  %v15537_v33 = vsub.s32 3, %v12935_v15 }
  0x5b   : > { %10280 = vmatmul.mubr.msk.bf16.vlgmr.msra.gmra.mrb[4].mxu1 %vm1055_vm0, %v12050_v8  ;;  %15598 = vst [vmem:[#allocation29_spill] sm:$0xff] %v12938_v16  ;;  %15599 = vst [vmem:[#allocation30_spill] sm:$0xff] %v12942_v18  ;;  %11604 = vmatpush3.bf16.msra.mxu0 %v12066_v21  ;;  %vm1180_vm3 = vcmask 1041408   ;;  %v12070_v39 = vld [vmem:[%s12689_s29 + $0x58] sm:$0xff]   ;;  %v1001_v44 = vrot.slane %v988_v17, %v15538_v30  ;;  %vm1181_vm4 = vcmask 1045508   ;;  %v15600_v53 = vmov 0 }
  0x5c   : > { %11082 = vmatpush3.bf16.msra.mxu1 %v12062_v12  ;;  %11605 = vmatprep.subr.bf16.mxu0 %v12069_v27  ;;  %v12071_v40 = vld [vmem:[%s12689_s29 + $0x18] sm:$0xff]   ;;  %v1005_v47 = vrot.slane %v988_v17, %v15537_v33  ;;  %vm12962_vm5 = vmor %vm1180_vm3, %vm1181_vm4  ;;  %v12073_v54 = vld [vmem:[%s12689_s29 + $0x60] sm:$0xff]   ;;  %s15566_s24 = smov 64   ;;  %vm1192_vm6 = vcmask 519168   ;;  %vm2233_vm7 = vcmask 523264   ;;  %vm1571_vm8 = vcmask 1046528  }
  0x5d   : > { %11083 = vmatprep.subr.bf16.mxu1 %v12064_v19  ;;  %v12072_v41 = vld [vmem:[%s12689_s29 + $0x118] sm:$0xff]   ;;  %v15601_v53 = vsel %vm12962_vm5, 4294967295, %v15600_v53  ;;  %v12074_v55 = vld [vmem:[%s12689_s29 + $0x20] sm:$0xff]   ;;  %v12079_v10 = vld [vmem:[%s12689_s29 + $0x68] sm:$0xff]   ;;  %vm1620_vm9 = vsmask.f32 6400 }
  0x5e   : > { %15602 = vst [vmem:[#allocation31_spill] sm:$0xff] %v15601_v53  ;;  %v12080_v11 = vld [vmem:[%s12689_s29 + $0x28] sm:$0xff]   ;;  %vm1434_vm10 = vsmask.f32 7424  ;;  %vm2072_vm11 = vsmask.f32 4352 }
  0x5f   : > { %11606 = vmatpush3.bf16.msra.mxu0 %v12069_v27  ;;  %vm1797_vm12 = vcmask 1045504   ;;  %vm2023_vm13 = vcmask 1044480   ;;  %vm1846_vm14 = vsmask.f32 5376  ;;  %vm3012_vm15 = vcmask 31744   ;;  %s15653_s3 = sld [smem:[#allocation11_spill]] }
  0x60   : > { %11084 = vmatpush3.bf16.msra.mxu1 %v12065_v20  ;;  %11607 = vmatprep.subr.bf16.mxu0 %v12072_v41  ;;  %s15695_s6 = sld [smem:[#allocation14_spill]]  ;;  %s15696_s26 = sld [smem:[#allocation15_spill]]  ;;  %vm9198_vm4 = vcmask 785408  }
  0x61   : > { %11085 = vmatprep.subr.bf16.mxu1 %v12067_v25  ;;  %s15698_s11 = sld [smem:[#allocation13_spill]]  ;;  %s15710_s5 = sld [smem:[#allocation24_spill]] }
  0x62   : > { %s15713_s12 = sld [smem:[#allocation27_spill]] }
  0x63   : > { %11608 = vmatpush3.bf16.msra.mxu0 %v12072_v41  ;;  %v12089_v41 = vld [vmem:[%s12689_s29 + $0x78] sm:$0xff]  }
  0x64   : > { %11086 = vmatpush3.bf16.msra.mxu1 %v12068_v26 }
  0x65   : > { %11087 = vmatprep.subr.bf16.mxu1 %v12070_v39 }
  0x68   : > { %11088 = vmatpush3.bf16.msra.mxu1 %v12071_v40 }
  0x69   : > { %11089 = vmatprep.subr.bf16.mxu1 %v12073_v54 }
  0x6c   : > { %11090 = vmatpush3.bf16.msra.mxu1 %v12074_v55  ;;  %v12092_v55 = vld [vmem:[%s12689_s29 + $0x38] sm:$0xff]  }
  0x6d   : > { %11091 = vmatprep.subr.bf16.mxu1 %v12079_v10  ;;  %v13031_v10 = vld [vmem:[%s12679_s21] sm:$0x3] }
  0x6e   : > { %11967 = vmatprep.subr.msk.bf16.mxu0 %vm1180_vm3, %v13031_v10 }
  0x70   : > { %11092 = vmatpush3.bf16.msra.mxu1 %v12080_v11 }
 0x126   : > { %v1093_v24 = vpop.f32.mrb[0].mxu1 }
 0x127   : > { %v1094_v28 = vadd.f32 %v1093_v24, %v993_v22  ;;  %v1095_v29 = vpop.f32.mrb[1].mxu1 }
 0x128   : > { %v1096_v31 = vadd.f32 %v1095_v29, %v997_v23  ;;  %v1097_v32 = vpop.f32.mrb[2].mxu1  ;;  %v12084_v29 = vld [vmem:[%s12689_s29 + $0x30] sm:$0xff]  }
 0x129   : > { %v1145_v34 = vmax.f32 %v1094_v28, 0.0  ;;  %v1098_v35 = vadd.f32 %v1097_v32, %v993_v22  ;;  %v1099_v36 = vpop.f32.mrb[3].mxu1 }
 0x12a   : > { %v1146_v37 = vmax.f32 %v1096_v31, 0.0  ;;  %v1100_v38 = vadd.f32 %v1099_v36, %v997_v23  ;;  %v12081_v23 = vld [vmem:[%s12689_s29 + $0x70] sm:$0xff]  }
 0x12b   : > { %v11057_v42 = vpack.c.bf16 %v1145_v34, %v1145_v34  ;;  %v1149_v43 = vmax.f32 %v1098_v35, 0.0  ;;  %11093 = vmatprep.subr.bf16.mxu1 %v12081_v23 }
 0x12c   : > { %v11059_v45 = vpack.c.bf16 %v1146_v37, %v1146_v37  ;;  %v1150_v46 = vmax.f32 %v1100_v38, 0.0  ;;  %11094 = vmatpush3.bf16.msra.mxu1 %v12084_v29 }
 0x12d   : > { %v1183_v48 = vrot.slane %v11057_v42, 6  ;;  %v11058_v49 = vpack.c.bf16 %v1149_v43, %v1149_v43  ;;  %11095 = vmatprep.subr.bf16.mxu1 %v12089_v41 }
 0x12e   : > { %v1213_v50 = vrot.slane %v11059_v45, 6  ;;  %v11060_v51 = vpack.c.bf16 %v1150_v46, %v1150_v46  ;;  %v1136_v52 = vpop.f32.mrb[4].mxu1 }
 0x12f   : > { %1191 = vst.msk [vmem:[#allocation2] sm:$0xc] %vm1166_vm1, %v1183_v48  ;;  %v1185_v56 = vrot.slane %v11058_v49, 6  ;;  %1195 = vrot.lane.b32.xlu0 %v1183_v48, %s15566_s24  ;;  %v1137_v57 = vadd.f32 %v1136_v52, %v1001_v44  ;;  %v1138_v58 = vpop.f32.mrb[5].mxu1  ;;  %v1184_v59 = vrot.slane %v1183_v48, 4 }
 0x130   : > { %1222 = vst.msk [vmem:[#allocation2 + $0x18] sm:$0xc] %vm1166_vm1, %v1213_v50  ;;  %v1215_v60 = vrot.slane %v11060_v51, 6  ;;  %v1139_v61 = vadd.f32 %v1138_v58, %v1005_v47  ;;  %v1140_v62 = vpop.f32.mrb[6].mxu1  ;;  %v1214_v63 = vrot.slane %v1213_v50, 4  ;;  %11096 = vmatpush3.bf16.msra.mxu1 %v12092_v55 }
 0x131   : > { %v1147_v0 = vmax.f32 %v1137_v57, 0.0  ;;  %v1187_v1 = vrot.slane %v1185_v56, 4  ;;  %v1186_v2 = vsel %vm12962_vm5, %v1184_v59, %v1185_v56  ;;  %v1141_v4 = vadd.f32 %v1140_v62, %v1001_v44  ;;  %v1142_v5 = vpop.f32.mrb[7].mxu1 }
 0x132   : > { %v1148_v6 = vmax.f32 %v1139_v61, 0.0  ;;  %1193 = vst.msk [vmem:[#allocation2 + $0x4] sm:$0xf] %vm1192_vm6, %v1186_v2  ;;  %v1216_v7 = vsel %vm12962_vm5, %v1214_v63, %v1215_v60  ;;  %v1143_v8 = vadd.f32 %v1142_v5, %v1005_v47  ;;  %v1217_v9 = vrot.slane %v1215_v60, 4 }
 0x133   : > { %v11061_v12 = vpack.c.bf16 %v1147_v0, %v1147_v0  ;;  %1199 = vrot.lane.b32.xlu1 %v1187_v1, %s15566_s24  ;;  %1194 = vst.msk [vmem:[#allocation2 + $0x8] sm:$0x3] %vm1157_vm2, %v1187_v1  ;;  %1197 = vrot.lane.b32.xlu0 %v1186_v2, %s15566_s24  ;;  %v1151_v13 = vmax.f32 %v1141_v4, 0.0 }
 0x134   : > { %1223 = vst.msk [vmem:[#allocation2 + $0x1c] sm:$0xf] %vm1192_vm6, %v1216_v7  ;;  %v11063_v14 = vpack.c.bf16 %v1148_v6, %v1148_v6  ;;  %v1152_v17 = vmax.f32 %v1143_v8, 0.0 }
 0x135   : > { %1224 = vst.msk [vmem:[#allocation2 + $0x20] sm:$0x3] %vm1157_vm2, %v1217_v9  ;;  %v1243_v19 = vrot.slane %v11061_v12, 6  ;;  %v11062_v20 = vpack.c.bf16 %v1151_v13, %v1151_v13 }
 0x136   : > { %v1273_v21 = vrot.slane %v11063_v14, 6  ;;  %v11064_v22 = vpack.c.bf16 %v1152_v17, %v1152_v17  ;;  %v1322_v28 = vld [vmem:[#allocation2] sm:$0xe] }
 0x137   : > { %1252 = vst.msk [vmem:[#allocation2 + $0x30] sm:$0xc] %vm1166_vm1, %v1243_v19  ;;  %v1245_v24 = vrot.slane %v11062_v20, 6  ;;  %1225 = vrot.lane.b32.xlu1 %v1213_v50, %s15566_s24  ;;  %1227 = vrot.lane.b32.xlu0 %v1216_v7, %s15566_s24  ;;  %v1244_v25 = vrot.slane %v1243_v19, 4  ;;  %v1298_v35 = vld [vmem:[#allocation2] sm:$0xf] }
 0x138   : > { %1282 = vst.msk [vmem:[#allocation2 + $0x48] sm:$0xc] %vm1166_vm1, %v1273_v21  ;;  %v1275_v26 = vrot.slane %v11064_v22, 6  ;;  %v1274_v27 = vrot.slane %v1273_v21, 4  ;;  %v1354_v6 = vld [vmem:[#allocation2] sm:$0x8] }
 0x139   : > { %v12989_v31 = vld [vmem:[#allocation2 + $0x4] sm:$0xf]  ;;  %v1246_v32 = vsel %vm12962_vm5, %v1244_v25, %v1245_v24  ;;  %v1247_v34 = vrot.slane %v1245_v24, 4  ;;  %v1324_v24 = vld [vmem:[#allocation2 + $0x18] sm:$0xe] }
 0x13a   : > { %v1362_v36 = vld [vmem:[#allocation2 + $0x8] sm:$0xf]  ;;  %1253 = vst.msk [vmem:[#allocation2 + $0x34] sm:$0xf] %vm1192_vm6, %v1246_v32  ;;  %v1276_v37 = vsel %vm12962_vm5, %v1274_v27, %v1275_v26  ;;  %v1277_v38 = vrot.slane %v1275_v26, 4  ;;  %v10305_v39 = vcombine.low %v1322_v28, %v12989_v31  ;;  %v12998_v40 = vcombine.low %v1298_v35, %v12989_v31 }
 0x13b   : > { %1229 = vrot.lane.b32.xlu1 %v1217_v9, %s15566_s24  ;;  %1255 = vrot.lane.b32.xlu0 %v1243_v19, %s15566_s24  ;;  %v10353_v42 = vcombine.low %v12989_v31, %v1362_v36  ;;  %1254 = vst.msk [vmem:[#allocation2 + $0x38] sm:$0x3] %vm1157_vm2, %v1247_v34  ;;  %v13006_v43 = vld [vmem:[#allocation2 + $0x8] ss:$0 sps:$4 sm:$0x33]   ;;  %v10345_v4 = vcombine.low %v1362_v36, %v1362_v36 }
 0x13c   : > { %1283 = vst.msk [vmem:[#allocation2 + $0x4c] sm:$0xf] %vm1192_vm6, %v1276_v37  ;;  %v1622_v44 = vshrl.u32 %v10305_v39, 16  ;;  %v1625_v45 = vshll.u32 %v10305_v39, 16  ;;  %v1630_v46 = vshrl.u32 %v13006_v43, 16  ;;  %v1633_v47 = vshll.u32 %v13006_v43, 16 }
 0x13d   : > { %1284 = vst.msk [vmem:[#allocation2 + $0x50] sm:$0x3] %vm1157_vm2, %v1277_v38  ;;  %11609 = vmatprep.mubr.msk.bf16.mxu0 %vm2233_vm7, %v10353_v42  ;;  %v12060_v50 = vld [vmem:[#allocation2 + $0x8] ss:$0 sps:$4 sm:$0x11]   ;;  %v1438_v51 = vshll.u32 %v12998_v40, 16  ;;  %v13028_v7 = vcombine.low %v1354_v6, %v12989_v31 }
 0x13e   : > { %v1624_v48 = vrot.slane %v1622_v44, 1  ;;  %v1627_v49 = vrot.slane %v1625_v45, 2  ;;  %v1632_v52 = vrot.slane %v1630_v46, 1  ;;  %v1635_v54 = vrot.slane %v1633_v47, 2  ;;  %v13040_v23 = vld [vmem:[#allocation2 + $0x1c] sm:$0xf] }
 0x13f   : > { %1257 = vrot.lane.b32.xlu1 %v1246_v32, %s15566_s24  ;;  %1259 = vrot.lane.b32.xlu0 %v1247_v34, %s15566_s24  ;;  %v1572_v56 = vrot.slane %v10305_v39, 1  ;;  %v1440_v59 = vrot.slane %v1438_v51, 1  ;;  %v1573_v60 = vrot.slane %v12060_v50, 1  ;;  %v1436_v61 = vshrl.u32 %v12998_v40, 16  ;;  %v1326_v26 = vld [vmem:[#allocation2 + $0x30] sm:$0xe] }
 0x140   : > { %v1628_v57 = vor.u32 %v1627_v49, %v1624_v48  ;;  %v1636_v58 = vor.u32 %v1635_v54, %v1632_v52  ;;  %v1443_v62 = vshll.u32 %v12060_v50, 16  ;;  %v2082_v8 = vshrl.u32 %v10345_v4, 16  ;;  %v1338_v28 = vld [vmem:[#allocation2] sm:$0xc]  ;;  %v1328_v32 = vld [vmem:[#allocation2 + $0x48] sm:$0xe] }
 0x141   : > { %v13020_v63 = vsel %vm1571_vm8, %v1572_v56, %v1573_v60  ;;  %v1441_v1 = vor.u32 %v1440_v59, %v1436_v61  ;;  %v2085_v9 = vshll.u32 %v10345_v4, 16  ;;  %v2074_v11 = vshrl.u32 %v13028_v7, 16  ;;  %v13045_v27 = vld [vmem:[#allocation2 + $0x34] sm:$0xf]  ;;  %v1358_v41 = vld [vmem:[#allocation2 + $0x30] sm:$0x8] }
 0x142   : > { %v1637_v0 = vsel %vm1620_vm9, %v1628_v57, %v1636_v58  ;;  %v1445_v2 = vrot.slane %v1443_v62, 1  ;;  %v2084_v12 = vrot.slane %v2082_v8, 3  ;;  %v2077_v17 = vshll.u32 %v13028_v7, 16  ;;  %v13047_v29 = vld [vmem:[#allocation2 + $0x20] ss:$0 sps:$4 sm:$0x11]  }
 0x143   : > { %1285 = vrot.lane.b32.xlu1 %v1273_v21, %s15566_s24  ;;  %1287 = vrot.lane.b32.xlu0 %v1276_v37, %s15566_s24  ;;  %v2087_v13 = vrot.slane %v2085_v9, 4  ;;  %v2076_v14 = vrot.slane %v2074_v11, 3  ;;  %v13043_v25 = vcombine.low %v1324_v24, %v13040_v23  ;;  %v13049_v34 = vld [vmem:[#allocation2 + $0x4c] sm:$0xf]  ;;  %v13052_v35 = vcombine.low %v1326_v26, %v13045_v27  ;;  %v1356_v45 = vld [vmem:[#allocation2 + $0x18] sm:$0x8] }
 0x144   : > { %v1446_v5 = vsel %vm1434_vm10, %v1441_v1, %v1445_v2  ;;  %v2079_v19 = vrot.slane %v2077_v17, 4  ;;  %v13054_v36 = vld [vmem:[#allocation2 + $0x38] ss:$0 sps:$4 sm:$0x11]   ;;  %v13065_v44 = vcombine.low %v1328_v32, %v13049_v34  ;;  %v1342_v46 = vld [vmem:[#allocation2 + $0x30] sm:$0xc]  ;;  %v13068_v49 = vcombine.low %v1356_v45, %v13040_v23 }
 0x145   : > { %v2088_v20 = vor.u32 %v2087_v13, %v2084_v12  ;;  %v13056_v37 = vld [vmem:[#allocation2 + $0x50] ss:$0 sps:$4 sm:$0x11]   ;;  %v13061_v39 = vld [vmem:[#allocation2 + $0x8] ss:$0 sps:$4 sm:$0x77]   ;;  %v13079_v56 = vcombine.low %v1358_v41, %v13045_v27  ;;  %v13084_v59 = vcombine.low %v1342_v46, %v13045_v27 }
 0x146   : > { %v2080_v21 = vor.u32 %v2079_v19, %v2076_v14  ;;  %v1578_v42 = vrot.slane %v13043_v25, 1  ;;  %v1360_v47 = vld [vmem:[#allocation2 + $0x48] sm:$0x8]  ;;  %v12090_v48 = vld [vmem:[#allocation2 + $0x20] ss:$0 sps:$4 sm:$0x33]  }
 0x147   : > { %1289 = vrot.lane.b32.xlu1 %v1277_v38, %s15566_s24  ;;  %1757 = vrot.lane.b32.xlu0 %v1637_v0, %s15566_s24  ;;  %v13059_v38 = vcombine.low %v1338_v28, %v12989_v31  ;;  %v1340_v50 = vld [vmem:[#allocation2 + $0x18] sm:$0xc]  ;;  %v1344_v51 = vld [vmem:[#allocation2 + $0x48] sm:$0xc]  ;;  %v1579_v31 = vrot.slane %v13047_v29, 1  ;;  %v1584_v57 = vrot.slane %v13052_v35, 1  ;;  %v13089_v61 = vcombine.low %v1360_v47, %v13049_v34 }
 0x148   : > { %v13038_v22 = vsel %vm2072_vm11, %v2080_v21, %v2088_v20  ;;  %v13071_v52 = vld [vmem:[#allocation2 + $0x38] ss:$0 sps:$4 sm:$0x33]   ;;  %v13074_v54 = vcombine.low %v1340_v50, %v13040_v23  ;;  %v13076_v55 = vld [vmem:[#allocation2 + $0x20] ss:$0 sps:$4 sm:$0x77]   ;;  %v13096_v1 = vcombine.low %v1344_v51, %v13049_v34 }
 0x149   : > { %v1585_v58 = vrot.slane %v13054_v36, 1  ;;  %v13086_v60 = vld [vmem:[#allocation2 + $0x38] ss:$0 sps:$4 sm:$0x77]   ;;  %v13092_v62 = vsel %vm1571_vm8, %v1578_v42, %v1579_v31  ;;  %v1798_v0 = vrot.slane %v13059_v38, 2  ;;  %v1590_v6 = vrot.slane %v13065_v44, 1 }
 0x14a   : > { %15603 = vst [vmem:[#allocation32_spill] sm:$0xff] %v13092_v62  ;;  %v13098_v2 = vld [vmem:[#allocation2 + $0x50] ss:$0 sps:$4 sm:$0x77]   ;;  %v1591_v8 = vrot.slane %v13056_v37, 1  ;;  %v2024_v9 = vrot.slane %v13028_v7, 3 }
 0x14b   : > { %1531 = vrot.lane.b32.xlu1 %v1446_v5, %s15566_s24  ;;  %v13101_v4 = vsel %vm1571_vm8, %v1584_v57, %v1585_v58  ;;  %v1799_v5 = vrot.slane %v13006_v43, 2  ;;  %v2025_v11 = vrot.slane %v13061_v39, 3  ;;  %v2030_v12 = vrot.slane %v13068_v49, 3  ;;  %v13109_v13 = vld [vmem:[#allocation2 + $0x50] ss:$0 sps:$4 sm:$0x33]  }
 0x14c   : > { %15604 = vst [vmem:[#allocation33_spill] sm:$0xff] %v13101_v4  ;;  %v2031_v17 = vrot.slane %v13076_v55, 3  ;;  %v1804_v43 = vrot.slane %v13074_v54, 2  ;;  %v13117_v19 = vsel %vm1571_vm8, %v1590_v6, %v1591_v8  ;;  %v1805_v7 = vrot.slane %v12090_v48, 2  ;;  %v12141_v41 = vld [vmem:[%s12689_s29 + $0xc0] sm:$0xff]  }
 0x14d   : > { %v13112_v14 = vsel %vm1797_vm12, %v1798_v0, %v1799_v5  ;;  %15606 = vst [vmem:[#allocation35_spill] sm:$0xff] %v13117_v19  ;;  %v13120_v20 = vsel %vm2023_vm13, %v2024_v9, %v2025_v11  ;;  %v2036_v21 = vrot.slane %v13079_v56, 3  ;;  %v2037_v26 = vrot.slane %v13086_v60, 3  ;;  %11145 = vmatprep.subr.bf16.mxu1 %v12141_v41  ;;  %v1302_v6 = vld [vmem:[#allocation2 + $0x18] sm:$0xf] }
 0x14e   : > { %15605 = vst [vmem:[#allocation34_spill] sm:$0xff] %v13112_v14  ;;  %15607 = vst [vmem:[#allocation36_spill] sm:$0xff] %v13120_v20  ;;  %v13124_v24 = vsel %vm2023_vm13, %v2030_v12, %v2031_v17  ;;  %v1810_v28 = vrot.slane %v13084_v59, 2  ;;  %v1811_v32 = vrot.slane %v13071_v52, 2  ;;  %v13131_v42 = vsel %vm1797_vm12, %v1804_v43, %v1805_v7  ;;  %v13152_v9 = vld [vmem:[#allocation2 + $0x20] sm:$0xf] }
 0x14f   : > { %15608 = vst [vmem:[#allocation37_spill] sm:$0xff] %v13124_v24  ;;  %15609 = vst [vmem:[#allocation38_spill] sm:$0xff] %v13131_v42  ;;  %v2042_v45 = vrot.slane %v13089_v61, 3  ;;  %v2043_v46 = vrot.slane %v13098_v2, 3  ;;  %v1816_v47 = vrot.slane %v13096_v1, 2  ;;  %v13137_v50 = vsel %vm2023_vm13, %v2036_v21, %v2037_v26 }
 0x150   : > { %15610 = vst [vmem:[#allocation39_spill] sm:$0xff] %v13137_v50  ;;  %v13140_v51 = vsel %vm1797_vm12, %v1810_v28, %v1811_v32  ;;  %v1817_v31 = vrot.slane %v13109_v13, 2  ;;  %v1664_v0 = vshrl.u32 %v12090_v48, 16  ;;  %v1667_v5 = vshll.u32 %v12090_v48, 16  ;;  %v13154_v11 = vld [vmem:[#allocation2 + $0x38] sm:$0xf] }
 0x151   : > { %15611 = vst [vmem:[#allocation40_spill] sm:$0xff] %v13140_v51  ;;  %v13144_v57 = vsel %vm2023_vm13, %v2042_v45, %v2043_v46  ;;  %v13150_v8 = vcombine.low %v1302_v6, %v13040_v23  ;;  %v1656_v12 = vshrl.u32 %v13043_v25, 16  ;;  %v1659_v17 = vshll.u32 %v13043_v25, 16  ;;  %v1306_v21 = vld [vmem:[#allocation2 + $0x30] sm:$0xf] }
 0x152   : > { %15612 = vst [vmem:[#allocation41_spill] sm:$0xff] %v13144_v57  ;;  %v13147_v58 = vsel %vm1797_vm12, %v1816_v47, %v1817_v31  ;;  %v1666_v43 = vrot.slane %v1664_v0, 1  ;;  %v1669_v7 = vrot.slane %v1667_v5, 2  ;;  %v13160_v26 = vcombine.low %v13152_v9, %v13152_v9  ;;  %v13166_v41 = vld [vmem:[#allocation2 + $0x50] sm:$0xf] }
 0x153   : > { %15613 = vst [vmem:[#allocation42_spill] sm:$0xff] %v13147_v58  ;;  %15614 = vst [vmem:[#allocation43_spill] sm:$0xff] %v13150_v8  ;;  %v1462_v28 = vshll.u32 %v13150_v8, 16  ;;  %v1467_v32 = vshll.u32 %v13047_v29, 16  ;;  %v1310_v45 = vld [vmem:[#allocation2 + $0x48] sm:$0xf]  ;;  %v13174_v0 = vcombine.low %v13154_v11, %v13154_v11  ;;  %v13179_v29 = vcombine.low %v1306_v21, %v13045_v27 }
 0x154   : > { %v1690_v46 = vshrl.u32 %v13052_v35, 16  ;;  %v1693_v25 = vshll.u32 %v13052_v35, 16  ;;  %v1698_v47 = vshrl.u32 %v13071_v52, 16  ;;  %v1701_v31 = vshll.u32 %v13071_v52, 16 }
 0x155   : > { %v1658_v6 = vrot.slane %v1656_v12, 1  ;;  %15615 = vst [vmem:[#allocation44_spill] sm:$0xff] %v13179_v29  ;;  %v1661_v3 = vrot.slane %v1659_v17, 2  ;;  %v1670_v33 = vor.u32 %v1669_v7, %v1666_v43  ;;  %v13183_v35 = vcombine.low %v13166_v41, %v13166_v41 }
 0x156   : > { %v13186_v30 = vcombine.low %v1310_v45, %v13049_v34  ;;  %v1460_v52 = vshrl.u32 %v13150_v8, 16  ;;  %v1464_v48 = vrot.slane %v1462_v28, 1  ;;  %v1469_v53 = vrot.slane %v1467_v32, 1 }
 0x157   : > { %v1692_v12 = vrot.slane %v1690_v46, 1  ;;  %v1695_v18 = vrot.slane %v1693_v25, 2  ;;  %v1700_v21 = vrot.slane %v1698_v47, 1  ;;  %v1703_v15 = vrot.slane %v1701_v31, 2 }
 0x158   : > { %15616 = vst [vmem:[#allocation45_spill] sm:$0xff] %v13186_v30  ;;  %v1486_v17 = vshll.u32 %v13179_v29, 16  ;;  %v1724_v43 = vshrl.u32 %v13065_v44, 16  ;;  %v1727_v7 = vshll.u32 %v13065_v44, 16  ;;  %v1732_v45 = vshrl.u32 %v13109_v13, 16 }
 0x159   : > { %v1662_v16 = vor.u32 %v1661_v3, %v1658_v6  ;;  %v1484_v58 = vshrl.u32 %v13179_v29, 16  ;;  %v1735_v28 = vshll.u32 %v13109_v13, 16  ;;  %v1510_v32 = vshll.u32 %v13186_v30, 16 }
 0x15a   : > { %v1848_v46 = vshrl.u32 %v13059_v38, 16  ;;  %v1851_v25 = vshll.u32 %v13059_v38, 16  ;;  %v1856_v47 = vshrl.u32 %v13061_v39, 16  ;;  %v1859_v31 = vshll.u32 %v13061_v39, 16 }
 0x15b   : > { %v1465_v5 = vor.u32 %v1464_v48, %v1460_v52  ;;  %v1696_v57 = vor.u32 %v1695_v18, %v1692_v12  ;;  %v1704_v44 = vor.u32 %v1703_v15, %v1700_v21  ;;  %v1491_v51 = vshll.u32 %v13054_v36, 16 }
 0x15c   : > { %v1488_v3 = vrot.slane %v1486_v17, 1  ;;  %v13203_v6 = vrot.slane %v1724_v43, 1  ;;  %v13205_v50 = vrot.slane %v1727_v7, 2  ;;  %v13207_v13 = vrot.slane %v1732_v45, 1 }
 0x15d   : > { %v13209_v42 = vrot.slane %v1735_v28, 2  ;;  %v1508_v38 = vshrl.u32 %v13186_v30, 16  ;;  %v1512_v24 = vrot.slane %v1510_v32, 1  ;;  %v1515_v14 = vshll.u32 %v13056_v37, 16 }
 0x15e   : > { %v13213_v39 = vrot.slane %v1848_v46, 2  ;;  %v13215_v18 = vrot.slane %v1851_v25, 3  ;;  %v13217_v15 = vrot.slane %v1856_v47, 2  ;;  %v13219_v36 = vrot.slane %v1859_v31, 3 }
 0x15f   : > { %v13222_v48 = vsel %vm1620_vm9, %v1662_v16, %v1670_v33  ;;  %v2108_v52 = vshrl.u32 %v13068_v49, 16  ;;  %v2111_v12 = vshll.u32 %v13068_v49, 16  ;;  %v2116_v21 = vshrl.u32 %v13160_v26, 16 }
 0x160   : > { %v13228_v17 = vsel %vm1434_vm10, %v1465_v5, %v1469_v53  ;;  %v13231_v37 = vsel %vm1620_vm9, %v1696_v57, %v1704_v44  ;;  %v13233_v43 = vrot.slane %v1491_v51, 1  ;;  %v2119_v7 = vshll.u32 %v13160_v26, 16 }
 0x161   : > { %v1489_v45 = vor.u32 %v1488_v3, %v1484_v58  ;;  %v1730_v16 = vor.u32 %v13205_v50, %v13203_v6  ;;  %v1738_v33 = vor.u32 %v13209_v42, %v13207_v13  ;;  %v13242_v49 = vsel %vm1180_vm3, %v13031_v10, 0 }
 0x162   : > { %v1513_v5 = vor.u32 %v1512_v24, %v1508_v38  ;;  %v1517_v28 = vrot.slane %v1515_v14, 1  ;;  %v1854_v51 = vor.u32 %v13215_v18, %v13213_v39  ;;  %v1862_v57 = vor.u32 %v13219_v36, %v13217_v15 }
 0x163   : > { %v13249_v50 = vrot.slane %v2108_v52, 3  ;;  %v13251_v58 = vrot.slane %v2111_v12, 4  ;;  %v13253_v42 = vrot.slane %v2116_v21, 3  ;;  %v1890_v10 = vshrl.u32 %v13076_v55, 16 }
 0x164   : > { %v13256_v26 = vrot.slane %v2119_v7, 4  ;;  %v1882_v14 = vshrl.u32 %v13074_v54, 16  ;;  %v1885_v24 = vshll.u32 %v13074_v54, 16  ;;  %v1893_v32 = vshll.u32 %v13076_v55, 16 }
 0x165   : > { %v2142_v46 = vshrl.u32 %v13079_v56, 16  ;;  %v2145_v25 = vshll.u32 %v13079_v56, 16  ;;  %v2150_v47 = vshrl.u32 %v13174_v0, 16  ;;  %v2153_v31 = vshll.u32 %v13174_v0, 16 }
 0x166   : > { %v1916_v6 = vshrl.u32 %v13084_v59, 16  ;;  %v1919_v13 = vshll.u32 %v13084_v59, 16  ;;  %v1924_v38 = vshrl.u32 %v13086_v60, 16  ;;  %v1927_v54 = vshll.u32 %v13086_v60, 16 }
 0x167   : > { %v13271_v55 = vrot.slane %v1890_v10, 2  ;;  %v2176_v56 = vshrl.u32 %v13089_v61, 16  ;;  %v2179_v0 = vshll.u32 %v13089_v61, 16  ;;  %v2184_v39 = vshrl.u32 %v13183_v35, 16 }
 0x168   : > { %v13276_v18 = vrot.slane %v1882_v14, 2  ;;  %v13278_v15 = vrot.slane %v1885_v24, 3  ;;  %v13280_v59 = vrot.slane %v1893_v32, 3  ;;  %v2187_v60 = vshll.u32 %v13183_v35, 16 }
 0x169   : > { %v13283_v36 = vrot.slane %v2142_v46, 3  ;;  %v13285_v52 = vrot.slane %v2145_v25, 4  ;;  %v13287_v12 = vrot.slane %v2150_v47, 3  ;;  %v13289_v21 = vrot.slane %v2153_v31, 4 }
 0x16a   : > { %v13293_v10 = vrot.slane %v1919_v13, 3  ;;  %v13295_v14 = vrot.slane %v1924_v38, 2  ;;  %v13297_v24 = vrot.slane %v1927_v54, 3  ;;  %v13301_v35 = vrot.slane %v2176_v56, 3 }
 0x16b   : > { %v13303_v32 = vrot.slane %v2179_v0, 4  ;;  %v13305_v46 = vrot.slane %v2184_v39, 3  ;;  %v1958_v25 = vshrl.u32 %v13098_v2, 16  ;;  %v13308_v47 = vrot.slane %v2187_v60, 4 }
 0x16c   : > { %v13315_v38 = vsel %vm1434_vm10, %v1489_v45, %v13233_v43  ;;  %v13318_v54 = vsel %vm1620_vm9, %v1730_v16, %v1738_v33  ;;  %v13321_v56 = vsel %vm1434_vm10, %v1513_v5, %v1517_v28  ;;  %v13324_v0 = vsel %vm1846_vm14, %v1854_v51, %v1862_v57 }
 0x16d   : > { %v2114_v43 = vor.u32 %v13251_v58, %v13249_v50  ;;  %v2122_v45 = vor.u32 %v13256_v26, %v13253_v42  ;;  %v1888_v16 = vor.u32 %v13278_v15, %v13276_v18  ;;  %v1896_v33 = vor.u32 %v13280_v59, %v13271_v55 }
 0x16e   : > { %v13350_v50 = vrot.slane %v1958_v25, 2  ;;  %v2148_v26 = vor.u32 %v13285_v52, %v13283_v36  ;;  %v2156_v55 = vor.u32 %v13289_v21, %v13287_v12  ;;  %v15618_v36 = vcombine.low %v13040_v23, %v13152_v9 }
 0x16f   : > { %vm8641_vm3 = vcmask 259074  }
 0x1a1   : > { %v1196_v53 = vpop.permute.xlu0 %1195 }
 0x1a2   : > { %1205 = vst.msk [vmem:[#allocation2 + $0xc] sm:$0xc] %vm1166_vm1, %v1196_v53  ;;  %v13291_v53 = vrot.slane %v1916_v6, 2 }
 0x1a5   : > { %v1200_v44 = vpop.permute.xlu1 %1199  ;;  %v1198_v3 = vpop.permute.xlu0 %1197 }
 0x1a6   : > { %1207 = vst.msk [vmem:[#allocation2 + $0x14] sm:$0x3] %vm1157_vm2, %v1200_v44 }
 0x1a7   : > { %1206 = vst.msk [vmem:[#allocation2 + $0x10] sm:$0xf] %vm1192_vm6, %v1198_v3  ;;  %v1961_v3 = vshll.u32 %v13098_v2, 16 }
 0x1a9   : > { %v1226_v7 = vpop.permute.xlu1 %1225  ;;  %v1228_v61 = vpop.permute.xlu0 %1227  ;;  %v1323_v6 = vld [vmem:[#allocation2 + $0xc] sm:$0xe]  ;;  %v13361_v18 = vrot.slane %v1961_v3, 3 }
 0x1aa   : > { %1235 = vst.msk [vmem:[#allocation2 + $0x24] sm:$0xc] %vm1166_vm1, %v1226_v7  ;;  %v1300_v13 = vld [vmem:[#allocation2 + $0xc] sm:$0xf] }
 0x1ab   : > { %1236 = vst.msk [vmem:[#allocation2 + $0x28] sm:$0xf] %vm1192_vm6, %v1228_v61  ;;  %v1355_v39 = vld [vmem:[#allocation2 + $0xc] sm:$0x8] }
 0x1ad   : > { %v1230_v60 = vpop.permute.xlu1 %1229  ;;  %v1256_v7 = vpop.permute.xlu0 %1255  ;;  %v13328_v2 = vld [vmem:[#allocation2 + $0x14] sm:$0xf] }
 0x1ae   : > { %v13326_v61 = vld [vmem:[#allocation2 + $0x10] sm:$0xf]  ;;  %1237 = vst.msk [vmem:[#allocation2 + $0x2c] sm:$0x3] %vm1157_vm2, %v1230_v60 }
 0x1af   : > { %1265 = vst.msk [vmem:[#allocation2 + $0x3c] sm:$0xc] %vm1166_vm1, %v1256_v7  ;;  %v10354_v5 = vcombine.low %v13326_v61, %v13328_v2  ;;  %v13343_v28 = vcombine.low %v1323_v6, %v13326_v61  ;;  %v13345_v51 = vld [vmem:[#allocation2 + $0x14] ss:$0 sps:$4 sm:$0x33]   ;;  %v13348_v57 = vcombine.low %v1300_v13, %v13326_v61  ;;  %v13355_v42 = vcombine.low %v1355_v39, %v13326_v61 }
 0x1b0   : > { %v13352_v58 = vld [vmem:[#allocation2 + $0x14] ss:$0 sps:$4 sm:$0x11]   ;;  %v1647_v25 = vshrl.u32 %v13345_v51, 16  ;;  %v1650_v6 = vshll.u32 %v13345_v51, 16 }
 0x1b1   : > { %15617 = vst [vmem:[#allocation46_spill] sm:$0xff] %v13348_v57  ;;  %11610 = vmatmul.mubr.msk.bf16.vlgmr.msra.gmra.mrb[0].mxu0 %vm2233_vm7, %v10354_v5  ;;  %v1639_v15 = vshrl.u32 %v13343_v28, 16  ;;  %v1642_v59 = vshll.u32 %v13343_v28, 16  ;;  %v1258_v13 = vpop.permute.xlu1 %1257  ;;  %v1260_v39 = vpop.permute.xlu0 %1259  ;;  %v1448_v52 = vshrl.u32 %v13348_v57, 16  ;;  %v1450_v12 = vshll.u32 %v13348_v57, 16 }
 0x1b2   : > { %11613 = vmatprep.mubr.msk.bf16.mxu0 %vm2233_vm7, %v15618_v36  ;;  %v1455_v21 = vshll.u32 %v13352_v58, 16  ;;  %v13375_v3 = vld [vmem:[#allocation2 + $0x28] sm:$0xf]  ;;  %11626 = vmatpush3.bf16.msra.mxu0 %v13242_v49  ;;  %v2091_v60 = vshrl.u32 %v13355_v42, 16  ;;  %1266 = vst.msk [vmem:[#allocation2 + $0x40] sm:$0xf] %vm1192_vm6, %v1258_v13 }
 0x1b3   : > { %1267 = vst.msk [vmem:[#allocation2 + $0x44] sm:$0x3] %vm1157_vm2, %v1260_v39  ;;  %v1641_v7 = vrot.slane %v1639_v15, 1  ;;  %v1644_v23 = vrot.slane %v1642_v59, 2  ;;  %v1649_v9 = vrot.slane %v1647_v25, 1  ;;  %v1652_v5 = vrot.slane %v1650_v6, 2 }
 0x1b4   : > { %v1325_v36 = vld [vmem:[#allocation2 + $0x24] sm:$0xe]  ;;  %v1452_v44 = vrot.slane %v1450_v12, 1  ;;  %v1457_v31 = vrot.slane %v1455_v21, 1  ;;  %v13384_v19 = vrot.slane %v2091_v60, 3  ;;  %v2094_v13 = vshll.u32 %v13355_v42, 16 }
 0x1b5   : > { %v13382_v20 = vcombine.low %v1325_v36, %v13375_v3  ;;  %v1304_v30 = vld [vmem:[#allocation2 + $0x24] sm:$0xf]  ;;  %v1645_v49 = vor.u32 %v1644_v23, %v1641_v7  ;;  %v1653_v29 = vor.u32 %v1652_v5, %v1649_v9  ;;  %v1286_v15 = vpop.permute.xlu1 %1285  ;;  %v1288_v59 = vpop.permute.xlu0 %1287  ;;  %v13390_v6 = vld [vmem:[#allocation2 + $0x2c] sm:$0xf]  ;;  %v13395_v21 = vsel %vm2072_vm11, %v2114_v43, %v2122_v45 }
 0x1b6   : > { %v13387_v4 = vcombine.low %v1304_v30, %v13375_v3  ;;  %v1453_v25 = vor.u32 %v1452_v44, %v1448_v52  ;;  %1295 = vst.msk [vmem:[#allocation2 + $0x54] sm:$0xc] %vm1166_vm1, %v1286_v15  ;;  %v10356_v60 = vcombine.low %v13375_v3, %v13390_v6  ;;  %v13402_v7 = vld [vmem:[#allocation2 + $0x2c] ss:$0 sps:$4 sm:$0x33]   ;;  %v13406_v52 = vsel %vm1846_vm14, %v1888_v16, %v1896_v33 }
 0x1b7   : > { %v1673_v39 = vshrl.u32 %v13382_v20, 16  ;;  %v1676_v12 = vshll.u32 %v13382_v20, 16  ;;  %1296 = vst.msk [vmem:[#allocation2 + $0x58] sm:$0xf] %vm1192_vm6, %v1288_v59  ;;  %v1654_v30 = vsel %vm1620_vm9, %v1645_v49, %v1653_v29  ;;  %v13415_v5 = vcombine.low %v13328_v2, %v13328_v2  ;;  %v1327_v36 = vld [vmem:[#allocation2 + $0x3c] sm:$0xe] }
 0x1b8   : > { %15619 = vst [vmem:[#allocation47_spill] sm:$0xff] %v13387_v4  ;;  %v1472_v44 = vshrl.u32 %v13387_v4, 16  ;;  %1759 = vrot.lane.b32.xlu0 %v1654_v30, %s15566_s24  ;;  %v1458_v43 = vsel %vm1434_vm10, %v1453_v25, %v1457_v31  ;;  %v13410_v9 = vld [vmem:[#allocation2 + $0x2c] ss:$0 sps:$4 sm:$0x11]   ;;  %v1474_v29 = vshll.u32 %v13387_v4, 16  ;;  %v13422_v49 = vsel %vm2072_vm11, %v2148_v26, %v2156_v55 }
 0x1b9   : > { %v1675_v45 = vrot.slane %v1673_v39, 1  ;;  %v1678_v23 = vrot.slane %v1676_v12, 2  ;;  %1533 = vrot.lane.b32.xlu1 %v1458_v43, %s15566_s24  ;;  %11614 = vmatmul.mubr.msk.bf16.gmra.mrb[4].mxu0 %vm2233_vm7, %v10356_v60  ;;  %v1681_v16 = vshrl.u32 %v13402_v7, 16  ;;  %v1684_v33 = vshll.u32 %v13402_v7, 16  ;;  %v1308_v31 = vld [vmem:[#allocation2 + $0x3c] sm:$0xf]  ;;  %v1290_v15 = vpop.permute.xlu1 %1289  ;;  %v1758_v2 = vpop.permute.xlu0 %1757 }
 0x1ba   : > { %v15620_v59 = vcombine.low %v13045_v27, %v13154_v11  ;;  %v1476_v25 = vrot.slane %v1474_v29, 1  ;;  %v1479_v39 = vshll.u32 %v13410_v9, 16  ;;  %v13429_v12 = vld [vmem:[#allocation2 + $0x40] sm:$0xf]  ;;  %v13431_v30 = vld [vmem:[#allocation2 + $0x44] sm:$0xf]  ;;  %v1922_v60 = vor.u32 %v13293_v10, %v13291_v53 }
 0x1bb   : > { %v1930_v26 = vor.u32 %v13297_v24, %v13295_v14  ;;  %1297 = vst.msk [vmem:[#allocation2 + $0x5c] sm:$0x3] %vm1157_vm2, %v1290_v15  ;;  %v2260_v27 = vsel %vm2233_vm7, %v13020_v63, %v1758_v2  ;;  %v1679_v11 = vor.u32 %v1678_v23, %v1675_v45  ;;  %v1683_v55 = vrot.slane %v1681_v16, 1  ;;  %v13447_v14 = vld [vmem:[#allocation2 + $0x44] ss:$0 sps:$4 sm:$0x33]  }
 0x1bc   : > { %11617 = vmatprep.mubr.msk.bf16.mxu0 %vm2233_vm7, %v15620_v59  ;;  %v1686_v43 = vrot.slane %v1684_v33, 2  ;;  %1761 = vrot.lane.b32.xlu0 %v13222_v48, %s15566_s24  ;;  %v1477_v29 = vor.u32 %v1476_v25, %v1472_v44  ;;  %v1481_v59 = vrot.slane %v1479_v39, 1  ;;  %v10358_v53 = vcombine.low %v13429_v12, %v13431_v30  ;;  %15621 = vst [vmem:[#allocation48_spill] sm:$0xff] %v13447_v14  ;;  %v13454_v48 = vld [vmem:[#allocation2 + $0x44] ss:$0 sps:$4 sm:$0x11]  }
 0x1bd   : > { %2705 = vmatprep.mubr.bf16.mxu1 %v2260_v27  ;;  %v13445_v10 = vcombine.low %v1327_v36, %v13429_v12  ;;  %1535 = vrot.lane.b32.xlu1 %v13228_v17, %s15566_s24  ;;  %v13452_v24 = vcombine.low %v1308_v31, %v13429_v12  ;;  %v13456_v44 = vrot.slane %v2094_v13, 4  ;;  %v12142_v23 = vld [vmem:[%s12689_s29 + $0x80] sm:$0xff]   ;;  %v1532_v16 = vpop.permute.xlu1 %1531  ;;  %v1715_v17 = vshrl.u32 %v13447_v14, 16  ;;  %v12143_v25 = vld [vmem:[%s12689_s29 + $0xc8] sm:$0xff]  }
 0x1be   : > { %v1687_v63 = vor.u32 %v1686_v43, %v1683_v55  ;;  %v1482_v33 = vsel %vm1434_vm10, %v1477_v29, %v1481_v59  ;;  %v13464_v2 = vld [vmem:[#allocation2 + $0x58] sm:$0xf]  ;;  %v1357_v31 = vld [vmem:[#allocation2 + $0x24] sm:$0x8]  ;;  %v2235_v13 = vsel %vm2233_vm7, %v12998_v40, %v1532_v16  ;;  %v1718_v27 = vshll.u32 %v13447_v14, 16 }
 0x1bf   : > { %15622 = vst [vmem:[#allocation49_spill] sm:$0xff] %v13452_v24  ;;  %v1707_v36 = vshrl.u32 %v13445_v10, 16  ;;  %v1710_v15 = vshll.u32 %v13445_v10, 16  ;;  %v1496_v55 = vshrl.u32 %v13452_v24, 16  ;;  %v1329_v43 = vld [vmem:[#allocation2 + $0x54] sm:$0xe]  ;;  %2706 = vmatmul.mubr.bf16.vlgmr.msra.gmra.mrb[8].mxu1 %v2235_v13 }
 0x1c0   : > { %v1688_v39 = vsel %vm1620_vm9, %v1679_v11, %v1687_v63  ;;  %v1312_v29 = vld [vmem:[#allocation2 + $0x54] sm:$0xf]  ;;  %v1717_v4 = vrot.slane %v1715_v17, 1  ;;  %v1498_v8 = vshll.u32 %v13452_v24, 16  ;;  %v1720_v40 = vrot.slane %v1718_v27, 2  ;;  %11146 = vmatpush3.bf16.msra.mxu1 %v12142_v23 }
 0x1c1   : > { %1763 = vrot.lane.b32.xlu0 %v1688_v39, %s15566_s24  ;;  %v1709_v59 = vrot.slane %v1707_v36, 1  ;;  %v1712_v45 = vrot.slane %v1710_v15, 2  ;;  %1537 = vrot.lane.b32.xlu1 %v1482_v33, %s15566_s24  ;;  %v1503_v11 = vshll.u32 %v13454_v48, 16  ;;  %v13478_v63 = vcombine.low %v1329_v43, %v13464_v2  ;;  %v1339_v13 = vld [vmem:[#allocation2 + $0xc] sm:$0xc]  ;;  %v12145_v43 = vld [vmem:[%s12689_s29 + $0xd0] sm:$0xff]  }
 0x1c2   : > { %11618 = vmatmul.mubr.msk.bf16.gmra.mrb[8].mxu0 %vm2233_vm7, %v10358_v53  ;;  %v13481_v16 = vcombine.low %v1312_v29, %v13464_v2  ;;  %v12144_v36 = vld [vmem:[%s12689_s29 + $0x88] sm:$0xff]   ;;  %v15624_v15 = vcombine.low %v13049_v34, %v13166_v41  ;;  %v1500_v33 = vrot.slane %v1498_v8, 1  ;;  %v13488_v39 = vld [vmem:[#allocation2 + $0x5c] sm:$0xf]  ;;  %v13491_v53 = vcombine.low %v1339_v13, %v13326_v61  ;;  %11147 = vmatprep.subr.bf16.mxu1 %v12143_v25 }
 0x1c3   : > { %v1713_v17 = vor.u32 %v1712_v45, %v1709_v59  ;;  %v13494_v27 = vsel %vm1846_vm14, %v1922_v60, %v1930_v26  ;;  %v1721_v29 = vor.u32 %v1720_v40, %v1717_v4  ;;  %v1505_v24 = vrot.slane %v1503_v11, 1  ;;  %v13499_v34 = vld [vmem:[#allocation2 + $0x5c] ss:$0 sps:$4 sm:$0x33]   ;;  %v12113_v59 = vld [vmem:[%s12898_s1] sm:$0xff]  }
 0x1c4   : > { %15623 = vst [vmem:[#allocation50_spill] sm:$0xff] %v13481_v16  ;;  %11621 = vmatprep.mubr.msk.bf16.mxu0 %vm2233_vm7, %v15624_v15  ;;  %15625 = vst [vmem:[#allocation51_spill] sm:$0xff] %v13494_v27  ;;  %v10360_v62 = vcombine.low %v13464_v2, %v13488_v39  ;;  %v13502_v8 = vcombine.low %v1357_v31, %v13375_v3  ;;  %v1501_v41 = vor.u32 %v1500_v33, %v1496_v55  ;;  %v13508_v60 = vld [vmem:[#allocation2 + $0x5c] ss:$0 sps:$4 sm:$0x11]   ;;  %v12146_v15 = vld [vmem:[%s12689_s29 + $0x90] sm:$0xff]  }
 0x1c5   : > { %15626 = vst [vmem:[#allocation52_spill] sm:$0xff] %v13499_v34  ;;  %1765 = vrot.lane.b32.xlu0 %v13231_v37, %s15566_s24  ;;  %v1741_v61 = vshrl.u32 %v13478_v63, 16  ;;  %v1744_v4 = vshll.u32 %v13478_v63, 16  ;;  %v1520_v26 = vshrl.u32 %v13481_v16, 16  ;;  %1539 = vrot.lane.b32.xlu1 %v13315_v38, %s15566_s24  ;;  %v1722_v45 = vsel %vm1620_vm9, %v1713_v17, %v1721_v29  ;;  %v12147_v38 = vld [vmem:[%s12689_s29 + $0xd8] sm:$0xff]  }
 0x1c6   : > { %v1749_v23 = vshrl.u32 %v13499_v34, 16  ;;  %v1752_v37 = vshll.u32 %v13499_v34, 16  ;;  %v1522_v31 = vshll.u32 %v13481_v16, 16  ;;  %v13517_v25 = vld [vmem:[#allocation2 + $0x14] ss:$0 sps:$4 sm:$0x77]   ;;  %v1506_v55 = vsel %vm1434_vm10, %v1501_v41, %v1505_v24  ;;  %11148 = vmatpush3.bf16.msra.mxu1 %v12144_v36 }
 0x1c7   : > { %v1743_v40 = vrot.slane %v1741_v61, 1  ;;  %v1746_v11 = vrot.slane %v1744_v4, 2  ;;  %v1527_v13 = vshll.u32 %v13508_v60, 16  ;;  %v2102_v57 = vshll.u32 %v13415_v5, 16  ;;  %11149 = vmatprep.subr.bf16.mxu1 %v12145_v43  ;;  %v1341_v4 = vld [vmem:[#allocation2 + $0x24] sm:$0xc] }
 0x1c8   : > { %v1751_v33 = vrot.slane %v1749_v23, 1  ;;  %v1754_v17 = vrot.slane %v1752_v37, 2  ;;  %v1524_v29 = vrot.slane %v1522_v31, 1  ;;  %v10348_v16 = vcombine.low %v13390_v6, %v13390_v6 }
 0x1c9   : > { %1767 = vrot.lane.b32.xlu0 %v1722_v45, %s15566_s24  ;;  %v15627_v24 = vshrl.u32 %v13415_v5, 16  ;;  %v1865_v61 = vshrl.u32 %v13491_v53, 16  ;;  %v1868_v36 = vshll.u32 %v13491_v53, 16  ;;  %1541 = vrot.lane.b32.xlu1 %v1506_v55, %s15566_s24  ;;  %v1747_v23 = vor.u32 %v1746_v11, %v1743_v40  ;;  %v13535_v45 = vld [vmem:[#allocation2 + $0x2c] ss:$0 sps:$4 sm:$0x77]  }
 0x1ca   : > { %11622 = vmatmul.mubr.msk.bf16.gmra.mrb[12].mxu0 %vm2233_vm7, %v10360_v62  ;;  %v1755_v43 = vor.u32 %v1754_v17, %v1751_v33  ;;  %v2104_v37 = vrot.slane %v2102_v57, 4  ;;  %v1873_v6 = vshrl.u32 %v13517_v25, 16  ;;  %v1525_v5 = vor.u32 %v1524_v29, %v1520_v26  ;;  %11150 = vmatpush3.bf16.msra.mxu1 %v12146_v15  ;;  %v12148_v62 = vld [vmem:[%s12689_s29 + $0x98] sm:$0xff]   ;;  %v12149_v11 = vld [vmem:[%s12689_s29 + $0xe0] sm:$0xff]  }
 0x1cb   : > { %v2101_v41 = vrot.slane %v15627_v24, 3  ;;  %11627 = vmatprep.mubr.msk.bf16.mxu0 %vm3012_vm15, %v12113_v59  ;;  %v1529_v31 = vrot.slane %v1527_v13, 1  ;;  %v1876_v24 = vshll.u32 %v13517_v25, 16  ;;  %v15628_v34 = vshrl.u32 %v13096_v1, 16  ;;  %11151 = vmatprep.subr.bf16.mxu1 %v12147_v38 }
 0x1cc   : > { %v2097_v57 = vor.u32 %v13456_v44, %v13384_v19  ;;  %v13546_v55 = vrot.slane %v1865_v61, 2  ;;  %v13548_v40 = vrot.slane %v1868_v36, 3  ;;  %v15629_v59 = vshll.u32 %v13096_v1, 16  ;;  %v12118_v1 = vld [vmem:[%s12898_s1 + $0x8] sm:$0xff]  }
 0x1cd   : > { %v13541_v14 = vrot.slane %v15628_v34, 2  ;;  %1769 = vrot.lane.b32.xlu0 %v13318_v54, %s15566_s24  ;;  %v2105_v34 = vor.u32 %v2104_v37, %v2101_v41  ;;  %v1875_v13 = vrot.slane %v1873_v6, 2  ;;  %v1878_v15 = vrot.slane %v1876_v24, 3  ;;  %1543 = vrot.lane.b32.xlu1 %v13321_v56, %s15566_s24  ;;  %v12120_v41 = vld [vmem:[%s12898_s1 + $0x10] sm:$0xff]   ;;  %v1359_v56 = vld [vmem:[#allocation2 + $0x3c] sm:$0x8] }
 0x1ce   : > { %v13552_v26 = vrot.slane %v15629_v59, 3  ;;  %v2125_v19 = vshrl.u32 %v13502_v8, 16  ;;  %v1756_v44 = vsel %vm1620_vm9, %v1747_v23, %v1755_v43  ;;  %v2133_v33 = vshrl.u32 %v10348_v16, 16  ;;  %11152 = vmatpush3.bf16.msra.mxu1 %v12148_v62  ;;  %v12150_v23 = vld [vmem:[%s12689_s29 + $0xa0] sm:$0xff]   ;;  %v1343_v43 = vld [vmem:[#allocation2 + $0x3c] sm:$0xc] }
 0x1cf   : > { %v2136_v17 = vshll.u32 %v10348_v16, 16  ;;  %v13563_v38 = vcombine.low %v1341_v4, %v13375_v3  ;;  %v10350_v54 = vcombine.low %v13431_v30, %v13431_v30  ;;  %v1530_v29 = vsel %vm1434_vm10, %v1525_v5, %v1529_v31  ;;  %11153 = vmatprep.subr.bf16.mxu1 %v12149_v11  ;;  %v12151_v37 = vld [vmem:[%s12689_s29 + $0xe8] sm:$0xff]   ;;  %v13593_v59 = vld [vmem:[#allocation2 + $0x44] ss:$0 sps:$4 sm:$0x77]  }
 0x1d0   : > { %v1907_v61 = vshrl.u32 %v13535_v45, 16  ;;  %v1910_v36 = vshll.u32 %v13535_v45, 16  ;;  %v13574_v16 = vcombine.low %v13488_v39, %v13488_v39  ;;  %v1871_v3 = vor.u32 %v13548_v40, %v13546_v55 }
 0x1d1   : > { %v2128_v4 = vshll.u32 %v13502_v8, 16  ;;  %v1899_v30 = vshrl.u32 %v13563_v38, 16  ;;  %1771 = vrot.lane.b32.xlu0 %v1756_v44, %s15566_s24  ;;  %v2106_v6 = vsel %vm2072_vm11, %v2097_v57, %v2105_v34  ;;  %v1879_v5 = vor.u32 %v1878_v15, %v1875_v13  ;;  %1545 = vrot.lane.b32.xlu1 %v1530_v29, %s15566_s24  ;;  %v12152_v15 = vld [vmem:[%s12689_s29 + $0xa8] sm:$0xff]  }
 0x1d2   : > { %v13583_v31 = vrot.slane %v2125_v19, 3  ;;  %v13585_v39 = vrot.slane %v2133_v33, 3  ;;  %11628 = vmatmul.mubr.msk.bf16.vlgmr.msra.gmra.mrb[0].mxu0 %vm3012_vm15, %v12118_v1  ;;  %v2138_v24 = vrot.slane %v2136_v17, 4  ;;  %v1902_v62 = vshll.u32 %v13563_v38, 16  ;;  %11154 = vmatpush3.bf16.msra.mxu1 %v12150_v23 }
 0x1d3   : > { %v1909_v55 = vrot.slane %v1907_v61, 2  ;;  %v13591_v40 = vcombine.low %v1359_v56, %v13429_v12  ;;  %11631 = vmatprep.mubr.msk.bf16.mxu0 %vm3012_vm15, %v12120_v41  ;;  %v1912_v57 = vrot.slane %v1910_v36, 3  ;;  %v2167_v11 = vshrl.u32 %v10350_v54, 16  ;;  %11155 = vmatprep.subr.bf16.mxu1 %v12151_v37  ;;  %v1361_v41 = vld [vmem:[#allocation2 + $0x54] sm:$0x8]  ;;  %v12122_v61 = vld [vmem:[%s12898_s1 + $0x18] sm:$0xff]  }
 0x1d4   : > { %v2170_v34 = vshll.u32 %v10350_v54, 16  ;;  %v13597_v13 = vcombine.low %v1343_v43, %v13429_v12  ;;  %v2130_v19 = vrot.slane %v2128_v4, 4  ;;  %v1901_v44 = vrot.slane %v1899_v30, 2 }
 0x1d5   : > { %v2159_v1 = vshrl.u32 %v13591_v40, 16  ;;  %v2162_v33 = vshll.u32 %v13591_v40, 16  ;;  %2209 = vrot.lane.b32.xlu0 %v13038_v22, %s15566_s24  ;;  %v2169_v17 = vrot.slane %v2167_v11, 3  ;;  %1983 = vrot.lane.b32.xlu1 %v13324_v0, %s15566_s24  ;;  %v1904_v36 = vrot.slane %v1902_v62, 3  ;;  %v12124_v22 = vld [vmem:[%s12898_s1 + $0x20] sm:$0xff]  }
 0x1d6   : > { %15630 = vst [vmem:[#allocation53_spill] sm:$0xff] %v13597_v13  ;;  %v2172_v29 = vrot.slane %v2170_v34, 4  ;;  %v1933_v54 = vshrl.u32 %v13597_v13, 16  ;;  %v1936_v12 = vshll.u32 %v13597_v13, 16  ;;  %v1941_v4 = vshrl.u32 %v13593_v59, 16  ;;  %11156 = vmatpush3.bf16.msra.mxu1 %v12152_v15 }
 0x1d7   : > { %v2161_v56 = vrot.slane %v2159_v1, 3  ;;  %v2164_v23 = vrot.slane %v2162_v33, 4  ;;  %v1880_v30 = vsel %vm1846_vm14, %v1871_v3, %v1879_v5  ;;  %v2139_v43 = vor.u32 %v2138_v24, %v13585_v39  ;;  %v1345_v34 = vld [vmem:[#allocation2 + $0x54] sm:$0xc] }
 0x1d8   : > { %v1913_v37 = vor.u32 %v1912_v57, %v1909_v55  ;;  %v1944_v11 = vshll.u32 %v13593_v59, 16  ;;  %v2173_v27 = vor.u32 %v2172_v29, %v2169_v17  ;;  %v13614_v13 = vrot.slane %v1933_v54, 2  ;;  %v12153_v1 = vld [vmem:[%s12689_s29 + $0xf0] sm:$0xff]  }
 0x1d9   : > { %v13616_v0 = vrot.slane %v1936_v12, 3  ;;  %v13619_v62 = vcombine.low %v1361_v41, %v13464_v2  ;;  %2211 = vrot.lane.b32.xlu0 %v2106_v6, %s15566_s24  ;;  %v2165_v3 = vor.u32 %v2164_v23, %v2161_v56  ;;  %v13623_v5 = vrot.slane %v1941_v4, 2  ;;  %1985 = vrot.lane.b32.xlu1 %v1880_v30, %s15566_s24  ;;  %v13649_v12 = vld [vmem:[#allocation2 + $0x5c] ss:$0 sps:$4 sm:$0x77]   ;;  %v12126_v23 = vld [vmem:[%s12898_s1 + $0x28] sm:$0xff]  }
 0x1da   : > { %v13625_v39 = vrot.slane %v1944_v11, 3  ;;  %v2201_v24 = vshrl.u32 %v13574_v16, 16  ;;  %11632 = vmatmul.mubr.msk.bf16.gmra.mrb[4].mxu0 %vm3012_vm15, %v12122_v61  ;;  %v2131_v55 = vor.u32 %v2130_v19, %v13583_v31  ;;  %v1905_v57 = vor.u32 %v1904_v36, %v1901_v44  ;;  %11157 = vmatprep.subr.bf16.mxu1 %v12153_v1  ;;  %v12154_v19 = vld [vmem:[%s12689_s29 + $0xb0] sm:$0xff]  }
 0x1db   : > { %v2204_v15 = vshll.u32 %v13574_v16, 16  ;;  %v13633_v33 = vcombine.low %v1345_v34, %v13464_v2  ;;  %11635 = vmatprep.mubr.msk.bf16.mxu0 %vm3012_vm15, %v12124_v22  ;;  %v2182_v6 = vor.u32 %v13303_v32, %v13301_v35  ;;  %v2190_v17 = vor.u32 %v13308_v47, %v13305_v46  ;;  %11158 = vmatpush3.bf16.msra.mxu1 %v12154_v19 }
 0x1dc   : > { %v1964_v29 = vor.u32 %v13361_v18, %v13350_v50  ;;  %v2193_v31 = vshrl.u32 %v13619_v62, 16  ;;  %v2140_v16 = vsel %vm2072_vm11, %v2131_v55, %v2139_v43  ;;  %v1914_v2 = vsel %vm1846_vm14, %v1905_v57, %v1913_v37  ;;  %v15635_v18 = vld [vmem:[#allocation46_spill] sm:$0xff] }
 0x1dd   : > { %v1956_v44 = vor.u32 %v13552_v26, %v13541_v14  ;;  %v2196_v54 = vshll.u32 %v13619_v62, 16  ;;  %2213 = vrot.lane.b32.xlu0 %v13395_v21, %s15566_s24  ;;  %v13654_v41 = vsel %vm2072_vm11, %v2165_v3, %v2173_v27  ;;  %v1939_v61 = vor.u32 %v13616_v0, %v13614_v13  ;;  %1987 = vrot.lane.b32.xlu1 %v13406_v52, %s15566_s24  ;;  %v12130_v13 = vld [vmem:[%s12898_s1 + $0x30] sm:$0xff]   ;;  %v12155_v3 = vld [vmem:[%s12689_s29 + $0xf8] sm:$0xff]  }
 0x1de   : > { %v1947_v36 = vor.u32 %v13625_v39, %v13623_v5  ;;  %v13660_v56 = vrot.slane %v2201_v24, 3  ;;  %v13665_v4 = vrot.slane %v2204_v15, 4  ;;  %v1967_v21 = vshrl.u32 %v13633_v33, 16  ;;  %11159 = vmatprep.subr.bf16.mxu1 %v12155_v3 }
 0x1df   : > { %v1970_v27 = vshll.u32 %v13633_v33, 16  ;;  %v1575_v30 = vrot.slane %v13343_v28, 1  ;;  %v13671_v22 = vrot.slane %v2193_v31, 3  ;;  %v1576_v43 = vrot.slane %v13352_v58, 1 }
 0x1e0   : > { %v1581_v37 = vrot.slane %v13382_v20, 1  ;;  %v1582_v11 = vrot.slane %v13410_v9, 1  ;;  %v13676_v34 = vrot.slane %v2196_v54, 4  ;;  %v1975_v52 = vshrl.u32 %v13649_v12, 16 }
 0x1e1   : > { %v1587_v0 = vrot.slane %v13445_v10, 1  ;;  %v1588_v1 = vrot.slane %v13454_v48, 1  ;;  %2215 = vrot.lane.b32.xlu0 %v2140_v16, %s15566_s24  ;;  %v13684_v28 = vsel %vm1571_vm8, %v1575_v30, %v1576_v43  ;;  %v1593_v20 = vrot.slane %v13478_v63, 1  ;;  %1989 = vrot.lane.b32.xlu1 %v1914_v2, %s15566_s24  ;;  %v12156_v63 = vld [vmem:[%s12689_s29 + $0xb8] sm:$0xff]  }
 0x1e2   : > { %v13687_v58 = vsel %vm1571_vm8, %v1581_v37, %v1582_v11  ;;  %v1594_v9 = vrot.slane %v13508_v60, 1  ;;  %11636 = vmatmul.mubr.msk.bf16.gmra.mrb[8].mxu0 %vm3012_vm15, %v12126_v23  ;;  %v1978_v10 = vshll.u32 %v13649_v12, 16  ;;  %v2027_v5 = vrot.slane %v13355_v42, 3  ;;  %11160 = vmatpush3.bf16.msra.mxu1 %v12156_v63  ;;  %v15632_v2 = vld [vmem:[#allocation51_spill] sm:$0xff] }
 0x1e3   : > { %v13695_v48 = vsel %vm1571_vm8, %v1587_v0, %v1588_v1  ;;  %v2028_v39 = vrot.slane %v13517_v25, 3  ;;  %11639 = vmatprep.mubr.msk.bf16.mxu0 %vm3012_vm15, %v12130_v13  ;;  %v1801_v60 = vrot.slane %v13491_v53, 2  ;;  %v1802_v55 = vrot.slane %v13345_v51, 2  ;;  %v15634_v13 = vld [vmem:[#allocation52_spill] sm:$0xff] }
 0x1e4   : > { %v13701_v24 = vsel %vm1571_vm8, %v1593_v20, %v1594_v9  ;;  %v2033_v57 = vrot.slane %v13502_v8, 3  ;;  %v2034_v42 = vrot.slane %v13535_v45, 3  ;;  %v1807_v25 = vrot.slane %v13563_v38, 2  ;;  %v15631_v8 = vld [vmem:[#allocation53_spill] sm:$0xff]  ;;  %v12134_v45 = vld [vmem:[%s12898_s1 + $0x38] sm:$0xff]   ;;  %s15697_s1 = sld [smem:[#allocation16_spill]] }
 0x1e5   : > { %v13708_v15 = vsel %vm2023_vm13, %v2027_v5, %v2028_v39  ;;  %v1808_v31 = vrot.slane %v13402_v7, 2  ;;  %2217 = vrot.lane.b32.xlu0 %v13422_v49, %s15566_s24  ;;  %v13716_v19 = vsel %vm1797_vm12, %v1801_v60, %v1802_v55  ;;  %v2039_v51 = vrot.slane %v13591_v40, 3  ;;  %1991 = vrot.lane.b32.xlu1 %v15632_v2, %s15566_s24  ;;  %v15633_v49 = vld [vmem:[#allocation48_spill] sm:$0xff]  ;;  %v15643_v2 = vld [vmem:[#allocation45_spill] sm:$0xff] }
 0x1e6   : > { %v2040_v53 = vrot.slane %v13593_v59, 3  ;;  %v1813_v16 = vrot.slane %v15631_v8, 2  ;;  %v13725_v38 = vsel %vm2023_vm13, %v2033_v57, %v2034_v42  ;;  %v1814_v54 = vrot.slane %v15633_v49, 2  ;;  %v15640_v60 = vld [vmem:[#allocation44_spill] sm:$0xff] }
 0x1e7   : > { %v13728_v7 = vsel %vm1797_vm12, %v1807_v25, %v1808_v31  ;;  %v2045_v23 = vrot.slane %v13619_v62, 3  ;;  %v2046_v59 = vrot.slane %v13649_v12, 3  ;;  %v1819_v30 = vrot.slane %v13633_v33, 2  ;;  %v15641_v25 = vld [vmem:[#allocation49_spill] sm:$0xff] }
 0x1e8   : > { %v13733_v40 = vsel %vm2023_vm13, %v2039_v51, %v2040_v53  ;;  %v1820_v43 = vrot.slane %v15634_v13, 2  ;;  %v1948_v37 = vsel %vm1846_vm14, %v1939_v61, %v1947_v36  ;;  %v1969_v11 = vrot.slane %v1967_v21, 2  ;;  %v15637_v21 = vld [vmem:[#allocation43_spill] sm:$0xff] }
 0x1e9   : > { %v1972_v0 = vrot.slane %v1970_v27, 3  ;;  %v13740_v1 = vsel %vm1797_vm12, %v1813_v16, %v1814_v54  ;;  %2219 = vrot.lane.b32.xlu0 %v13654_v41, %s15566_s24  ;;  %v1977_v62 = vrot.slane %v1975_v52, 2  ;;  %v1980_v3 = vrot.slane %v1978_v10, 3  ;;  %1993 = vrot.lane.b32.xlu1 %v1948_v37, %s15566_s24  ;;  %v15639_v10 = vld [vmem:[#allocation33_spill] sm:$0xff]  ;;  %v15642_v51 = vld [vmem:[#allocation35_spill] sm:$0xff] }
 0x1ea   : > { %v13745_v20 = vsel %vm2023_vm13, %v2045_v23, %v2046_v59  ;;  %v13748_v12 = vsel %vm1797_vm12, %v1819_v30, %v1820_v43  ;;  %11640 = vmatmul.mubr.msk.bf16.gmra.mrb[12].mxu0 %vm3012_vm15, %v12134_v45  ;;  %v2191_v33 = vsel %vm2072_vm11, %v2182_v6, %v2190_v17  ;;  %v2199_v41 = vor.u32 %v13676_v34, %v13671_v22  ;;  %v15644_v23 = vld [vmem:[#allocation50_spill] sm:$0xff]  ;;  %v15645_v30 = vld [vmem:[#allocation36_spill] sm:$0xff] }
 0x1eb   : > { %v2207_v61 = vor.u32 %v13665_v4, %v13660_v56  ;;  %v1965_v46 = vsel %vm1846_vm14, %v1956_v44, %v1964_v29  ;;  %v1973_v47 = vor.u32 %v1972_v0, %v1969_v11  ;;  %v1981_v35 = vor.u32 %v1980_v3, %v1977_v62  ;;  %v15636_v29 = vld [vmem:[#allocation32_spill] sm:$0xff]  ;;  %v15646_v11 = vld [vmem:[#allocation34_spill] sm:$0xff] }
 0x1ec   : > { %vm8629_vm1 = vcmask 261126   ;;  %vm8620_vm2 = vcmask 254976   ;;  %vm9979_vm6 = vcmask 130048  }
 0x1ed   : > { %2221 = vrot.lane.b32.xlu0 %v2191_v33, %s15566_s24  ;;  %1995 = vrot.lane.b32.xlu1 %v1965_v46, %s15566_s24  ;;  %v2208_v32 = vsel %vm2072_vm11, %v2199_v41, %v2207_v61  ;;  %v1982_v6 = vsel %vm1846_vm14, %v1973_v47, %v1981_v35  ;;  %v15647_v41 = vld [vmem:[#allocation37_spill] sm:$0xff]  ;;  %v15648_v35 = vld [vmem:[#allocation38_spill] sm:$0xff] }
 0x1f1   : > { %2223 = vrot.lane.b32.xlu0 %v2208_v32, %s15566_s24  ;;  %1997 = vrot.lane.b32.xlu1 %v1982_v6, %s15566_s24 }
 0x22a   : > { %v1760_v17 = vpop.permute.xlu0 %1759 }
 0x22b   : > { %v1534_v36 = vpop.permute.xlu1 %1533  ;;  %v2264_v50 = vsel %vm2233_vm7, %v13684_v28, %v1760_v17  ;;  %v15638_v28 = vld [vmem:[#allocation47_spill] sm:$0xff] }
 0x22c   : > { %2713 = vmatprep.mubr.bf16.mxu1 %v2264_v50  ;;  %v2238_v14 = vsel %vm2233_vm7, %v15635_v18, %v1534_v36  ;;  %v15649_v36 = vld [vmem:[#allocation39_spill] sm:$0xff] }
 0x22d   : > { %2714 = vmatmul.mubr.bf16.gmra.mrb[12].mxu1 %v2238_v14 }
 0x22e   : > { %v1762_v26 = vpop.permute.xlu0 %1761 }
 0x22f   : > { %v2268_v44 = vsel %vm2233_vm7, %v15636_v29, %v1762_v26  ;;  %v1536_v56 = vpop.permute.xlu1 %1535  ;;  %v15650_v26 = vld [vmem:[#allocation40_spill] sm:$0xff] }
 0x230   : > { %2721 = vmatprep.mubr.bf16.mxu1 %v2268_v44  ;;  %v2241_v27 = vsel %vm2233_vm7, %v15637_v21, %v1536_v56 }
 0x233   : > { %v1764_v4 = vpop.permute.xlu0 %1763  ;;  %v1538_v34 = vpop.permute.xlu1 %1537 }
 0x234   : > { %v2272_v22 = vsel %vm2233_vm7, %v13687_v58, %v1764_v4  ;;  %v2244_v9 = vsel %vm2233_vm7, %v15638_v28, %v1538_v34  ;;  %v15651_v4 = vld [vmem:[#allocation41_spill] sm:$0xff]  ;;  %v15652_v28 = vld [vmem:[#allocation42_spill] sm:$0xff] }
 0x235   : > { %2722 = vmatmul.mubr.bf16.gmra.mrb[16].mxu1 %v2241_v27 }
 0x236   : > { %2729 = vmatprep.mubr.bf16.mxu1 %v2272_v22 }
 0x237   : > { %v1766_v52 = vpop.permute.xlu0 %1765  ;;  %v1540_v39 = vpop.permute.xlu1 %1539 }
 0x238   : > { %v2276_v5 = vsel %vm2233_vm7, %v15639_v10, %v1766_v52  ;;  %v2247_v55 = vsel %vm2233_vm7, %v15640_v60, %v1540_v39 }
 0x23b   : > { %v1768_v63 = vpop.permute.xlu0 %1767  ;;  %v1542_v57 = vpop.permute.xlu1 %1541 }
 0x23c   : > { %v2280_v58 = vsel %vm2233_vm7, %v13695_v48, %v1768_v63  ;;  %v2250_v31 = vsel %vm2233_vm7, %v15641_v25, %v1542_v57 }
 0x23d   : > { %2730 = vmatmul.mubr.bf16.gmra.mrb[20].mxu1 %v2244_v9 }
 0x23e   : > { %2737 = vmatprep.mubr.bf16.mxu1 %v2276_v5 }
 0x23f   : > { %v1770_v42 = vpop.permute.xlu0 %1769  ;;  %v1544_v8 = vpop.permute.xlu1 %1543 }
 0x240   : > { %v2284_v53 = vsel %vm2233_vm7, %v15642_v51, %v1770_v42  ;;  %v2253_v45 = vsel %vm2233_vm7, %v15643_v2, %v1544_v8 }
 0x243   : > { %v1772_v16 = vpop.permute.xlu0 %1771  ;;  %v1546_v49 = vpop.permute.xlu1 %1545 }
 0x244   : > { %v2288_v48 = vsel %vm2233_vm7, %v13701_v24, %v1772_v16  ;;  %v2256_v59 = vsel %vm2233_vm7, %v15644_v23, %v1546_v49  ;;  %v3206_v23 = vld [vmem:[%s15592_s8] sm:$0xff] }
 0x245   : > { %2738 = vmatmul.mubr.bf16.gmra.mrb[24].mxu1 %v2247_v55 }
 0x246   : > { %2745 = vmatprep.mubr.bf16.mxu1 %v2280_v58 }
 0x247   : > { %v2210_v54 = vpop.permute.xlu0 %2209  ;;  %v1984_v43 = vpop.permute.xlu1 %1983 }
 0x248   : > { %v2324_v13 = vsel %vm2233_vm7, %v15645_v30, %v2210_v54  ;;  %v2292_v0 = vsel %vm2233_vm7, %v15646_v11, %v1984_v43  ;;  %v3207_v30 = vld [vmem:[%s15592_s8 + $0x8] sm:$0xff] }
 0x249   : > { %v3211_v11 = vld [vmem:[%s15592_s8 + $0x28] sm:$0xff] }
 0x24b   : > { %v2212_v37 = vpop.permute.xlu0 %2211  ;;  %v1986_v62 = vpop.permute.xlu1 %1985 }
 0x24c   : > { %v2328_v24 = vsel %vm2233_vm7, %v13708_v15, %v2212_v37  ;;  %v2296_v33 = vsel %vm2233_vm7, %v13716_v19, %v1986_v62 }
 0x24d   : > { %2746 = vmatmul.mubr.bf16.gmra.mrb[28].mxu1 %v2250_v31 }
 0x24e   : > { %2753 = vmatprep.mubr.bf16.mxu1 %v2284_v53 }
 0x24f   : > { %v2214_v3 = vpop.permute.xlu0 %2213  ;;  %v1988_v46 = vpop.permute.xlu1 %1987 }
 0x250   : > { %v2332_v61 = vsel %vm2233_vm7, %v15647_v41, %v2214_v3  ;;  %v2300_v32 = vsel %vm2233_vm7, %v15648_v35, %v1988_v46  ;;  %v10426_v41 = vcombine.high %v3207_v30, %v3211_v11  ;;  %v3219_v46 = vld [vmem:[%s15592_s8 + $0x68] sm:$0xff] }
 0x252   : > { %4870 = vmatprep.subr.bf16.mxu0 %v10426_v41 }
 0x253   : > { %v2216_v47 = vpop.permute.xlu0 %2215  ;;  %v1990_v6 = vpop.permute.xlu1 %1989 }
 0x254   : > { %v2336_v15 = vsel %vm2233_vm7, %v13725_v38, %v2216_v47  ;;  %v2304_v19 = vsel %vm2233_vm7, %v13728_v7, %v1990_v6  ;;  %v3222_v47 = vld [vmem:[%s15592_s8 + $0x80] sm:$0xff] }
 0x255   : > { %2754 = vmatmul.mubr.bf16.gmra.mrb[32].mxu1 %v2253_v45  ;;  %v3226_v6 = vld [vmem:[%s15592_s8 + $0xa0] sm:$0xff] }
 0x256   : > { %2761 = vmatprep.mubr.bf16.mxu1 %v2288_v48 }
 0x257   : > { %v2218_v17 = vpop.permute.xlu0 %2217  ;;  %v1992_v18 = vpop.permute.xlu1 %1991 }
 0x258   : > { %v2340_v50 = vsel %vm2233_vm7, %v15649_v36, %v2218_v17  ;;  %v2308_v29 = vsel %vm2233_vm7, %v15650_v26, %v1992_v18  ;;  %v3223_v17 = vld [vmem:[%s15592_s8 + $0x88] sm:$0xff] }
 0x25b   : > { %v2220_v14 = vpop.permute.xlu0 %2219  ;;  %v1994_v44 = vpop.permute.xlu1 %1993 }
 0x25c   : > { %v2344_v38 = vsel %vm2233_vm7, %v13733_v40, %v2220_v14  ;;  %v2312_v7 = vsel %vm2233_vm7, %v13740_v1, %v1994_v44  ;;  %v10440_v14 = vcombine.high %v3222_v47, %v3226_v6  ;;  %v3231_v44 = vld [vmem:[%s15592_s8 + $0xc8] sm:$0xff] }
 0x25d   : > { %2762 = vmatmul.mubr.bf16.gmra.mrb[36].mxu1 %v2256_v59  ;;  %v3210_v59 = vld [vmem:[%s15592_s8 + $0x20] sm:$0xff] }
 0x25e   : > { %2802 = vmatprep.mubr.bf16.mxu1 %v2324_v13  ;;  %v10423_v43 = vcombine.low %v3206_v23, %v3210_v59  ;;  %v10424_v37 = vcombine.high %v3206_v23, %v3210_v59 }
 0x25f   : > { %v2222_v56 = vpop.permute.xlu0 %2221  ;;  %v1996_v27 = vpop.permute.xlu1 %1995 }
 0x260   : > { %v2348_v21 = vsel %vm2233_vm7, %v15651_v4, %v2222_v56  ;;  %v2316_v9 = vsel %vm2233_vm7, %v15652_v28, %v1996_v27  ;;  %4784 = vmatprep.subr.bf16.mxu1 %v10424_v37  ;;  %v3235_v56 = vld [vmem:[%s15592_s8 + $0xe8] sm:$0xff]  ;;  %v10439_v4 = vcombine.low %v3222_v47, %v3226_v6 }
 0x261   : > { %v10450_v28 = vcombine.high %v3231_v44, %v3235_v56  ;;  %v10449_v23 = vcombine.low %v3231_v44, %v3235_v56  ;;  %v3247_v37 = vld [vmem:[%s15592_s8 + $0x148] sm:$0xff] }
 0x262   : > { %v3255_v6 = vld [vmem:[%s15592_s8 + $0x188] sm:$0xff] }
 0x263   : > { %v2224_v22 = vpop.permute.xlu0 %2223  ;;  %v1998_v63 = vpop.permute.xlu1 %1997  ;;  %v3263_v44 = vld [vmem:[%s15592_s8 + $0x1c8] sm:$0xff] }
 0x264   : > { %v2352_v5 = vsel %vm2233_vm7, %v13745_v20, %v2224_v22  ;;  %v2320_v60 = vsel %vm2233_vm7, %v13748_v12, %v1998_v63  ;;  %v3243_v63 = vld [vmem:[%s15592_s8 + $0x128] sm:$0xff] }
 0x265   : > { %2803 = vmatmul.mubr.bf16.vlgmr.msra.gmra.mrb[40].mxu1 %v2292_v0  ;;  %v3214_v0 = vld [vmem:[%s15592_s8 + $0x40] sm:$0xff]  ;;  %v3267_v56 = vld [vmem:[%s15592_s8 + $0x1e8] sm:$0xff] }
 0x266   : > { %2810 = vmatprep.mubr.bf16.mxu1 %v2328_v24  ;;  %v3218_v24 = vld [vmem:[%s15592_s8 + $0x60] sm:$0xff]  ;;  %4785 = vmatpush1.bf16.msra.mxu1 %v10423_v43 }
 0x267   : > { %v3250_v43 = vld [vmem:[%s15592_s8 + $0x160] sm:$0xff] }
 0x26d   : > { %2811 = vmatmul.mubr.bf16.gmra.mrb[44].mxu1 %v2296_v33  ;;  %v10425_v33 = vcombine.low %v3207_v30, %v3211_v11  ;;  %v3251_v11 = vld [vmem:[%s15592_s8 + $0x168] sm:$0xff] }
 0x26e   : > { %2818 = vmatprep.mubr.bf16.mxu1 %v2332_v61  ;;  %v3215_v61 = vld [vmem:[%s15592_s8 + $0x48] sm:$0xff]  ;;  %v10466_v47 = vcombine.high %v3247_v37, %v3251_v11 }
 0x26f   : > { %4871 = vmatpush1.bf16.msra.mxu0 %v10425_v33  ;;  %v10433_v18 = vcombine.low %v3215_v61, %v3219_v46 }
 0x275   : > { %2819 = vmatmul.mubr.bf16.gmra.mrb[48].mxu1 %v2300_v32  ;;  %v10432_v32 = vcombine.high %v3214_v0, %v3218_v24 }
 0x276   : > { %2826 = vmatprep.mubr.bf16.mxu1 %v2336_v15  ;;  %v10434_v15 = vcombine.high %v3215_v61, %v3219_v46 }
 0x277   : > { %4786 = vmatprep.subr.bf16.mxu1 %v10432_v32  ;;  %v3258_v32 = vld [vmem:[%s15592_s8 + $0x1a0] sm:$0xff] }
 0x278   : > { %4872 = vmatprep.subr.bf16.mxu0 %v10434_v15 }
 0x279   : > { %4873 = vmatpush1.bf16.msra.mxu0 %v10433_v18  ;;  %v10465_v18 = vcombine.low %v3247_v37, %v3251_v11  ;;  %v3278_v37 = vld [vmem:[%s15592_s8 + $0x240] sm:$0xff] }
 0x27a   : > { %v3282_v11 = vld [vmem:[%s15592_s8 + $0x260] sm:$0xff] }
 0x27d   : > { %2827 = vmatmul.mubr.bf16.gmra.mrb[52].mxu1 %v2304_v19  ;;  %v3227_v19 = vld [vmem:[%s15592_s8 + $0xa8] sm:$0xff] }
 0x27e   : > { %2834 = vmatprep.mubr.bf16.mxu1 %v2340_v50  ;;  %v10431_v50 = vcombine.low %v3214_v0, %v3218_v24  ;;  %v10442_v26 = vcombine.high %v3223_v17, %v3227_v19  ;;  %v10441_v27 = vcombine.low %v3223_v17, %v3227_v19  ;;  %v3259_v17 = vld [vmem:[%s15592_s8 + $0x1a8] sm:$0xff] }
 0x280   : > { %4787 = vmatpush1.bf16.msra.mxu1 %v10431_v50  ;;  %4874 = vmatprep.subr.bf16.mxu0 %v10442_v26  ;;  %v10474_v26 = vcombine.high %v3255_v6, %v3259_v17 }
 0x281   : > { %4788 = vmatprep.subr.bf16.mxu1 %v10440_v14  ;;  %4875 = vmatpush1.bf16.msra.mxu0 %v10441_v27  ;;  %v10473_v27 = vcombine.low %v3255_v6, %v3259_v17  ;;  %v3286_v6 = vld [vmem:[%s15592_s8 + $0x280] sm:$0xff] }
 0x282   : > { %4876 = vmatprep.subr.bf16.mxu0 %v10450_v28  ;;  %v3290_v17 = vld [vmem:[%s15592_s8 + $0x2a0] sm:$0xff] }
 0x284   : > { %4789 = vmatpush1.bf16.msra.mxu1 %v10439_v4 }
 0x285   : > { %2835 = vmatmul.mubr.bf16.gmra.mrb[56].mxu1 %v2308_v29  ;;  %v3230_v29 = vld [vmem:[%s15592_s8 + $0xc0] sm:$0xff]  ;;  %4877 = vmatpush1.bf16.msra.mxu0 %v10449_v23 }
 0x286   : > { %2842 = vmatprep.mubr.bf16.mxu1 %v2344_v38  ;;  %v3234_v38 = vld [vmem:[%s15592_s8 + $0xe0] sm:$0xff] }
 0x287   : > { %v10448_v22 = vcombine.high %v3230_v29, %v3234_v38 }
 0x289   : > { %4790 = vmatprep.subr.bf16.mxu1 %v10448_v22 }
 0x28d   : > { %2843 = vmatmul.mubr.bf16.gmra.mrb[60].mxu1 %v2312_v7 }
 0x28e   : > { %2850 = vmatprep.mubr.bf16.mxu1 %v2348_v21 }
 0x292   : > { %v11097_v34 = vpop.f32.mrb[8].mxu1 }
 0x293   : > { %v11098_v52 = vpop.f32.mrb[9].mxu1 }
 0x294   : > { %v13832_v10 = vadd.f32 %v11098_v52, %v11097_v34  ;;  %v11100_v40 = vpop.f32.mrb[10].mxu1 }
 0x295   : > { %2851 = vmatmul.mubr.bf16.gmra.mrb[64].mxu1 %v2316_v9  ;;  %v11101_v1 = vpop.f32.mrb[11].mxu1  ;;  %v3238_v9 = vld [vmem:[%s15592_s8 + $0x100] sm:$0xff] }
 0x296   : > { %2858 = vmatprep.mubr.bf16.mxu1 %v2352_v5  ;;  %v13836_v39 = vadd.f32 %v11101_v1, %v11100_v40  ;;  %v3242_v40 = vld [vmem:[%s15592_s8 + $0x120] sm:$0xff]  ;;  %v3239_v1 = vld [vmem:[%s15592_s8 + $0x108] sm:$0xff] }
 0x297   : > { %v10456_v59 = vcombine.high %v3238_v9, %v3242_v40  ;;  %v10458_v30 = vcombine.high %v3239_v1, %v3243_v63  ;;  %v10455_v24 = vcombine.low %v3238_v9, %v3242_v40  ;;  %v10457_v33 = vcombine.low %v3239_v1, %v3243_v63  ;;  %v3270_v40 = vld [vmem:[%s15592_s8 + $0x200] sm:$0xff]  ;;  %v3271_v63 = vld [vmem:[%s15592_s8 + $0x208] sm:$0xff] }
 0x298   : > { %v10482_v9 = vcombine.high %v3263_v44, %v3267_v56 }
 0x299   : > { %4878 = vmatprep.subr.bf16.mxu0 %v10458_v30  ;;  %v10481_v30 = vcombine.low %v3263_v44, %v3267_v56  ;;  %v10504_v44 = vcombine.high %v3286_v6, %v3290_v17 }
 0x29a   : > { %4879 = vmatpush1.bf16.msra.mxu0 %v10457_v33 }
 0x29b   : > { %4880 = vmatprep.subr.bf16.mxu0 %v10466_v47  ;;  %v10496_v47 = vcombine.high %v3278_v37, %v3282_v11 }
 0x29d   : > { %2859 = vmatmul.mubr.bf16.gmra.mrb[68].mxu1 %v2320_v60 }
 0x29e   : > { %4881 = vmatpush1.bf16.msra.mxu0 %v10465_v18  ;;  %v3287_v18 = vld [vmem:[%s15592_s8 + $0x288] sm:$0xff] }
 0x29f   : > { %4882 = vmatprep.subr.bf16.mxu0 %v10474_v26 }
 0x2a2   : > { %4883 = vmatpush1.bf16.msra.mxu0 %v10473_v27  ;;  %v3299_v27 = vld [vmem:[%s15592_s8 + $0x2e8] sm:$0xff] }
 0x2a3   : > { %4884 = vmatprep.subr.bf16.mxu0 %v10482_v9 }
 0x2a5   : > { %v13840_v55 = vpop.f32.mrb[0].mxu0 }
 0x2a6   : > { %v13842_v58 = vpop.f32.mrb[1].mxu0  ;;  %4885 = vmatpush1.bf16.msra.mxu0 %v10481_v30 }
 0x2a7   : > { %v13844_v57 = vpop.f32.mrb[2].mxu0 }
 0x2a8   : > { %v13846_v42 = vpop.f32.mrb[3].mxu0 }
 0x2ad   : > { %v13848_v20 = vpop.f32.mrb[4].mxu0 }
 0x2ae   : > { %v13850_v25 = vpop.f32.mrb[5].mxu0 }
 0x2af   : > { %v13852_v31 = vpop.f32.mrb[6].mxu0 }
 0x2b0   : > { %v13854_v51 = vpop.f32.mrb[7].mxu0 }
 0x2b5   : > { %v13856_v12 = vpop.f32.mrb[8].mxu0 }
 0x2b6   : > { %v13858_v53 = vpop.f32.mrb[9].mxu0 }
 0x2b7   : > { %v13860_v8 = vpop.f32.mrb[10].mxu0 }
 0x2b8   : > { %v13862_v16 = vpop.f32.mrb[11].mxu0 }
 0x2bd   : > { %v13864_v2 = vpop.f32.mrb[12].mxu0 }
 0x2be   : > { %v13866_v45 = vpop.f32.mrb[13].mxu0 }
 0x2bf   : > { %v13868_v48 = vpop.f32.mrb[14].mxu0 }
 0x2c0   : > { %v13870_v49 = vpop.f32.mrb[15].mxu0 }
 0x300   : > { %v11103_v54 = vpop.f32.mrb[12].mxu1 }
 0x301   : > { %v11104_v13 = vpop.f32.mrb[13].mxu1 }
 0x302   : > { %v13878_v62 = vadd.f32 %v11104_v13, %v11103_v54  ;;  %v11106_v3 = vpop.f32.mrb[14].mxu1  ;;  %v10447_v54 = vcombine.low %v3230_v29, %v3234_v38  ;;  %v3246_v13 = vld [vmem:[%s15592_s8 + $0x140] sm:$0xff] }
 0x303   : > { %v11107_v35 = vpop.f32.mrb[15].mxu1  ;;  %v10464_v41 = vcombine.high %v3246_v13, %v3250_v43  ;;  %v10463_v50 = vcombine.low %v3246_v13, %v3250_v43  ;;  %v3262_v29 = vld [vmem:[%s15592_s8 + $0x1c0] sm:$0xff] }
 0x304   : > { %v13886_v36 = vadd.f32 %v11107_v35, %v11106_v3  ;;  %4791 = vmatpush1.bf16.msra.mxu1 %v10447_v54  ;;  %v3254_v35 = vld [vmem:[%s15592_s8 + $0x180] sm:$0xff]  ;;  %v3275_v54 = vld [vmem:[%s15592_s8 + $0x228] sm:$0xff] }
 0x305   : > { %4792 = vmatprep.subr.bf16.mxu1 %v10456_v59  ;;  %v10472_v14 = vcombine.high %v3254_v35, %v3258_v32  ;;  %v3266_v38 = vld [vmem:[%s15592_s8 + $0x1e0] sm:$0xff]  ;;  %v10471_v4 = vcombine.low %v3254_v35, %v3258_v32  ;;  %v10490_v43 = vcombine.high %v3271_v63, %v3275_v54 }
 0x306   : > { %v10480_v22 = vcombine.high %v3262_v29, %v3266_v38  ;;  %v10479_v59 = vcombine.low %v3262_v29, %v3266_v38  ;;  %v10495_v29 = vcombine.low %v3278_v37, %v3282_v11 }
 0x307   : > { %4886 = vmatprep.subr.bf16.mxu0 %v10490_v43 }
 0x308   : > { %v11109_v7 = vpop.f32.mrb[16].mxu1  ;;  %4793 = vmatpush1.bf16.msra.mxu1 %v10455_v24  ;;  %v3283_v24 = vld [vmem:[%s15592_s8 + $0x268] sm:$0xff] }
 0x309   : > { %v11110_v21 = vpop.f32.mrb[17].mxu1  ;;  %4794 = vmatprep.subr.bf16.mxu1 %v10464_v41 }
 0x30a   : > { %v13892_v34 = vadd.f32 %v11110_v21, %v11109_v7  ;;  %v11112_v52 = vpop.f32.mrb[18].mxu1 }
 0x30b   : > { %v11113_v5 = vpop.f32.mrb[19].mxu1 }
 0x30c   : > { %v13898_v60 = vadd.f32 %v11113_v5, %v11112_v52  ;;  %4795 = vmatpush1.bf16.msra.mxu1 %v10463_v50  ;;  %v3274_v5 = vld [vmem:[%s15592_s8 + $0x220] sm:$0xff] }
 0x30d   : > { %4796 = vmatprep.subr.bf16.mxu1 %v10472_v14  ;;  %v10488_v13 = vcombine.high %v3270_v40, %v3274_v5  ;;  %v10487_v33 = vcombine.low %v3270_v40, %v3274_v5  ;;  %v3291_v14 = vld [vmem:[%s15592_s8 + $0x2a8] sm:$0xff] }
 0x30e   : > { %v10506_v56 = vcombine.high %v3287_v18, %v3291_v14  ;;  %v10505_v40 = vcombine.low %v3287_v18, %v3291_v14 }
 0x310   : > { %v11115_v0 = vpop.f32.mrb[20].mxu1  ;;  %4797 = vmatpush1.bf16.msra.mxu1 %v10471_v4  ;;  %v3298_v4 = vld [vmem:[%s15592_s8 + $0x2e0] sm:$0xff] }
 0x311   : > { %v11116_v3 = vpop.f32.mrb[21].mxu1  ;;  %4798 = vmatprep.subr.bf16.mxu1 %v10480_v22 }
 0x312   : > { %v13904_v61 = vadd.f32 %v11116_v3, %v11115_v0  ;;  %v11118_v46 = vpop.f32.mrb[22].mxu1  ;;  %v3279_v0 = vld [vmem:[%s15592_s8 + $0x248] sm:$0xff] }
 0x313   : > { %v11119_v15 = vpop.f32.mrb[23].mxu1  ;;  %v10497_v38 = vcombine.low %v3279_v0, %v3283_v24 }
 0x314   : > { %v13910_v19 = vadd.f32 %v11119_v15, %v11118_v46  ;;  %4799 = vmatpush1.bf16.msra.mxu1 %v10479_v59  ;;  %v10489_v46 = vcombine.low %v3271_v63, %v3275_v54  ;;  %v10498_v15 = vcombine.high %v3279_v0, %v3283_v24 }
 0x315   : > { %4800 = vmatprep.subr.bf16.mxu1 %v10488_v13 }
 0x316   : > { %4887 = vmatpush1.bf16.msra.mxu0 %v10489_v46 }
 0x317   : > { %4888 = vmatprep.subr.bf16.mxu0 %v10498_v15 }
 0x318   : > { %v11121_v7 = vpop.f32.mrb[24].mxu1  ;;  %4801 = vmatpush1.bf16.msra.mxu1 %v10487_v33 }
 0x319   : > { %v11122_v21 = vpop.f32.mrb[25].mxu1  ;;  %4802 = vmatprep.subr.bf16.mxu1 %v10496_v47 }
 0x31a   : > { %v13916_v52 = vadd.f32 %v11122_v21, %v11121_v7  ;;  %v11124_v28 = vpop.f32.mrb[26].mxu1  ;;  %v3294_v7 = vld [vmem:[%s15592_s8 + $0x2c0] sm:$0xff]  ;;  %v3295_v21 = vld [vmem:[%s15592_s8 + $0x2c8] sm:$0xff]  ;;  %4889 = vmatpush1.bf16.msra.mxu0 %v10497_v38 }
 0x31b   : > { %v11125_v1 = vpop.f32.mrb[27].mxu1  ;;  %v10512_v5 = vcombine.high %v3294_v7, %v3298_v4  ;;  %4890 = vmatprep.subr.bf16.mxu0 %v10506_v56  ;;  %v10514_v54 = vcombine.high %v3295_v21, %v3299_v27  ;;  %v10511_v13 = vcombine.low %v3294_v7, %v3298_v4  ;;  %v10513_v43 = vcombine.low %v3295_v21, %v3299_v27 }
 0x31c   : > { %v13922_v23 = vadd.f32 %v11125_v1, %v11124_v28  ;;  %4803 = vmatpush1.bf16.msra.mxu1 %v10495_v29  ;;  %v10503_v28 = vcombine.low %v3286_v6, %v3290_v17  ;;  %v13956_v29 = vld [vmem:[%s12684_s25] ss:$0 sm:$0xff] }
 0x31d   : > { %4804 = vmatprep.subr.bf16.mxu1 %v10504_v44 }
 0x31e   : > { %4891 = vmatpush1.bf16.msra.mxu0 %v10505_v40  ;;  %v3302_v40 = vld [vmem:[%s15592_s8 + $0x300] sm:$0xff] }
 0x31f   : > { %4892 = vmatprep.subr.bf16.mxu0 %v10514_v54 }
 0x320   : > { %v11127_v3 = vpop.f32.mrb[28].mxu1  ;;  %4805 = vmatpush1.bf16.msra.mxu1 %v10503_v28 }
 0x321   : > { %v11128_v41 = vpop.f32.mrb[29].mxu1  ;;  %4806 = vmatprep.subr.bf16.mxu1 %v10512_v5  ;;  %v3306_v5 = vld [vmem:[%s15592_s8 + $0x320] sm:$0xff] }
 0x322   : > { %v13928_v35 = vadd.f32 %v11128_v41, %v11127_v3  ;;  %v11130_v32 = vpop.f32.mrb[30].mxu1  ;;  %4893 = vmatpush1.bf16.msra.mxu0 %v10513_v43  ;;  %v13949_v41 = vld [vmem:[%s15653_s3] ss:$0 sm:$0xff]  ;;  %s12647_s3 = smov 32  }
 0x323   : > { %v11131_v50 = vpop.f32.mrb[31].mxu1  ;;  %v3310_v43 = vld [vmem:[%s15592_s8 + $0x340] sm:$0xff] }
 0x324   : > { %v13934_v26 = vadd.f32 %v11131_v50, %v11130_v32  ;;  %4807 = vmatpush1.bf16.msra.mxu1 %v10511_v13  ;;  %v2708_v32 = vadd.f32 %v13832_v10, %v13949_v41  ;;  %v2711_v50 = vadd.f32 %v13836_v39, %v13949_v41  ;;  %v2716_v39 = vadd.f32 %v13878_v62, %v13949_v41 }
 0x325   : > { %v10519_v13 = vcombine.low %v3302_v40, %v3306_v5 }
 0x328   : > { %v11133_v22 = vpop.f32.mrb[32].mxu1 }
 0x329   : > { %v11134_v9 = vpop.f32.mrb[33].mxu1 }
 0x32a   : > { %v13940_v1 = vadd.f32 %v11134_v9, %v11133_v22  ;;  %v11136_v63 = vpop.f32.mrb[34].mxu1 }
 0x32b   : > { %v11137_v59 = vpop.f32.mrb[35].mxu1 }
 0x32c   : > { %v13942_v30 = vadd.f32 %v11137_v59, %v11136_v63  ;;  %v3303_v63 = vld [vmem:[%s15592_s8 + $0x308] sm:$0xff] }
 0x330   : > { %v11139_v37 = vpop.f32.mrb[36].mxu1 }
 0x331   : > { %v11140_v11 = vpop.f32.mrb[37].mxu1 }
 0x332   : > { %v13944_v0 = vadd.f32 %v11140_v11, %v11139_v37  ;;  %v11142_v24 = vpop.f32.mrb[38].mxu1  ;;  %v3314_v37 = vld [vmem:[%s15592_s8 + $0x360] sm:$0xff]  ;;  %v10520_v11 = vcombine.high %v3302_v40, %v3306_v5  ;;  %v2727_v5 = vadd.f32 %v13898_v60, %v13949_v41 }
 0x333   : > { %v11143_v3 = vpop.f32.mrb[39].mxu1  ;;  %v3330_v40 = vld [vmem:[%s15592_s8 + $0x3e0] sm:$0xff] }
 0x334   : > { %v13946_v33 = vadd.f32 %v11143_v3, %v11142_v24  ;;  %v3311_v3 = vld [vmem:[%s15592_s8 + $0x348] sm:$0xff]  ;;  %4808 = vmatprep.subr.bf16.mxu1 %v10520_v11 }
 0x335   : > { %4809 = vmatpush1.bf16.msra.mxu1 %v10519_v13 }
 0x338   : > { %v11161_v46 = vpop.f32.mrb[40].mxu1 }
 0x339   : > { %v11162_v47 = vpop.f32.mrb[41].mxu1 }
 0x33a   : > { %v11163_v15 = vadd.f32 %v11162_v47, %v11161_v46  ;;  %v11164_v6 = vpop.f32.mrb[42].mxu1  ;;  %v3315_v46 = vld [vmem:[%s15592_s8 + $0x368] sm:$0xff]  ;;  %v3318_v47 = vld [vmem:[%s15592_s8 + $0x380] sm:$0xff] }
 0x33b   : > { %v11165_v17 = vpop.f32.mrb[43].mxu1 }
 0x33c   : > { %v2805_v18 = vadd.f32 %v11163_v15, %v2708_v32  ;;  %v11166_v14 = vadd.f32 %v11165_v17, %v11164_v6  ;;  %v10528_v17 = vcombine.high %v3310_v43, %v3314_v37 }
 0x33e   : > { %v11803_v38 = vadd.f32 %v13842_v58, %v2805_v18  ;;  %v2808_v44 = vadd.f32 %v11166_v14, %v2711_v50  ;;  %v2719_v58 = vadd.f32 %v13886_v36, %v13949_v41  ;;  %v3322_v50 = vld [vmem:[%s15592_s8 + $0x3a0] sm:$0xff]  ;;  %v3319_v18 = vld [vmem:[%s15592_s8 + $0x388] sm:$0xff]  ;;  %4810 = vmatprep.subr.bf16.mxu1 %v10528_v17 }
 0x33f   : > { %v3323_v14 = vld [vmem:[%s15592_s8 + $0x3a8] sm:$0xff] }
 0x340   : > { %v11804_v56 = vadd.f32 %v11803_v38, %v13956_v29  ;;  %v11807_v10 = vadd.f32 %v13956_v29, %v2808_v44  ;;  %v11167_v7 = vpop.f32.mrb[44].mxu1  ;;  %v10527_v38 = vcombine.low %v3310_v43, %v3314_v37  ;;  %v10530_v44 = vcombine.high %v3311_v3, %v3315_v46 }
 0x341   : > { %v11168_v4 = vpop.f32.mrb[45].mxu1 }
 0x342   : > { %v11808_v21 = vadd.f32 %v11807_v10, %v13846_v42  ;;  %v11169_v27 = vadd.f32 %v11168_v4, %v11167_v7  ;;  %v11170_v22 = vpop.f32.mrb[46].mxu1  ;;  %v3154_v28 = vmax.f32 %v11804_v56, 0.0  ;;  %v3307_v42 = vld [vmem:[%s15592_s8 + $0x328] sm:$0xff]  ;;  %4811 = vmatpush1.bf16.msra.mxu1 %v10527_v38  ;;  %v2735_v38 = vadd.f32 %v13910_v19, %v13949_v41 }
 0x343   : > { %v11171_v9 = vpop.f32.mrb[47].mxu1  ;;  %v10521_v36 = vcombine.low %v3303_v63, %v3307_v42  ;;  %v10522_v24 = vcombine.high %v3303_v63, %v3307_v42  ;;  %v14018_v19 = vld [vmem:[%s15592_s8 + $0x428] sm:$0xff] }
 0x344   : > { %v3155_v54 = vmax.f32 %v11808_v21, 0.0  ;;  %v2813_v59 = vadd.f32 %v11169_v27, %v2716_v39  ;;  %v11172_v62 = vadd.f32 %v11171_v9, %v11170_v22  ;;  %v10536_v39 = vcombine.high %v3318_v47, %v3322_v50  ;;  %v3326_v9 = vld [vmem:[%s15592_s8 + $0x3c0] sm:$0xff] }
 0x345   : > { %4894 = vmatprep.subr.bf16.mxu0 %v10522_v24  ;;  %v10538_v21 = vcombine.high %v3319_v18, %v3323_v14  ;;  %v2724_v27 = vadd.f32 %v13892_v34, %v13949_v41  ;;  %v10537_v34 = vcombine.low %v3319_v18, %v3323_v14  ;;  %v10544_v11 = vcombine.high %v3326_v9, %v3330_v40 }
 0x346   : > { %v11801_v32 = vadd.f32 %v13840_v55, %v2813_v59  ;;  %v2816_v15 = vadd.f32 %v11172_v62, %v2719_v58  ;;  %v13976_v6 = vpack.c.bf16 %v3155_v54, %v3154_v28  ;;  %4895 = vmatpush1.bf16.msra.mxu0 %v10521_v36  ;;  %v10529_v55 = vcombine.low %v3311_v3, %v3315_v46  ;;  %v3327_v59 = vld [vmem:[%s15592_s8 + $0x3c8] sm:$0xff] }
 0x347   : > { %4896 = vmatprep.subr.bf16.mxu0 %v10530_v44  ;;  %v10535_v54 = vcombine.low %v3318_v47, %v3322_v50  ;;  %v3331_v62 = vld [vmem:[%s15592_s8 + $0x3e8] sm:$0xff]  ;;  %4812 = vmatprep.subr.bf16.mxu1 %v10536_v39  ;;  %v2732_v50 = vadd.f32 %v13904_v61, %v13949_v41  ;;  %v14008_v39 = vld [vmem:[%s15592_s8 + $0x420] sm:$0xff] }
 0x348   : > { %v11805_v56 = vadd.f32 %v13956_v29, %v2816_v15  ;;  %v11173_v10 = vpop.f32.mrb[48].mxu1  ;;  %v11802_v7 = vadd.f32 %v11801_v32, %v13956_v29  ;;  %v10546_v60 = vcombine.high %v3327_v59, %v3331_v62  ;;  %v10543_v32 = vcombine.low %v3326_v9, %v3330_v40  ;;  %v14011_v61 = vld [vmem:[%s15592_s8 + $0x408] sm:$0xff] }
 0x349   : > { %v11174_v4 = vpop.f32.mrb[49].mxu1  ;;  %4813 = vmatpush1.bf16.msra.mxu1 %v10535_v54  ;;  %v10545_v17 = vcombine.low %v3327_v59, %v3331_v62  ;;  %v10554_v9 = vcombine.high %v14011_v61, %v14018_v19  ;;  %v2740_v59 = vadd.f32 %v13916_v52, %v13949_v41 }
 0x34a   : > { %v11175_v22 = vadd.f32 %v11174_v4, %v11173_v10  ;;  %v11176_v58 = vpop.f32.mrb[50].mxu1  ;;  %v11806_v28 = vadd.f32 %v11805_v56, %v13844_v57  ;;  %v3156_v43 = vmax.f32 %v11802_v7, 0.0  ;;  %4897 = vmatpush1.bf16.msra.mxu0 %v10529_v55  ;;  %4814 = vmatprep.subr.bf16.mxu1 %v10544_v11  ;;  %v14005_v4 = vld [vmem:[%s15592_s8 + $0x400] sm:$0xff] }
 0x34b   : > { %v11177_v63 = vpop.f32.mrb[51].mxu1  ;;  %4898 = vmatprep.subr.bf16.mxu0 %v10538_v21  ;;  %v10552_v21 = vcombine.high %v14005_v4, %v14008_v39 }
 0x34c   : > { %v2821_v13 = vadd.f32 %v11175_v22, %v2724_v27  ;;  %v11178_v42 = vadd.f32 %v11177_v63, %v11176_v58  ;;  %v3157_v37 = vmax.f32 %v11806_v28, 0.0  ;;  %v10553_v28 = vcombine.low %v14011_v61, %v14018_v19  ;;  %v3366_v19 = vld [vmem:[%s15592_s8 + $0x500] sm:$0xff] }
 0x34d   : > { %4815 = vmatpush1.bf16.msra.mxu1 %v10543_v32 }
 0x34e   : > { %v11811_v57 = vadd.f32 %v13956_v29, %v2821_v13  ;;  %v2824_v36 = vadd.f32 %v11178_v42, %v2727_v5  ;;  %v13993_v24 = vpack.c.bf16 %v3157_v37, %v3156_v43  ;;  %4899 = vmatpush1.bf16.msra.mxu0 %v10537_v34  ;;  %4827 = vmatprep.subr.bf16.mxu1 %v10552_v21 }
 0x34f   : > { %4900 = vmatprep.subr.bf16.mxu0 %v10546_v60  ;;  %v2743_v43 = vadd.f32 %v13922_v23, %v13949_v41  ;;  %v2748_v23 = vadd.f32 %v13928_v35, %v13949_v41  ;;  %v2756_v21 = vadd.f32 %v13940_v1, %v13949_v41 }
 0x350   : > { %v11812_v3 = vadd.f32 %v11811_v57, %v13850_v25  ;;  %v11815_v46 = vadd.f32 %v13956_v29, %v2824_v36  ;;  %3179 = vrot.lane.b32.xlu1 %v13993_v24, %s15566_s24  ;;  %v11179_v47 = vpop.f32.mrb[52].mxu1 }
 0x351   : > { %v11180_v15 = vpop.f32.mrb[53].mxu1 }
 0x352   : > { %v11816_v25 = vadd.f32 %v11815_v46, %v13854_v51  ;;  %v11181_v18 = vadd.f32 %v11180_v15, %v11179_v47  ;;  %v11182_v14 = vpop.f32.mrb[54].mxu1  ;;  %v3158_v56 = vmax.f32 %v11812_v3, 0.0  ;;  %4901 = vmatpush1.bf16.msra.mxu0 %v10545_v17  ;;  %v10551_v51 = vcombine.low %v14005_v4, %v14008_v39 }
 0x353   : > { %v11183_v44 = vpop.f32.mrb[55].mxu1  ;;  %4913 = vmatprep.subr.bf16.mxu0 %v10554_v9  ;;  %v2759_v9 = vadd.f32 %v13942_v30, %v13949_v41  ;;  %v2764_v30 = vadd.f32 %v13944_v0, %v13949_v41 }
 0x354   : > { %v3159_v10 = vmax.f32 %v11816_v25, 0.0  ;;  %v2829_v7 = vadd.f32 %v11181_v18, %v2732_v50  ;;  %v11184_v55 = vadd.f32 %v11183_v44, %v11182_v14  ;;  %v2751_v50 = vadd.f32 %v13934_v26, %v13949_v41 }
 0x356   : > { %v11809_v27 = vadd.f32 %v13956_v29, %v2829_v7  ;;  %v2832_v22 = vadd.f32 %v11184_v55, %v2735_v38  ;;  %v14021_v58 = vpack.c.bf16 %v3159_v10, %v3158_v56 }
 0x358   : > { %v11813_v40 = vadd.f32 %v13956_v29, %v2832_v22  ;;  %v11185_v5 = vpop.f32.mrb[56].mxu1  ;;  %v11810_v63 = vadd.f32 %v11809_v27, %v13848_v20 }
 0x359   : > { %v11186_v54 = vpop.f32.mrb[57].mxu1 }
 0x35a   : > { %v11187_v62 = vadd.f32 %v11186_v54, %v11185_v5  ;;  %v11188_v13 = vpop.f32.mrb[58].mxu1  ;;  %v11814_v42 = vadd.f32 %v11813_v40, %v13852_v31  ;;  %v3160_v57 = vmax.f32 %v11810_v63, 0.0 }
 0x35b   : > { %v11189_v37 = vpop.f32.mrb[59].mxu1 }
 0x35c   : > { %v2837_v34 = vadd.f32 %v11187_v62, %v2740_v59  ;;  %v11190_v11 = vadd.f32 %v11189_v37, %v11188_v13  ;;  %v3161_v36 = vmax.f32 %v11814_v42, 0.0 }
 0x35e   : > { %v11819_v60 = vadd.f32 %v13956_v29, %v2837_v34  ;;  %v2840_v20 = vadd.f32 %v11190_v11, %v2743_v43  ;;  %v14035_v3 = vpack.c.bf16 %v3161_v36, %v3160_v57  ;;  %v2767_v57 = vadd.f32 %v13946_v33, %v13949_v41 }
 0x360   : > { %v11820_v46 = vadd.f32 %v11819_v60, %v13858_v53  ;;  %v11823_v52 = vadd.f32 %v13956_v29, %v2840_v20  ;;  %3182 = vrot.lane.b32.xlu0 %v14035_v3, %s15566_s24  ;;  %v11191_v31 = vpop.f32.mrb[60].mxu1 }
 0x361   : > { %v11192_v47 = vpop.f32.mrb[61].mxu1 }
 0x362   : > { %v11824_v32 = vadd.f32 %v11823_v52, %v13862_v16  ;;  %v11193_v15 = vadd.f32 %v11192_v47, %v11191_v31  ;;  %v11194_v17 = vpop.f32.mrb[62].mxu1  ;;  %v3162_v18 = vmax.f32 %v11820_v46, 0.0 }
 0x363   : > { %v11195_v25 = vpop.f32.mrb[63].mxu1 }
 0x364   : > { %v3163_v53 = vmax.f32 %v11824_v32, 0.0  ;;  %v2845_v14 = vadd.f32 %v11193_v15, %v2748_v23  ;;  %v11196_v38 = vadd.f32 %v11195_v25, %v11194_v17  ;;  %v3342_v15 = vld [vmem:[%s15592_s8 + $0x440] sm:$0xff]  ;;  %v3347_v25 = vld [vmem:[%s15592_s8 + $0x468] sm:$0xff] }
 0x365   : > { %v3346_v17 = vld [vmem:[%s15592_s8 + $0x460] sm:$0xff] }
 0x366   : > { %v11817_v44 = vadd.f32 %v13956_v29, %v2845_v14  ;;  %v2848_v56 = vadd.f32 %v11196_v38, %v2751_v50  ;;  %v14047_v10 = vpack.c.bf16 %v3163_v53, %v3162_v18  ;;  %v3343_v50 = vld [vmem:[%s15592_s8 + $0x448] sm:$0xff]  ;;  %v3350_v14 = vld [vmem:[%s15592_s8 + $0x480] sm:$0xff] }
 0x367   : > { %v10562_v53 = vcombine.high %v3343_v50, %v3347_v25 }
 0x368   : > { %v11821_v7 = vadd.f32 %v13956_v29, %v2848_v56  ;;  %v11197_v35 = vpop.f32.mrb[64].mxu1  ;;  %v11818_v16 = vadd.f32 %v11817_v44, %v13856_v12  ;;  %v3354_v44 = vld [vmem:[%s15592_s8 + $0x4a0] sm:$0xff]  ;;  %v3351_v56 = vld [vmem:[%s15592_s8 + $0x488] sm:$0xff] }
 0x369   : > { %v11198_v55 = vpop.f32.mrb[65].mxu1  ;;  %v10567_v4 = vcombine.low %v3350_v14, %v3354_v44 }
 0x36a   : > { %v11199_v26 = vadd.f32 %v11198_v55, %v11197_v35  ;;  %v11200_v27 = vpop.f32.mrb[66].mxu1  ;;  %v11822_v22 = vadd.f32 %v11821_v7, %v13860_v8  ;;  %v3164_v54 = vmax.f32 %v11818_v16, 0.0  ;;  %v3355_v7 = vld [vmem:[%s15592_s8 + $0x4a8] sm:$0xff]  ;;  %v10559_v35 = vcombine.low %v3342_v15, %v3346_v17 }
 0x36b   : > { %v11201_v40 = vpop.f32.mrb[67].mxu1  ;;  %v10561_v16 = vcombine.low %v3343_v50, %v3347_v25  ;;  %v10568_v55 = vcombine.high %v3350_v14, %v3354_v44  ;;  %v10569_v39 = vcombine.low %v3351_v56, %v3355_v7  ;;  %v3398_v50 = vld [vmem:[%s15592_s8 + $0x600] sm:$0xff] }
 0x36c   : > { %v2853_v5 = vadd.f32 %v11199_v26, %v2756_v21  ;;  %v11202_v63 = vadd.f32 %v11201_v40, %v11200_v27  ;;  %v3165_v59 = vmax.f32 %v11822_v22, 0.0  ;;  %v10570_v21 = vcombine.high %v3351_v56, %v3355_v7  ;;  %v3358_v26 = vld [vmem:[%s15592_s8 + $0x4c0] sm:$0xff]  ;;  %v3359_v22 = vld [vmem:[%s15592_s8 + $0x4c8] sm:$0xff] }
 0x36d   : > { %v3362_v27 = vld [vmem:[%s15592_s8 + $0x4e0] sm:$0xff]  ;;  %v3367_v40 = vld [vmem:[%s15592_s8 + $0x508] sm:$0xff] }
 0x36e   : > { %v11827_v62 = vadd.f32 %v13956_v29, %v2853_v5  ;;  %v2856_v13 = vadd.f32 %v11202_v63, %v2759_v9  ;;  %v14057_v12 = vpack.c.bf16 %v3165_v59, %v3164_v54  ;;  %v3363_v9 = vld [vmem:[%s15592_s8 + $0x4e8] sm:$0xff]  ;;  %v10576_v61 = vcombine.high %v3358_v26, %v3362_v27  ;;  %v3402_v25 = vld [vmem:[%s15592_s8 + $0x620] sm:$0xff] }
 0x36f   : > { %v3371_v5 = vld [vmem:[%s15592_s8 + $0x528] sm:$0xff]  ;;  %v10575_v63 = vcombine.low %v3358_v26, %v3362_v27  ;;  %v10577_v54 = vcombine.low %v3359_v22, %v3363_v9  ;;  %v10616_v14 = vcombine.high %v3398_v50, %v3402_v25  ;;  %v3406_v56 = vld [vmem:[%s15592_s8 + $0x640] sm:$0xff] }
 0x370   : > { %15654 = vst [vmem:[#allocation53_spill] sm:$0xff] %v14057_v12  ;;  %v11828_v42 = vadd.f32 %v11827_v62, %v13866_v45  ;;  %v11831_v1 = vadd.f32 %v13956_v29, %v2856_v13  ;;  %3185 = vrot.lane.b32.xlu1 %v14057_v12, %s15566_s24  ;;  %v11203_v8 = vpop.f32.mrb[68].mxu1  ;;  %v10586_v62 = vcombine.high %v3367_v40, %v3371_v5  ;;  %v3374_v13 = vld [vmem:[%s15592_s8 + $0x540] sm:$0xff] }
 0x371   : > { %v11204_v43 = vpop.f32.mrb[69].mxu1  ;;  %v3410_v7 = vld [vmem:[%s15592_s8 + $0x660] sm:$0xff] }
 0x372   : > { %v11832_v37 = vadd.f32 %v11831_v1, %v13870_v49  ;;  %v11205_v34 = vadd.f32 %v11204_v43, %v11203_v8  ;;  %v11206_v11 = vpop.f32.mrb[70].mxu1  ;;  %v3166_v45 = vmax.f32 %v11828_v42, 0.0  ;;  %v3378_v42 = vld [vmem:[%s15592_s8 + $0x560] sm:$0xff]  ;;  %v3375_v1 = vld [vmem:[%s15592_s8 + $0x548] sm:$0xff] }
 0x373   : > { %v11207_v36 = vpop.f32.mrb[71].mxu1  ;;  %v3379_v8 = vld [vmem:[%s15592_s8 + $0x568] sm:$0xff] }
 0x374   : > { %v3167_v60 = vmax.f32 %v11832_v37, 0.0  ;;  %v2861_v20 = vadd.f32 %v11205_v34, %v2764_v30  ;;  %v11208_v46 = vadd.f32 %v11207_v36, %v11206_v11  ;;  %v10585_v30 = vcombine.low %v3367_v40, %v3371_v5  ;;  %v3382_v11 = vld [vmem:[%s15592_s8 + $0x580] sm:$0xff]  ;;  %v3383_v36 = vld [vmem:[%s15592_s8 + $0x588] sm:$0xff] }
 0x375   : > { %v10592_v37 = vcombine.high %v3374_v13, %v3378_v42  ;;  %v10594_v34 = vcombine.high %v3375_v1, %v3379_v8 }
 0x376   : > { %v11825_v52 = vadd.f32 %v13956_v29, %v2861_v20  ;;  %v2864_v31 = vadd.f32 %v11208_v46, %v2767_v57  ;;  %v14069_v0 = vpack.c.bf16 %v3167_v60, %v3166_v45  ;;  %v3386_v57 = vld [vmem:[%s15592_s8 + $0x5a0] sm:$0xff]  ;;  %v3387_v45 = vld [vmem:[%s15592_s8 + $0x5a8] sm:$0xff]  ;;  %v10591_v60 = vcombine.low %v3374_v13, %v3378_v42 }
 0x377   : > { %v10593_v20 = vcombine.low %v3375_v1, %v3379_v8  ;;  %v10600_v46 = vcombine.high %v3382_v11, %v3386_v57 }
 0x378   : > { %15655 = vst [vmem:[#allocation51_spill] sm:$0xff] %v14069_v0  ;;  %v11829_v49 = vadd.f32 %v13956_v29, %v2864_v31  ;;  %v11826_v47 = vadd.f32 %v11825_v52, %v13864_v2  ;;  %v10602_v52 = vcombine.high %v3383_v36, %v3387_v45  ;;  %v3390_v31 = vld [vmem:[%s15592_s8 + $0x5c0] sm:$0xff] }
 0x37a   : > { %v11830_v33 = vadd.f32 %v11829_v49, %v13868_v48  ;;  %v3168_v41 = vmax.f32 %v11826_v47, 0.0  ;;  %v10560_v48 = vcombine.high %v3342_v15, %v3346_v17  ;;  %v3394_v49 = vld [vmem:[%s15592_s8 + $0x5e0] sm:$0xff]  ;;  %v3391_v47 = vld [vmem:[%s15592_s8 + $0x5c8] sm:$0xff] }
 0x37b   : > { %v10608_v15 = vcombine.high %v3390_v31, %v3394_v49 }
 0x37c   : > { %v3169_v23 = vmax.f32 %v11830_v33, 0.0  ;;  %v3395_v33 = vld [vmem:[%s15592_s8 + $0x5e8] sm:$0xff] }
 0x37d   : > { %v10610_v17 = vcombine.high %v3391_v47, %v3395_v33 }
 0x37e   : > { %v14074_v32 = vpack.c.bf16 %v3169_v23, %v3168_v41  ;;  %v10599_v41 = vcombine.low %v3382_v11, %v3386_v57  ;;  %v10601_v23 = vcombine.low %v3383_v36, %v3387_v45 }
 0x380   : > { %15656 = vst [vmem:[#allocation48_spill] sm:$0xff] %v14074_v32  ;;  %3188 = vrot.lane.b32.xlu0 %v14074_v32, %s15566_s24  ;;  %s15701_s24 = sld [smem:[#allocation20_spill]] }
 0x3c2   : > { %v3180_v29 = vpop.permute.xlu1 %3179 }
 0x3c3   : > { %v14089_v38 = vsel %vm2233_vm7, %v13976_v6, %v3180_v29  ;;  %v3399_v29 = vld [vmem:[%s15592_s8 + $0x608] sm:$0xff] }
 0x3d2   : > { %v3183_v18 = vpop.permute.xlu0 %3182 }
 0x3d3   : > { %v14084_v2 = vsel %vm2233_vm7, %v14021_v58, %v3183_v18  ;;  %v3403_v18 = vld [vmem:[%s15592_s8 + $0x628] sm:$0xff] }
 0x3d4   : > { %4816 = vmatprep.mubr.bf16.mxu1 %v14084_v2  ;;  %4902 = vmatprep.mubr.bf16.mxu0 %v14084_v2  ;;  %v10618_v44 = vcombine.high %v3399_v29, %v3403_v18  ;;  %v10617_v26 = vcombine.low %v3399_v29, %v3403_v18 }
 0x3d5   : > { %4817 = vmatmul.mubr.bf16.vlgmr.msra.gmra.mrb[72].mxu1 %v14089_v38  ;;  %4903 = vmatmul.mubr.bf16.vlgmr.msra.gmra.mrb[16].mxu0 %v14089_v38 }
 0x3d6   : > { %4828 = vmatpush1.bf16.msra.mxu1 %v10551_v51  ;;  %4914 = vmatpush1.bf16.msra.mxu0 %v10553_v28  ;;  %v10578_v51 = vcombine.high %v3359_v22, %v3363_v9  ;;  %v3370_v28 = vld [vmem:[%s15592_s8 + $0x520] sm:$0xff]  ;;  %v10624_v22 = vcombine.high %v3406_v56, %v3410_v7 }
 0x3d7   : > { %4829 = vmatprep.subr.bf16.mxu1 %v10560_v48  ;;  %4915 = vmatprep.subr.bf16.mxu0 %v10562_v53  ;;  %v10584_v59 = vcombine.high %v3366_v19, %v3370_v28  ;;  %v10583_v43 = vcombine.low %v3366_v19, %v3370_v28  ;;  %v10607_v48 = vcombine.low %v3390_v31, %v3394_v49 }
 0x3d8   : > { %v10609_v53 = vcombine.low %v3391_v47, %v3395_v33  ;;  %v10623_v19 = vcombine.low %v3406_v56, %v3410_v7 }
 0x3da   : > { %4830 = vmatpush1.bf16.msra.mxu1 %v10559_v35  ;;  %4916 = vmatpush1.bf16.msra.mxu0 %v10561_v16  ;;  %v3407_v35 = vld [vmem:[%s15592_s8 + $0x648] sm:$0xff] }
 0x3db   : > { %4831 = vmatprep.subr.bf16.mxu1 %v10568_v55  ;;  %4917 = vmatprep.subr.bf16.mxu0 %v10570_v21  ;;  %v3411_v16 = vld [vmem:[%s15592_s8 + $0x668] sm:$0xff]  ;;  %v10615_v21 = vcombine.low %v3398_v50, %v3402_v25 }
 0x3dc   : > { %v10626_v9 = vcombine.high %v3407_v35, %v3411_v16  ;;  %v10625_v28 = vcombine.low %v3407_v35, %v3411_v16 }
 0x3de   : > { %4832 = vmatpush1.bf16.msra.mxu1 %v10567_v4  ;;  %4918 = vmatpush1.bf16.msra.mxu0 %v10569_v39  ;;  %v3414_v4 = vld [vmem:[%s15592_s8 + $0x680] sm:$0xff] }
 0x3df   : > { %4833 = vmatprep.subr.bf16.mxu1 %v10576_v61  ;;  %4919 = vmatprep.subr.bf16.mxu0 %v10578_v51  ;;  %v3418_v39 = vld [vmem:[%s15592_s8 + $0x6a0] sm:$0xff]  ;;  %v3415_v61 = vld [vmem:[%s15592_s8 + $0x688] sm:$0xff] }
 0x3e0   : > { %v3419_v51 = vld [vmem:[%s15592_s8 + $0x6a8] sm:$0xff]  ;;  %v10632_v40 = vcombine.high %v3414_v4, %v3418_v39  ;;  %v10631_v13 = vcombine.low %v3414_v4, %v3418_v39 }
 0x3e1   : > { %v10634_v5 = vcombine.high %v3415_v61, %v3419_v51  ;;  %v10633_v42 = vcombine.low %v3415_v61, %v3419_v51  ;;  %v3216_v51 = vld [vmem:[%s15592_s8 + $0x50] sm:$0xff] }
 0x3e2   : > { %4834 = vmatpush1.bf16.msra.mxu1 %v10575_v63  ;;  %4920 = vmatpush1.bf16.msra.mxu0 %v10577_v54  ;;  %v3422_v63 = vld [vmem:[%s15592_s8 + $0x6c0] sm:$0xff] }
 0x3e3   : > { %4835 = vmatprep.subr.bf16.mxu1 %v10584_v59  ;;  %4921 = vmatprep.subr.bf16.mxu0 %v10586_v62  ;;  %v3426_v54 = vld [vmem:[%s15592_s8 + $0x6e0] sm:$0xff]  ;;  %v3423_v59 = vld [vmem:[%s15592_s8 + $0x6c8] sm:$0xff] }
 0x3e4   : > { %v3427_v62 = vld [vmem:[%s15592_s8 + $0x6e8] sm:$0xff]  ;;  %v10640_v1 = vcombine.high %v3422_v63, %v3426_v54  ;;  %v10639_v11 = vcombine.low %v3422_v63, %v3426_v54 }
 0x3e5   : > { %v10642_v8 = vcombine.high %v3423_v59, %v3427_v62  ;;  %v10641_v57 = vcombine.low %v3423_v59, %v3427_v62 }
 0x3e6   : > { %4836 = vmatpush1.bf16.msra.mxu1 %v10583_v43  ;;  %4922 = vmatpush1.bf16.msra.mxu0 %v10585_v30  ;;  %v3430_v43 = vld [vmem:[%s15592_s8 + $0x700] sm:$0xff] }
 0x3e7   : > { %4837 = vmatprep.subr.bf16.mxu1 %v10592_v37  ;;  %4923 = vmatprep.subr.bf16.mxu0 %v10594_v34  ;;  %v3434_v30 = vld [vmem:[%s15592_s8 + $0x720] sm:$0xff]  ;;  %v3431_v37 = vld [vmem:[%s15592_s8 + $0x708] sm:$0xff] }
 0x3e8   : > { %v3435_v34 = vld [vmem:[%s15592_s8 + $0x728] sm:$0xff]  ;;  %v10648_v36 = vcombine.high %v3430_v43, %v3434_v30  ;;  %v10647_v31 = vcombine.low %v3430_v43, %v3434_v30  ;;  %v3229_v43 = vld [vmem:[%s15592_s8 + $0xb8] sm:$0xff] }
 0x3e9   : > { %v10650_v45 = vcombine.high %v3431_v37, %v3435_v34  ;;  %v10649_v49 = vcombine.low %v3431_v37, %v3435_v34 }
 0x3ea   : > { %4838 = vmatpush1.bf16.msra.mxu1 %v10591_v60  ;;  %4924 = vmatpush1.bf16.msra.mxu0 %v10593_v20  ;;  %v3438_v60 = vld [vmem:[%s15592_s8 + $0x740] sm:$0xff] }
 0x3eb   : > { %4839 = vmatprep.subr.bf16.mxu1 %v10600_v46  ;;  %4925 = vmatprep.subr.bf16.mxu0 %v10602_v52  ;;  %v3442_v20 = vld [vmem:[%s15592_s8 + $0x760] sm:$0xff]  ;;  %v3439_v46 = vld [vmem:[%s15592_s8 + $0x748] sm:$0xff] }
 0x3ec   : > { %v3443_v52 = vld [vmem:[%s15592_s8 + $0x768] sm:$0xff]  ;;  %v10656_v47 = vcombine.high %v3438_v60, %v3442_v20  ;;  %v10655_v50 = vcombine.low %v3438_v60, %v3442_v20  ;;  %v3237_v60 = vld [vmem:[%s15592_s8 + $0xf8] sm:$0xff] }
 0x3ed   : > { %v10658_v33 = vcombine.high %v3439_v46, %v3443_v52  ;;  %v10657_v25 = vcombine.low %v3439_v46, %v3443_v52 }
 0x3ee   : > { %4840 = vmatpush1.bf16.msra.mxu1 %v10599_v41  ;;  %4926 = vmatpush1.bf16.msra.mxu0 %v10601_v23  ;;  %v3446_v41 = vld [vmem:[%s15592_s8 + $0x780] sm:$0xff] }
 0x3ef   : > { %4841 = vmatprep.subr.bf16.mxu1 %v10608_v15  ;;  %4927 = vmatprep.subr.bf16.mxu0 %v10610_v17  ;;  %v3450_v23 = vld [vmem:[%s15592_s8 + $0x7a0] sm:$0xff]  ;;  %v3447_v15 = vld [vmem:[%s15592_s8 + $0x788] sm:$0xff] }
 0x3f0   : > { %v3451_v17 = vld [vmem:[%s15592_s8 + $0x7a8] sm:$0xff]  ;;  %v10664_v29 = vcombine.high %v3446_v41, %v3450_v23  ;;  %v10663_v56 = vcombine.low %v3446_v41, %v3450_v23 }
 0x3f1   : > { %v10666_v18 = vcombine.high %v3447_v15, %v3451_v17  ;;  %v10665_v7 = vcombine.low %v3447_v15, %v3451_v17 }
 0x3f2   : > { %4842 = vmatpush1.bf16.msra.mxu1 %v10607_v48  ;;  %4928 = vmatpush1.bf16.msra.mxu0 %v10609_v53  ;;  %v3189_v55 = vpop.permute.xlu0 %3188  ;;  %v3454_v48 = vld [vmem:[%s15592_s8 + $0x7c0] sm:$0xff] }
 0x3f3   : > { %v14134_v27 = vsel %vm2233_vm7, %v14069_v0, %v3189_v55  ;;  %4843 = vmatprep.subr.bf16.mxu1 %v10616_v14  ;;  %4929 = vmatprep.subr.bf16.mxu0 %v10618_v44  ;;  %v3458_v53 = vld [vmem:[%s15592_s8 + $0x7e0] sm:$0xff]  ;;  %v3455_v14 = vld [vmem:[%s15592_s8 + $0x7c8] sm:$0xff]  ;;  %v3208_v55 = vld [vmem:[%s15592_s8 + $0x10] sm:$0xff] }
 0x3f4   : > { %4859 = vmatprep.mubr.bf16.mxu1 %v14134_v27  ;;  %4945 = vmatprep.mubr.bf16.mxu0 %v14134_v27  ;;  %v3459_v44 = vld [vmem:[%s15592_s8 + $0x7e8] sm:$0xff]  ;;  %v10672_v35 = vcombine.high %v3454_v48, %v3458_v53 }
 0x3f5   : > { %v10674_v16 = vcombine.high %v3455_v14, %v3459_v44  ;;  %v10673_v4 = vcombine.low %v3455_v14, %v3459_v44 }
 0x3f6   : > { %4844 = vmatpush1.bf16.msra.mxu1 %v10615_v21  ;;  %4930 = vmatpush1.bf16.msra.mxu0 %v10617_v26  ;;  %v3212_v21 = vld [vmem:[%s15592_s8 + $0x30] sm:$0xff]  ;;  %v3209_v26 = vld [vmem:[%s15592_s8 + $0x18] sm:$0xff] }
 0x3f7   : > { %4845 = vmatprep.subr.bf16.mxu1 %v10624_v22  ;;  %4931 = vmatprep.subr.bf16.mxu0 %v10626_v9  ;;  %v3213_v22 = vld [vmem:[%s15592_s8 + $0x38] sm:$0xff]  ;;  %v10671_v9 = vcombine.low %v3454_v48, %v3458_v53  ;;  %v10428_v39 = vcombine.high %v3208_v55, %v3212_v21  ;;  %v10427_v63 = vcombine.low %v3208_v55, %v3212_v21 }
 0x3f8   : > { %v10430_v61 = vcombine.high %v3209_v26, %v3213_v22  ;;  %v10429_v54 = vcombine.low %v3209_v26, %v3213_v22 }
 0x3fa   : > { %4846 = vmatpush1.bf16.msra.mxu1 %v10623_v19  ;;  %4932 = vmatpush1.bf16.msra.mxu0 %v10625_v28  ;;  %v3186_v19 = vpop.permute.xlu1 %3185  ;;  %v3220_v28 = vld [vmem:[%s15592_s8 + $0x70] sm:$0xff] }
 0x3fb   : > { %4847 = vmatprep.subr.bf16.mxu1 %v10632_v40  ;;  %4933 = vmatprep.subr.bf16.mxu0 %v10634_v5  ;;  %v3217_v40 = vld [vmem:[%s15592_s8 + $0x58] sm:$0xff]  ;;  %v14172_v59 = vsel %vm2233_vm7, %v14047_v10, %v3186_v19  ;;  %v10436_v62 = vcombine.high %v3216_v51, %v3220_v28  ;;  %v10435_v30 = vcombine.low %v3216_v51, %v3220_v28 }
 0x3fc   : > { %v3221_v5 = vld [vmem:[%s15592_s8 + $0x78] sm:$0xff] }
 0x3fd   : > { %v10437_v37 = vcombine.low %v3217_v40, %v3221_v5 }
 0x3fe   : > { %4848 = vmatpush1.bf16.msra.mxu1 %v10631_v13  ;;  %4934 = vmatpush1.bf16.msra.mxu0 %v10633_v42  ;;  %v10438_v13 = vcombine.high %v3217_v40, %v3221_v5  ;;  %v3224_v42 = vld [vmem:[%s15592_s8 + $0x90] sm:$0xff] }
 0x3ff   : > { %4849 = vmatprep.subr.bf16.mxu1 %v10640_v1  ;;  %4935 = vmatprep.subr.bf16.mxu0 %v10642_v8  ;;  %v3228_v1 = vld [vmem:[%s15592_s8 + $0xb0] sm:$0xff]  ;;  %v3225_v8 = vld [vmem:[%s15592_s8 + $0x98] sm:$0xff] }
 0x400   : > { %v10444_v34 = vcombine.high %v3224_v42, %v3228_v1  ;;  %v10443_v20 = vcombine.low %v3224_v42, %v3228_v1  ;;  %v10445_v46 = vcombine.low %v3225_v8, %v3229_v43  ;;  %v3272_v5 = vld [vmem:[%s15592_s8 + $0x210] sm:$0xff] }
 0x402   : > { %4850 = vmatpush1.bf16.msra.mxu1 %v10639_v11  ;;  %4936 = vmatpush1.bf16.msra.mxu0 %v10641_v57  ;;  %v10446_v11 = vcombine.high %v3225_v8, %v3229_v43  ;;  %v3232_v57 = vld [vmem:[%s15592_s8 + $0xd0] sm:$0xff] }
 0x403   : > { %4851 = vmatprep.subr.bf16.mxu1 %v10648_v36  ;;  %4937 = vmatprep.subr.bf16.mxu0 %v10650_v45  ;;  %v3236_v36 = vld [vmem:[%s15592_s8 + $0xf0] sm:$0xff]  ;;  %v3233_v45 = vld [vmem:[%s15592_s8 + $0xd8] sm:$0xff] }
 0x404   : > { %v10454_v52 = vcombine.high %v3233_v45, %v3237_v60  ;;  %v10451_v41 = vcombine.low %v3232_v57, %v3236_v36  ;;  %v10453_v23 = vcombine.low %v3233_v45, %v3237_v60  ;;  %v3280_v43 = vld [vmem:[%s15592_s8 + $0x250] sm:$0xff] }
 0x405   : > { %v3288_v60 = vld [vmem:[%s15592_s8 + $0x290] sm:$0xff] }
 0x406   : > { %4852 = vmatpush1.bf16.msra.mxu1 %v10647_v31  ;;  %4938 = vmatpush1.bf16.msra.mxu0 %v10649_v49  ;;  %v3240_v31 = vld [vmem:[%s15592_s8 + $0x110] sm:$0xff] }
 0x407   : > { %4853 = vmatprep.subr.bf16.mxu1 %v10656_v47  ;;  %4939 = vmatprep.subr.bf16.mxu0 %v10658_v33  ;;  %v3244_v49 = vld [vmem:[%s15592_s8 + $0x130] sm:$0xff]  ;;  %v3241_v47 = vld [vmem:[%s15592_s8 + $0x118] sm:$0xff] }
 0x408   : > { %v3245_v33 = vld [vmem:[%s15592_s8 + $0x138] sm:$0xff]  ;;  %v10460_v15 = vcombine.high %v3240_v31, %v3244_v49  ;;  %v10459_v48 = vcombine.low %v3240_v31, %v3244_v49 }
 0x409   : > { %v10462_v17 = vcombine.high %v3241_v47, %v3245_v33  ;;  %v10461_v53 = vcombine.low %v3241_v47, %v3245_v33  ;;  %v3296_v33 = vld [vmem:[%s15592_s8 + $0x2d0] sm:$0xff] }
 0x40a   : > { %4854 = vmatpush1.bf16.msra.mxu1 %v10655_v50  ;;  %4940 = vmatpush1.bf16.msra.mxu0 %v10657_v25  ;;  %v3248_v50 = vld [vmem:[%s15592_s8 + $0x150] sm:$0xff] }
 0x40b   : > { %4855 = vmatprep.subr.bf16.mxu1 %v10664_v29  ;;  %4941 = vmatprep.subr.bf16.mxu0 %v10666_v18  ;;  %v3252_v25 = vld [vmem:[%s15592_s8 + $0x170] sm:$0xff]  ;;  %v3249_v29 = vld [vmem:[%s15592_s8 + $0x158] sm:$0xff] }
 0x40c   : > { %v3253_v18 = vld [vmem:[%s15592_s8 + $0x178] sm:$0xff]  ;;  %v10468_v14 = vcombine.high %v3248_v50, %v3252_v25  ;;  %v10467_v55 = vcombine.low %v3248_v50, %v3252_v25 }
 0x40d   : > { %v10470_v44 = vcombine.high %v3249_v29, %v3253_v18  ;;  %v10469_v21 = vcombine.low %v3249_v29, %v3253_v18  ;;  %v3304_v18 = vld [vmem:[%s15592_s8 + $0x310] sm:$0xff] }
 0x40e   : > { %4856 = vmatpush1.bf16.msra.mxu1 %v10663_v56  ;;  %4942 = vmatpush1.bf16.msra.mxu0 %v10665_v7  ;;  %v3256_v56 = vld [vmem:[%s15592_s8 + $0x190] sm:$0xff] }
 0x40f   : > { %4857 = vmatprep.subr.bf16.mxu1 %v10672_v35  ;;  %4943 = vmatprep.subr.bf16.mxu0 %v10674_v16  ;;  %v3260_v7 = vld [vmem:[%s15592_s8 + $0x1b0] sm:$0xff]  ;;  %v3257_v35 = vld [vmem:[%s15592_s8 + $0x198] sm:$0xff] }
 0x410   : > { %v3261_v16 = vld [vmem:[%s15592_s8 + $0x1b8] sm:$0xff]  ;;  %v10476_v26 = vcombine.high %v3256_v56, %v3260_v7  ;;  %v10475_v51 = vcombine.low %v3256_v56, %v3260_v7 }
 0x411   : > { %v10478_v22 = vcombine.high %v3257_v35, %v3261_v16  ;;  %v10477_v19 = vcombine.low %v3257_v35, %v3261_v16  ;;  %v3312_v16 = vld [vmem:[%s15592_s8 + $0x350] sm:$0xff] }
 0x412   : > { %4858 = vmatpush1.bf16.msra.mxu1 %v10671_v9  ;;  %4944 = vmatpush1.bf16.msra.mxu0 %v10673_v4  ;;  %v3264_v9 = vld [vmem:[%s15592_s8 + $0x1d0] sm:$0xff] }
 0x413   : > { %4956 = vmatprep.subr.bf16.mxu1 %v10428_v39  ;;  %5042 = vmatprep.subr.bf16.mxu0 %v10430_v61  ;;  %v3268_v4 = vld [vmem:[%s15592_s8 + $0x1f0] sm:$0xff]  ;;  %v3265_v39 = vld [vmem:[%s15592_s8 + $0x1d8] sm:$0xff] }
 0x414   : > { %v3269_v61 = vld [vmem:[%s15592_s8 + $0x1f8] sm:$0xff]  ;;  %v10484_v28 = vcombine.high %v3264_v9, %v3268_v4 }
 0x415   : > { %4860 = vmatmul.mubr.bf16.vlgmr.msra.gmra.mrb[72].mxu1 %v14172_v59  ;;  %4946 = vmatmul.mubr.bf16.vlgmr.msra.gmra.mrb[16].mxu0 %v14172_v59  ;;  %v10486_v40 = vcombine.high %v3265_v39, %v3269_v61  ;;  %v10485_v42 = vcombine.low %v3265_v39, %v3269_v61  ;;  %v3320_v61 = vld [vmem:[%s15592_s8 + $0x390] sm:$0xff] }
 0x416   : > { %4957 = vmatpush1.bf16.msra.mxu1 %v10427_v63  ;;  %4988 = vmatprep.mubr.bf16.mxu1 %v14084_v2  ;;  %v3276_v63 = vld [vmem:[%s15592_s8 + $0x230] sm:$0xff] }
 0x417   : > { %5043 = vmatpush1.bf16.msra.mxu0 %v10429_v54  ;;  %5074 = vmatprep.mubr.bf16.mxu0 %v14084_v2  ;;  %v10452_v2 = vcombine.high %v3232_v57, %v3236_v36  ;;  %v3273_v54 = vld [vmem:[%s15592_s8 + $0x218] sm:$0xff]  ;;  %v10492_v1 = vcombine.high %v3272_v5, %v3276_v63 }
 0x418   : > { %4958 = vmatprep.subr.bf16.mxu1 %v10436_v62  ;;  %5044 = vmatprep.subr.bf16.mxu0 %v10438_v13  ;;  %v3277_v62 = vld [vmem:[%s15592_s8 + $0x238] sm:$0xff]  ;;  %v10483_v13 = vcombine.low %v3264_v9, %v3268_v4 }
 0x419   : > { %v10494_v8 = vcombine.high %v3273_v54, %v3277_v62  ;;  %v10493_v57 = vcombine.low %v3273_v54, %v3277_v62  ;;  %v3328_v62 = vld [vmem:[%s15592_s8 + $0x3d0] sm:$0xff] }
 0x41a   : > { %4959 = vmatpush1.bf16.msra.mxu1 %v10435_v30  ;;  %v3284_v30 = vld [vmem:[%s15592_s8 + $0x270] sm:$0xff] }
 0x41b   : > { %5045 = vmatpush1.bf16.msra.mxu0 %v10437_v37  ;;  %4960 = vmatprep.subr.bf16.mxu1 %v10444_v34  ;;  %v3281_v37 = vld [vmem:[%s15592_s8 + $0x258] sm:$0xff]  ;;  %v10500_v36 = vcombine.high %v3280_v43, %v3284_v30 }
 0x41c   : > { %5046 = vmatprep.subr.bf16.mxu0 %v10446_v11  ;;  %v3285_v34 = vld [vmem:[%s15592_s8 + $0x278] sm:$0xff]  ;;  %v10491_v11 = vcombine.low %v3272_v5, %v3276_v63 }
 0x41d   : > { %v10502_v45 = vcombine.high %v3281_v37, %v3285_v34  ;;  %v10501_v31 = vcombine.low %v3281_v37, %v3285_v34  ;;  %v3336_v34 = vld [vmem:[%s15592_s8 + $0x410] sm:$0xff] }
 0x41e   : > { %4961 = vmatpush1.bf16.msra.mxu1 %v10443_v20  ;;  %v3292_v20 = vld [vmem:[%s15592_s8 + $0x2b0] sm:$0xff] }
 0x41f   : > { %5047 = vmatpush1.bf16.msra.mxu0 %v10445_v46  ;;  %4962 = vmatprep.subr.bf16.mxu1 %v10452_v2  ;;  %v3289_v46 = vld [vmem:[%s15592_s8 + $0x298] sm:$0xff]  ;;  %v10508_v49 = vcombine.high %v3288_v60, %v3292_v20 }
 0x420   : > { %5048 = vmatprep.subr.bf16.mxu0 %v10454_v52  ;;  %v3293_v2 = vld [vmem:[%s15592_s8 + $0x2b8] sm:$0xff]  ;;  %v10499_v52 = vcombine.low %v3280_v43, %v3284_v30 }
 0x421   : > { %v10510_v47 = vcombine.high %v3289_v46, %v3293_v2  ;;  %v10509_v50 = vcombine.low %v3289_v46, %v3293_v2  ;;  %v3344_v2 = vld [vmem:[%s15592_s8 + $0x450] sm:$0xff] }
 0x422   : > { %4963 = vmatpush1.bf16.msra.mxu1 %v10451_v41  ;;  %v3300_v41 = vld [vmem:[%s15592_s8 + $0x2f0] sm:$0xff] }
 0x423   : > { %5049 = vmatpush1.bf16.msra.mxu0 %v10453_v23  ;;  %4964 = vmatprep.subr.bf16.mxu1 %v10460_v15  ;;  %v3297_v23 = vld [vmem:[%s15592_s8 + $0x2d8] sm:$0xff]  ;;  %v10516_v25 = vcombine.high %v3296_v33, %v3300_v41 }
 0x424   : > { %5050 = vmatprep.subr.bf16.mxu0 %v10462_v17  ;;  %v3301_v15 = vld [vmem:[%s15592_s8 + $0x2f8] sm:$0xff]  ;;  %v10507_v17 = vcombine.low %v3288_v60, %v3292_v20 }
 0x425   : > { %v10518_v29 = vcombine.high %v3297_v23, %v3301_v15  ;;  %v10517_v56 = vcombine.low %v3297_v23, %v3301_v15  ;;  %v3352_v23 = vld [vmem:[%s15592_s8 + $0x490] sm:$0xff] }
 0x426   : > { %4965 = vmatpush1.bf16.msra.mxu1 %v10459_v48  ;;  %v3308_v48 = vld [vmem:[%s15592_s8 + $0x330] sm:$0xff] }
 0x427   : > { %5051 = vmatpush1.bf16.msra.mxu0 %v10461_v53  ;;  %4966 = vmatprep.subr.bf16.mxu1 %v10468_v14  ;;  %v3305_v53 = vld [vmem:[%s15592_s8 + $0x318] sm:$0xff]  ;;  %v10524_v7 = vcombine.high %v3304_v18, %v3308_v48  ;;  %v3356_v15 = vld [vmem:[%s15592_s8 + $0x4b0] sm:$0xff] }
 0x428   : > { %5052 = vmatprep.subr.bf16.mxu0 %v10470_v44  ;;  %v3309_v14 = vld [vmem:[%s15592_s8 + $0x338] sm:$0xff]  ;;  %v10515_v44 = vcombine.low %v3296_v33, %v3300_v41 }
 0x429   : > { %v10526_v35 = vcombine.high %v3305_v53, %v3309_v14  ;;  %v10525_v9 = vcombine.low %v3305_v53, %v3309_v14  ;;  %v3360_v14 = vld [vmem:[%s15592_s8 + $0x4d0] sm:$0xff] }
 0x42a   : > { %4967 = vmatpush1.bf16.msra.mxu1 %v10467_v55  ;;  %v3316_v55 = vld [vmem:[%s15592_s8 + $0x370] sm:$0xff] }
 0x42b   : > { %5053 = vmatpush1.bf16.msra.mxu0 %v10469_v21  ;;  %4968 = vmatprep.subr.bf16.mxu1 %v10476_v26  ;;  %v3313_v21 = vld [vmem:[%s15592_s8 + $0x358] sm:$0xff]  ;;  %v10532_v4 = vcombine.high %v3312_v16, %v3316_v55 }
 0x42c   : > { %5054 = vmatprep.subr.bf16.mxu0 %v10478_v22  ;;  %v3317_v26 = vld [vmem:[%s15592_s8 + $0x378] sm:$0xff]  ;;  %v10523_v22 = vcombine.low %v3304_v18, %v3308_v48  ;;  %v10572_v48 = vcombine.high %v3352_v23, %v3356_v15 }
 0x42d   : > { %v10534_v39 = vcombine.high %v3313_v21, %v3317_v26  ;;  %v10533_v5 = vcombine.low %v3313_v21, %v3317_v26  ;;  %v3372_v21 = vld [vmem:[%s15592_s8 + $0x530] sm:$0xff]  ;;  %v3369_v26 = vld [vmem:[%s15592_s8 + $0x518] sm:$0xff] }
 0x42e   : > { %4969 = vmatpush1.bf16.msra.mxu1 %v10475_v51  ;;  %v3324_v51 = vld [vmem:[%s15592_s8 + $0x3b0] sm:$0xff] }
 0x42f   : > { %5055 = vmatpush1.bf16.msra.mxu0 %v10477_v19  ;;  %4970 = vmatprep.subr.bf16.mxu1 %v10484_v28  ;;  %v3321_v19 = vld [vmem:[%s15592_s8 + $0x398] sm:$0xff]  ;;  %v10540_v63 = vcombine.high %v3320_v61, %v3324_v51 }
 0x430   : > { %5056 = vmatprep.subr.bf16.mxu0 %v10486_v40  ;;  %v3325_v28 = vld [vmem:[%s15592_s8 + $0x3b8] sm:$0xff]  ;;  %v10531_v40 = vcombine.low %v3312_v16, %v3316_v55  ;;  %v3368_v55 = vld [vmem:[%s15592_s8 + $0x510] sm:$0xff] }
 0x431   : > { %v10542_v54 = vcombine.high %v3321_v19, %v3325_v28  ;;  %v10541_v43 = vcombine.low %v3321_v19, %v3325_v28  ;;  %v3380_v19 = vld [vmem:[%s15592_s8 + $0x570] sm:$0xff]  ;;  %v3377_v28 = vld [vmem:[%s15592_s8 + $0x558] sm:$0xff] }
 0x432   : > { %4971 = vmatpush1.bf16.msra.mxu1 %v10483_v13  ;;  %v3332_v13 = vld [vmem:[%s15592_s8 + $0x3f0] sm:$0xff] }
 0x433   : > { %5057 = vmatpush1.bf16.msra.mxu0 %v10485_v42  ;;  %4972 = vmatprep.subr.bf16.mxu1 %v10492_v1  ;;  %v3329_v42 = vld [vmem:[%s15592_s8 + $0x3d8] sm:$0xff]  ;;  %v10548_v30 = vcombine.high %v3328_v62, %v3332_v13 }
 0x434   : > { %5058 = vmatprep.subr.bf16.mxu0 %v10494_v8  ;;  %v3333_v1 = vld [vmem:[%s15592_s8 + $0x3f8] sm:$0xff]  ;;  %v10539_v8 = vcombine.low %v3320_v61, %v3324_v51  ;;  %v3376_v51 = vld [vmem:[%s15592_s8 + $0x550] sm:$0xff] }
 0x435   : > { %v10550_v37 = vcombine.high %v3329_v42, %v3333_v1  ;;  %v10549_v60 = vcombine.low %v3329_v42, %v3333_v1  ;;  %v3388_v42 = vld [vmem:[%s15592_s8 + $0x5b0] sm:$0xff]  ;;  %v3385_v1 = vld [vmem:[%s15592_s8 + $0x598] sm:$0xff] }
 0x436   : > { %4973 = vmatpush1.bf16.msra.mxu1 %v10491_v11  ;;  %v3340_v11 = vld [vmem:[%s15592_s8 + $0x430] sm:$0xff] }
 0x437   : > { %5059 = vmatpush1.bf16.msra.mxu0 %v10493_v57  ;;  %4974 = vmatprep.subr.bf16.mxu1 %v10500_v36  ;;  %v3337_v57 = vld [vmem:[%s15592_s8 + $0x418] sm:$0xff]  ;;  %v10556_v20 = vcombine.high %v3336_v34, %v3340_v11 }
 0x438   : > { %5060 = vmatprep.subr.bf16.mxu0 %v10502_v45  ;;  %v3341_v36 = vld [vmem:[%s15592_s8 + $0x438] sm:$0xff]  ;;  %v10547_v45 = vcombine.low %v3328_v62, %v3332_v13  ;;  %v3384_v13 = vld [vmem:[%s15592_s8 + $0x590] sm:$0xff] }
 0x439   : > { %v10558_v46 = vcombine.high %v3337_v57, %v3341_v36  ;;  %v10557_v33 = vcombine.low %v3337_v57, %v3341_v36  ;;  %v3396_v57 = vld [vmem:[%s15592_s8 + $0x5f0] sm:$0xff]  ;;  %v3393_v36 = vld [vmem:[%s15592_s8 + $0x5d8] sm:$0xff] }
 0x43a   : > { %4975 = vmatpush1.bf16.msra.mxu1 %v10499_v52  ;;  %v3348_v52 = vld [vmem:[%s15592_s8 + $0x470] sm:$0xff] }
 0x43b   : > { %5061 = vmatpush1.bf16.msra.mxu0 %v10501_v31  ;;  %4976 = vmatprep.subr.bf16.mxu1 %v10508_v49  ;;  %v10555_v31 = vcombine.low %v3336_v34, %v3340_v11  ;;  %v3345_v49 = vld [vmem:[%s15592_s8 + $0x458] sm:$0xff]  ;;  %v10564_v41 = vcombine.high %v3344_v2, %v3348_v52  ;;  %v3392_v11 = vld [vmem:[%s15592_s8 + $0x5d0] sm:$0xff] }
 0x43c   : > { %5062 = vmatprep.subr.bf16.mxu0 %v10510_v47  ;;  %v3349_v47 = vld [vmem:[%s15592_s8 + $0x478] sm:$0xff] }
 0x43d   : > { %v10565_v18 = vcombine.low %v3345_v49, %v3349_v47 }
 0x43e   : > { %4977 = vmatpush1.bf16.msra.mxu1 %v10507_v17  ;;  %v10566_v17 = vcombine.high %v3345_v49, %v3349_v47  ;;  %v3401_v49 = vld [vmem:[%s15592_s8 + $0x618] sm:$0xff] }
 0x43f   : > { %5063 = vmatpush1.bf16.msra.mxu0 %v10509_v50  ;;  %4978 = vmatprep.subr.bf16.mxu1 %v10516_v25  ;;  %v3353_v50 = vld [vmem:[%s15592_s8 + $0x498] sm:$0xff] }
 0x440   : > { %5064 = vmatprep.subr.bf16.mxu0 %v10518_v29  ;;  %v3357_v25 = vld [vmem:[%s15592_s8 + $0x4b8] sm:$0xff]  ;;  %v10563_v29 = vcombine.low %v3344_v2, %v3348_v52  ;;  %v3400_v52 = vld [vmem:[%s15592_s8 + $0x610] sm:$0xff] }
 0x441   : > { %v10574_v53 = vcombine.high %v3353_v50, %v3357_v25  ;;  %v3405_v47 = vld [vmem:[%s15592_s8 + $0x638] sm:$0xff] }
 0x442   : > { %4979 = vmatpush1.bf16.msra.mxu1 %v10515_v44  ;;  %v3364_v44 = vld [vmem:[%s15592_s8 + $0x4f0] sm:$0xff] }
 0x443   : > { %5065 = vmatpush1.bf16.msra.mxu0 %v10517_v56  ;;  %4980 = vmatprep.subr.bf16.mxu1 %v10524_v7  ;;  %v3361_v56 = vld [vmem:[%s15592_s8 + $0x4d8] sm:$0xff]  ;;  %v10571_v7 = vcombine.low %v3352_v23, %v3356_v15  ;;  %v10580_v16 = vcombine.high %v3360_v14, %v3364_v44  ;;  %v10622_v15 = vcombine.high %v3401_v49, %v3405_v47 }
 0x444   : > { %5066 = vmatprep.subr.bf16.mxu0 %v10526_v35  ;;  %v10573_v35 = vcombine.low %v3353_v50, %v3357_v25  ;;  %v3412_v50 = vld [vmem:[%s15592_s8 + $0x670] sm:$0xff]  ;;  %v3409_v25 = vld [vmem:[%s15592_s8 + $0x658] sm:$0xff] }
 0x446   : > { %4981 = vmatpush1.bf16.msra.mxu1 %v10523_v22  ;;  %v3373_v22 = vld [vmem:[%s15592_s8 + $0x538] sm:$0xff] }
 0x447   : > { %5067 = vmatpush1.bf16.msra.mxu0 %v10525_v9  ;;  %4982 = vmatprep.subr.bf16.mxu1 %v10532_v4  ;;  %v10579_v9 = vcombine.low %v3360_v14, %v3364_v44  ;;  %v10590_v61 = vcombine.high %v3369_v26, %v3373_v22  ;;  %v3416_v44 = vld [vmem:[%s15592_s8 + $0x690] sm:$0xff] }
 0x448   : > { %5068 = vmatprep.subr.bf16.mxu0 %v10534_v39  ;;  %v10588_v39 = vcombine.high %v3368_v55, %v3372_v21 }
 0x44a   : > { %4983 = vmatpush1.bf16.msra.mxu1 %v10531_v40  ;;  %v3381_v40 = vld [vmem:[%s15592_s8 + $0x578] sm:$0xff] }
 0x44b   : > { %5069 = vmatpush1.bf16.msra.mxu0 %v10533_v5  ;;  %4984 = vmatprep.subr.bf16.mxu1 %v10540_v63  ;;  %v10587_v5 = vcombine.low %v3368_v55, %v3372_v21  ;;  %v10589_v63 = vcombine.low %v3369_v26, %v3373_v22  ;;  %v10598_v62 = vcombine.high %v3377_v28, %v3381_v40  ;;  %v3424_v21 = vld [vmem:[%s15592_s8 + $0x6d0] sm:$0xff]  ;;  %v3425_v22 = vld [vmem:[%s15592_s8 + $0x6d8] sm:$0xff] }
 0x44c   : > { %5070 = vmatprep.subr.bf16.mxu0 %v10542_v54  ;;  %v10596_v54 = vcombine.high %v3376_v51, %v3380_v19  ;;  %v3428_v26 = vld [vmem:[%s15592_s8 + $0x6f0] sm:$0xff] }
 0x44e   : > { %4985 = vmatpush1.bf16.msra.mxu1 %v10539_v8  ;;  %v3389_v8 = vld [vmem:[%s15592_s8 + $0x5b8] sm:$0xff] }
 0x44f   : > { %5071 = vmatpush1.bf16.msra.mxu0 %v10541_v43  ;;  %4986 = vmatprep.subr.bf16.mxu1 %v10548_v30  ;;  %v10595_v43 = vcombine.low %v3376_v51, %v3380_v19  ;;  %v10597_v30 = vcombine.low %v3377_v28, %v3381_v40  ;;  %v10606_v34 = vcombine.high %v3385_v1, %v3389_v8  ;;  %v3432_v19 = vld [vmem:[%s15592_s8 + $0x710] sm:$0xff]  ;;  %v3433_v40 = vld [vmem:[%s15592_s8 + $0x718] sm:$0xff] }
 0x450   : > { %5072 = vmatprep.subr.bf16.mxu0 %v10550_v37  ;;  %v10604_v37 = vcombine.high %v3384_v13, %v3388_v42  ;;  %v3436_v28 = vld [vmem:[%s15592_s8 + $0x730] sm:$0xff] }
 0x452   : > { %4987 = vmatpush1.bf16.msra.mxu1 %v10547_v45  ;;  %v3397_v45 = vld [vmem:[%s15592_s8 + $0x5f8] sm:$0xff] }
 0x453   : > { %5073 = vmatpush1.bf16.msra.mxu0 %v10549_v60  ;;  %4999 = vmatprep.subr.bf16.mxu1 %v10556_v20  ;;  %v10603_v60 = vcombine.low %v3384_v13, %v3388_v42  ;;  %v10605_v20 = vcombine.low %v3385_v1, %v3389_v8  ;;  %v10614_v2 = vcombine.high %v3393_v36, %v3397_v45  ;;  %v3440_v42 = vld [vmem:[%s15592_s8 + $0x750] sm:$0xff]  ;;  %v3441_v8 = vld [vmem:[%s15592_s8 + $0x758] sm:$0xff] }
 0x454   : > { %5085 = vmatprep.subr.bf16.mxu0 %v10558_v46  ;;  %v10612_v46 = vcombine.high %v3392_v11, %v3396_v57  ;;  %v3444_v1 = vld [vmem:[%s15592_s8 + $0x770] sm:$0xff] }
 0x455   : > { %4989 = vmatmul.mubr.bf16.vlgmr.msra.gmra.mrb[76].mxu1 %v14089_v38 }
 0x456   : > { %5075 = vmatmul.mubr.bf16.vlgmr.msra.gmra.mrb[20].mxu0 %v14089_v38  ;;  %5000 = vmatpush1.bf16.msra.mxu1 %v10555_v31  ;;  %v3365_v38 = vld [vmem:[%s15592_s8 + $0x4f8] sm:$0xff]  ;;  %v3404_v31 = vld [vmem:[%s15592_s8 + $0x630] sm:$0xff] }
 0x457   : > { %5031 = vmatprep.mubr.bf16.mxu1 %v14134_v27  ;;  %5086 = vmatpush1.bf16.msra.mxu0 %v10557_v33  ;;  %v10581_v4 = vcombine.low %v3361_v56, %v3365_v38  ;;  %v10611_v33 = vcombine.low %v3392_v11, %v3396_v57  ;;  %v10620_v23 = vcombine.high %v3400_v52, %v3404_v31  ;;  %v3448_v57 = vld [vmem:[%s15592_s8 + $0x790] sm:$0xff] }
 0x458   : > { %5117 = vmatprep.mubr.bf16.mxu0 %v14134_v27  ;;  %5001 = vmatprep.subr.bf16.mxu1 %v10564_v41  ;;  %v10582_v27 = vcombine.high %v3361_v56, %v3365_v38  ;;  %v10613_v41 = vcombine.low %v3393_v36, %v3397_v45  ;;  %v3420_v56 = vld [vmem:[%s15592_s8 + $0x6b0] sm:$0xff]  ;;  %v3417_v38 = vld [vmem:[%s15592_s8 + $0x698] sm:$0xff] }
 0x459   : > { %5087 = vmatprep.subr.bf16.mxu0 %v10566_v17  ;;  %v3408_v17 = vld [vmem:[%s15592_s8 + $0x650] sm:$0xff]  ;;  %v3449_v45 = vld [vmem:[%s15592_s8 + $0x798] sm:$0xff] }
 0x45a   : > { %5002 = vmatpush1.bf16.msra.mxu1 %v10563_v29  ;;  %v3413_v29 = vld [vmem:[%s15592_s8 + $0x678] sm:$0xff]  ;;  %v3452_v36 = vld [vmem:[%s15592_s8 + $0x7b0] sm:$0xff] }
 0x45b   : > { %5088 = vmatpush1.bf16.msra.mxu0 %v10565_v18  ;;  %5003 = vmatprep.subr.bf16.mxu1 %v10572_v48  ;;  %v10619_v18 = vcombine.low %v3400_v52, %v3404_v31  ;;  %v10621_v48 = vcombine.low %v3401_v49, %v3405_v47  ;;  %v10630_v14 = vcombine.high %v3409_v25, %v3413_v29  ;;  %v3456_v31 = vld [vmem:[%s15592_s8 + $0x7d0] sm:$0xff]  ;;  %v3457_v47 = vld [vmem:[%s15592_s8 + $0x7d8] sm:$0xff] }
 0x45c   : > { %5089 = vmatprep.subr.bf16.mxu0 %v10574_v53  ;;  %v10628_v53 = vcombine.high %v3408_v17, %v3412_v50  ;;  %v3460_v49 = vld [vmem:[%s15592_s8 + $0x7f0] sm:$0xff] }
 0x45e   : > { %5004 = vmatpush1.bf16.msra.mxu1 %v10571_v7  ;;  %v3421_v7 = vld [vmem:[%s15592_s8 + $0x6b8] sm:$0xff] }
 0x45f   : > { %5090 = vmatpush1.bf16.msra.mxu0 %v10573_v35  ;;  %5005 = vmatprep.subr.bf16.mxu1 %v10580_v16  ;;  %v10627_v35 = vcombine.low %v3408_v17, %v3412_v50  ;;  %v10629_v16 = vcombine.low %v3409_v25, %v3413_v29  ;;  %v10638_v55 = vcombine.high %v3417_v38, %v3421_v7  ;;  %v12157_v29 = vld [vmem:[%s12719_s30 + $0x40] sm:$0xff]  }
 0x460   : > { %5091 = vmatprep.subr.bf16.mxu0 %v10582_v27  ;;  %v10636_v27 = vcombine.high %v3416_v44, %v3420_v56  ;;  %v10675_v50 = vcombine.low %v3456_v31, %v3460_v49 }
 0x462   : > { %5006 = vmatpush1.bf16.msra.mxu1 %v10579_v9  ;;  %v3429_v9 = vld [vmem:[%s15592_s8 + $0x6f8] sm:$0xff] }
 0x463   : > { %5092 = vmatpush1.bf16.msra.mxu0 %v10581_v4  ;;  %5007 = vmatprep.subr.bf16.mxu1 %v10588_v39  ;;  %v10635_v4 = vcombine.low %v3416_v44, %v3420_v56  ;;  %v10637_v39 = vcombine.low %v3417_v38, %v3421_v7  ;;  %v10646_v51 = vcombine.high %v3425_v22, %v3429_v9  ;;  %v12163_v44 = vld [vmem:[%s12719_s30 + $0x148] sm:$0xff]   ;;  %v12165_v7 = vld [vmem:[%s12719_s30 + $0x50] sm:$0xff]  }
 0x464   : > { %5093 = vmatprep.subr.bf16.mxu0 %v10590_v61  ;;  %v10644_v61 = vcombine.high %v3424_v21, %v3428_v26  ;;  %v12162_v56 = vld [vmem:[%s12719_s30 + $0x8] sm:$0xff]  }
 0x465   : > { %v12164_v38 = vld [vmem:[%s12719_s30 + $0x108] sm:$0xff]  }
 0x466   : > { %5008 = vmatpush1.bf16.msra.mxu1 %v10587_v5  ;;  %v3437_v5 = vld [vmem:[%s15592_s8 + $0x738] sm:$0xff] }
 0x467   : > { %5094 = vmatpush1.bf16.msra.mxu0 %v10589_v63  ;;  %5009 = vmatprep.subr.bf16.mxu1 %v10596_v54  ;;  %v10643_v63 = vcombine.low %v3424_v21, %v3428_v26  ;;  %v10645_v54 = vcombine.low %v3425_v22, %v3429_v9  ;;  %v10654_v13 = vcombine.high %v3433_v40, %v3437_v5  ;;  %v12170_v21 = vld [vmem:[%s12719_s30 + $0x18] sm:$0xff]   ;;  %v12173_v22 = vld [vmem:[%s12719_s30 + $0x60] sm:$0xff]  }
 0x468   : > { %5095 = vmatprep.subr.bf16.mxu0 %v10598_v62  ;;  %v10652_v62 = vcombine.high %v3432_v19, %v3436_v28  ;;  %v12172_v26 = vld [vmem:[%s12719_s30 + $0x118] sm:$0xff]   ;;  %v12175_v9 = vld [vmem:[%s12719_s30 + $0x160] sm:$0xff]  }
 0x46a   : > { %5010 = vmatpush1.bf16.msra.mxu1 %v10595_v43  ;;  %v3445_v43 = vld [vmem:[%s15592_s8 + $0x778] sm:$0xff] }
 0x46b   : > { %5096 = vmatpush1.bf16.msra.mxu0 %v10597_v30  ;;  %5011 = vmatprep.subr.bf16.mxu1 %v10604_v37  ;;  %v10651_v30 = vcombine.low %v3432_v19, %v3436_v28  ;;  %v10653_v37 = vcombine.low %v3433_v40, %v3437_v5  ;;  %v10662_v11 = vcombine.high %v3441_v8, %v3445_v43  ;;  %v12178_v19 = vld [vmem:[%s12719_s30 + $0x28] sm:$0xff]   ;;  %v12181_v40 = vld [vmem:[%s12719_s30 + $0x70] sm:$0xff]  }
 0x46c   : > { %5097 = vmatprep.subr.bf16.mxu0 %v10606_v34  ;;  %v10660_v34 = vcombine.high %v3440_v42, %v3444_v1  ;;  %v12180_v28 = vld [vmem:[%s12719_s30 + $0x128] sm:$0xff]   ;;  %v12183_v5 = vld [vmem:[%s12719_s30 + $0x170] sm:$0xff]  }
 0x46e   : > { %5012 = vmatpush1.bf16.msra.mxu1 %v10603_v60  ;;  %v3453_v60 = vld [vmem:[%s15592_s8 + $0x7b8] sm:$0xff] }
 0x46f   : > { %5098 = vmatpush1.bf16.msra.mxu0 %v10605_v20  ;;  %5013 = vmatprep.subr.bf16.mxu1 %v10612_v46  ;;  %v10659_v20 = vcombine.low %v3440_v42, %v3444_v1  ;;  %v10661_v46 = vcombine.low %v3441_v8, %v3445_v43  ;;  %v10670_v52 = vcombine.high %v3449_v45, %v3453_v60  ;;  %v12186_v42 = vld [vmem:[%s12719_s30 + $0x38] sm:$0xff]   ;;  %v14337_v8 = vld [vmem:[%s12704_s14] sm:$0xff]  ;;  %v15657_v43 = vld [vmem:[#allocation29_spill] sm:$0xff] }
 0x470   : > { %5099 = vmatprep.subr.bf16.mxu0 %v10614_v2  ;;  %v10668_v2 = vcombine.high %v3448_v57, %v3452_v36  ;;  %v12188_v1 = vld [vmem:[%s12719_s30 + $0x138] sm:$0xff]  }
 0x472   : > { %5014 = vmatpush1.bf16.msra.mxu1 %v10611_v33  ;;  %v3461_v33 = vld [vmem:[%s15592_s8 + $0x7f8] sm:$0xff] }
 0x473   : > { %5100 = vmatpush1.bf16.msra.mxu0 %v10613_v41  ;;  %5015 = vmatprep.subr.bf16.mxu1 %v10620_v23  ;;  %v10667_v41 = vcombine.low %v3448_v57, %v3452_v36  ;;  %v10669_v23 = vcombine.low %v3449_v45, %v3453_v60  ;;  %v10678_v17 = vcombine.high %v3457_v47, %v3461_v33  ;;  %v15660_v57 = vld [vmem:[#allocation30_spill] sm:$0xff] }
 0x474   : > { %5101 = vmatprep.subr.bf16.mxu0 %v10622_v15  ;;  %v10676_v15 = vcombine.high %v3456_v31, %v3460_v49  ;;  %v10677_v25 = vcombine.low %v3457_v47, %v3461_v33  ;;  %v3471_v36 = vrot.slane %v14337_v8, %v15660_v57 }
 0x476   : > { %5016 = vmatpush1.bf16.msra.mxu1 %v10619_v18  ;;  %v12159_v18 = vld [vmem:[%s12719_s30 + $0x140] sm:$0xff]  }
 0x477   : > { %5102 = vmatpush1.bf16.msra.mxu0 %v10621_v48  ;;  %5017 = vmatprep.subr.bf16.mxu1 %v10628_v53  ;;  %v12158_v48 = vld [vmem:[%s12719_s30] sm:$0xff]  }
 0x478   : > { %5103 = vmatprep.subr.bf16.mxu0 %v10630_v14  ;;  %v12160_v53 = vld [vmem:[%s12719_s30 + $0x100] sm:$0xff]   ;;  %v12161_v14 = vld [vmem:[%s12719_s30 + $0x48] sm:$0xff]  }
 0x47a   : > { %5018 = vmatpush1.bf16.msra.mxu1 %v10627_v35  ;;  %v12167_v35 = vld [vmem:[%s12719_s30 + $0x150] sm:$0xff]  }
 0x47b   : > { %5104 = vmatpush1.bf16.msra.mxu0 %v10629_v16  ;;  %5019 = vmatprep.subr.bf16.mxu1 %v10636_v27  ;;  %v12166_v16 = vld [vmem:[%s12719_s30 + $0x10] sm:$0xff]  }
 0x47c   : > { %5105 = vmatprep.subr.bf16.mxu0 %v10638_v55  ;;  %v12168_v27 = vld [vmem:[%s12719_s30 + $0x110] sm:$0xff]   ;;  %v12171_v55 = vld [vmem:[%s12719_s30 + $0x158] sm:$0xff]  }
 0x47e   : > { %5020 = vmatpush1.bf16.msra.mxu1 %v10635_v4  ;;  %v12174_v4 = vld [vmem:[%s12719_s30 + $0x20] sm:$0xff]  }
 0x47f   : > { %5106 = vmatpush1.bf16.msra.mxu0 %v10637_v39  ;;  %5021 = vmatprep.subr.bf16.mxu1 %v10644_v61  ;;  %v12176_v39 = vld [vmem:[%s12719_s30 + $0x120] sm:$0xff]   ;;  %v12177_v61 = vld [vmem:[%s12719_s30 + $0x68] sm:$0xff]  }
 0x480   : > { %5107 = vmatprep.subr.bf16.mxu0 %v10646_v51  ;;  %v12179_v51 = vld [vmem:[%s12719_s30 + $0x168] sm:$0xff]  }
 0x482   : > { %5022 = vmatpush1.bf16.msra.mxu1 %v10643_v63  ;;  %v12182_v63 = vld [vmem:[%s12719_s30 + $0x30] sm:$0xff]  }
 0x483   : > { %5108 = vmatpush1.bf16.msra.mxu0 %v10645_v54  ;;  %5023 = vmatprep.subr.bf16.mxu1 %v10652_v62  ;;  %v12184_v54 = vld [vmem:[%s12719_s30 + $0x130] sm:$0xff]   ;;  %v12185_v62 = vld [vmem:[%s12719_s30 + $0x78] sm:$0xff]  }
 0x484   : > { %5109 = vmatprep.subr.bf16.mxu0 %v10654_v13  ;;  %v12187_v13 = vld [vmem:[%s12719_s30 + $0x178] sm:$0xff]  }
 0x486   : > { %5024 = vmatpush1.bf16.msra.mxu1 %v10651_v30  ;;  %v3467_v30 = vrot.slane %v14337_v8, %v15657_v43 }
 0x487   : > { %5110 = vmatpush1.bf16.msra.mxu0 %v10653_v37  ;;  %5025 = vmatprep.subr.bf16.mxu1 %v10660_v34  ;;  %v15658_v37 = vld [vmem:[#allocation28_spill] sm:$0xff] }
 0x488   : > { %5111 = vmatprep.subr.bf16.mxu0 %v10662_v11  ;;  %v15659_v34 = vsub.s32 2, %v15658_v37  ;;  %v15661_v45 = vsub.s32 3, %v15658_v37 }
 0x48a   : > { %5026 = vmatpush1.bf16.msra.mxu1 %v10659_v20  ;;  %v3475_v11 = vrot.slane %v14337_v8, %v15659_v34  ;;  %v3479_v60 = vrot.slane %v14337_v8, %v15661_v45 }
 0x48b   : > { %5112 = vmatpush1.bf16.msra.mxu0 %v10661_v46  ;;  %5027 = vmatprep.subr.bf16.mxu1 %v10668_v2 }
 0x48c   : > { %5113 = vmatprep.subr.bf16.mxu0 %v10670_v52 }
 0x48e   : > { %5028 = vmatpush1.bf16.msra.mxu1 %v10667_v41 }
 0x48f   : > { %5114 = vmatpush1.bf16.msra.mxu0 %v10669_v23  ;;  %5029 = vmatprep.subr.bf16.mxu1 %v10676_v15 }
 0x490   : > { %5115 = vmatprep.subr.bf16.mxu0 %v10678_v17 }
 0x492   : > { %5030 = vmatpush1.bf16.msra.mxu1 %v10675_v50 }
 0x493   : > { %5116 = vmatpush1.bf16.msra.mxu0 %v10677_v25  ;;  %11230 = vmatprep.subr.bf16.mxu1 %v12157_v29 }
 0x494   : > { %11358 = vmatprep.subr.bf16.mxu0 %v12159_v18 }
 0x495   : > { %5032 = vmatmul.mubr.bf16.vlgmr.msra.gmra.mrb[76].mxu1 %v14172_v59 }
 0x496   : > { %5118 = vmatmul.mubr.bf16.vlgmr.msra.gmra.mrb[20].mxu0 %v14172_v59  ;;  %11231 = vmatpush3.bf16.msra.mxu1 %v12158_v48  ;;  %v12169_v59 = vld [vmem:[%s12719_s30 + $0x58] sm:$0xff]  }
 0x497   : > { %11359 = vmatpush3.bf16.msra.mxu0 %v12160_v53  ;;  %11232 = vmatprep.subr.bf16.mxu1 %v12161_v14 }
 0x498   : > { %11360 = vmatprep.subr.bf16.mxu0 %v12163_v44 }
 0x49a   : > { %11233 = vmatpush3.bf16.msra.mxu1 %v12162_v56 }
 0x49b   : > { %11361 = vmatpush3.bf16.msra.mxu0 %v12164_v38  ;;  %11234 = vmatprep.subr.bf16.mxu1 %v12165_v7 }
 0x49c   : > { %11362 = vmatprep.subr.bf16.mxu0 %v12167_v35 }
 0x49e   : > { %11235 = vmatpush3.bf16.msra.mxu1 %v12166_v16 }
 0x49f   : > { %11363 = vmatpush3.bf16.msra.mxu0 %v12168_v27  ;;  %11236 = vmatprep.subr.bf16.mxu1 %v12169_v59 }
 0x4a0   : > { %11364 = vmatprep.subr.bf16.mxu0 %v12171_v55 }
 0x4a2   : > { %11237 = vmatpush3.bf16.msra.mxu1 %v12170_v21 }
 0x4a3   : > { %11365 = vmatpush3.bf16.msra.mxu0 %v12172_v26  ;;  %11238 = vmatprep.subr.bf16.mxu1 %v12173_v22 }
 0x4a4   : > { %11366 = vmatprep.subr.bf16.mxu0 %v12175_v9 }
 0x4a6   : > { %11239 = vmatpush3.bf16.msra.mxu1 %v12174_v4 }
 0x4a7   : > { %11367 = vmatpush3.bf16.msra.mxu0 %v12176_v39  ;;  %11240 = vmatprep.subr.bf16.mxu1 %v12177_v61 }
 0x4a8   : > { %11368 = vmatprep.subr.bf16.mxu0 %v12179_v51 }
 0x4aa   : > { %11241 = vmatpush3.bf16.msra.mxu1 %v12178_v19 }
 0x4ab   : > { %11369 = vmatpush3.bf16.msra.mxu0 %v12180_v28  ;;  %11242 = vmatprep.subr.bf16.mxu1 %v12181_v40 }
 0x4ac   : > { %11370 = vmatprep.subr.bf16.mxu0 %v12183_v5 }
 0x4ae   : > { %11243 = vmatpush3.bf16.msra.mxu1 %v12182_v63 }
 0x4af   : > { %11371 = vmatpush3.bf16.msra.mxu0 %v12184_v54  ;;  %11244 = vmatprep.subr.bf16.mxu1 %v12185_v62 }
 0x4b0   : > { %11372 = vmatprep.subr.bf16.mxu0 %v12187_v13 }
 0x4b2   : > { %11245 = vmatpush3.bf16.msra.mxu1 %v12186_v42 }
 0x4b3   : > { %11373 = vmatpush3.bf16.msra.mxu0 %v12188_v1 }
 0x4e8   : > { %v4861_v20 = vpop.f32.mrb[72].mxu1  ;;  %v4947_v46 = vpop.f32.mrb[16].mxu0 }
 0x4e9   : > { %v11833_v2 = vadd.f32 %v4861_v20, %v3467_v30  ;;  %v11837_v52 = vadd.f32 %v4947_v46, %v3475_v11  ;;  %v4863_v31 = vpop.f32.mrb[73].mxu1  ;;  %v4949_v49 = vpop.f32.mrb[17].mxu0  ;;  %v12213_v46 = vld [vmem:[%s12719_s30 + $0xc0] sm:$0xff]  }
 0x4ea   : > { %v11834_v47 = vadd.f32 %v4863_v31, %v3471_v36  ;;  %v11838_v33 = vadd.f32 %v4949_v49, %v3479_v60  ;;  %v4865_v41 = vpop.f32.mrb[74].mxu1  ;;  %v4951_v23 = vpop.f32.mrb[18].mxu0  ;;  %11294 = vmatprep.subr.bf16.mxu1 %v12213_v46  ;;  %v12216_v46 = vld [vmem:[%s12719_s30 + $0x88] sm:$0xff]  }
 0x4eb   : > { %v5128_v15 = vmax.f32 %v11833_v2, 0.0  ;;  %v5130_v17 = vmax.f32 %v11837_v52, 0.0  ;;  %v11835_v50 = vadd.f32 %v4865_v41, %v3467_v30  ;;  %v11839_v25 = vadd.f32 %v4951_v23, %v3475_v11  ;;  %v4867_v29 = vpop.f32.mrb[75].mxu1  ;;  %v4953_v18 = vpop.f32.mrb[19].mxu0 }
 0x4ec   : > { %v5129_v48 = vmax.f32 %v11834_v47, 0.0  ;;  %v5131_v53 = vmax.f32 %v11838_v33, 0.0  ;;  %v11836_v14 = vadd.f32 %v4867_v29, %v3471_v36  ;;  %v11840_v44 = vadd.f32 %v4953_v18, %v3479_v60 }
 0x4ed   : > { %v11065_v56 = vpack.c.bf16 %v5128_v15, %v5128_v15  ;;  %v11069_v38 = vpack.c.bf16 %v5130_v17, %v5130_v17  ;;  %v5136_v7 = vmax.f32 %v11835_v50, 0.0  ;;  %v5138_v35 = vmax.f32 %v11839_v25, 0.0 }
 0x4ee   : > { %v11067_v16 = vpack.c.bf16 %v5129_v48, %v5129_v48  ;;  %v11071_v27 = vpack.c.bf16 %v5131_v53, %v5131_v53  ;;  %v5137_v59 = vmax.f32 %v11836_v14, 0.0  ;;  %v5139_v55 = vmax.f32 %v11840_v44, 0.0 }
 0x4ef   : > { %v5173_v21 = vrot.slane %v11065_v56, 6  ;;  %v5206_v26 = vrot.slane %v11069_v38, 6  ;;  %v11066_v22 = vpack.c.bf16 %v5136_v7, %v5136_v7  ;;  %v11070_v9 = vpack.c.bf16 %v5138_v35, %v5138_v35 }
 0x4f0   : > { %v5189_v4 = vrot.slane %v11067_v16, 6  ;;  %v5223_v39 = vrot.slane %v11071_v27, 6  ;;  %v11068_v61 = vpack.c.bf16 %v5137_v59, %v5137_v59  ;;  %v11072_v51 = vpack.c.bf16 %v5139_v55, %v5139_v55 }
 0x4f1   : > { %v5174_v19 = vrot.slane %v5173_v21, 4  ;;  %5181 = vst [vmem:[#allocation3] sm:$0xc] %v5173_v21  ;;  %v5207_v28 = vrot.slane %v5206_v26, 4  ;;  %5215 = vst [vmem:[#allocation3 + $0x18] sm:$0xc] %v5206_v26 }
 0x4f2   : > { %v5175_v40 = vrot.slane %v11066_v22, 6  ;;  %v5208_v5 = vrot.slane %v11070_v9, 6  ;;  %v5190_v63 = vrot.slane %v5189_v4, 4  ;;  %5198 = vst [vmem:[#allocation3 + $0xc] sm:$0xc] %v5189_v4  ;;  %v5224_v54 = vrot.slane %v5223_v39, 4 }
 0x4f3   : > { %5232 = vst [vmem:[#allocation3 + $0x24] sm:$0xc] %v5223_v39  ;;  %v5191_v62 = vrot.slane %v11068_v61, 6  ;;  %v5225_v13 = vrot.slane %v11072_v51, 6  ;;  %v12214_v26 = vld [vmem:[%s12719_s30 + $0x80] sm:$0xff]   ;;  %v12215_v51 = vld [vmem:[%s12719_s30 + $0xc8] sm:$0xff]  }
 0x4f4   : > { %v5176_v1 = vsel %vm12962_vm5, %v5174_v19, %v5175_v40  ;;  %v5177_v30 = vrot.slane %v5175_v40, 4  ;;  %v5209_v34 = vsel %vm12962_vm5, %v5207_v28, %v5208_v5  ;;  %v5210_v11 = vrot.slane %v5208_v5, 4 }
 0x4f5   : > { %5182 = vst [vmem:[#allocation3 + $0x4] sm:$0xf] %v5176_v1  ;;  %5216 = vst [vmem:[#allocation3 + $0x1c] sm:$0xf] %v5209_v34  ;;  %v5192_v36 = vsel %vm12962_vm5, %v5190_v63, %v5191_v62  ;;  %v5193_v45 = vrot.slane %v5191_v62, 4  ;;  %v5226_v60 = vsel %vm12962_vm5, %v5224_v54, %v5225_v13  ;;  %v5227_v20 = vrot.slane %v5225_v13, 4 }
 0x4f6   : > { %5183 = vst [vmem:[#allocation3 + $0x8] sm:$0x3] %v5177_v30  ;;  %5217 = vst [vmem:[#allocation3 + $0x20] sm:$0x3] %v5210_v11 }
 0x4f7   : > { %5199 = vst [vmem:[#allocation3 + $0x10] sm:$0xf] %v5192_v36  ;;  %5233 = vst [vmem:[#allocation3 + $0x28] sm:$0xf] %v5226_v60 }
 0x4f8   : > { %5200 = vst [vmem:[#allocation3 + $0x14] sm:$0x3] %v5193_v45  ;;  %5234 = vst [vmem:[#allocation3 + $0x2c] sm:$0x3] %v5227_v20  ;;  %v5319_v2 = vld [vmem:[#allocation3] sm:$0xf] }
 0x4f9   : > { %v5359_v31 = vld [vmem:[#allocation3] sm:$0xc]  ;;  %v5322_v41 = vld [vmem:[#allocation3 + $0xc] sm:$0xf]  ;;  %v5325_v63 = vld [vmem:[#allocation3 + $0x18] sm:$0xf] }
 0x4fa   : > { %v5360_v15 = vld [vmem:[#allocation3 + $0xc] sm:$0xc]  ;;  %v5361_v34 = vld [vmem:[#allocation3 + $0x18] sm:$0xc] }
 0x4fc   : > { %v14358_v52 = vld [vmem:[#allocation3 + $0x4] sm:$0xf]  ;;  %v14390_v20 = vld [vmem:[#allocation3 + $0x1c] sm:$0xf] }
 0x4fd   : > { %v10703_v49 = vcombine.low %v5319_v2, %v14358_v52  ;;  %v14361_v47 = vld [vmem:[#allocation3 + $0x8] ss:$0 sps:$4 sm:$0x11]   ;;  %v10735_v33 = vcombine.low %v5359_v31, %v14358_v52  ;;  %v12191_v62 = vld [vmem:[#allocation3] sm:$0xff]  }
 0x4fe   : > { %v14364_v23 = vld [vmem:[#allocation3 + $0x8] ss:$0 sps:$4 sm:$0x77]   ;;  %v5511_v25 = vshll.u32 %v14361_v47, 16  ;;  %v14367_v18 = vld [vmem:[#allocation3 + $0x10] sm:$0xf] }
 0x4ff   : > { %v5504_v17 = vshrl.u32 %v10703_v49, 16  ;;  %v5506_v50 = vshll.u32 %v10703_v49, 16  ;;  %v5912_v29 = vshrl.u32 %v10735_v33, 16  ;;  %v5915_v48 = vshll.u32 %v10735_v33, 16 }
 0x500   : > { %v5920_v53 = vshrl.u32 %v14364_v23, 16  ;;  %v5923_v14 = vshll.u32 %v14364_v23, 16  ;;  %v10705_v44 = vcombine.low %v5322_v41, %v14367_v18  ;;  %v5513_v38 = vrot.slane %v5511_v25, 1  ;;  %v14372_v35 = vld [vmem:[#allocation3 + $0x14] ss:$0 sps:$4 sm:$0x11]  }
 0x501   : > { %v5508_v56 = vrot.slane %v5506_v50, 1  ;;  %v5914_v7 = vrot.slane %v5912_v29, 2  ;;  %v14375_v16 = vcombine.low %v5360_v15, %v14367_v18  ;;  %v5917_v27 = vrot.slane %v5915_v48, 3  ;;  %v14379_v39 = vld [vmem:[#allocation3 + $0x8] ss:$0 sps:$4 sm:$0x33]  }
 0x502   : > { %v5922_v59 = vrot.slane %v5920_v53, 2  ;;  %v5925_v55 = vrot.slane %v5923_v14, 3  ;;  %v5516_v21 = vshrl.u32 %v10705_v44, 16  ;;  %v5518_v9 = vshll.u32 %v10705_v44, 16  ;;  %v12217_v29 = vld [vmem:[%s12719_s30 + $0xd0] sm:$0xff]  }
 0x503   : > { %v5509_v22 = vor.u32 %v5508_v56, %v5504_v17  ;;  %v5523_v4 = vshll.u32 %v14372_v35, 16  ;;  %v5855_v61 = vrot.slane %v10735_v33, 2  ;;  %v5918_v19 = vor.u32 %v5917_v27, %v5914_v7  ;;  %v14382_v40 = vld [vmem:[#allocation3 + $0x14] ss:$0 sps:$4 sm:$0x77]  }
 0x504   : > { %v5926_v28 = vor.u32 %v5925_v55, %v5922_v59  ;;  %v5929_v5 = vshrl.u32 %v14375_v16, 16  ;;  %v5520_v13 = vrot.slane %v5518_v9, 1  ;;  %v5856_v30 = vrot.slane %v14379_v39, 2  ;;  %v14396_v41 = vld [vmem:[#allocation3 + $0x20] ss:$0 sps:$4 sm:$0x11]  }
 0x505   : > { %v5514_v54 = vsel %vm1434_vm10, %v5509_v22, %v5513_v38  ;;  %v5525_v1 = vrot.slane %v5523_v4, 1  ;;  %v5932_v45 = vshll.u32 %v14375_v16, 16  ;;  %v5937_v60 = vshrl.u32 %v14382_v40, 16  ;;  %v14404_v56 = vld [vmem:[#allocation3 + $0x14] ss:$0 sps:$4 sm:$0x33]  }
 0x506   : > { %6910 = vmatprep.mubr.bf16.mxu1 %v5514_v54  ;;  %v5927_v11 = vsel %vm1846_vm14, %v5918_v19, %v5926_v28  ;;  %v5931_v36 = vrot.slane %v5929_v5, 2  ;;  %v5521_v2 = vor.u32 %v5520_v13, %v5516_v21  ;;  %v5857_v31 = vsel %vm1797_vm12, %v5855_v61, %v5856_v30  ;;  %v12199_v59 = vld [vmem:[#allocation3 + $0xc] sm:$0xff]   ;;  %v5328_v19 = vld [vmem:[#allocation3 + $0x24] sm:$0xf]  ;;  %v12219_v28 = vld [vmem:[%s12719_s30 + $0xd8] sm:$0xff]  }
 0x507   : > { %6911 = vmatmul.mubr.bf16.vlgmr.msra.gmra.mrb[80].mxu1 %v12191_v62  ;;  %7104 = vmatprep.mubr.bf16.mxu0 %v5927_v11  ;;  %v5940_v49 = vshll.u32 %v14382_v40, 16  ;;  %v10707_v33 = vcombine.low %v5325_v63, %v14390_v20  ;;  %v5934_v15 = vrot.slane %v5932_v45, 3  ;;  %v5939_v17 = vrot.slane %v5937_v60, 2  ;;  %v12218_v22 = vld [vmem:[%s12719_s30 + $0x90] sm:$0xff]   ;;  %v14417_v62 = vld [vmem:[#allocation3 + $0x28] sm:$0xf] }
 0x508   : > { %7105 = vmatmul.mubr.bf16.vlgmr.msra.gmra.mrb[24].mxu0 %v5857_v31  ;;  %v5858_v50 = vrot.slane %v14375_v16, 2  ;;  %v14400_v25 = vcombine.low %v5361_v34, %v14390_v20  ;;  %11295 = vmatpush3.bf16.msra.mxu1 %v12214_v26  ;;  %v5526_v48 = vsel %vm1434_vm10, %v5521_v2, %v5525_v1  ;;  %v5535_v7 = vshll.u32 %v14396_v41, 16  ;;  %v14407_v16 = vld [vmem:[#allocation3 + $0x20] ss:$0 sps:$4 sm:$0x77]   ;;  %v12220_v2 = vld [vmem:[%s12719_s30 + $0x98] sm:$0xff]  }
 0x509   : > { %v5942_v53 = vrot.slane %v5940_v49, 3  ;;  %v5528_v14 = vshrl.u32 %v10707_v33, 16  ;;  %v5530_v44 = vshll.u32 %v10707_v33, 16  ;;  %11296 = vmatprep.subr.bf16.mxu1 %v12215_v51  ;;  %6918 = vmatprep.mubr.bf16.mxu1 %v5526_v48  ;;  %v5935_v38 = vor.u32 %v5934_v15, %v5931_v36  ;;  %v12229_v13 = vld [vmem:[%s12719_s30 + $0x200] sm:$0xff]  }
 0x50a   : > { %v5859_v21 = vrot.slane %v14404_v56, 2  ;;  %v5946_v26 = vshrl.u32 %v14400_v25, 16  ;;  %v5537_v9 = vrot.slane %v5535_v7, 1  ;;  %v5949_v4 = vshll.u32 %v14400_v25, 16  ;;  %11643 = vmatprep.subr.bf16.mxu0 %v12229_v13 }
 0x50b   : > { %v5943_v27 = vor.u32 %v5942_v53, %v5939_v17  ;;  %v5532_v55 = vrot.slane %v5530_v44, 1  ;;  %v5954_v61 = vshrl.u32 %v14407_v16, 16  ;;  %v5957_v51 = vshll.u32 %v14407_v16, 16  ;;  %v14421_v36 = vld [vmem:[#allocation3 + $0x2c] ss:$0 sps:$4 sm:$0x11]   ;;  %11644 = vmatpush3.bf16.msra.mxu0 %v12229_v13 }
 0x50c   : > { %11297 = vmatpush3.bf16.msra.mxu1 %v12216_v46  ;;  %v5948_v54 = vrot.slane %v5946_v26, 2  ;;  %v5951_v1 = vrot.slane %v5949_v4, 3  ;;  %v10709_v11 = vcombine.low %v5328_v19, %v14417_v62  ;;  %v5860_v60 = vsel %vm1797_vm12, %v5858_v50, %v5859_v21  ;;  %v14425_v46 = vld [vmem:[#allocation3 + $0x20] ss:$0 sps:$4 sm:$0x33]   ;;  %v12205_v4 = vld [vmem:[#allocation3 + $0x18] sm:$0xff]  }
 0x50d   : > { %v5944_v5 = vsel %vm1846_vm14, %v5935_v38, %v5943_v27  ;;  %v5533_v63 = vor.u32 %v5532_v55, %v5528_v14  ;;  %11298 = vmatprep.subr.bf16.mxu1 %v12217_v29  ;;  %v5956_v30 = vrot.slane %v5954_v61, 2  ;;  %v5959_v34 = vrot.slane %v5957_v51, 3  ;;  %v5362_v17 = vld [vmem:[#allocation3 + $0x24] sm:$0xc] }
 0x50e   : > { %7112 = vmatprep.mubr.bf16.mxu0 %v5944_v5  ;;  %v5952_v31 = vor.u32 %v5951_v1, %v5948_v54  ;;  %v5542_v33 = vshll.u32 %v10709_v11, 16  ;;  %v5861_v15 = vrot.slane %v14400_v25, 2  ;;  %v5540_v29 = vshrl.u32 %v10709_v11, 16  ;;  %v14434_v14 = vld [vmem:[#allocation3 + $0x2c] ss:$0 sps:$4 sm:$0x77]  }
 0x50f   : > { %6919 = vmatmul.mubr.bf16.gmra.mrb[84].mxu1 %v12199_v59  ;;  %v5538_v45 = vsel %vm1434_vm10, %v5533_v63, %v5537_v9  ;;  %v5960_v49 = vor.u32 %v5959_v34, %v5956_v30  ;;  %v5547_v48 = vshll.u32 %v14421_v36, 16  ;;  %v5862_v53 = vrot.slane %v14425_v46, 2  ;;  %v12232_v25 = vld [vmem:[%s12719_s30 + $0xe0] sm:$0xff]   ;;  %v12234_v59 = vld [vmem:[%s12719_s30 + $0x208] sm:$0xff]  }
 0x510   : > { %6926 = vmatprep.mubr.bf16.mxu1 %v5538_v45  ;;  %7113 = vmatmul.mubr.bf16.gmra.mrb[28].mxu0 %v5860_v60  ;;  %v14432_v50 = vcombine.low %v5362_v17, %v14417_v62  ;;  %v5544_v38 = vrot.slane %v5542_v33, 1  ;;  %v5971_v26 = vshrl.u32 %v14434_v14, 16  ;;  %v14443_v9 = vld [vmem:[#allocation3 + $0x2c] ss:$0 sps:$4 sm:$0x33]   ;;  %v12233_v19 = vld [vmem:[%s12719_s30 + $0xa0] sm:$0xff]  }
 0x511   : > { %11299 = vmatpush3.bf16.msra.mxu1 %v12218_v22  ;;  %v5961_v44 = vsel %vm1846_vm14, %v5952_v31, %v5960_v49  ;;  %v5549_v21 = vrot.slane %v5547_v48, 1  ;;  %v5974_v22 = vshll.u32 %v14434_v14, 16  ;;  %11645 = vmatprep.subr.bf16.mxu0 %v12234_v59  ;;  %v5696_v5 = vshrl.u32 %v14379_v39, 16  ;;  %v12242_v30 = vld [vmem:[%s12719_s30 + $0xe8] sm:$0xff]   ;;  %v5343_v34 = vld [vmem:[#allocation3] sm:$0xe] }
 0x512   : > { %11300 = vmatprep.subr.bf16.mxu1 %v12219_v28  ;;  %7120 = vmatprep.mubr.bf16.mxu0 %v5961_v44  ;;  %v5963_v7 = vshrl.u32 %v14432_v50, 16  ;;  %v5966_v27 = vshll.u32 %v14432_v50, 16  ;;  %v5545_v55 = vor.u32 %v5544_v38, %v5540_v29  ;;  %v12239_v28 = vld [vmem:[%s12719_s30 + $0x210] sm:$0xff]   ;;  %v5863_v54 = vsel %vm1797_vm12, %v5861_v15, %v5862_v53  ;;  %v12244_v45 = vld [vmem:[%s12719_s30 + $0x218] sm:$0xff]   ;;  %v12243_v15 = vld [vmem:[%s12719_s30 + $0xa8] sm:$0xff]  }
 0x513   : > { %v5973_v13 = vrot.slane %v5971_v26, 2  ;;  %v5976_v1 = vrot.slane %v5974_v22, 3  ;;  %11646 = vmatpush3.bf16.msra.mxu0 %v12234_v59  ;;  %v10719_v60 = vcombine.low %v5343_v34, %v14358_v52  ;;  %v5699_v31 = vshll.u32 %v14379_v39, 16 }
 0x514   : > { %v5965_v61 = vrot.slane %v5963_v7, 2  ;;  %v5968_v51 = vrot.slane %v5966_v27, 3  ;;  %v5550_v63 = vsel %vm1434_vm10, %v5545_v55, %v5549_v21  ;;  %11647 = vmatprep.subr.bf16.mxu0 %v12239_v28  ;;  %v5632_v33 = vrot.slane %v14361_v47, 1  ;;  %v12249_v47 = vld [vmem:[%s12719_s30 + $0x220] sm:$0xff]   ;;  %v12252_v7 = vld [vmem:[%s12719_s30 + $0xf0] sm:$0xff]  }
 0x515   : > { %11301 = vmatpush3.bf16.msra.mxu1 %v12220_v2  ;;  %v5698_v2 = vrot.slane %v5696_v5, 1  ;;  %v5977_v49 = vor.u32 %v5976_v1, %v5973_v13  ;;  %v5688_v17 = vshrl.u32 %v10719_v60, 16  ;;  %v5691_v29 = vshll.u32 %v10719_v60, 16  ;;  %v12254_v1 = vld [vmem:[%s12719_s30 + $0x228] sm:$0xff]  }
 0x516   : > { %11302 = vmatprep.subr.bf16.mxu1 %v12232_v25  ;;  %v5969_v11 = vor.u32 %v5968_v51, %v5965_v61  ;;  %v5701_v48 = vrot.slane %v5699_v31, 2  ;;  %v5864_v44 = vrot.slane %v14432_v50, 2  ;;  %v5865_v38 = vrot.slane %v14443_v9, 2  ;;  %v5344_v25 = vld [vmem:[#allocation3 + $0xc] sm:$0xe]  ;;  %v12253_v61 = vld [vmem:[%s12719_s30 + $0xb0] sm:$0xff]  }
 0x517   : > { %6927 = vmatmul.mubr.bf16.gmra.mrb[88].mxu1 %v12205_v4  ;;  %11648 = vmatpush3.bf16.msra.mxu0 %v12239_v28  ;;  %v5631_v39 = vrot.slane %v10719_v60, 1  ;;  %v5690_v27 = vrot.slane %v5688_v17, 1  ;;  %v5693_v59 = vrot.slane %v5691_v29, 2  ;;  %v10720_v21 = vcombine.low %v5344_v25, %v14367_v18  ;;  %v12211_v4 = vld [vmem:[#allocation3 + $0x24] sm:$0xff]   ;;  %v12261_v31 = vld [vmem:[%s12719_s30 + $0xf8] sm:$0xff]  }
 0x518   : > { %6934 = vmatprep.mubr.bf16.mxu1 %v5550_v63  ;;  %7121 = vmatmul.mubr.bf16.gmra.mrb[32].mxu0 %v5863_v54  ;;  %v5978_v53 = vsel %vm1846_vm14, %v5969_v11, %v5977_v49  ;;  %v5702_v55 = vor.u32 %v5701_v48, %v5698_v2  ;;  %v5713_v50 = vshrl.u32 %v14404_v56, 16  ;;  %v5716_v22 = vshll.u32 %v14404_v56, 16  ;;  %v5345_v11 = vld [vmem:[#allocation3 + $0x18] sm:$0xe] }
 0x519   : > { %11303 = vmatpush3.bf16.msra.mxu1 %v12233_v19  ;;  %7128 = vmatprep.mubr.bf16.mxu0 %v5978_v53  ;;  %v14463_v26 = vsel %vm1571_vm8, %v5631_v39, %v5632_v33  ;;  %v5694_v51 = vor.u32 %v5693_v59, %v5690_v27  ;;  %v5705_v19 = vshrl.u32 %v10720_v21, 16  ;;  %v5708_v28 = vshll.u32 %v10720_v21, 16  ;;  %v12262_v49 = vld [vmem:[%s12719_s30 + $0xb8] sm:$0xff]   ;;  %v5346_v59 = vld [vmem:[#allocation3 + $0x24] sm:$0xe] }
 0x51a   : > { %11304 = vmatprep.subr.bf16.mxu1 %v12242_v30  ;;  %11649 = vmatprep.subr.bf16.mxu0 %v12244_v45  ;;  %v5715_v5 = vrot.slane %v5713_v50, 1  ;;  %v5718_v63 = vrot.slane %v5716_v22, 2  ;;  %v5634_v54 = vrot.slane %v10720_v21, 1  ;;  %v5866_v13 = vsel %vm1797_vm12, %v5864_v44, %v5865_v38  ;;  %v12258_v44 = vld [vmem:[%s12719_s30 + $0x230] sm:$0xff]   ;;  %v5375_v22 = vld [vmem:[#allocation3] sm:$0x8] }
 0x51b   : > { %11650 = vmatpush3.bf16.msra.mxu0 %v12244_v45  ;;  %v14471_v56 = vsel %vm1620_vm9, %v5694_v51, %v5702_v55  ;;  %v5707_v30 = vrot.slane %v5705_v19, 1  ;;  %v5710_v34 = vrot.slane %v5708_v28, 2  ;;  %v5635_v60 = vrot.slane %v14372_v35, 1  ;;  %v12263_v28 = vld [vmem:[%s12719_s30 + $0x238] sm:$0xff]  }
 0x51c   : > { %11651 = vmatprep.subr.bf16.mxu0 %v12249_v47  ;;  %v5719_v45 = vor.u32 %v5718_v63, %v5715_v5  ;;  %v10721_v2 = vcombine.low %v5345_v11, %v14390_v20  ;;  %v5733_v17 = vshll.u32 %v14425_v46, 16  ;;  %v5638_v55 = vrot.slane %v14396_v41, 1 }
 0x51d   : > { %11305 = vmatpush3.bf16.msra.mxu1 %v12243_v15  ;;  %v5711_v33 = vor.u32 %v5710_v34, %v5707_v30  ;;  %v5730_v15 = vshrl.u32 %v14425_v46, 16  ;;  %v14480_v29 = vsel %vm1571_vm8, %v5634_v54, %v5635_v60  ;;  %v14486_v46 = vld [vmem:[#allocation3 + $0x20] sm:$0xf]  ;;  %v10722_v21 = vcombine.low %v5346_v59, %v14417_v62 }
 0x51e   : > { %11306 = vmatprep.subr.bf16.mxu1 %v12252_v7  ;;  %v5722_v48 = vshrl.u32 %v10721_v2, 16  ;;  %v5725_v53 = vshll.u32 %v10721_v2, 16  ;;  %v5735_v39 = vrot.slane %v5733_v17, 2  ;;  %v5637_v27 = vrot.slane %v10721_v2, 1 }
 0x51f   : > { %6935 = vmatmul.mubr.bf16.gmra.mrb[92].mxu1 %v12211_v4  ;;  %11652 = vmatpush3.bf16.msra.mxu0 %v12249_v47  ;;  %v14484_v35 = vsel %vm1620_vm9, %v5711_v33, %v5719_v45  ;;  %v5732_v38 = vrot.slane %v5730_v15, 1  ;;  %v5747_v50 = vshrl.u32 %v14443_v9, 16  ;;  %v5641_v51 = vrot.slane %v14421_v36, 1  ;;  %v5376_v15 = vld [vmem:[#allocation3 + $0xc] sm:$0x8] }
 0x520   : > { %7129 = vmatmul.mubr.bf16.gmra.mrb[36].mxu0 %v5866_v13  ;;  %11653 = vmatprep.subr.bf16.mxu0 %v12254_v1  ;;  %v5724_v25 = vrot.slane %v5722_v48, 1  ;;  %v5727_v7 = vrot.slane %v5725_v53, 2  ;;  %v14494_v19 = vcombine.low %v5375_v22, %v14358_v52  ;;  %v14498_v5 = vsel %vm1571_vm8, %v5637_v27, %v5638_v55  ;;  %v12268_v52 = vld [vmem:[%s12719_s30 + $0x1c0] sm:$0xff]   ;;  %v5377_v53 = vld [vmem:[#allocation3 + $0x18] sm:$0x8] }
 0x521   : > { %11307 = vmatpush3.bf16.msra.mxu1 %v12253_v61  ;;  %v5736_v47 = vor.u32 %v5735_v39, %v5732_v38  ;;  %v5750_v61 = vshll.u32 %v14443_v9, 16  ;;  %v5739_v41 = vshrl.u32 %v10722_v21, 16  ;;  %v5742_v63 = vshll.u32 %v10722_v21, 16  ;;  %v14505_v9 = vld [vmem:[#allocation3 + $0x2c] sm:$0xf] }
 0x522   : > { %11308 = vmatprep.subr.bf16.mxu1 %v12261_v31  ;;  %v5728_v4 = vor.u32 %v5727_v7, %v5724_v25  ;;  %15663 = vst [vmem:[#allocation52_spill] sm:$0xff] %v14494_v19  ;;  %v5749_v54 = vrot.slane %v5747_v50, 1  ;;  %v10761_v13 = vcombine.low %v14486_v46, %v14486_v46  ;;  %v5640_v30 = vrot.slane %v10722_v21, 1 }
 0x523   : > { %11654 = vmatpush3.bf16.msra.mxu0 %v12254_v1  ;;  %v5752_v36 = vrot.slane %v5750_v61, 2  ;;  %v5741_v34 = vrot.slane %v5739_v41, 1  ;;  %v5744_v11 = vrot.slane %v5742_v63, 2  ;;  %v10762_v2 = vcombine.low %v14505_v9, %v14505_v9 }
 0x524   : > { %11655 = vmatprep.subr.bf16.mxu0 %v12258_v44  ;;  %v14503_v1 = vsel %vm1620_vm9, %v5728_v4, %v5736_v47  ;;  %v14509_v60 = vsel %vm1571_vm8, %v5640_v30, %v5641_v51  ;;  %v6080_v33 = vrot.slane %v14364_v23, 3  ;;  %v6178_v17 = vshrl.u32 %v10761_v13, 16  ;;  %v5378_v51 = vld [vmem:[#allocation3 + $0x24] sm:$0x8] }
 0x525   : > { %11309 = vmatpush3.bf16.msra.mxu1 %v12262_v49  ;;  %v5753_v45 = vor.u32 %v5752_v36, %v5749_v54  ;;  %v5745_v31 = vor.u32 %v5744_v11, %v5741_v34  ;;  %v6079_v49 = vrot.slane %v14494_v19, 3  ;;  %v14516_v48 = vcombine.low %v5376_v15, %v14367_v18 }
 0x526   : > { %11422 = vmatprep.subr.bf16.mxu1 %v12268_v52  ;;  %v6083_v39 = vrot.slane %v14382_v40, 3  ;;  %v10753_v25 = vcombine.low %v5377_v53, %v14390_v20  ;;  %v6181_v7 = vshll.u32 %v10761_v13, 16  ;;  %v6195_v27 = vshrl.u32 %v10762_v2, 16 }
 0x527   : > { %11656 = vmatpush3.bf16.msra.mxu0 %v12258_v44  ;;  %15664 = vst [vmem:[#allocation46_spill] sm:$0xff] %v14516_v48  ;;  %v14519_v44 = vsel %vm1620_vm9, %v5745_v31, %v5753_v45  ;;  %v14522_v38 = vsel %vm2023_vm13, %v6079_v49, %v6080_v33  ;;  %v6082_v23 = vrot.slane %v14516_v48, 3  ;;  %v6198_v18 = vshll.u32 %v10762_v2, 16  ;;  %v14543_v33 = vld [vmem:[%s12709_s19] sm:$0xff]  }
 0x528   : > { %11657 = vmatprep.subr.bf16.mxu0 %v12263_v28  ;;  %15665 = vst [vmem:[#allocation32_spill] sm:$0xff] %v14522_v38  ;;  %v6170_v59 = vshrl.u32 %v10753_v25, 16  ;;  %v6173_v47 = vshll.u32 %v10753_v25, 16  ;;  %v6180_v22 = vrot.slane %v6178_v17, 3  ;;  %v6183_v4 = vrot.slane %v6181_v7, 4  ;;  %v12276_v38 = vld [vmem:[%s12719_s30 + $0x188] sm:$0xff]  }
 0x529   : > { %v14528_v55 = vsel %vm2023_vm13, %v6082_v23, %v6083_v39  ;;  %v6085_v61 = vrot.slane %v10753_v25, 3  ;;  %v10754_v41 = vcombine.low %v5378_v51, %v14417_v62  ;;  %v6197_v63 = vrot.slane %v6195_v27, 3 }
 0x52a   : > { %15666 = vst [vmem:[#allocation43_spill] sm:$0xff] %v14528_v55  ;;  %v6172_v21 = vrot.slane %v6170_v59, 3  ;;  %v6175_v50 = vrot.slane %v6173_v47, 4  ;;  %v6184_v54 = vor.u32 %v6183_v4, %v6180_v22  ;;  %v6200_v13 = vrot.slane %v6198_v18, 4 }
 0x52b   : > { %11658 = vmatpush3.bf16.msra.mxu0 %v12263_v28  ;;  %v6086_v28 = vrot.slane %v14407_v16, 3  ;;  %v6089_v36 = vrot.slane %v14434_v14, 3  ;;  %v6187_v52 = vshrl.u32 %v10754_v41, 16  ;;  %v6190_v34 = vshll.u32 %v10754_v41, 16 }
 0x52c   : > { %v6176_v40 = vor.u32 %v6175_v50, %v6172_v21  ;;  %v6088_v11 = vrot.slane %v10754_v41, 3  ;;  %v6201_v49 = vor.u32 %v6200_v13, %v6197_v63  ;;  %11675 = vmatprep.subr.bf16.mxu0 %v14543_v33  ;;  %v3482_v17 = vsub.s32 4, %v15658_v37 }
 0x52d   : > { %v14534_v30 = vsel %vm2023_vm13, %v6085_v61, %v6086_v28  ;;  %v6189_v2 = vrot.slane %v6187_v52, 3  ;;  %v6192_v31 = vrot.slane %v6190_v34, 4  ;;  %v3490_v53 = vsub.s32 6, %v15658_v37 }
 0x52e   : > { %15667 = vst [vmem:[#allocation47_spill] sm:$0xff] %v14534_v30  ;;  %v14537_v45 = vsel %vm2072_vm11, %v6176_v40, %v6184_v54  ;;  %v14540_v16 = vsel %vm2023_vm13, %v6088_v11, %v6089_v36  ;;  %v3486_v39 = vsub.s32 5, %v15658_v37  ;;  %v3494_v25 = vsub.s32 7, %v15658_v37 }
 0x52f   : > { %15668 = vst [vmem:[#allocation33_spill] sm:$0xff] %v14537_v45  ;;  %15669 = vst [vmem:[#allocation44_spill] sm:$0xff] %v14540_v16  ;;  %v6193_v15 = vor.u32 %v6192_v31, %v6189_v2  ;;  %v3483_v7 = vrot.slane %v14337_v8, %v3482_v17  ;;  %v3491_v27 = vrot.slane %v14337_v8, %v3490_v53 }
 0x530   : > { %v3487_v23 = vrot.slane %v14337_v8, %v3486_v39  ;;  %v3495_v59 = vrot.slane %v14337_v8, %v3494_v25 }
 0x531   : > { %v14547_v14 = vsel %vm2072_vm11, %v6193_v15, %v6201_v49 }
 0x532   : > { %15670 = vst [vmem:[#allocation49_spill] sm:$0xff] %v14547_v14 }
 0x568   : > { %v5033_v47 = vpop.f32.mrb[76].mxu1 }
 0x569   : > { %v11841_v18 = vadd.f32 %v5033_v47, %v3483_v7  ;;  %v5119_v21 = vpop.f32.mrb[20].mxu0  ;;  %v5035_v50 = vpop.f32.mrb[77].mxu1 }
 0x56a   : > { %v11845_v22 = vadd.f32 %v5119_v21, %v3491_v27  ;;  %v11842_v4 = vadd.f32 %v5035_v50, %v3487_v23  ;;  %v5121_v61 = vpop.f32.mrb[21].mxu0  ;;  %v5037_v51 = vpop.f32.mrb[78].mxu1 }
 0x56b   : > { %v5132_v40 = vmax.f32 %v11841_v18, 0.0  ;;  %v11846_v28 = vadd.f32 %v5121_v61, %v3495_v59  ;;  %v11843_v41 = vadd.f32 %v5037_v51, %v3483_v7  ;;  %v5123_v37 = vpop.f32.mrb[22].mxu0  ;;  %v5039_v63 = vpop.f32.mrb[79].mxu1 }
 0x56c   : > { %v5134_v54 = vmax.f32 %v11845_v22, 0.0  ;;  %v5133_v13 = vmax.f32 %v11842_v4, 0.0  ;;  %v11847_v36 = vadd.f32 %v5123_v37, %v3491_v27  ;;  %v11844_v52 = vadd.f32 %v5039_v63, %v3487_v23  ;;  %v5125_v34 = vpop.f32.mrb[23].mxu0 }
 0x56d   : > { %v11073_v11 = vpack.c.bf16 %v5132_v40, %v5132_v40  ;;  %v5135_v8 = vmax.f32 %v11846_v28, 0.0  ;;  %v5140_v2 = vmax.f32 %v11843_v41, 0.0  ;;  %v11848_v31 = vadd.f32 %v5125_v34, %v3495_v59 }
 0x56e   : > { %v11077_v49 = vpack.c.bf16 %v5134_v54, %v5134_v54  ;;  %v11075_v15 = vpack.c.bf16 %v5133_v13, %v5133_v13  ;;  %v5142_v17 = vmax.f32 %v11847_v36, 0.0  ;;  %v5141_v53 = vmax.f32 %v11844_v52, 0.0 }
 0x56f   : > { %v5240_v39 = vrot.slane %v11073_v11, 6  ;;  %v11079_v25 = vpack.c.bf16 %v5135_v8, %v5135_v8  ;;  %v11074_v47 = vpack.c.bf16 %v5140_v2, %v5140_v2  ;;  %v5143_v18 = vmax.f32 %v11848_v31, 0.0 }
 0x570   : > { %v5274_v7 = vrot.slane %v11077_v49, 6  ;;  %v5257_v21 = vrot.slane %v11075_v15, 6  ;;  %v11078_v50 = vpack.c.bf16 %v5142_v17, %v5142_v17  ;;  %v11076_v22 = vpack.c.bf16 %v5141_v53, %v5141_v53 }
 0x571   : > { %v5241_v4 = vrot.slane %v5240_v39, 4  ;;  %5249 = vst [vmem:[#allocation3 + $0x30] sm:$0xc] %v5240_v39  ;;  %v5291_v27 = vrot.slane %v11079_v25, 6  ;;  %v5242_v23 = vrot.slane %v11074_v47, 6  ;;  %v11080_v61 = vpack.c.bf16 %v5143_v18, %v5143_v18 }
 0x572   : > { %v5275_v51 = vrot.slane %v5274_v7, 4  ;;  %5283 = vst [vmem:[#allocation3 + $0x48] sm:$0xc] %v5274_v7  ;;  %v5258_v59 = vrot.slane %v5257_v21, 4  ;;  %5266 = vst [vmem:[#allocation3 + $0x3c] sm:$0xc] %v5257_v21 }
 0x573   : > { %v5276_v40 = vrot.slane %v11078_v50, 6  ;;  %v5259_v28 = vrot.slane %v11076_v22, 6  ;;  %v5292_v41 = vrot.slane %v5291_v27, 4  ;;  %5300 = vst [vmem:[#allocation3 + $0x54] sm:$0xc] %v5291_v27  ;;  %v5243_v37 = vsel %vm12962_vm5, %v5241_v4, %v5242_v23 }
 0x574   : > { %v5244_v63 = vrot.slane %v5242_v23, 4  ;;  %v5293_v54 = vrot.slane %v11080_v61, 6  ;;  %5250 = vst [vmem:[#allocation3 + $0x34] sm:$0xf] %v5243_v37 }
 0x575   : > { %v5277_v13 = vsel %vm12962_vm5, %v5275_v51, %v5276_v40  ;;  %v5278_v36 = vrot.slane %v5276_v40, 4  ;;  %v5260_v52 = vsel %vm12962_vm5, %v5258_v59, %v5259_v28  ;;  %v5261_v34 = vrot.slane %v5259_v28, 4 }
 0x576   : > { %5251 = vst [vmem:[#allocation3 + $0x38] sm:$0x3] %v5244_v63  ;;  %5284 = vst [vmem:[#allocation3 + $0x4c] sm:$0xf] %v5277_v13  ;;  %v5294_v11 = vsel %vm12962_vm5, %v5292_v41, %v5293_v54  ;;  %v5295_v8 = vrot.slane %v5293_v54, 4  ;;  %vm12649_vm5 = vmmov 0  }
 0x577   : > { %5267 = vst [vmem:[#allocation3 + $0x40] sm:$0xf] %v5260_v52  ;;  %5285 = vst [vmem:[#allocation3 + $0x50] sm:$0x3] %v5278_v36 }
 0x578   : > { %5268 = vst [vmem:[#allocation3 + $0x44] sm:$0x3] %v5261_v34  ;;  %5301 = vst [vmem:[#allocation3 + $0x58] sm:$0xf] %v5294_v11  ;;  %v5331_v2 = vld [vmem:[#allocation3 + $0x30] sm:$0xf] }
 0x579   : > { %5302 = vst [vmem:[#allocation3 + $0x5c] sm:$0x3] %v5295_v8  ;;  %v5363_v49 = vld [vmem:[#allocation3 + $0x30] sm:$0xc]  ;;  %v5334_v39 = vld [vmem:[#allocation3 + $0x3c] sm:$0xf] }
 0x57a   : > { %v5364_v42 = vld [vmem:[#allocation3 + $0x3c] sm:$0xc]  ;;  %v5381_v19 = vld [vmem:[#allocation3 + $0x48] sm:$0x8] }
 0x57b   : > { %v14565_v31 = vld [vmem:[#allocation3 + $0x34] sm:$0xf] }
 0x57c   : > { %v10711_v15 = vcombine.low %v5331_v2, %v14565_v31  ;;  %v10739_v53 = vcombine.low %v5363_v49, %v14565_v31 }
 0x57d   : > { %v14568_v17 = vld [vmem:[#allocation3 + $0x38] ss:$0 sps:$4 sm:$0x11]  }
 0x57e   : > { %v14571_v25 = vld [vmem:[#allocation3 + $0x38] ss:$0 sps:$4 sm:$0x77]   ;;  %v5552_v47 = vshrl.u32 %v10711_v15, 16  ;;  %v5554_v18 = vshll.u32 %v10711_v15, 16  ;;  %v5559_v7 = vshll.u32 %v14568_v17, 16 }
 0x57f   : > { %v5980_v21 = vshrl.u32 %v10739_v53, 16  ;;  %v14574_v50 = vld [vmem:[#allocation3 + $0x40] sm:$0xf]  ;;  %v5983_v22 = vshll.u32 %v10739_v53, 16  ;;  %v5988_v4 = vshrl.u32 %v14571_v25, 16  ;;  %v5991_v27 = vshll.u32 %v14571_v25, 16 }
 0x580   : > { %v10713_v23 = vcombine.low %v5334_v39, %v14574_v50  ;;  %v5556_v61 = vrot.slane %v5554_v18, 1  ;;  %v5561_v51 = vrot.slane %v5559_v7, 1  ;;  %v14579_v40 = vld [vmem:[#allocation3 + $0x44] ss:$0 sps:$4 sm:$0x11]   ;;  %v14582_v28 = vcombine.low %v5364_v42, %v14574_v50  ;;  %v12223_v18 = vld [vmem:[#allocation3 + $0x30] sm:$0xff]  }
 0x581   : > { %v5982_v59 = vrot.slane %v5980_v21, 2  ;;  %v5985_v41 = vrot.slane %v5983_v22, 3  ;;  %v5990_v37 = vrot.slane %v5988_v4, 2  ;;  %v5993_v63 = vrot.slane %v5991_v27, 3  ;;  %v5337_v39 = vld [vmem:[#allocation3 + $0x48] sm:$0xf] }
 0x582   : > { %v5564_v54 = vshrl.u32 %v10713_v23, 16  ;;  %v5557_v13 = vor.u32 %v5556_v61, %v5552_v47  ;;  %v5566_v36 = vshll.u32 %v10713_v23, 16  ;;  %v5571_v52 = vshll.u32 %v14579_v40, 16  ;;  %v14585_v34 = vld [vmem:[#allocation3 + $0x38] ss:$0 sps:$4 sm:$0x33]  }
 0x583   : > { %v5867_v11 = vrot.slane %v10739_v53, 2  ;;  %v5986_v8 = vor.u32 %v5985_v41, %v5982_v59  ;;  %v5994_v2 = vor.u32 %v5993_v63, %v5990_v37  ;;  %v14587_v49 = vld [vmem:[#allocation3 + $0x44] ss:$0 sps:$4 sm:$0x77]   ;;  %v5997_v15 = vshrl.u32 %v14582_v28, 16 }
 0x584   : > { %v5562_v42 = vsel %vm1434_vm10, %v5557_v13, %v5561_v51  ;;  %v5568_v7 = vrot.slane %v5566_v36, 1  ;;  %v5573_v21 = vrot.slane %v5571_v52, 1  ;;  %v5868_v47 = vrot.slane %v14585_v34, 2  ;;  %v5365_v22 = vld [vmem:[#allocation3 + $0x48] sm:$0xc] }
 0x585   : > { %6942 = vmatprep.mubr.bf16.mxu1 %v5562_v42  ;;  %v5995_v4 = vsel %vm1846_vm14, %v5986_v8, %v5994_v2  ;;  %v5999_v27 = vrot.slane %v5997_v15, 2  ;;  %v6000_v53 = vshll.u32 %v14582_v28, 16  ;;  %v6005_v23 = vshrl.u32 %v14587_v49, 16  ;;  %v14595_v61 = vld [vmem:[#allocation3 + $0x4c] sm:$0xf] }
 0x586   : > { %6943 = vmatmul.mubr.bf16.gmra.mrb[96].mxu1 %v12223_v18  ;;  %7136 = vmatprep.mubr.bf16.mxu0 %v5995_v4  ;;  %v5569_v59 = vor.u32 %v5568_v7, %v5564_v54  ;;  %v5869_v51 = vsel %vm1797_vm12, %v5867_v11, %v5868_v47  ;;  %v6008_v41 = vshll.u32 %v14587_v49, 16  ;;  %v10715_v37 = vcombine.low %v5337_v39, %v14595_v61  ;;  %v14600_v63 = vld [vmem:[#allocation3 + $0x50] ss:$0 sps:$4 sm:$0x11]  }
 0x587   : > { %7137 = vmatmul.mubr.bf16.gmra.mrb[40].mxu0 %v5869_v51  ;;  %v6002_v13 = vrot.slane %v6000_v53, 3  ;;  %v6007_v36 = vrot.slane %v6005_v23, 2  ;;  %v5870_v52 = vrot.slane %v14582_v28, 2  ;;  %v14604_v8 = vcombine.low %v5365_v22, %v14595_v61  ;;  %v14607_v11 = vld [vmem:[#allocation3 + $0x44] ss:$0 sps:$4 sm:$0x33]  }
 0x588   : > { %v5574_v2 = vsel %vm1434_vm10, %v5569_v59, %v5573_v21  ;;  %v6010_v15 = vrot.slane %v6008_v41, 3  ;;  %v5576_v54 = vshrl.u32 %v10715_v37, 16  ;;  %v5578_v42 = vshll.u32 %v10715_v37, 16  ;;  %v14610_v7 = vld [vmem:[#allocation3 + $0x50] ss:$0 sps:$4 sm:$0x77]  }
 0x589   : > { %6950 = vmatprep.mubr.bf16.mxu1 %v5574_v2  ;;  %v6003_v18 = vor.u32 %v6002_v13, %v5999_v27  ;;  %v5583_v39 = vshll.u32 %v14600_v63, 16  ;;  %v5871_v28 = vrot.slane %v14607_v11, 2  ;;  %v6014_v22 = vshrl.u32 %v14604_v8, 16  ;;  %v12235_v53 = vld [vmem:[#allocation3 + $0x3c] sm:$0xff]   ;;  %v5340_v51 = vld [vmem:[#allocation3 + $0x54] sm:$0xf] }
 0x58a   : > { %v6011_v47 = vor.u32 %v6010_v15, %v6007_v36  ;;  %v5580_v4 = vrot.slane %v5578_v42, 1  ;;  %v6017_v21 = vshll.u32 %v14604_v8, 16  ;;  %v6022_v23 = vshrl.u32 %v14610_v7, 16  ;;  %v14618_v2 = vld [vmem:[#allocation3 + $0x58] sm:$0xf] }
 0x58b   : > { %v6025_v59 = vshll.u32 %v14610_v7, 16  ;;  %v5585_v37 = vrot.slane %v5583_v39, 1  ;;  %v6016_v13 = vrot.slane %v6014_v22, 2  ;;  %v10717_v57 = vcombine.low %v5340_v51, %v14618_v2  ;;  %v14621_v43 = vld [vmem:[#allocation3 + $0x5c] ss:$0 sps:$4 sm:$0x11]  }
 0x58c   : > { %v6012_v27 = vsel %vm1846_vm14, %v6003_v18, %v6011_v47  ;;  %v5581_v41 = vor.u32 %v5580_v4, %v5576_v54  ;;  %v6019_v36 = vrot.slane %v6017_v21, 3  ;;  %v6024_v15 = vrot.slane %v6022_v23, 2  ;;  %v14625_v30 = vld [vmem:[#allocation3 + $0x50] ss:$0 sps:$4 sm:$0x33]  }
 0x58d   : > { %7144 = vmatprep.mubr.bf16.mxu0 %v6012_v27  ;;  %v6027_v42 = vrot.slane %v6025_v59, 3  ;;  %v5872_v14 = vsel %vm1797_vm12, %v5870_v52, %v5871_v28  ;;  %v5590_v39 = vshll.u32 %v10717_v57, 16  ;;  %v5366_v47 = vld [vmem:[#allocation3 + $0x54] sm:$0xc]  ;;  %v5595_v4 = vshll.u32 %v14621_v43, 16 }
 0x58e   : > { %6951 = vmatmul.mubr.bf16.gmra.mrb[100].mxu1 %v12235_v53  ;;  %v5586_v16 = vsel %vm1434_vm10, %v5581_v41, %v5585_v37  ;;  %v6020_v54 = vor.u32 %v6019_v36, %v6016_v13  ;;  %v10742_v22 = vcombine.low %v5366_v47, %v14618_v2  ;;  %v14629_v21 = vld [vmem:[#allocation3 + $0x5c] ss:$0 sps:$4 sm:$0x77]   ;;  %v5588_v23 = vshrl.u32 %v10717_v57, 16  ;;  %v12245_v37 = vld [vmem:[#allocation3 + $0x48] sm:$0xff]  }
 0x58f   : > { %6958 = vmatprep.mubr.bf16.mxu1 %v5586_v16  ;;  %7145 = vmatmul.mubr.bf16.gmra.mrb[44].mxu0 %v5872_v14  ;;  %v6028_v18 = vor.u32 %v6027_v42, %v6024_v15  ;;  %v5592_v59 = vrot.slane %v5590_v39, 1  ;;  %v5873_v52 = vrot.slane %v14604_v8, 2  ;;  %v5874_v16 = vrot.slane %v14625_v30, 2  ;;  %v14638_v39 = vld [vmem:[#allocation3 + $0x5c] ss:$0 sps:$4 sm:$0x33]  }
 0x590   : > { %v6031_v14 = vshrl.u32 %v10742_v22, 16  ;;  %v6034_v28 = vshll.u32 %v10742_v22, 16  ;;  %v6039_v27 = vshrl.u32 %v14629_v21, 16  ;;  %v6042_v41 = vshll.u32 %v14629_v21, 16 }
 0x591   : > { %v6029_v53 = vsel %vm1846_vm14, %v6020_v54, %v6028_v18  ;;  %v5593_v51 = vor.u32 %v5592_v59, %v5588_v23  ;;  %v5597_v13 = vrot.slane %v5595_v4, 1  ;;  %v5875_v8 = vsel %vm1797_vm12, %v5873_v52, %v5874_v16  ;;  %v14642_v59 = vld [vmem:[#allocation3 + $0x8] sm:$0xf]  ;;  %v12548_v16 = vld [vmem:[#allocation3 + $0x4] sm:$0xf] }
 0x592   : > { %7152 = vmatprep.mubr.bf16.mxu0 %v6029_v53  ;;  %v6033_v36 = vrot.slane %v6031_v14, 2  ;;  %v6036_v15 = vrot.slane %v6034_v28, 3  ;;  %v6041_v42 = vrot.slane %v6039_v27, 2  ;;  %v6044_v54 = vrot.slane %v6042_v41, 3  ;;  %v12255_v14 = vld [vmem:[#allocation3 + $0x54] sm:$0xff]  }
 0x593   : > { %v5598_v57 = vsel %vm1434_vm10, %v5593_v51, %v5597_v13  ;;  %v5876_v23 = vrot.slane %v10742_v22, 2  ;;  %v5877_v4 = vrot.slane %v14638_v39, 2  ;;  %v14644_v28 = vld [vmem:[#allocation3 + $0x38] sm:$0xf]  ;;  %v10767_v51 = vcombine.low %v12548_v16, %v14642_v59  ;;  %v5349_v27 = vld [vmem:[#allocation3 + $0x48] sm:$0xe] }
 0x594   : > { %v6037_v18 = vor.u32 %v6036_v15, %v6033_v36  ;;  %v6045_v47 = vor.u32 %v6044_v54, %v6041_v42  ;;  %v14649_v41 = vld [vmem:[#allocation3 + $0x14] sm:$0xf]  ;;  %v10763_v22 = vcombine.low %v14644_v28, %v14644_v28  ;;  %v14656_v13 = vcombine.low %v5349_v27, %v14595_v61  ;;  %v14658_v36 = vld [vmem:[#allocation3 + $0x50] sm:$0xf] }
 0x595   : > { %v5878_v52 = vsel %vm1797_vm12, %v5876_v23, %v5877_v4  ;;  %15671 = vst [vmem:[#allocation35_spill] sm:$0xff] %v14649_v41  ;;  %v12549_v15 = vld [vmem:[#allocation3 + $0x10] sm:$0xf]  ;;  %v5764_v54 = vshrl.u32 %v14585_v34, 16  ;;  %v5350_v4 = vld [vmem:[#allocation3 + $0x54] sm:$0xe]  ;;  %v14675_v16 = vcombine.low %v14658_v36, %v14658_v36 }
 0x596   : > { %6959 = vmatmul.mubr.bf16.gmra.mrb[104].mxu1 %v12245_v37  ;;  %v6046_v53 = vsel %vm1846_vm14, %v6037_v18, %v6045_v47  ;;  %v14653_v37 = vld [vmem:[#allocation3 + $0x44] sm:$0xf]  ;;  %v10768_v42 = vcombine.low %v12549_v15, %v14649_v41  ;;  %v6212_v47 = vshrl.u32 %v10763_v22, 16  ;;  %v5649_v23 = vrot.slane %v14656_v13, 1  ;;  %v12275_v15 = vld [vmem:[%s12719_s30 + $0x1c8] sm:$0xff]  }
 0x597   : > { %6966 = vmatprep.mubr.bf16.mxu1 %v5598_v57  ;;  %7153 = vmatmul.mubr.bf16.gmra.mrb[48].mxu0 %v5875_v8  ;;  %v10769_v8 = vcombine.low %v14390_v20, %v14486_v46  ;;  %v5650_v27 = vrot.slane %v14600_v63, 1  ;;  %v14679_v20 = vcombine.low %v5350_v4, %v14618_v2  ;;  %v12285_v63 = vld [vmem:[%s12709_s19 + $0x8] sm:$0xff]   ;;  %v14692_v55 = vrot.slane %v5764_v54, 1  ;;  %v5379_v57 = vld [vmem:[#allocation3 + $0x30] sm:$0x8] }
 0x598   : > { %7160 = vmatprep.mubr.bf16.mxu0 %v6046_v53  ;;  %v14669_v53 = vld [vmem:[#allocation3 + $0x5c] sm:$0xf]  ;;  %v6214_v32 = vrot.slane %v6212_v47, 3  ;;  %v6095_v41 = vrot.slane %v14587_v49, 3 }
 0x599   : > { %v14696_v4 = vcombine.low %v14669_v53, %v14669_v53  ;;  %v14699_v46 = vsel %vm1571_vm8, %v5649_v23, %v5650_v27  ;;  %v5652_v54 = vrot.slane %v14679_v20, 1  ;;  %v6246_v23 = vshrl.u32 %v14675_v16, 16 }
 0x59a   : > { %15672 = vst [vmem:[#allocation45_spill] sm:$0xff] %v14699_v46  ;;  %v6249_v27 = vshll.u32 %v14675_v16, 16 }
 0x59b   : > { %v6266_v47 = vshll.u32 %v14696_v4, 16  ;;  %v6248_v49 = vrot.slane %v6246_v23, 3 }
 0x59e   : > { %6967 = vmatmul.mubr.bf16.gmra.mrb[108].mxu1 %v12255_v14  ;;  %v12269_v14 = vld [vmem:[%s12719_s30 + $0x180] sm:$0xff]  }
 0x59f   : > { %7007 = vmatprep.mubr.bf16.mxu1 %v14471_v56  ;;  %7161 = vmatmul.mubr.bf16.gmra.mrb[52].mxu0 %v5878_v52  ;;  %v10764_v56 = vcombine.low %v14653_v37, %v14653_v37  ;;  %v6215_v52 = vshll.u32 %v10763_v22, 16  ;;  %v5653_v22 = vrot.slane %v14621_v43, 1 }
 0x5a0   : > { %11659 = vmatprep.mubr.bf16.mxu0 %v10767_v51  ;;  %v5347_v51 = vld [vmem:[#allocation3 + $0x30] sm:$0xe] }
 0x5a1   : > { %v14687_v18 = vcombine.low %v5347_v51, %v14565_v31  ;;  %v6229_v45 = vshrl.u32 %v10764_v56, 16  ;;  %v6232_v43 = vshll.u32 %v10764_v56, 16  ;;  %v10755_v51 = vcombine.low %v5379_v57, %v14565_v31 }
 0x5a2   : > { %v6217_v48 = vrot.slane %v6215_v52, 4  ;;  %v14715_v57 = vsel %vm1571_vm8, %v5652_v54, %v5653_v22  ;;  %v12284_v22 = vld [vmem:[%s12719_s30 + $0x190] sm:$0xff]  }
 0x5a3   : > { %15673 = vst [vmem:[#allocation50_spill] sm:$0xff] %v14715_v57  ;;  %v6207_v52 = vshll.u32 %v10755_v51, 16  ;;  %v6091_v16 = vrot.slane %v10755_v51, 3  ;;  %v6231_v56 = vrot.slane %v6229_v45, 3  ;;  %v6234_v12 = vrot.slane %v6232_v43, 4 }
 0x5a4   : > { %v6218_v57 = vor.u32 %v6217_v48, %v6214_v32  ;;  %v10757_v48 = vcombine.low %v5381_v19, %v14595_v61 }
 0x5a5   : > { %v6209_v54 = vrot.slane %v6207_v52, 4  ;;  %v6235_v32 = vor.u32 %v6234_v12, %v6231_v56  ;;  %v12291_v12 = vld [vmem:[%s12719_s30 + $0x198] sm:$0xff]  }
 0x5a6   : > { %7008 = vmatmul.mubr.bf16.vlgmr.msra.gmra.mrb[112].mxu1 %v14463_v26  ;;  %v12289_v26 = vld [vmem:[%s12709_s19 + $0x10] sm:$0xff]   ;;  %v6241_v23 = vshll.u32 %v10757_v48, 16 }
 0x5a7   : > { %7015 = vmatprep.mubr.bf16.mxu1 %v14484_v35  ;;  %11660 = vmatmul.mubr.bf16.vlgmr.msra.gmra.mrb[56].mxu0 %v10768_v42  ;;  %v12283_v35 = vld [vmem:[%s12719_s30 + $0x1d0] sm:$0xff]   ;;  %v6092_v42 = vrot.slane %v14571_v25, 3 }
 0x5a8   : > { %11663 = vmatprep.mubr.bf16.mxu0 %v10769_v8  ;;  %11423 = vmatpush3.bf16.msra.mxu1 %v12269_v14  ;;  %v6204_v8 = vshrl.u32 %v10755_v51, 16  ;;  %v6263_v14 = vshrl.u32 %v14696_v4, 16  ;;  %v12290_v4 = vld [vmem:[%s12719_s30 + $0x1d8] sm:$0xff]   ;;  %v6243_v52 = vrot.slane %v6241_v23, 4 }
 0x5a9   : > { %11424 = vmatprep.subr.bf16.mxu1 %v12275_v15  ;;  %11676 = vmatpush3.bf16.msra.mxu0 %v14543_v33  ;;  %v5380_v33 = vld [vmem:[#allocation3 + $0x3c] sm:$0x8]  ;;  %v14725_v51 = vsel %vm2023_vm13, %v6091_v16, %v6092_v42  ;;  %v15675_v42 = vcombine.low %v14565_v31, %v14644_v28 }
 0x5aa   : > { %11677 = vmatprep.subr.bf16.mxu0 %v12285_v63  ;;  %v6206_v15 = vrot.slane %v6204_v8, 3  ;;  %v10756_v0 = vcombine.low %v5380_v33, %v14574_v50  ;;  %v6265_v16 = vrot.slane %v6263_v14, 3  ;;  %v15677_v14 = vshrl.u32 %v14687_v18, 16 }
 0x5ac   : > { %11425 = vmatpush3.bf16.msra.mxu1 %v12276_v38  ;;  %v6221_v8 = vshrl.u32 %v10756_v0, 16  ;;  %v6224_v46 = vshll.u32 %v10756_v0, 16  ;;  %v6094_v25 = vrot.slane %v10756_v0, 3  ;;  %v12292_v38 = vld [vmem:[%s12709_s19 + $0x18] sm:$0xff]   ;;  %v6210_v45 = vor.u32 %v6209_v54, %v6206_v15 }
 0x5ad   : > { %11426 = vmatprep.subr.bf16.mxu1 %v12283_v35  ;;  %11678 = vmatpush3.bf16.msra.mxu0 %v12285_v63  ;;  %v15674_v63 = vcombine.low %v14417_v62, %v14505_v9  ;;  %v6097_v62 = vrot.slane %v10757_v48, 3  ;;  %v5382_v9 = vld [vmem:[#allocation3 + $0x54] sm:$0x8]  ;;  %v15676_v54 = vshll.u32 %v14585_v34, 16  ;;  %v15678_v34 = vshll.u32 %v14687_v18, 16 }
 0x5ae   : > { %7016 = vmatmul.mubr.bf16.gmra.mrb[116].mxu1 %v14480_v29  ;;  %11679 = vmatprep.subr.bf16.mxu0 %v12289_v26  ;;  %v6223_v43 = vrot.slane %v6221_v8, 3  ;;  %v6226_v0 = vrot.slane %v6224_v46, 4  ;;  %v14735_v35 = vsel %vm2023_vm13, %v6094_v25, %v6095_v41  ;;  %v6251_v29 = vrot.slane %v6249_v27, 4  ;;  %v12294_v46 = vld [vmem:[%s12719_s30 + $0x1e0] sm:$0xff]  }
 0x5af   : > { %7023 = vmatprep.mubr.bf16.mxu1 %v14503_v1  ;;  %11664 = vmatmul.mubr.bf16.gmra.mrb[60].mxu0 %v15674_v63  ;;  %v14742_v19 = vsel %vm2072_vm11, %v6210_v45, %v6218_v57  ;;  %v6238_v1 = vshrl.u32 %v10757_v48, 16  ;;  %v6098_v27 = vrot.slane %v14610_v7, 3  ;;  %v10758_v31 = vcombine.low %v5382_v9, %v14618_v2  ;;  %v12295_v7 = vld [vmem:[%s12719_s30 + $0x1a0] sm:$0xff]   ;;  %v12297_v48 = vld [vmem:[%s12719_s30 + $0x1e8] sm:$0xff]   ;;  %v12300_v9 = vld [vmem:[%s12719_s30 + $0x1f0] sm:$0xff]  }
 0x5b0   : > { %11667 = vmatprep.mubr.bf16.mxu0 %v15675_v42  ;;  %11427 = vmatpush3.bf16.msra.mxu1 %v12284_v22  ;;  %v6227_v41 = vor.u32 %v6226_v0, %v6223_v43  ;;  %v6252_v56 = vor.u32 %v6251_v29, %v6248_v49  ;;  %v6268_v57 = vrot.slane %v6266_v47, 4  ;;  %v6101_v45 = vrot.slane %v14629_v21, 3 }
 0x5b1   : > { %11680 = vmatpush3.bf16.msra.mxu0 %v12289_v26  ;;  %11428 = vmatprep.subr.bf16.mxu1 %v12290_v4  ;;  %v6240_v28 = vrot.slane %v6238_v1, 3  ;;  %v14751_v26 = vsel %vm2023_vm13, %v6097_v62, %v6098_v27  ;;  %v6255_v15 = vshrl.u32 %v10758_v31, 16  ;;  %v6258_v22 = vshll.u32 %v10758_v31, 16  ;;  %v12298_v1 = vld [vmem:[%s12719_s30 + $0x1a8] sm:$0xff]  }
 0x5b2   : > { %11681 = vmatprep.subr.bf16.mxu0 %v12292_v38  ;;  %v14748_v33 = vsel %vm2072_vm11, %v6227_v41, %v6235_v32  ;;  %v5769_v4 = vrot.slane %v15676_v54, 2  ;;  %v6100_v25 = vrot.slane %v10758_v31, 3  ;;  %v5758_v47 = vrot.slane %v15677_v14, 1  ;;  %v5348_v32 = vld [vmem:[#allocation3 + $0x3c] sm:$0xe] }
 0x5b3   : > { %v6244_v8 = vor.u32 %v6243_v52, %v6240_v28  ;;  %v6257_v49 = vrot.slane %v6255_v15, 3  ;;  %v6260_v63 = vrot.slane %v6258_v22, 4  ;;  %v6269_v43 = vor.u32 %v6268_v57, %v6265_v16 }
 0x5b4   : > { %11429 = vmatpush3.bf16.msra.mxu1 %v12291_v12  ;;  %v5761_v0 = vrot.slane %v15678_v34, 2  ;;  %v14764_v29 = vcombine.low %v5348_v32, %v14574_v50  ;;  %v15679_v42 = vcombine.low %v14574_v50, %v14653_v37  ;;  %v15680_v12 = vcombine.low %v14595_v61, %v14658_v36  ;;  %v12301_v36 = vld [vmem:[%s12719_s30 + $0x1b0] sm:$0xff]  }
 0x5b5   : > { %11682 = vmatpush3.bf16.msra.mxu0 %v12292_v38  ;;  %11430 = vmatprep.subr.bf16.mxu1 %v12294_v46  ;;  %v14767_v21 = vsel %vm2072_vm11, %v6244_v8, %v6252_v56  ;;  %v14770_v38 = vsel %vm2023_vm13, %v6100_v25, %v6101_v45  ;;  %v5770_v23 = vor.u32 %v5769_v4, %v14692_v55  ;;  %v5781_v62 = vshrl.u32 %v14607_v11, 16  ;;  %v12303_v56 = vld [vmem:[%s12719_s30 + $0x1f8] sm:$0xff]  }
 0x5b6   : > { %7024 = vmatmul.mubr.bf16.gmra.mrb[120].mxu1 %v14498_v5  ;;  %v6261_v5 = vor.u32 %v6260_v63, %v6257_v49  ;;  %v5762_v50 = vor.u32 %v5761_v0, %v5758_v47  ;;  %v5773_v37 = vshrl.u32 %v14764_v29, 16  ;;  %v5776_v46 = vshll.u32 %v14764_v29, 16  ;;  %v15681_v0 = vld [vmem:[#allocation52_spill] sm:$0xff] }
 0x5b7   : > { %7031 = vmatprep.mubr.bf16.mxu1 %v14519_v44  ;;  %11668 = vmatmul.mubr.bf16.gmra.mrb[64].mxu0 %v15679_v42  ;;  %v5784_v61 = vshll.u32 %v14607_v11, 16  ;;  %v10774_v55 = vcombine.low %v14618_v2, %v14669_v53  ;;  %v5783_v41 = vrot.slane %v5781_v62, 1  ;;  %v12304_v11 = vld [vmem:[%s12719_s30 + $0x1b8] sm:$0xff]   ;;  %v5643_v16 = vrot.slane %v14687_v18, 1 }
 0x5b8   : > { %11671 = vmatprep.mubr.bf16.mxu0 %v15680_v12  ;;  %11431 = vmatpush3.bf16.msra.mxu1 %v12295_v7  ;;  %v14784_v44 = vsel %vm2072_vm11, %v6261_v5, %v6269_v43  ;;  %v5771_v27 = vsel %vm1620_vm9, %v5762_v50, %v5770_v23  ;;  %v5775_v31 = vrot.slane %v5773_v37, 1  ;;  %v5778_v28 = vrot.slane %v5776_v46, 2  ;;  %v15685_v46 = vld [vmem:[#allocation51_spill] sm:$0xff] }
 0x5b9   : > { %11432 = vmatprep.subr.bf16.mxu1 %v12297_v48  ;;  %v5786_v52 = vrot.slane %v5784_v61, 2  ;;  %v5644_v2 = vrot.slane %v14568_v17, 1  ;;  %v5790_v53 = vshrl.u32 %v14656_v13, 16  ;;  %v5798_v22 = vshrl.u32 %v14625_v30, 16 }
 0x5ba   : > { %v5779_v57 = vor.u32 %v5778_v28, %v5775_v31  ;;  %v5801_v54 = vshll.u32 %v14625_v30, 16  ;;  %v5647_v30 = vrot.slane %v14579_v40, 1  ;;  %v5815_v45 = vshrl.u32 %v14638_v39, 16 }
 0x5bb   : > { %v5787_v15 = vor.u32 %v5786_v52, %v5783_v41  ;;  %v5792_v4 = vrot.slane %v5790_v53, 1  ;;  %v5800_v17 = vrot.slane %v5798_v22, 1  ;;  %v5807_v47 = vshrl.u32 %v14679_v20, 16  ;;  %v15686_v41 = vld [vmem:[#allocation46_spill] sm:$0xff] }
 0x5bc   : > { %11433 = vmatpush3.bf16.msra.mxu1 %v12298_v1  ;;  %v5803_v8 = vrot.slane %v5801_v54, 2  ;;  %v5810_v32 = vshll.u32 %v14679_v20, 16  ;;  %v5818_v48 = vshll.u32 %v14638_v39, 16  ;;  %v6156_v28 = vshll.u32 %v15686_v41, 16 }
 0x5bd   : > { %11434 = vmatprep.subr.bf16.mxu1 %v12300_v9  ;;  %v5788_v18 = vsel %vm1620_vm9, %v5779_v57, %v5787_v15  ;;  %v5809_v40 = vrot.slane %v5807_v47, 1  ;;  %v15682_v9 = vld [vmem:[#allocation45_spill] sm:$0xff] }
 0x5be   : > { %7032 = vmatmul.mubr.bf16.gmra.mrb[124].mxu1 %v14509_v60  ;;  %v5793_v60 = vshll.u32 %v14656_v13, 16  ;;  %v5646_v13 = vrot.slane %v14764_v29, 1  ;;  %v5804_v14 = vor.u32 %v5803_v8, %v5800_v17  ;;  %v5812_v43 = vrot.slane %v5810_v32, 2 }
 0x5bf   : > { %7039 = vmatprep.mubr.bf16.mxu1 %v5771_v27  ;;  %11672 = vmatmul.mubr.bf16.gmra.mrb[68].mxu0 %v10774_v55  ;;  %v5820_v34 = vrot.slane %v5818_v48, 2  ;;  %v6139_v29 = vshll.u32 %v15681_v0, 16  ;;  %v6158_v17 = vrot.slane %v6156_v28, 4 }
 0x5c0   : > { %11683 = vmatprep.mubr.msk.bf16.mxu0 %vm2233_vm7, %v13976_v6  ;;  %11435 = vmatpush3.bf16.msra.mxu1 %v12301_v36  ;;  %v5645_v6 = vsel %vm1571_vm8, %v5643_v16, %v5644_v2  ;;  %v5795_v7 = vrot.slane %v5793_v60, 2  ;;  %v5648_v49 = vsel %vm1571_vm8, %v5646_v13, %v5647_v30  ;;  %v5813_v42 = vor.u32 %v5812_v43, %v5809_v40  ;;  %v15688_v30 = vld [vmem:[#allocation48_spill] sm:$0xff] }
 0x5c1   : > { %11436 = vmatprep.subr.bf16.mxu1 %v12303_v56  ;;  %v6141_v1 = vrot.slane %v6139_v29, 4  ;;  %v6153_v56 = vshrl.u32 %v15686_v41, 16  ;;  %vm10117_vm8 = vcmask 253952  }
 0x5c2   : > { %v5796_v25 = vor.u32 %v5795_v7, %v5792_v4 }
 0x5c3   : > { %v6155_v4 = vrot.slane %v6153_v56, 3 }
 0x5c4   : > { %11437 = vmatpush3.bf16.msra.mxu1 %v12304_v11  ;;  %v5805_v63 = vsel %vm1620_vm9, %v5796_v25, %v5804_v14 }
 0x5c5   : > { %v6159_v47 = vor.u32 %v6158_v17, %v6155_v4 }
 0x5c6   : > { %7040 = vmatmul.mubr.bf16.gmra.mrb[128].mxu1 %v5645_v6 }
 0x5c7   : > { %7047 = vmatprep.mubr.bf16.mxu1 %v5788_v18  ;;  %11684 = vmatmul.mubr.msk.bf16.vlgmr.msra.gmra.mrb[56].mxu0 %vm2233_vm7, %v13993_v24  ;;  %v10759_v24 = vcombine.low %v14642_v59, %v14642_v59  ;;  %v6136_v59 = vshrl.u32 %v15681_v0, 16  ;;  %v15687_v18 = vld [vmem:[#allocation50_spill] sm:$0xff] }
 0x5c8   : > { %11687 = vmatprep.mubr.msk.bf16.mxu0 %vm2233_vm7, %v14021_v58  ;;  %v5817_v58 = vrot.slane %v5815_v45, 1 }
 0x5c9   : > { %v6144_v39 = vshrl.u32 %v10759_v24, 16  ;;  %v6147_v20 = vshll.u32 %v10759_v24, 16  ;;  %v6138_v12 = vrot.slane %v6136_v59, 3 }
 0x5ca   : > { %v5821_v5 = vor.u32 %v5820_v34, %v5817_v58 }
 0x5cb   : > { %v6146_v23 = vrot.slane %v6144_v39, 3  ;;  %v6149_v62 = vrot.slane %v6147_v20, 4  ;;  %v6142_v36 = vor.u32 %v6141_v1, %v6138_v12  ;;  %v15689_v20 = vld [vmem:[#allocation32_spill] sm:$0xff] }
 0x5cc   : > { %v5822_v50 = vsel %vm1620_vm9, %v5813_v42, %v5821_v5 }
 0x5cd   : > { %v6150_v55 = vor.u32 %v6149_v62, %v6146_v23 }
 0x5ce   : > { %7048 = vmatmul.mubr.bf16.gmra.mrb[132].mxu1 %v5648_v49 }
 0x5cf   : > { %7055 = vmatprep.mubr.bf16.mxu1 %v5805_v63  ;;  %11688 = vmatmul.mubr.msk.bf16.gmra.mrb[60].mxu0 %vm2233_vm7, %v14035_v3  ;;  %v15683_v3 = vld [vmem:[#allocation35_spill] sm:$0xff]  ;;  %v6151_v6 = vsel %vm2072_vm11, %v6142_v36, %v6150_v55 }
 0x5d0   : > { %11691 = vmatprep.mubr.msk.bf16.mxu0 %vm2233_vm7, %v14047_v10  ;;  %v10760_v37 = vcombine.low %v15683_v3, %v15683_v3  ;;  %v15684_v10 = vld [vmem:[#allocation53_spill] sm:$0xff] }
 0x5d2   : > { %v6161_v52 = vshrl.u32 %v10760_v37, 16  ;;  %v6164_v11 = vshll.u32 %v10760_v37, 16 }
 0x5d4   : > { %v6163_v8 = vrot.slane %v6161_v52, 3  ;;  %v6166_v13 = vrot.slane %v6164_v11, 4 }
 0x5d6   : > { %7056 = vmatmul.mubr.bf16.gmra.mrb[136].mxu1 %v15682_v9  ;;  %v6167_v32 = vor.u32 %v6166_v13, %v6163_v8 }
 0x5d7   : > { %7063 = vmatprep.mubr.bf16.mxu1 %v5822_v50  ;;  %11692 = vmatmul.mubr.msk.bf16.gmra.mrb[64].mxu0 %vm2233_vm7, %v15684_v10  ;;  %v15690_v10 = vld [vmem:[#allocation43_spill] sm:$0xff] }
 0x5d8   : > { %11695 = vmatprep.mubr.msk.bf16.mxu0 %vm2233_vm7, %v15685_v46  ;;  %v6168_v0 = vsel %vm2072_vm11, %v6159_v47, %v6167_v32  ;;  %v15691_v46 = vld [vmem:[#allocation33_spill] sm:$0xff] }
 0x5da   : > { %v11246_v61 = vpop.f32.mrb[80].mxu1 }
 0x5db   : > { %v11247_v27 = vpop.f32.mrb[81].mxu1  ;;  %v11374_v31 = vpop.f32.mrb[24].mxu0 }
 0x5dc   : > { %v14836_v16 = vadd.f32 %v11247_v27, %v11246_v61  ;;  %v11249_v2 = vpop.f32.mrb[82].mxu1  ;;  %v11375_v53 = vpop.f32.mrb[25].mxu0 }
 0x5dd   : > { %v14838_v60 = vadd.f32 %v11375_v53, %v11374_v31  ;;  %v11250_v57 = vpop.f32.mrb[83].mxu1  ;;  %v11377_v15 = vpop.f32.mrb[26].mxu0 }
 0x5de   : > { %v14840_v22 = vadd.f32 %v11250_v57, %v11249_v2  ;;  %v11378_v54 = vpop.f32.mrb[27].mxu0  ;;  %7064 = vmatmul.mubr.bf16.gmra.mrb[140].mxu1 %v15687_v18  ;;  %v15692_v57 = vld [vmem:[#allocation47_spill] sm:$0xff] }
 0x5df   : > { %v14843_v7 = vadd.f32 %v11378_v54, %v11377_v15  ;;  %7201 = vmatprep.mubr.bf16.mxu1 %v6151_v6  ;;  %11696 = vmatmul.mubr.msk.bf16.gmra.mrb[68].mxu0 %vm2233_vm7, %v15688_v30  ;;  %v15693_v15 = vld [vmem:[#allocation49_spill] sm:$0xff]  ;;  %v15694_v54 = vld [vmem:[#allocation44_spill] sm:$0xff] }
 0x5e2   : > { %v11252_v25 = vpop.f32.mrb[84].mxu1 }
 0x5e3   : > { %v11253_v45 = vpop.f32.mrb[85].mxu1  ;;  %v11380_v14 = vpop.f32.mrb[28].mxu0 }
 0x5e4   : > { %v14848_v48 = vadd.f32 %v11253_v45, %v11252_v25  ;;  %v11255_v24 = vpop.f32.mrb[86].mxu1  ;;  %v11381_v49 = vpop.f32.mrb[29].mxu0 }
 0x5e5   : > { %v14850_v58 = vadd.f32 %v11381_v49, %v11380_v14  ;;  %v11256_v63 = vpop.f32.mrb[87].mxu1  ;;  %v11383_v40 = vpop.f32.mrb[30].mxu0 }
 0x5e6   : > { %v14852_v43 = vadd.f32 %v11256_v63, %v11255_v24  ;;  %v11384_v34 = vpop.f32.mrb[31].mxu0  ;;  %7202 = vmatmul.mubr.bf16.vlgmr.msra.gmra.mrb[144].mxu1 %v15689_v20 }
 0x5e7   : > { %v14854_v39 = vadd.f32 %v11384_v34, %v11383_v40  ;;  %7209 = vmatprep.mubr.bf16.mxu1 %v6168_v0 }
 0x5ea   : > { %v11258_v59 = vpop.f32.mrb[88].mxu1 }
 0x5eb   : > { %v11259_v29 = vpop.f32.mrb[89].mxu1  ;;  %v11386_v42 = vpop.f32.mrb[32].mxu0 }
 0x5ec   : > { %v14858_v5 = vadd.f32 %v11259_v29, %v11258_v59  ;;  %v11261_v12 = vpop.f32.mrb[90].mxu1  ;;  %v11387_v1 = vpop.f32.mrb[33].mxu0 }
 0x5ed   : > { %v14860_v23 = vadd.f32 %v11387_v1, %v11386_v42  ;;  %v11262_v62 = vpop.f32.mrb[91].mxu1  ;;  %v11389_v9 = vpop.f32.mrb[34].mxu0 }
 0x5ee   : > { %v14862_v50 = vadd.f32 %v11262_v62, %v11261_v12  ;;  %v11390_v3 = vpop.f32.mrb[35].mxu0  ;;  %7210 = vmatmul.mubr.bf16.gmra.mrb[148].mxu1 %v15690_v10 }
 0x5ef   : > { %v14864_v37 = vadd.f32 %v11390_v3, %v11389_v9  ;;  %7217 = vmatprep.mubr.bf16.mxu1 %v15691_v46 }
 0x5f2   : > { %v11264_v61 = vpop.f32.mrb[92].mxu1 }
 0x5f3   : > { %v11265_v36 = vpop.f32.mrb[93].mxu1  ;;  %v11392_v55 = vpop.f32.mrb[36].mxu0 }
 0x5f4   : > { %v14868_v41 = vadd.f32 %v11265_v36, %v11264_v61  ;;  %v11267_v56 = vpop.f32.mrb[94].mxu1  ;;  %v11393_v27 = vpop.f32.mrb[37].mxu0 }
 0x5f5   : > { %v14870_v31 = vadd.f32 %v11393_v27, %v11392_v55  ;;  %v11268_v28 = vpop.f32.mrb[95].mxu1  ;;  %v11395_v52 = vpop.f32.mrb[38].mxu0 }
 0x5f6   : > { %v14872_v11 = vadd.f32 %v11268_v28, %v11267_v56  ;;  %v11396_v2 = vpop.f32.mrb[39].mxu0  ;;  %7218 = vmatmul.mubr.bf16.gmra.mrb[152].mxu1 %v15692_v57 }
 0x5f7   : > { %v14874_v53 = vadd.f32 %v11396_v2, %v11395_v52  ;;  %7225 = vmatprep.mubr.bf16.mxu1 %v15693_v15 }
 0x5fe   : > { %7226 = vmatmul.mubr.bf16.gmra.mrb[156].mxu1 %v15694_v54 }
 0x5ff   : > { %7233 = vmatprep.mubr.bf16.mxu1 %v14742_v19 }
 0x606   : > { %7234 = vmatmul.mubr.bf16.gmra.mrb[160].mxu1 %v14725_v51 }
 0x607   : > { %7241 = vmatprep.mubr.bf16.mxu1 %v14748_v33 }
 0x60e   : > { %7242 = vmatmul.mubr.bf16.gmra.mrb[164].mxu1 %v14735_v35 }
 0x60f   : > { %7249 = vmatprep.mubr.bf16.mxu1 %v14767_v21 }
 0x616   : > { %7250 = vmatmul.mubr.bf16.gmra.mrb[168].mxu1 %v14751_v26 }
 0x617   : > { %7257 = vmatprep.mubr.bf16.mxu1 %v14784_v44 }
 0x61e   : > { %7258 = vmatmul.mubr.bf16.gmra.mrb[172].mxu1 %v14770_v38 }
 0x659   : > { %v11270_v6 = vpop.f32.mrb[96].mxu1 }
 0x65a   : > { %v11271_v4 = vpop.f32.mrb[97].mxu1  ;;  %v11398_v18 = vpop.f32.mrb[40].mxu0 }
 0x65b   : > { %v14887_v17 = vadd.f32 %v11271_v4, %v11270_v6  ;;  %v11273_v19 = vpop.f32.mrb[98].mxu1  ;;  %v11399_v8 = vpop.f32.mrb[41].mxu0  ;;  %v14920_v6 = vld [vmem:[%s15695_s6] ss:$0 sm:$0xff]  ;;  %s15712_s6 = sld [smem:[#allocation25_spill]] }
 0x65c   : > { %v14889_v51 = vadd.f32 %v11399_v8, %v11398_v18  ;;  %v11274_v33 = vpop.f32.mrb[99].mxu1  ;;  %v11401_v13 = vpop.f32.mrb[42].mxu0 }
 0x65d   : > { %v14891_v35 = vadd.f32 %v11274_v33, %v11273_v19  ;;  %v11402_v21 = vpop.f32.mrb[43].mxu0  ;;  %v6913_v19 = vadd.f32 %v14836_v16, %v14920_v6  ;;  %v6921_v16 = vadd.f32 %v14848_v48, %v14920_v6 }
 0x65e   : > { %v14893_v30 = vadd.f32 %v11402_v21, %v11401_v13  ;;  %v6916_v21 = vadd.f32 %v14840_v22, %v14920_v6  ;;  %v6924_v22 = vadd.f32 %v14852_v43, %v14920_v6 }
 0x661   : > { %v11276_v26 = vpop.f32.mrb[100].mxu1 }
 0x662   : > { %v11277_v44 = vpop.f32.mrb[101].mxu1  ;;  %v11404_v25 = vpop.f32.mrb[44].mxu0 }
 0x663   : > { %v14895_v38 = vadd.f32 %v11277_v44, %v11276_v26  ;;  %v11279_v45 = vpop.f32.mrb[102].mxu1  ;;  %v11405_v14 = vpop.f32.mrb[45].mxu0 }
 0x664   : > { %v14897_v47 = vadd.f32 %v11405_v14, %v11404_v25  ;;  %v11280_v32 = vpop.f32.mrb[103].mxu1  ;;  %v11407_v24 = vpop.f32.mrb[46].mxu0 }
 0x665   : > { %v14899_v49 = vadd.f32 %v11280_v32, %v11279_v45  ;;  %v11408_v63 = vpop.f32.mrb[47].mxu0 }
 0x666   : > { %v14901_v40 = vadd.f32 %v11408_v63, %v11407_v24  ;;  %v12313_v63 = vld [vmem:[%s15696_s26] sm:$0xff]  }
 0x667   : > { %11715 = vmatprep.mubr.bf16.mxu1 %v12313_v63 }
 0x669   : > { %v11282_v34 = vpop.f32.mrb[104].mxu1 }
 0x66a   : > { %v11283_v20 = vpop.f32.mrb[105].mxu1  ;;  %v11410_v0 = vpop.f32.mrb[48].mxu0 }
 0x66b   : > { %v14903_v59 = vadd.f32 %v11283_v20, %v11282_v34  ;;  %v11285_v29 = vpop.f32.mrb[106].mxu1  ;;  %v11411_v42 = vpop.f32.mrb[49].mxu0 }
 0x66c   : > { %v14905_v12 = vadd.f32 %v11411_v42, %v11410_v0  ;;  %v11286_v1 = vpop.f32.mrb[107].mxu1  ;;  %v11413_v62 = vpop.f32.mrb[50].mxu0 }
 0x66d   : > { %v14907_v9 = vadd.f32 %v11286_v1, %v11285_v29  ;;  %v11414_v3 = vpop.f32.mrb[51].mxu0 }
 0x66e   : > { %v14909_v10 = vadd.f32 %v11414_v3, %v11413_v62  ;;  %v6929_v3 = vadd.f32 %v14858_v5, %v14920_v6  ;;  %v12320_v5 = vld [vmem:[%s15697_s1 + $0x10] ss:$8 sps:$4 sm:$0xff]  }
 0x671   : > { %v11288_v46 = vpop.f32.mrb[108].mxu1 }
 0x672   : > { %v11289_v61 = vpop.f32.mrb[109].mxu1  ;;  %v11416_v36 = vpop.f32.mrb[52].mxu0 }
 0x673   : > { %v14911_v55 = vadd.f32 %v11289_v61, %v11288_v46  ;;  %v11291_v56 = vpop.f32.mrb[110].mxu1  ;;  %v11417_v27 = vpop.f32.mrb[53].mxu0 }
 0x674   : > { %v14913_v28 = vadd.f32 %v11417_v27, %v11416_v36  ;;  %v11292_v52 = vpop.f32.mrb[111].mxu1  ;;  %v11419_v2 = vpop.f32.mrb[54].mxu0  ;;  %v6932_v36 = vadd.f32 %v14862_v50, %v14920_v6  ;;  %v12325_v50 = vld [vmem:[%s15697_s1 + $0x24] ss:$8 sps:$4 sm:$0xff]  }
 0x675   : > { %v14915_v57 = vadd.f32 %v11292_v52, %v11291_v56  ;;  %v11420_v15 = vpop.f32.mrb[55].mxu0  ;;  %v12319_v52 = vld [vmem:[%s15697_s1 + $0x4] ss:$8 sps:$4 sm:$0xff]  }
 0x676   : > { %v14917_v54 = vadd.f32 %v11420_v15, %v11419_v2  ;;  %v12322_v2 = vld [vmem:[%s15697_s1 + $0x14] ss:$8 sps:$4 sm:$0xff]   ;;  %8452 = vmatprep.subr.bf16.mxu0 %v12319_v52 }
 0x679   : > { %v11310_v4 = vpop.f32.mrb[112].mxu1 }
 0x67a   : > { %v11311_v18 = vpop.f32.mrb[113].mxu1 }
 0x67b   : > { %v11312_v8 = vadd.f32 %v11311_v18, %v11310_v4  ;;  %v11313_v33 = vpop.f32.mrb[114].mxu1 }
 0x67c   : > { %v11314_v13 = vpop.f32.mrb[115].mxu1 }
 0x67d   : > { %v7010_v26 = vadd.f32 %v11312_v8, %v6913_v19  ;;  %v11315_v44 = vadd.f32 %v11314_v13, %v11313_v33  ;;  %v6937_v8 = vadd.f32 %v14868_v41, %v14920_v6  ;;  %v12326_v41 = vld [vmem:[%s15697_s1 + $0x30] ss:$8 sps:$4 sm:$0xff]  }
 0x67f   : > { %v7013_v25 = vadd.f32 %v11315_v44, %v6916_v21  ;;  %v14927_v45 = vadd.f32 %v14838_v60, %v7010_v26  ;;  %v12323_v21 = vld [vmem:[%s15697_s1 + $0x20] ss:$8 sps:$4 sm:$0xff]   ;;  %v6940_v26 = vadd.f32 %v14872_v11, %v14920_v6 }
 0x681   : > { %v11316_v14 = vpop.f32.mrb[116].mxu1  ;;  %v14930_v32 = vadd.f32 %v14843_v7, %v7013_v25 }
 0x682   : > { %v11317_v24 = vpop.f32.mrb[117].mxu1 }
 0x683   : > { %v11318_v34 = vadd.f32 %v11317_v24, %v11316_v14  ;;  %v11319_v20 = vpop.f32.mrb[118].mxu1 }
 0x684   : > { %v11320_v0 = vpop.f32.mrb[119].mxu1 }
 0x685   : > { %v7018_v60 = vadd.f32 %v11318_v34, %v6921_v16  ;;  %v11321_v29 = vadd.f32 %v11320_v0, %v11319_v20  ;;  %v12331_v34 = vld [vmem:[%s15697_s1 + $0x44] ss:$8 sps:$4 sm:$0xff]   ;;  %v6945_v0 = vadd.f32 %v14887_v17, %v14920_v6  ;;  %v12334_v17 = vld [vmem:[%s15697_s1 + $0x54] ss:$8 sps:$4 sm:$0xff]  }
 0x687   : > { %v7021_v42 = vadd.f32 %v11321_v29, %v6924_v22  ;;  %v14938_v7 = vadd.f32 %v14850_v58, %v7018_v60  ;;  %v12317_v58 = vld [vmem:[%s15697_s1] ss:$8 sps:$4 sm:$0xff]  }
 0x688   : > { %8453 = vmatpush1.bf16.msra.mxu0 %v12317_v58  ;;  %v12337_v58 = vld [vmem:[%s15697_s1 + $0x64] ss:$8 sps:$4 sm:$0xff]  }
 0x689   : > { %v11322_v1 = vpop.f32.mrb[120].mxu1  ;;  %v14941_v62 = vadd.f32 %v14854_v39, %v7021_v42  ;;  %8454 = vmatprep.subr.bf16.mxu0 %v12322_v2  ;;  %v6953_v2 = vadd.f32 %v14895_v38, %v14920_v6  ;;  %v12340_v38 = vld [vmem:[%s15697_s1 + $0x74] ss:$8 sps:$4 sm:$0xff]  }
 0x68a   : > { %v11323_v48 = vpop.f32.mrb[121].mxu1 }
 0x68b   : > { %v11324_v46 = vadd.f32 %v11323_v48, %v11322_v1  ;;  %v11325_v61 = vpop.f32.mrb[122].mxu1  ;;  %v6948_v1 = vadd.f32 %v14891_v35, %v14920_v6 }
 0x68c   : > { %v11326_v43 = vpop.f32.mrb[123].mxu1  ;;  %8455 = vmatpush1.bf16.msra.mxu0 %v12320_v5 }
 0x68d   : > { %v7026_v56 = vadd.f32 %v11324_v46, %v6929_v3  ;;  %v11327_v27 = vadd.f32 %v11326_v43, %v11325_v61  ;;  %8456 = vmatprep.subr.bf16.mxu0 %v12325_v50 }
 0x68f   : > { %v7029_v39 = vadd.f32 %v11327_v27, %v6932_v36  ;;  %v14951_v15 = vadd.f32 %v14860_v23, %v7026_v56  ;;  %v12332_v36 = vld [vmem:[%s15697_s1 + $0x50] ss:$8 sps:$4 sm:$0xff]  }
 0x690   : > { %8457 = vmatpush1.bf16.msra.mxu0 %v12323_v21 }
 0x691   : > { %v11328_v4 = vpop.f32.mrb[124].mxu1  ;;  %v14955_v18 = vadd.f32 %v14864_v37, %v7029_v39  ;;  %v12328_v37 = vld [vmem:[%s15697_s1 + $0x34] ss:$8 sps:$4 sm:$0xff]  }
 0x692   : > { %v11329_v19 = vpop.f32.mrb[125].mxu1  ;;  %8458 = vmatprep.subr.bf16.mxu0 %v12328_v37  ;;  %v12343_v37 = vld [vmem:[%s15697_s1 + $0x84] ss:$8 sps:$4 sm:$0xff]  }
 0x693   : > { %v11330_v33 = vadd.f32 %v11329_v19, %v11328_v4  ;;  %v11331_v13 = vpop.f32.mrb[126].mxu1  ;;  %v6956_v19 = vadd.f32 %v14899_v49, %v14920_v6 }
 0x694   : > { %v11332_v23 = vpop.f32.mrb[127].mxu1  ;;  %8459 = vmatpush1.bf16.msra.mxu0 %v12326_v41  ;;  %v6961_v41 = vadd.f32 %v14903_v59, %v14920_v6  ;;  %v12346_v59 = vld [vmem:[%s15697_s1 + $0x94] ss:$8 sps:$4 sm:$0xff]  }
 0x695   : > { %v7034_v44 = vadd.f32 %v11330_v33, %v6937_v8  ;;  %v11333_v25 = vadd.f32 %v11332_v23, %v11331_v13  ;;  %8460 = vmatprep.subr.bf16.mxu0 %v12331_v34 }
 0x697   : > { %v7037_v14 = vadd.f32 %v11333_v25, %v6940_v26  ;;  %v14965_v24 = vadd.f32 %v14870_v31, %v7034_v44  ;;  %v12338_v26 = vld [vmem:[%s15697_s1 + $0x70] ss:$8 sps:$4 sm:$0xff]  }
 0x699   : > { %v11334_v63 = vpop.f32.mrb[128].mxu1  ;;  %v14969_v16 = vadd.f32 %v14874_v53, %v7037_v14  ;;  %v12329_v53 = vld [vmem:[%s15697_s1 + $0x40] ss:$8 sps:$4 sm:$0xff]  }
 0x69a   : > { %v11335_v20 = vpop.f32.mrb[129].mxu1  ;;  %v14972_v11 = vpop.f32.mrb[56].mxu0  ;;  %8461 = vmatpush1.bf16.msra.mxu0 %v12329_v53 }
 0x69b   : > { %v11336_v22 = vadd.f32 %v11335_v20, %v11334_v63  ;;  %v11337_v31 = vpop.f32.mrb[130].mxu1  ;;  %v14976_v60 = vpop.f32.mrb[57].mxu0  ;;  %8462 = vmatprep.subr.bf16.mxu0 %v12334_v17 }
 0x69c   : > { %v11338_v29 = vpop.f32.mrb[131].mxu1  ;;  %v14978_v42 = vpop.f32.mrb[58].mxu0 }
 0x69d   : > { %v7042_v48 = vadd.f32 %v11336_v22, %v6945_v0  ;;  %v11339_v3 = vadd.f32 %v11338_v29, %v11337_v31  ;;  %v14983_v46 = vpop.f32.mrb[59].mxu0  ;;  %v6964_v22 = vadd.f32 %v14907_v9, %v14920_v6 }
 0x69e   : > { %8463 = vmatpush1.bf16.msra.mxu0 %v12332_v36  ;;  %v12349_v36 = vld [vmem:[%s15697_s1 + $0xa4] ss:$8 sps:$4 sm:$0xff]  }
 0x69f   : > { %v7045_v61 = vadd.f32 %v11339_v3, %v6948_v1  ;;  %v14987_v43 = vadd.f32 %v14889_v51, %v7042_v48  ;;  %8464 = vmatprep.subr.bf16.mxu0 %v12337_v58  ;;  %v12344_v3 = vld [vmem:[%s15697_s1 + $0x90] ss:$8 sps:$4 sm:$0xff]   ;;  %v6969_v58 = vadd.f32 %v14911_v55, %v14920_v6  ;;  %v12352_v55 = vld [vmem:[%s15697_s1 + $0xb4] ss:$8 sps:$4 sm:$0xff]  }
 0x6a1   : > { %v11340_v56 = vpop.f32.mrb[132].mxu1  ;;  %v14991_v27 = vadd.f32 %v14893_v30, %v7045_v61  ;;  %v12335_v30 = vld [vmem:[%s15697_s1 + $0x60] ss:$8 sps:$4 sm:$0xff]  }
 0x6a2   : > { %v11341_v35 = vpop.f32.mrb[133].mxu1  ;;  %v14994_v52 = vpop.f32.mrb[60].mxu0  ;;  %8465 = vmatpush1.bf16.msra.mxu0 %v12335_v30 }
 0x6a3   : > { %v11342_v39 = vadd.f32 %v11341_v35, %v11340_v56  ;;  %v11343_v51 = vpop.f32.mrb[134].mxu1  ;;  %v14998_v5 = vpop.f32.mrb[61].mxu0  ;;  %8466 = vmatprep.subr.bf16.mxu0 %v12340_v38 }
 0x6a4   : > { %v11344_v4 = vpop.f32.mrb[135].mxu1  ;;  %v15000_v50 = vpop.f32.mrb[62].mxu0 }
 0x6a5   : > { %v7050_v8 = vadd.f32 %v11342_v39, %v6953_v2  ;;  %v11345_v33 = vadd.f32 %v11344_v4, %v11343_v51  ;;  %v15005_v13 = vpop.f32.mrb[63].mxu0  ;;  %v6972_v4 = vadd.f32 %v14915_v57, %v14920_v6  ;;  %v12355_v57 = vld [vmem:[%s15697_s1 + $0xc4] ss:$8 sps:$4 sm:$0xff]  }
 0x6a6   : > { %8467 = vmatpush1.bf16.msra.mxu0 %v12338_v26 }
 0x6a7   : > { %v7053_v23 = vadd.f32 %v11345_v33, %v6956_v19  ;;  %v15009_v21 = vadd.f32 %v14897_v47, %v7050_v8  ;;  %8468 = vmatprep.subr.bf16.mxu0 %v12343_v37 }
 0x6a9   : > { %v11346_v44 = vpop.f32.mrb[136].mxu1  ;;  %v15013_v25 = vadd.f32 %v14901_v40, %v7053_v23  ;;  %v12341_v40 = vld [vmem:[%s15697_s1 + $0x80] ss:$8 sps:$4 sm:$0xff]   ;;  %v12350_v23 = vld [vmem:[%s15697_s1 + $0xb0] ss:$8 sps:$4 sm:$0xff]  }
 0x6aa   : > { %v11347_v49 = vpop.f32.mrb[137].mxu1  ;;  %v15016_v14 = vpop.f32.mrb[64].mxu0  ;;  %8469 = vmatpush1.bf16.msra.mxu0 %v12341_v40  ;;  %v15064_v40 = vld [vmem:[%s15698_s11] ss:$0 sm:$0xff]  ;;  %s15700_s11 = sld [smem:[#allocation17_spill]] }
 0x6ab   : > { %v11348_v63 = vadd.f32 %v11347_v49, %v11346_v44  ;;  %v11349_v47 = vpop.f32.mrb[138].mxu1  ;;  %v15020_v34 = vpop.f32.mrb[65].mxu0  ;;  %8470 = vmatprep.subr.bf16.mxu0 %v12346_v59 }
 0x6ac   : > { %v11350_v20 = vpop.f32.mrb[139].mxu1  ;;  %v15022_v0 = vpop.f32.mrb[66].mxu0 }
 0x6ad   : > { %v7058_v31 = vadd.f32 %v11348_v63, %v6961_v41  ;;  %v11351_v29 = vadd.f32 %v11350_v20, %v11349_v47  ;;  %v15027_v53 = vpop.f32.mrb[67].mxu0  ;;  %v12353_v63 = vld [vmem:[%s15697_s1 + $0xc0] ss:$8 sps:$4 sm:$0xff]   ;;  %v12358_v20 = vld [vmem:[%s15697_s1 + $0xd4] ss:$8 sps:$4 sm:$0xff]  }
 0x6ae   : > { %8471 = vmatpush1.bf16.msra.mxu0 %v12344_v3 }
 0x6af   : > { %v7061_v1 = vadd.f32 %v11351_v29, %v6964_v22  ;;  %v15031_v48 = vadd.f32 %v14905_v12, %v7058_v31  ;;  %8472 = vmatprep.subr.bf16.mxu0 %v12349_v36  ;;  %v12356_v31 = vld [vmem:[%s15697_s1 + $0xd0] ss:$8 sps:$4 sm:$0xff]  }
 0x6b1   : > { %v11352_v17 = vpop.f32.mrb[140].mxu1  ;;  %v15035_v61 = vadd.f32 %v14909_v10, %v7061_v1  ;;  %v12347_v10 = vld [vmem:[%s15697_s1 + $0xa0] ss:$8 sps:$4 sm:$0xff]  }
 0x6b2   : > { %v11353_v9 = vpop.f32.mrb[141].mxu1  ;;  %v15038_v56 = vpop.f32.mrb[68].mxu0  ;;  %8473 = vmatpush1.bf16.msra.mxu0 %v12347_v10 }
 0x6b3   : > { %v11354_v35 = vadd.f32 %v11353_v9, %v11352_v17  ;;  %v11355_v12 = vpop.f32.mrb[142].mxu1  ;;  %v15042_v2 = vpop.f32.mrb[69].mxu0  ;;  %8474 = vmatprep.subr.bf16.mxu0 %v12352_v55 }
 0x6b4   : > { %v11356_v39 = vpop.f32.mrb[143].mxu1  ;;  %v15044_v51 = vpop.f32.mrb[70].mxu0 }
 0x6b5   : > { %v7066_v30 = vadd.f32 %v11354_v35, %v6969_v58  ;;  %v11357_v19 = vadd.f32 %v11356_v39, %v11355_v12  ;;  %v15049_v8 = vpop.f32.mrb[71].mxu0 }
 0x6b6   : > { %8475 = vmatpush1.bf16.msra.mxu0 %v12350_v23 }
 0x6b7   : > { %v7069_v33 = vadd.f32 %v11357_v19, %v6972_v4  ;;  %v15053_v38 = vadd.f32 %v14913_v28, %v7066_v30  ;;  %8476 = vmatprep.subr.bf16.mxu0 %v12355_v57 }
 0x6b9   : > { %v11438_v26 = vpop.f32.mrb[144].mxu1  ;;  %v15057_v44 = vadd.f32 %v14917_v54, %v7069_v33 }
 0x6ba   : > { %v11439_v6 = vpop.f32.mrb[145].mxu1  ;;  %8477 = vmatpush1.bf16.msra.mxu0 %v12353_v63 }
 0x6bb   : > { %v11440_v37 = vadd.f32 %v11439_v6, %v11438_v26  ;;  %v11441_v49 = vpop.f32.mrb[146].mxu1  ;;  %8478 = vmatprep.subr.bf16.mxu0 %v12358_v20 }
 0x6bc   : > { %v11442_v41 = vpop.f32.mrb[147].mxu1 }
 0x6bd   : > { %v7204_v28 = vadd.f32 %v11440_v37, %v14927_v45  ;;  %v11443_v47 = vadd.f32 %v11442_v41, %v11441_v49 }
 0x6be   : > { %8479 = vmatpush1.bf16.msra.mxu0 %v12356_v31 }
 0x6bf   : > { %v11851_v22 = vadd.f32 %v14976_v60, %v7204_v28  ;;  %v7207_v54 = vadd.f32 %v11443_v47, %v14930_v32 }
 0x6c1   : > { %v11855_v29 = vadd.f32 %v15064_v40, %v7207_v54  ;;  %v11444_v59 = vpop.f32.mrb[148].mxu1  ;;  %v11852_v1 = vadd.f32 %v11851_v22, %v15064_v40 }
 0x6c2   : > { %v11445_v3 = vpop.f32.mrb[149].mxu1 }
 0x6c3   : > { %v11446_v17 = vadd.f32 %v11445_v3, %v11444_v59  ;;  %v11447_v45 = vpop.f32.mrb[150].mxu1  ;;  %v11856_v36 = vadd.f32 %v11855_v29, %v14983_v46  ;;  %v7535_v35 = vmax.f32 %v11852_v1, 0.0 }
 0x6c4   : > { %v11448_v9 = vpop.f32.mrb[151].mxu1 }
 0x6c5   : > { %v7212_v58 = vadd.f32 %v11446_v17, %v14938_v7  ;;  %v11449_v60 = vadd.f32 %v11448_v9, %v11447_v45  ;;  %v7536_v32 = vmax.f32 %v11856_v36, 0.0 }
 0x6c7   : > { %v11849_v12 = vadd.f32 %v14972_v11, %v7212_v58  ;;  %v7215_v39 = vadd.f32 %v11449_v60, %v14941_v62  ;;  %v7551_v10 = vpack.c.bf16 %v7536_v32, %v7535_v35 }
 0x6c9   : > { %v11853_v4 = vadd.f32 %v15064_v40, %v7215_v39  ;;  %v11450_v30 = vpop.f32.mrb[152].mxu1  ;;  %11699 = vmatprep.subr.bf16.mxu1 %v7551_v10  ;;  %v11850_v19 = vadd.f32 %v11849_v12, %v15064_v40 }
 0x6ca   : > { %v11451_v55 = vpop.f32.mrb[153].mxu1  ;;  %11700 = vmatpush3.bf16.msra.mxu1 %v7551_v10 }
 0x6cb   : > { %v11452_v46 = vadd.f32 %v11451_v55, %v11450_v30  ;;  %v11453_v33 = vpop.f32.mrb[154].mxu1  ;;  %v11854_v7 = vadd.f32 %v11853_v4, %v14978_v42  ;;  %v7537_v11 = vmax.f32 %v11850_v19, 0.0 }
 0x6cc   : > { %v11454_v23 = vpop.f32.mrb[155].mxu1 }
 0x6cd   : > { %v7220_v26 = vadd.f32 %v11452_v46, %v14951_v15  ;;  %v11455_v57 = vadd.f32 %v11454_v23, %v11453_v33  ;;  %v7538_v6 = vmax.f32 %v11854_v7, 0.0 }
 0x6cf   : > { %v11859_v62 = vadd.f32 %v15064_v40, %v7220_v26  ;;  %v7223_v37 = vadd.f32 %v11455_v57, %v14955_v18  ;;  %v7552_v49 = vpack.c.bf16 %v7538_v6, %v7537_v11 }
 0x6d1   : > { %v11863_v41 = vadd.f32 %v15064_v40, %v7223_v37  ;;  %v11456_v63 = vpop.f32.mrb[156].mxu1  ;;  %11701 = vmatprep.subr.bf16.mxu1 %v7552_v49  ;;  %v11860_v28 = vadd.f32 %v11859_v62, %v14998_v5 }
 0x6d2   : > { %v11457_v47 = vpop.f32.mrb[157].mxu1  ;;  %11702 = vmatpush3.bf16.msra.mxu1 %v7552_v49 }
 0x6d3   : > { %v11458_v42 = vadd.f32 %v11457_v47, %v11456_v63  ;;  %v11459_v20 = vpop.f32.mrb[158].mxu1  ;;  %v11864_v15 = vadd.f32 %v11863_v41, %v15005_v13  ;;  %v7539_v29 = vmax.f32 %v11860_v28, 0.0 }
 0x6d4   : > { %v11460_v22 = vpop.f32.mrb[159].mxu1 }
 0x6d5   : > { %v7228_v54 = vadd.f32 %v11458_v42, %v14965_v24  ;;  %v11461_v31 = vadd.f32 %v11460_v22, %v11459_v20  ;;  %v7540_v59 = vmax.f32 %v11864_v15, 0.0 }
 0x6d7   : > { %v11857_v18 = vadd.f32 %v15064_v40, %v7228_v54  ;;  %v7231_v1 = vadd.f32 %v11461_v31, %v14969_v16  ;;  %v7553_v3 = vpack.c.bf16 %v7540_v59, %v7539_v29 }
 0x6d9   : > { %v11861_v17 = vadd.f32 %v15064_v40, %v7231_v1  ;;  %v11462_v5 = vpop.f32.mrb[160].mxu1  ;;  %11703 = vmatprep.subr.bf16.mxu1 %v7553_v3  ;;  %v11858_v45 = vadd.f32 %v11857_v18, %v14994_v52 }
 0x6da   : > { %v11463_v36 = vpop.f32.mrb[161].mxu1  ;;  %11704 = vmatpush3.bf16.msra.mxu1 %v7553_v3 }
 0x6db   : > { %v11464_v13 = vadd.f32 %v11463_v36, %v11462_v5  ;;  %v11465_v9 = vpop.f32.mrb[162].mxu1  ;;  %v11862_v24 = vadd.f32 %v11861_v17, %v15000_v50  ;;  %v7541_v32 = vmax.f32 %v11858_v45, 0.0 }
 0x6dc   : > { %v11466_v58 = vpop.f32.mrb[163].mxu1 }
 0x6dd   : > { %v7236_v60 = vadd.f32 %v11464_v13, %v14987_v43  ;;  %v11467_v35 = vadd.f32 %v11466_v58, %v11465_v9  ;;  %v7542_v12 = vmax.f32 %v11862_v24, 0.0  ;;  %v12315_v24 = vld [vmem:[%s15696_s26 + $0x10] sm:$0xff]   ;;  %v12359_v58 = vld [vmem:[%s15697_s1 + $0xe0] ss:$8 sps:$4 sm:$0xff]  }
 0x6df   : > { %v11867_v16 = vadd.f32 %v15064_v40, %v7236_v60  ;;  %v7239_v39 = vadd.f32 %v11467_v35, %v14991_v27  ;;  %v7554_v10 = vpack.c.bf16 %v7542_v12, %v7541_v32  ;;  %v12361_v60 = vld [vmem:[%s15697_s1 + $0xe4] ss:$8 sps:$4 sm:$0xff]  }
 0x6e0   : > { %8480 = vmatprep.subr.bf16.mxu0 %v12361_v60  ;;  %v12367_v35 = vld [vmem:[%s15697_s1 + $0x104] ss:$8 sps:$4 sm:$0xff]   ;;  %v12436_v60 = vld [vmem:[%s15697_s1 + $0x274] ss:$8 sps:$4 sm:$0xff]  }
 0x6e1   : > { %v11871_v4 = vadd.f32 %v15064_v40, %v7239_v39  ;;  %v11468_v52 = vpop.f32.mrb[164].mxu1  ;;  %11705 = vmatprep.subr.bf16.mxu1 %v7554_v10  ;;  %v11868_v30 = vadd.f32 %v11867_v16, %v15020_v34  ;;  %8481 = vmatpush1.bf16.msra.mxu0 %v12359_v58  ;;  %v12431_v58 = vld [vmem:[%s15697_s1 + $0x260] ss:$8 sps:$4 sm:$0xff]  }
 0x6e2   : > { %v11469_v19 = vpop.f32.mrb[165].mxu1  ;;  %11706 = vmatpush3.bf16.msra.mxu1 %v7554_v10 }
 0x6e3   : > { %v11470_v50 = vadd.f32 %v11469_v19, %v11468_v52  ;;  %v11471_v55 = vpop.f32.mrb[166].mxu1  ;;  %v11872_v43 = vadd.f32 %v11871_v4, %v15027_v53  ;;  %v7543_v23 = vmax.f32 %v11868_v30, 0.0  ;;  %v12365_v30 = vld [vmem:[%s15697_s1 + $0x100] ss:$8 sps:$4 sm:$0xff]   ;;  %v12370_v19 = vld [vmem:[%s15697_s1 + $0x114] ss:$8 sps:$4 sm:$0xff]  }
 0x6e4   : > { %v11472_v46 = vpop.f32.mrb[167].mxu1 }
 0x6e5   : > { %v7244_v33 = vadd.f32 %v11470_v50, %v15009_v21  ;;  %v11473_v7 = vadd.f32 %v11472_v46, %v11471_v55  ;;  %v7544_v26 = vmax.f32 %v11872_v43, 0.0  ;;  %v12368_v46 = vld [vmem:[%s15697_s1 + $0x110] ss:$8 sps:$4 sm:$0xff]  }
 0x6e7   : > { %v11865_v27 = vadd.f32 %v15064_v40, %v7244_v33  ;;  %v7247_v57 = vadd.f32 %v11473_v7, %v15013_v25  ;;  %v7555_v11 = vpack.c.bf16 %v7544_v26, %v7543_v23  ;;  %v12373_v7 = vld [vmem:[%s15697_s1 + $0x124] ss:$8 sps:$4 sm:$0xff]  }
 0x6e9   : > { %v11869_v6 = vadd.f32 %v15064_v40, %v7247_v57  ;;  %v11474_v34 = vpop.f32.mrb[168].mxu1  ;;  %11707 = vmatprep.subr.bf16.mxu1 %v7555_v11  ;;  %v11866_v62 = vadd.f32 %v11865_v27, %v15016_v14  ;;  %v12371_v57 = vld [vmem:[%s15697_s1 + $0x120] ss:$8 sps:$4 sm:$0xff]  }
 0x6ea   : > { %v11475_v37 = vpop.f32.mrb[169].mxu1  ;;  %11708 = vmatpush3.bf16.msra.mxu1 %v7555_v11  ;;  %v12376_v11 = vld [vmem:[%s15697_s1 + $0x134] ss:$8 sps:$4 sm:$0xff]  }
 0x6eb   : > { %v11476_v53 = vadd.f32 %v11475_v37, %v11474_v34  ;;  %v11477_v49 = vpop.f32.mrb[170].mxu1  ;;  %v11870_v21 = vadd.f32 %v11869_v6, %v15022_v0  ;;  %v7545_v47 = vmax.f32 %v11866_v62, 0.0  ;;  %v12374_v6 = vld [vmem:[%s15697_s1 + $0x130] ss:$8 sps:$4 sm:$0xff]   ;;  %v12379_v34 = vld [vmem:[%s15697_s1 + $0x144] ss:$8 sps:$4 sm:$0xff]  }
 0x6ec   : > { %v11478_v41 = vpop.f32.mrb[171].mxu1  ;;  %v12377_v62 = vld [vmem:[%s15697_s1 + $0x140] ss:$8 sps:$4 sm:$0xff]   ;;  %v12382_v37 = vld [vmem:[%s15697_s1 + $0x154] ss:$8 sps:$4 sm:$0xff]  }
 0x6ed   : > { %v7252_v63 = vadd.f32 %v11476_v53, %v15031_v48  ;;  %v11479_v28 = vadd.f32 %v11478_v41, %v11477_v49  ;;  %v7546_v42 = vmax.f32 %v11870_v21, 0.0  ;;  %v12380_v53 = vld [vmem:[%s15697_s1 + $0x150] ss:$8 sps:$4 sm:$0xff]   ;;  %v12385_v49 = vld [vmem:[%s15697_s1 + $0x164] ss:$8 sps:$4 sm:$0xff]  }
 0x6ee   : > { %v12383_v21 = vld [vmem:[%s15697_s1 + $0x160] ss:$8 sps:$4 sm:$0xff]   ;;  %v12388_v41 = vld [vmem:[%s15697_s1 + $0x174] ss:$8 sps:$4 sm:$0xff]  }
 0x6ef   : > { %v11875_v25 = vadd.f32 %v15064_v40, %v7252_v63  ;;  %v7255_v20 = vadd.f32 %v11479_v28, %v15035_v61  ;;  %v7556_v15 = vpack.c.bf16 %v7546_v42, %v7545_v47  ;;  %v12386_v63 = vld [vmem:[%s15697_s1 + $0x170] ss:$8 sps:$4 sm:$0xff]   ;;  %v12391_v28 = vld [vmem:[%s15697_s1 + $0x184] ss:$8 sps:$4 sm:$0xff]   ;;  %v12389_v47 = vld [vmem:[%s15697_s1 + $0x180] ss:$8 sps:$4 sm:$0xff]  }
 0x6f0   : > { %v12394_v42 = vld [vmem:[%s15697_s1 + $0x194] ss:$8 sps:$4 sm:$0xff]  }
 0x6f1   : > { %v11879_v22 = vadd.f32 %v15064_v40, %v7255_v20  ;;  %v11480_v14 = vpop.f32.mrb[172].mxu1  ;;  %11709 = vmatprep.subr.bf16.mxu1 %v7556_v15  ;;  %v11876_v54 = vadd.f32 %v11875_v25, %v15042_v2  ;;  %v12392_v25 = vld [vmem:[%s15697_s1 + $0x190] ss:$8 sps:$4 sm:$0xff]   ;;  %v12397_v20 = vld [vmem:[%s15697_s1 + $0x1a4] ss:$8 sps:$4 sm:$0xff]  }
 0x6f2   : > { %v11481_v31 = vpop.f32.mrb[173].mxu1  ;;  %11710 = vmatpush3.bf16.msra.mxu1 %v7556_v15  ;;  %v12395_v15 = vld [vmem:[%s15697_s1 + $0x1a0] ss:$8 sps:$4 sm:$0xff]  }
 0x6f3   : > { %v11482_v0 = vadd.f32 %v11481_v31, %v11480_v14  ;;  %v11483_v29 = vpop.f32.mrb[174].mxu1  ;;  %v11880_v48 = vadd.f32 %v11879_v22, %v15049_v8  ;;  %v7547_v3 = vmax.f32 %v11876_v54, 0.0  ;;  %v12400_v22 = vld [vmem:[%s15697_s1 + $0x1b4] ss:$8 sps:$4 sm:$0xff]   ;;  %v12398_v14 = vld [vmem:[%s15697_s1 + $0x1b0] ss:$8 sps:$4 sm:$0xff]  }
 0x6f4   : > { %v11484_v59 = vpop.f32.mrb[175].mxu1  ;;  %v12403_v54 = vld [vmem:[%s15697_s1 + $0x1c4] ss:$8 sps:$4 sm:$0xff]   ;;  %v12401_v31 = vld [vmem:[%s15697_s1 + $0x1c0] ss:$8 sps:$4 sm:$0xff]  }
 0x6f5   : > { %v7260_v18 = vadd.f32 %v11482_v0, %v15053_v38  ;;  %v11485_v1 = vadd.f32 %v11484_v59, %v11483_v29  ;;  %v7548_v61 = vmax.f32 %v11880_v48, 0.0  ;;  %v12406_v0 = vld [vmem:[%s15697_s1 + $0x1d4] ss:$8 sps:$4 sm:$0xff]   ;;  %v12404_v29 = vld [vmem:[%s15697_s1 + $0x1d0] ss:$8 sps:$4 sm:$0xff]  }
 0x6f6   : > { %v12409_v48 = vld [vmem:[%s15697_s1 + $0x1e4] ss:$8 sps:$4 sm:$0xff]   ;;  %v12407_v59 = vld [vmem:[%s15697_s1 + $0x1e0] ss:$8 sps:$4 sm:$0xff]  }
 0x6f7   : > { %v11873_v17 = vadd.f32 %v15064_v40, %v7260_v18  ;;  %v7263_v5 = vadd.f32 %v11485_v1, %v15057_v44  ;;  %v7557_v2 = vpack.c.bf16 %v7548_v61, %v7547_v3  ;;  %v12314_v44 = vld [vmem:[%s15696_s26 + $0x8] sm:$0xff]   ;;  %v12412_v18 = vld [vmem:[%s15697_s1 + $0x1f4] ss:$8 sps:$4 sm:$0xff]   ;;  %v12410_v1 = vld [vmem:[%s15697_s1 + $0x1f0] ss:$8 sps:$4 sm:$0xff]  }
 0x6f8   : > { %v12415_v3 = vld [vmem:[%s15697_s1 + $0x204] ss:$8 sps:$4 sm:$0xff]   ;;  %v12413_v61 = vld [vmem:[%s15697_s1 + $0x200] ss:$8 sps:$4 sm:$0xff]  }
 0x6f9   : > { %v11877_v45 = vadd.f32 %v15064_v40, %v7263_v5  ;;  %11711 = vmatprep.subr.bf16.mxu1 %v7557_v2  ;;  %v11874_v8 = vadd.f32 %v11873_v17, %v15038_v56  ;;  %v12316_v40 = vld [vmem:[%s15696_s26 + $0x18] sm:$0xff]  }
 0x6fa   : > { %11712 = vmatpush3.bf16.msra.mxu1 %v7557_v2  ;;  %v12362_v56 = vld [vmem:[%s15697_s1 + $0xf0] ss:$8 sps:$4 sm:$0xff]   ;;  %v12418_v5 = vld [vmem:[%s15697_s1 + $0x214] ss:$8 sps:$4 sm:$0xff]  }
 0x6fb   : > { %v11878_v38 = vadd.f32 %v11877_v45, %v15044_v51  ;;  %v7549_v36 = vmax.f32 %v11874_v8, 0.0  ;;  %v12364_v51 = vld [vmem:[%s15697_s1 + $0xf4] ss:$8 sps:$4 sm:$0xff]   ;;  %v12416_v2 = vld [vmem:[%s15697_s1 + $0x210] ss:$8 sps:$4 sm:$0xff]  }
 0x6fc   : > { %8482 = vmatprep.subr.bf16.mxu0 %v12364_v51  ;;  %v12421_v45 = vld [vmem:[%s15697_s1 + $0x224] ss:$8 sps:$4 sm:$0xff]   ;;  %v12419_v8 = vld [vmem:[%s15697_s1 + $0x220] ss:$8 sps:$4 sm:$0xff]  }
 0x6fd   : > { %v7550_v13 = vmax.f32 %v11878_v38, 0.0  ;;  %8483 = vmatpush1.bf16.msra.mxu0 %v12362_v56  ;;  %v12424_v38 = vld [vmem:[%s15697_s1 + $0x234] ss:$8 sps:$4 sm:$0xff]   ;;  %v12434_v56 = vld [vmem:[%s15697_s1 + $0x270] ss:$8 sps:$4 sm:$0xff]  }
 0x6fe   : > { %8493 = vmatprep.subr.bf16.mxu0 %v12367_v35  ;;  %v12439_v51 = vld [vmem:[%s15697_s1 + $0x284] ss:$8 sps:$4 sm:$0xff]   ;;  %v12437_v35 = vld [vmem:[%s15697_s1 + $0x280] ss:$8 sps:$4 sm:$0xff]  }
 0x6ff   : > { %v7558_v9 = vpack.c.bf16 %v7550_v13, %v7549_v36  ;;  %v12422_v36 = vld [vmem:[%s15697_s1 + $0x230] ss:$8 sps:$4 sm:$0xff]   ;;  %v12427_v13 = vld [vmem:[%s15697_s1 + $0x244] ss:$8 sps:$4 sm:$0xff]  }
 0x701   : > { %11713 = vmatprep.subr.bf16.mxu1 %v7558_v9 }
 0x702   : > { %11714 = vmatpush3.bf16.msra.mxu1 %v7558_v9  ;;  %v12425_v9 = vld [vmem:[%s15697_s1 + $0x240] ss:$8 sps:$4 sm:$0xff]  }
 0x705   : > { %11716 = vmatmul.mubr.bf16.vlgmr.msra.gmra.mrb[176].mxu1 %v12314_v44  ;;  %v12430_v44 = vld [vmem:[%s15697_s1 + $0x254] ss:$8 sps:$4 sm:$0xff]  }
 0x706   : > { %11719 = vmatprep.mubr.bf16.mxu1 %v12315_v24  ;;  %v12428_v24 = vld [vmem:[%s15697_s1 + $0x250] ss:$8 sps:$4 sm:$0xff]  }
 0x70d   : > { %11720 = vmatmul.mubr.bf16.gmra.mrb[180].mxu1 %v12316_v40  ;;  %v12433_v40 = vld [vmem:[%s15697_s1 + $0x264] ss:$8 sps:$4 sm:$0xff]  }
 0x7d8   : > { %v11717_v32 = vpop.f32.mrb[176].mxu1 }
 0x7d9   : > { %v7625_v12 = vpop.f32.mrb[177].mxu1 }
 0x7da   : > { %v11718_v16 = vpop.f32.mrb[178].mxu1 }
 0x7db   : > { %v15122_v39 = vpack.c.bf16 %v11718_v16, %v11717_v32  ;;  %v7628_v10 = vpop.f32.mrb[179].mxu1  ;;  %v12442_v32 = vld [vmem:[%s15697_s1 + $0x294] ss:$8 sps:$4 sm:$0xff]   ;;  %v12445_v16 = vld [vmem:[%s15697_s1 + $0x2a4] ss:$8 sps:$4 sm:$0xff]  }
 0x7dc   : > { %v15124_v4 = vpack.c.bf16 %v7628_v10, %v7625_v12  ;;  %v12440_v12 = vld [vmem:[%s15697_s1 + $0x290] ss:$8 sps:$4 sm:$0xff]   ;;  %v12443_v10 = vld [vmem:[%s15697_s1 + $0x2a0] ss:$8 sps:$4 sm:$0xff]  }
 0x7dd   : > { %v7664_v50 = vrot.slane %v15122_v39, 4 }
 0x7de   : > { %v7661_v52 = vrot.slane %v15124_v4, 4 }
 0x7e0   : > { %8484 = vmatprep.mubr.bf16.mxu0 %v7661_v52  ;;  %v11721_v55 = vpop.f32.mrb[180].mxu1  ;;  %v12448_v52 = vld [vmem:[%s15697_s1 + $0x2b4] ss:$8 sps:$4 sm:$0xff]  }
 0x7e1   : > { %8485 = vmatmul.mubr.bf16.vlgmr.msra.gmra.mrb[72].mxu0 %v15124_v4  ;;  %v7641_v43 = vpop.f32.mrb[181].mxu1 }
 0x7e2   : > { %8494 = vmatpush1.bf16.msra.mxu0 %v12365_v30  ;;  %8525 = vmatprep.mubr.bf16.mxu0 %v7664_v50  ;;  %v11722_v33 = vpop.f32.mrb[182].mxu1  ;;  %v12446_v30 = vld [vmem:[%s15697_s1 + $0x2b0] ss:$8 sps:$4 sm:$0xff]   ;;  %v12449_v50 = vld [vmem:[%s15697_s1 + $0x2c0] ss:$8 sps:$4 sm:$0xff]  }
 0x7e3   : > { %8495 = vmatprep.subr.bf16.mxu0 %v12370_v19  ;;  %v15133_v23 = vpack.c.bf16 %v11722_v33, %v11721_v55  ;;  %v7644_v26 = vpop.f32.mrb[183].mxu1  ;;  %v12451_v19 = vld [vmem:[%s15697_s1 + $0x2c4] ss:$8 sps:$4 sm:$0xff]   ;;  %v12454_v55 = vld [vmem:[%s15697_s1 + $0x2d4] ss:$8 sps:$4 sm:$0xff]  }
 0x7e4   : > { %v15135_v27 = vpack.c.bf16 %v7644_v26, %v7641_v43  ;;  %v12452_v43 = vld [vmem:[%s15697_s1 + $0x2d0] ss:$8 sps:$4 sm:$0xff]   ;;  %v12455_v33 = vld [vmem:[%s15697_s1 + $0x2e0] ss:$8 sps:$4 sm:$0xff]  }
 0x7e5   : > { %v12458_v26 = vld [vmem:[%s15697_s1 + $0x2f0] ss:$8 sps:$4 sm:$0xff]  }
 0x7e6   : > { %8496 = vmatpush1.bf16.msra.mxu0 %v12368_v46  ;;  %v7667_v17 = vrot.slane %v15135_v27, 4  ;;  %v12457_v46 = vld [vmem:[%s15697_s1 + $0x2e4] ss:$8 sps:$4 sm:$0xff]  }
 0x7e7   : > { %8497 = vmatprep.subr.bf16.mxu0 %v12373_v7  ;;  %v12460_v7 = vld [vmem:[%s15697_s1 + $0x2f4] ss:$8 sps:$4 sm:$0xff]  }
 0x7ea   : > { %8498 = vmatpush1.bf16.msra.mxu0 %v12371_v57  ;;  %v12463_v57 = vld [vmem:[%s15697_s1 + $0x304] ss:$8 sps:$4 sm:$0xff]  }
 0x7eb   : > { %8499 = vmatprep.subr.bf16.mxu0 %v12376_v11  ;;  %v12461_v11 = vld [vmem:[%s15697_s1 + $0x300] ss:$8 sps:$4 sm:$0xff]  }
 0x7ee   : > { %8500 = vmatpush1.bf16.msra.mxu0 %v12374_v6  ;;  %v12466_v6 = vld [vmem:[%s15697_s1 + $0x314] ss:$8 sps:$4 sm:$0xff]  }
 0x7ef   : > { %8501 = vmatprep.subr.bf16.mxu0 %v12379_v34  ;;  %v7670_v34 = vrot.slane %v15133_v23, 4 }
 0x7f2   : > { %8502 = vmatpush1.bf16.msra.mxu0 %v12377_v62  ;;  %v12464_v62 = vld [vmem:[%s15697_s1 + $0x310] ss:$8 sps:$4 sm:$0xff]  }
 0x7f3   : > { %8503 = vmatprep.subr.bf16.mxu0 %v12382_v37  ;;  %v12469_v37 = vld [vmem:[%s15697_s1 + $0x324] ss:$8 sps:$4 sm:$0xff]  }
 0x7f6   : > { %8504 = vmatpush1.bf16.msra.mxu0 %v12380_v53  ;;  %v12467_v53 = vld [vmem:[%s15697_s1 + $0x320] ss:$8 sps:$4 sm:$0xff]  }
 0x7f7   : > { %8505 = vmatprep.subr.bf16.mxu0 %v12385_v49  ;;  %v12472_v49 = vld [vmem:[%s15697_s1 + $0x334] ss:$8 sps:$4 sm:$0xff]  }
 0x7fa   : > { %8506 = vmatpush1.bf16.msra.mxu0 %v12383_v21  ;;  %v12470_v21 = vld [vmem:[%s15697_s1 + $0x330] ss:$8 sps:$4 sm:$0xff]  }
 0x7fb   : > { %8507 = vmatprep.subr.bf16.mxu0 %v12388_v41  ;;  %v12475_v41 = vld [vmem:[%s15697_s1 + $0x344] ss:$8 sps:$4 sm:$0xff]  }
 0x7fe   : > { %8508 = vmatpush1.bf16.msra.mxu0 %v12386_v63  ;;  %v12473_v63 = vld [vmem:[%s15697_s1 + $0x340] ss:$8 sps:$4 sm:$0xff]  }
 0x7ff   : > { %8509 = vmatprep.subr.bf16.mxu0 %v12391_v28  ;;  %v12478_v28 = vld [vmem:[%s15697_s1 + $0x354] ss:$8 sps:$4 sm:$0xff]  }
 0x802   : > { %8510 = vmatpush1.bf16.msra.mxu0 %v12389_v47  ;;  %v12476_v47 = vld [vmem:[%s15697_s1 + $0x350] ss:$8 sps:$4 sm:$0xff]  }
 0x803   : > { %8511 = vmatprep.subr.bf16.mxu0 %v12394_v42  ;;  %v12481_v42 = vld [vmem:[%s15697_s1 + $0x364] ss:$8 sps:$4 sm:$0xff]  }
 0x806   : > { %8512 = vmatpush1.bf16.msra.mxu0 %v12392_v25  ;;  %v12479_v25 = vld [vmem:[%s15697_s1 + $0x360] ss:$8 sps:$4 sm:$0xff]  }
 0x807   : > { %8513 = vmatprep.subr.bf16.mxu0 %v12397_v20  ;;  %v12484_v20 = vld [vmem:[%s15697_s1 + $0x374] ss:$8 sps:$4 sm:$0xff]  }
 0x80a   : > { %8514 = vmatpush1.bf16.msra.mxu0 %v12395_v15  ;;  %v12482_v15 = vld [vmem:[%s15697_s1 + $0x370] ss:$8 sps:$4 sm:$0xff]  }
 0x80b   : > { %8515 = vmatprep.subr.bf16.mxu0 %v12400_v22  ;;  %v12487_v22 = vld [vmem:[%s15697_s1 + $0x384] ss:$8 sps:$4 sm:$0xff]  }
 0x80e   : > { %8516 = vmatpush1.bf16.msra.mxu0 %v12398_v14  ;;  %v12485_v14 = vld [vmem:[%s15697_s1 + $0x380] ss:$8 sps:$4 sm:$0xff]  }
 0x80f   : > { %8517 = vmatprep.subr.bf16.mxu0 %v12403_v54  ;;  %v12490_v54 = vld [vmem:[%s15697_s1 + $0x394] ss:$8 sps:$4 sm:$0xff]  }
 0x812   : > { %8518 = vmatpush1.bf16.msra.mxu0 %v12401_v31  ;;  %v12488_v31 = vld [vmem:[%s15697_s1 + $0x390] ss:$8 sps:$4 sm:$0xff]  }
 0x813   : > { %8519 = vmatprep.subr.bf16.mxu0 %v12406_v0  ;;  %v12493_v0 = vld [vmem:[%s15697_s1 + $0x3a4] ss:$8 sps:$4 sm:$0xff]  }
 0x816   : > { %8520 = vmatpush1.bf16.msra.mxu0 %v12404_v29  ;;  %v12491_v29 = vld [vmem:[%s15697_s1 + $0x3a0] ss:$8 sps:$4 sm:$0xff]  }
 0x817   : > { %8521 = vmatprep.subr.bf16.mxu0 %v12409_v48  ;;  %v12496_v48 = vld [vmem:[%s15697_s1 + $0x3b4] ss:$8 sps:$4 sm:$0xff]  }
 0x81a   : > { %8522 = vmatpush1.bf16.msra.mxu0 %v12407_v59  ;;  %v12494_v59 = vld [vmem:[%s15697_s1 + $0x3b0] ss:$8 sps:$4 sm:$0xff]  }
 0x81b   : > { %8523 = vmatprep.subr.bf16.mxu0 %v12412_v18  ;;  %v12499_v18 = vld [vmem:[%s15697_s1 + $0x3c4] ss:$8 sps:$4 sm:$0xff]  }
 0x81e   : > { %8524 = vmatpush1.bf16.msra.mxu0 %v12410_v1  ;;  %v12497_v1 = vld [vmem:[%s15697_s1 + $0x3c0] ss:$8 sps:$4 sm:$0xff]  }
 0x81f   : > { %8534 = vmatprep.subr.bf16.mxu0 %v12415_v3  ;;  %v12502_v3 = vld [vmem:[%s15697_s1 + $0x3d4] ss:$8 sps:$4 sm:$0xff]  }
 0x821   : > { %8526 = vmatmul.mubr.bf16.vlgmr.msra.gmra.mrb[72].mxu0 %v15122_v39 }
 0x822   : > { %8535 = vmatpush1.bf16.msra.mxu0 %v12413_v61  ;;  %8566 = vmatprep.mubr.bf16.mxu0 %v7667_v17  ;;  %v12500_v61 = vld [vmem:[%s15697_s1 + $0x3d0] ss:$8 sps:$4 sm:$0xff]   ;;  %v12505_v17 = vld [vmem:[%s15697_s1 + $0x3e4] ss:$8 sps:$4 sm:$0xff]  }
 0x823   : > { %8536 = vmatprep.subr.bf16.mxu0 %v12418_v5  ;;  %v12503_v5 = vld [vmem:[%s15697_s1 + $0x3e0] ss:$8 sps:$4 sm:$0xff]  }
 0x826   : > { %8537 = vmatpush1.bf16.msra.mxu0 %v12416_v2  ;;  %v12508_v2 = vld [vmem:[%s15697_s1 + $0x3f4] ss:$8 sps:$4 sm:$0xff]  }
 0x827   : > { %8538 = vmatprep.subr.bf16.mxu0 %v12421_v45  ;;  %v12506_v45 = vld [vmem:[%s15697_s1 + $0x3f0] ss:$8 sps:$4 sm:$0xff]   ;;  %s12646_s1 = smov 96  }
 0x82a   : > { %8539 = vmatpush1.bf16.msra.mxu0 %v12419_v8  ;;  %v15699_v8 = vmov 0  }
 0x82b   : > { %8540 = vmatprep.subr.bf16.mxu0 %v12424_v38  ;;  %8630 = vst.msk [vmem:[#allocation4] sm:$0xc0] %vm8629_vm1, %v15699_v8  ;;  %8631 = vst.msk [vmem:[#allocation4 + $0x8] sm:$0xc0] %vm8629_vm1, %v15699_v8  ;;  %v7800_v38 = vld [vmem:[%s15700_s11] sm:$0x3] }
 0x82c   : > { %8632 = vst.msk [vmem:[#allocation4 + $0x10] sm:$0xc0] %vm8629_vm1, %v15699_v8  ;;  %8633 = vst.msk [vmem:[#allocation4 + $0x18] sm:$0xc0] %vm8629_vm1, %v15699_v8  ;;  %s15704_s11 = smov 64  }
 0x82d   : > { %8634 = vst.msk [vmem:[#allocation4 + $0x20] sm:$0xc0] %vm8629_vm1, %v15699_v8  ;;  %8635 = vst.msk [vmem:[#allocation4 + $0x28] sm:$0xc0] %vm8629_vm1, %v15699_v8 }
 0x82e   : > { %8541 = vmatpush1.bf16.msra.mxu0 %v12422_v36  ;;  %8636 = vst.msk [vmem:[#allocation4 + $0x30] sm:$0xc0] %vm8629_vm1, %v15699_v8  ;;  %8637 = vst.msk [vmem:[#allocation4 + $0x38] sm:$0xc0] %vm8629_vm1, %v15699_v8  ;;  %v15702_v36 = vld [vmem:[#allocation29_spill] sm:$0xff] }
 0x82f   : > { %8542 = vmatprep.subr.bf16.mxu0 %v12427_v13  ;;  %8621 = vst.msk [vmem:[#allocation4] sm:$0x3] %vm8620_vm2, %v15699_v8  ;;  %8622 = vst.msk [vmem:[#allocation4 + $0x8] sm:$0x3] %vm8620_vm2, %v15699_v8  ;;  %v7805_v13 = vrot.slane %v7800_v38, %v15702_v36 }
 0x830   : > { %8623 = vst.msk [vmem:[#allocation4 + $0x10] sm:$0x3] %vm8620_vm2, %v15699_v8  ;;  %8624 = vst.msk [vmem:[#allocation4 + $0x18] sm:$0x3] %vm8620_vm2, %v15699_v8 }
 0x831   : > { %8625 = vst.msk [vmem:[#allocation4 + $0x20] sm:$0x3] %vm8620_vm2, %v15699_v8  ;;  %8626 = vst.msk [vmem:[#allocation4 + $0x28] sm:$0x3] %vm8620_vm2, %v15699_v8 }
 0x832   : > { %8543 = vmatpush1.bf16.msra.mxu0 %v12425_v9  ;;  %8627 = vst.msk [vmem:[#allocation4 + $0x30] sm:$0x3] %vm8620_vm2, %v15699_v8  ;;  %8628 = vst.msk [vmem:[#allocation4 + $0x38] sm:$0x3] %vm8620_vm2, %v15699_v8  ;;  %v15703_v9 = vld [vmem:[#allocation30_spill] sm:$0xff] }
 0x833   : > { %8544 = vmatprep.subr.bf16.mxu0 %v12430_v44  ;;  %v7809_v44 = vrot.slane %v7800_v38, %v15703_v9 }
 0x836   : > { %8545 = vmatpush1.bf16.msra.mxu0 %v12428_v24 }
 0x837   : > { %8546 = vmatprep.subr.bf16.mxu0 %v12433_v40 }
 0x83a   : > { %8547 = vmatpush1.bf16.msra.mxu0 %v12431_v58 }
 0x83b   : > { %8548 = vmatprep.subr.bf16.mxu0 %v12436_v60 }
 0x83e   : > { %8549 = vmatpush1.bf16.msra.mxu0 %v12434_v56 }
 0x83f   : > { %8550 = vmatprep.subr.bf16.mxu0 %v12439_v51 }
 0x842   : > { %8551 = vmatpush1.bf16.msra.mxu0 %v12437_v35 }
 0x843   : > { %8552 = vmatprep.subr.bf16.mxu0 %v12442_v32 }
 0x846   : > { %8553 = vmatpush1.bf16.msra.mxu0 %v12440_v12  ;;  %v12509_v12 = vld [vmem:[%s15701_s24 + $0x80] sm:$0xff]  }
 0x847   : > { %8554 = vmatprep.subr.bf16.mxu0 %v12445_v16 }
 0x84a   : > { %8555 = vmatpush1.bf16.msra.mxu0 %v12443_v10 }
 0x84b   : > { %8556 = vmatprep.subr.bf16.mxu0 %v12448_v52 }
 0x84e   : > { %8557 = vmatpush1.bf16.msra.mxu0 %v12446_v30  ;;  %v12510_v30 = vld [vmem:[%s15701_s24 + $0x88] sm:$0xff]  }
 0x84f   : > { %8558 = vmatprep.subr.bf16.mxu0 %v12451_v19 }
 0x852   : > { %8559 = vmatpush1.bf16.msra.mxu0 %v12449_v50 }
 0x853   : > { %8560 = vmatprep.subr.bf16.mxu0 %v12454_v55 }
 0x856   : > { %8561 = vmatpush1.bf16.msra.mxu0 %v12452_v43 }
 0x857   : > { %8562 = vmatprep.subr.bf16.mxu0 %v12457_v46 }
 0x85a   : > { %8563 = vmatpush1.bf16.msra.mxu0 %v12455_v33 }
 0x85b   : > { %8564 = vmatprep.subr.bf16.mxu0 %v12460_v7 }
 0x85e   : > { %8565 = vmatpush1.bf16.msra.mxu0 %v12458_v26 }
 0x85f   : > { %8575 = vmatprep.subr.bf16.mxu0 %v12463_v57 }
 0x861   : > { %8567 = vmatmul.mubr.bf16.vlgmr.msra.gmra.mrb[72].mxu0 %v15135_v27 }
 0x862   : > { %8576 = vmatpush1.bf16.msra.mxu0 %v12461_v11  ;;  %8607 = vmatprep.mubr.bf16.mxu0 %v7670_v34 }
 0x863   : > { %8577 = vmatprep.subr.bf16.mxu0 %v12466_v6 }
 0x866   : > { %8578 = vmatpush1.bf16.msra.mxu0 %v12464_v62 }
 0x867   : > { %8579 = vmatprep.subr.bf16.mxu0 %v12469_v37 }
 0x86a   : > { %8580 = vmatpush1.bf16.msra.mxu0 %v12467_v53 }
 0x86b   : > { %8581 = vmatprep.subr.bf16.mxu0 %v12472_v49 }
 0x86e   : > { %8582 = vmatpush1.bf16.msra.mxu0 %v12470_v21 }
 0x86f   : > { %8583 = vmatprep.subr.bf16.mxu0 %v12475_v41 }
 0x872   : > { %8584 = vmatpush1.bf16.msra.mxu0 %v12473_v63 }
 0x873   : > { %8585 = vmatprep.subr.bf16.mxu0 %v12478_v28 }
 0x876   : > { %8586 = vmatpush1.bf16.msra.mxu0 %v12476_v47 }
 0x877   : > { %8587 = vmatprep.subr.bf16.mxu0 %v12481_v42 }
 0x87a   : > { %8588 = vmatpush1.bf16.msra.mxu0 %v12479_v25 }
 0x87b   : > { %8589 = vmatprep.subr.bf16.mxu0 %v12484_v20 }
 0x87e   : > { %8590 = vmatpush1.bf16.msra.mxu0 %v12482_v15 }
 0x87f   : > { %8591 = vmatprep.subr.bf16.mxu0 %v12487_v22 }
 0x882   : > { %8592 = vmatpush1.bf16.msra.mxu0 %v12485_v14 }
 0x883   : > { %8593 = vmatprep.subr.bf16.mxu0 %v12490_v54 }
 0x886   : > { %8594 = vmatpush1.bf16.msra.mxu0 %v12488_v31 }
 0x887   : > { %8595 = vmatprep.subr.bf16.mxu0 %v12493_v0 }
 0x88a   : > { %8596 = vmatpush1.bf16.msra.mxu0 %v12491_v29 }
 0x88b   : > { %8597 = vmatprep.subr.bf16.mxu0 %v12496_v48 }
 0x88e   : > { %8598 = vmatpush1.bf16.msra.mxu0 %v12494_v59 }
 0x88f   : > { %8599 = vmatprep.subr.bf16.mxu0 %v12499_v18 }
 0x892   : > { %8600 = vmatpush1.bf16.msra.mxu0 %v12497_v1 }
 0x893   : > { %8601 = vmatprep.subr.bf16.mxu0 %v12502_v3 }
 0x896   : > { %8602 = vmatpush1.bf16.msra.mxu0 %v12500_v61 }
 0x897   : > { %8603 = vmatprep.subr.bf16.mxu0 %v12505_v17 }
 0x89a   : > { %8604 = vmatpush1.bf16.msra.mxu0 %v12503_v5 }
 0x89b   : > { %8605 = vmatprep.subr.bf16.mxu0 %v12508_v2 }
 0x89e   : > { %8606 = vmatpush1.bf16.msra.mxu0 %v12506_v45 }
 0x89f   : > { %11723 = vmatprep.subr.bf16.mxu0 %v12509_v12 }
 0x8a1   : > { %8608 = vmatmul.mubr.bf16.vlgmr.msra.gmra.mrb[72].mxu0 %v15133_v23 }
 0x8a2   : > { %11724 = vmatpush3.bf16.msra.mxu0 %v12509_v12 }
 0x8a3   : > { %11725 = vmatprep.subr.bf16.mxu0 %v12510_v30 }
 0x8a6   : > { %11726 = vmatpush3.bf16.msra.mxu0 %v12510_v30 }
 0x974   : > { %v8609_v24 = vpop.f32.mrb[72].mxu0 }
 0x975   : > { %v11881_v40 = vadd.f32 %v8609_v24, %v7805_v13  ;;  %v8611_v58 = vpop.f32.mrb[73].mxu0 }
 0x976   : > { %v11882_v60 = vadd.f32 %v8611_v58, %v7809_v44  ;;  %v8613_v56 = vpop.f32.mrb[74].mxu0 }
 0x977   : > { %v8616_v51 = vmax.f32 %v11881_v40, 0.0  ;;  %v8614_v35 = vpop.f32.mrb[75].mxu0 }
 0x978   : > { %v8617_v32 = vmax.f32 %v11882_v60, 0.0 }
 0x979   : > { %v8618_v16 = vpack.c.bf16 %v8616_v51, %v8616_v51 }
 0x97a   : > { %v8619_v10 = vpack.c.bf16 %v8617_v32, %v8617_v32 }
 0x97b   : > { %v8639_v52 = vrot.slane %v8618_v16, 6 }
 0x97c   : > { %v8659_v19 = vrot.slane %v8619_v10, 6 }
 0x97d   : > { %8642 = vst.msk [vmem:[#allocation4] sm:$0x3c] %vm8641_vm3, %v8639_v52  ;;  %8648 = vrot.lane.b32.xlu1 %v8639_v52, %s15704_s11  ;;  %8643 = vrot.lane.b32.xlu0 %v8639_v52, %s12646_s1 }
 0x97e   : > { %8662 = vst.msk [vmem:[#allocation4 + $0x20] sm:$0x3c] %vm8641_vm3, %v8659_v19 }
 0x981   : > { %8663 = vrot.lane.b32.xlu1 %v8659_v19, %s12646_s1  ;;  %8653 = vrot.lane.b32.xlu0 %v8639_v52, %s12647_s3 }
 0x984   : > { %v8726_v50 = vld [vmem:[#allocation4] sm:$0x78] }
 0x985   : > { %8673 = vrot.lane.b32.xlu1 %v8659_v19, %s12647_s3  ;;  %8668 = vrot.lane.b32.xlu0 %v8659_v19, %s15704_s11  ;;  %v9038_v55 = vrot.slane %v8726_v50, 3  ;;  %v8694_v43 = vld [vmem:[#allocation4] sm:$0x1e] }
 0x986   : > { %v8830_v46 = vrot.slane %v8694_v43, 1  ;;  %v8730_v33 = vld [vmem:[#allocation4 + $0x20] sm:$0x78] }
 0x987   : > { %v8718_v7 = vld [vmem:[#allocation4] sm:$0x7c]  ;;  %v9042_v26 = vrot.slane %v8730_v33, 3 }
 0x988   : > { %v8951_v57 = vshrl.u32 %v8718_v7, 16  ;;  %v8954_v11 = vshll.u32 %v8718_v7, 16  ;;  %v8698_v6 = vld [vmem:[#allocation4 + $0x20] sm:$0x1e] }
 0x989   : > { %9046 = vrot.lane.b32.xlu0 %v9038_v55, %s15704_s11  ;;  %v8686_v34 = vld [vmem:[#allocation4] sm:$0x1f]  ;;  %v8834_v62 = vrot.slane %v8698_v6, 1 }
 0x98a   : > { %v8953_v37 = vrot.slane %v8951_v57, 2  ;;  %v8956_v53 = vrot.slane %v8954_v11, 3  ;;  %v8753_v49 = vshll.u32 %v8686_v34, 16  ;;  %v8734_v21 = vld [vmem:[#allocation4] sm:$0xf8]  ;;  %v8751_v25 = vshrl.u32 %v8686_v34, 16 }
 0x98b   : > { %v9063_v28 = vshrl.u32 %v8734_v21, 16  ;;  %v9066_v47 = vshll.u32 %v8734_v21, 16  ;;  %v8702_v42 = vld [vmem:[#allocation4] sm:$0x3e] }
 0x98c   : > { %v8957_v41 = vor.u32 %v8956_v53, %v8953_v37  ;;  %v8755_v63 = vrot.slane %v8753_v49, 1  ;;  %v8855_v20 = vshrl.u32 %v8702_v42, 16  ;;  %v8858_v54 = vshll.u32 %v8702_v42, 16  ;;  %v8722_v31 = vld [vmem:[#allocation4 + $0x20] sm:$0x7c] }
 0x98d   : > { %8838 = vrot.lane.b32.xlu0 %v8830_v46, %s15704_s11  ;;  %v9065_v22 = vrot.slane %v9063_v28, 3  ;;  %v9068_v14 = vrot.slane %v9066_v47, 4  ;;  %v8983_v0 = vshrl.u32 %v8722_v31, 16  ;;  %v8986_v18 = vshll.u32 %v8722_v31, 16  ;;  %v8690_v1 = vld [vmem:[#allocation4 + $0x20] sm:$0x1f] }
 0x98e   : > { %v8756_v15 = vor.u32 %v8755_v63, %v8751_v25  ;;  %v8857_v48 = vrot.slane %v8855_v20, 1  ;;  %v8860_v59 = vrot.slane %v8858_v54, 2  ;;  %v8781_v5 = vshll.u32 %v8690_v1, 16  ;;  %v8738_v2 = vld [vmem:[#allocation4 + $0x20] sm:$0xf8] }
 0x98f   : > { %v9069_v29 = vor.u32 %v9068_v14, %v9065_v22  ;;  %v8985_v61 = vrot.slane %v8983_v0, 2  ;;  %v8988_v17 = vrot.slane %v8986_v18, 3  ;;  %v9095_v38 = vshrl.u32 %v8738_v2, 16  ;;  %v8706_v13 = vld [vmem:[#allocation4 + $0x20] sm:$0x3e] }
 0x990   : > { %v8861_v3 = vor.u32 %v8860_v59, %v8857_v48  ;;  %v8783_v8 = vrot.slane %v8781_v5, 1  ;;  %v9098_v36 = vshll.u32 %v8738_v2, 16  ;;  %v8779_v9 = vshrl.u32 %v8690_v1, 16  ;;  %v8742_v30 = vld [vmem:[#allocation4] sm:$0xf0] }
 0x991   : > { %9054 = vrot.lane.b32.xlu0 %v9042_v26, %s15704_s11  ;;  %v8989_v45 = vor.u32 %v8988_v17, %v8985_v61  ;;  %v8887_v44 = vshrl.u32 %v8706_v13, 16  ;;  %v9097_v40 = vrot.slane %v9095_v38, 3  ;;  %v8890_v60 = vshll.u32 %v8706_v13, 16  ;;  %v8746_v50 = vld [vmem:[#allocation4 + $0x20] sm:$0xf0] }
 0x992   : > { %v8784_v24 = vor.u32 %v8783_v8, %v8779_v9  ;;  %v9100_v58 = vrot.slane %v9098_v36, 4  ;;  %v9150_v19 = vrot.slane %v8742_v30, 4  ;;  %v12511_v34 = vld [vmem:[%s15701_s24 + $0x40] sm:$0xff]   ;;  %v9154_v63 = vrot.slane %v8746_v50, 4  ;;  %v12513_v8 = vld [vmem:[%s15701_s24 + $0x48] sm:$0xff]   ;;  %v12517_v30 = vld [vmem:[%s15701_s24 + $0x58] sm:$0xff]  }
 0x993   : > { %v8889_v51 = vrot.slane %v8887_v44, 1  ;;  %v8892_v35 = vrot.slane %v8890_v60, 2  ;;  %11526 = vmatprep.subr.bf16.mxu1 %v12511_v34  ;;  %v12512_v2 = vld [vmem:[%s15701_s24] sm:$0xff]   ;;  %v12515_v60 = vld [vmem:[%s15701_s24 + $0x50] sm:$0xff]  }
 0x994   : > { %v9101_v56 = vor.u32 %v9100_v58, %v9097_v40  ;;  %11527 = vmatpush3.bf16.msra.mxu1 %v12512_v2  ;;  %v12514_v40 = vld [vmem:[%s15701_s24 + $0x8] sm:$0xff]   ;;  %v12519_v34 = vld [vmem:[%s15701_s24 + $0x60] sm:$0xff]  }
 0x995   : > { %8846 = vrot.lane.b32.xlu0 %v8834_v62, %s15704_s11  ;;  %v8893_v32 = vor.u32 %v8892_v35, %v8889_v51  ;;  %11528 = vmatprep.subr.bf16.mxu1 %v12513_v8 }
 0x998   : > { %11529 = vmatpush3.bf16.msra.mxu1 %v12514_v40 }
 0x999   : > { %9014 = vrot.lane.b32.xlu0 %v8957_v41, %s12647_s3  ;;  %11530 = vmatprep.subr.bf16.mxu1 %v12515_v60 }
 0x99d   : > { %8806 = vrot.lane.b32.xlu0 %v8756_v15, %s12647_s3 }
 0x9a1   : > { %9126 = vrot.lane.b32.xlu0 %v9069_v29, %s12646_s1 }
 0x9a5   : > { %8918 = vrot.lane.b32.xlu0 %v8861_v3, %s12646_s1 }
 0x9a9   : > { %9022 = vrot.lane.b32.xlu0 %v8989_v45, %s12647_s3 }
 0x9ad   : > { %8814 = vrot.lane.b32.xlu0 %v8784_v24, %s12647_s3 }
 0x9b1   : > { %9134 = vrot.lane.b32.xlu0 %v9101_v56, %s12646_s1 }
 0x9b5   : > { %8926 = vrot.lane.b32.xlu0 %v8893_v32, %s12646_s1 }
 0x9ef   : > { %v8649_v12 = vpop.permute.xlu1 %8648  ;;  %v8644_v16 = vpop.permute.xlu0 %8643 }
 0x9f0   : > { %8652 = vst.msk [vmem:[#allocation4 + $0x10] sm:$0x3c] %vm8641_vm3, %v8649_v12  ;;  %8647 = vst.msk [vmem:[#allocation4 + $0x8] sm:$0x3c] %vm8641_vm3, %v8644_v16 }
 0x9f3   : > { %v8664_v10 = vpop.permute.xlu1 %8663  ;;  %v8654_v52 = vpop.permute.xlu0 %8653 }
 0x9f4   : > { %8667 = vst.msk [vmem:[#allocation4 + $0x28] sm:$0x3c] %vm8641_vm3, %v8664_v10  ;;  %8657 = vst.msk [vmem:[#allocation4 + $0x18] sm:$0x3c] %vm8641_vm3, %v8654_v52  ;;  %v12516_v52 = vld [vmem:[%s15701_s24 + $0x10] sm:$0xff]  }
 0x9f5   : > { %11531 = vmatpush3.bf16.msra.mxu1 %v12516_v52 }
 0x9f6   : > { %11532 = vmatprep.subr.bf16.mxu1 %v12517_v30 }
 0x9f7   : > { %v8674_v55 = vpop.permute.xlu1 %8673  ;;  %v8669_v43 = vpop.permute.xlu0 %8668  ;;  %v8727_v46 = vld [vmem:[#allocation4 + $0x8] sm:$0x78]  ;;  %v8728_v33 = vld [vmem:[#allocation4 + $0x10] sm:$0x78] }
 0x9f8   : > { %v8743_v7 = vld [vmem:[#allocation4 + $0x8] sm:$0xf0]  ;;  %8677 = vst.msk [vmem:[#allocation4 + $0x38] sm:$0x3c] %vm8641_vm3, %v8674_v55  ;;  %8672 = vst.msk [vmem:[#allocation4 + $0x30] sm:$0x3c] %vm8641_vm3, %v8669_v43 }
 0x9f9   : > { %v9039_v26 = vrot.slane %v8727_v46, 3  ;;  %v9040_v57 = vrot.slane %v8728_v33, 3  ;;  %v9151_v11 = vrot.slane %v8743_v7, 4  ;;  %v8695_v6 = vld [vmem:[#allocation4 + $0x8] sm:$0x1e] }
 0x9fa   : > { %v8696_v62 = vld [vmem:[#allocation4 + $0x10] sm:$0x1e]  ;;  %v8831_v49 = vrot.slane %v8695_v6, 1 }
 0x9fb   : > { %v8744_v37 = vld [vmem:[#allocation4 + $0x10] sm:$0xf0]  ;;  %9048 = vrot.lane.b32.xlu1 %v9039_v26, %s15704_s11  ;;  %9050 = vrot.lane.b32.xlu0 %v9040_v57, %s15704_s11  ;;  %v10996_v53 = vcombine.low %v9150_v19, %v9151_v11  ;;  %v8745_v21 = vld [vmem:[#allocation4 + $0x18] sm:$0xf0]  ;;  %v8747_v41 = vld [vmem:[#allocation4 + $0x28] sm:$0xf0] }
 0x9fc   : > { %v8832_v28 = vrot.slane %v8696_v62, 1  ;;  %v9152_v47 = vrot.slane %v8744_v37, 4  ;;  %v9153_v42 = vrot.slane %v8745_v21, 4  ;;  %v9155_v25 = vrot.slane %v8747_v41, 4  ;;  %v8729_v20 = vld [vmem:[#allocation4 + $0x18] sm:$0x78] }
 0x9fd   : > { %11727 = vmatprep.mubr.msk.bf16.mxu0 %vm1055_vm0, %v10996_v53  ;;  %v8720_v15 = vld [vmem:[#allocation4 + $0x10] sm:$0x7c]  ;;  %v8697_v31 = vld [vmem:[#allocation4 + $0x18] sm:$0x1e]  ;;  %v9041_v29 = vrot.slane %v8729_v20, 3 }
 0x9fe   : > { %v10999_v22 = vcombine.low %v9152_v47, %v9153_v42  ;;  %v11002_v14 = vcombine.low %v9154_v63, %v9155_v25  ;;  %v8967_v18 = vshrl.u32 %v8720_v15, 16  ;;  %v8970_v1 = vshll.u32 %v8720_v15, 16  ;;  %v8688_v61 = vld [vmem:[#allocation4 + $0x10] sm:$0x1f]  ;;  %v8731_v36 = vld [vmem:[#allocation4 + $0x28] sm:$0x78] }
 0x9ff   : > { %8840 = vrot.lane.b32.xlu1 %v8831_v49, %s15704_s11  ;;  %8842 = vrot.lane.b32.xlu0 %v8832_v28, %s15704_s11  ;;  %v8732_v54 = vld [vmem:[#allocation4 + $0x30] sm:$0x78]  ;;  %v8749_v59 = vld [vmem:[#allocation4 + $0x38] sm:$0xf0]  ;;  %v8833_v45 = vrot.slane %v8697_v31, 1  ;;  %v8767_v44 = vshll.u32 %v8688_v61, 16 }
 0xa00   : > { %v8748_v0 = vld [vmem:[#allocation4 + $0x30] sm:$0xf0]  ;;  %11728 = vmatmul.mubr.msk.bf16.vlgmr.msra.gmra.mrb[76].mxu0 %vm1055_vm0, %v10999_v22  ;;  %v9044_v48 = vrot.slane %v8732_v54, 3  ;;  %v9157_v5 = vrot.slane %v8749_v59, 4  ;;  %v8969_v13 = vrot.slane %v8967_v18, 2  ;;  %v8972_v9 = vrot.slane %v8970_v1, 3 }
 0xa01   : > { %11731 = vmatprep.mubr.msk.bf16.mxu0 %vm1055_vm0, %v11002_v14  ;;  %v8700_v3 = vld [vmem:[#allocation4 + $0x30] sm:$0x1e]  ;;  %v9156_v17 = vrot.slane %v8748_v0, 4  ;;  %v9043_v56 = vrot.slane %v8731_v36, 3  ;;  %v8699_v51 = vld [vmem:[#allocation4 + $0x28] sm:$0x1e] }
 0xa02   : > { %v8836_v38 = vrot.slane %v8700_v3, 1  ;;  %v8736_v24 = vld [vmem:[#allocation4 + $0x10] sm:$0xf8]  ;;  %v8973_v35 = vor.u32 %v8972_v9, %v8969_v13  ;;  %v8769_v32 = vrot.slane %v8767_v44, 1  ;;  %v8765_v19 = vshrl.u32 %v8688_v61, 16  ;;  %v12518_v11 = vld [vmem:[%s15701_s24 + $0x18] sm:$0xff]  }
 0xa03   : > { %9052 = vrot.lane.b32.xlu1 %v9041_v29, %s15704_s11  ;;  %9058 = vrot.lane.b32.xlu0 %v9044_v48, %s15704_s11  ;;  %v11005_v58 = vcombine.low %v9156_v17, %v9157_v5  ;;  %v9079_v12 = vshrl.u32 %v8736_v24, 16  ;;  %v9082_v16 = vshll.u32 %v8736_v24, 16  ;;  %v8704_v10 = vld [vmem:[#allocation4 + $0x10] sm:$0x3e]  ;;  %v8835_v50 = vrot.slane %v8699_v51, 1  ;;  %v12520_v25 = vld [vmem:[%s15701_s24 + $0x20] sm:$0xff]  }
 0xa04   : > { %v8733_v55 = vld [vmem:[#allocation4 + $0x38] sm:$0x78]  ;;  %v8871_v43 = vshrl.u32 %v8704_v10, 16  ;;  %v8770_v46 = vor.u32 %v8769_v32, %v8765_v19  ;;  %v8874_v26 = vshll.u32 %v8704_v10, 16  ;;  %v8719_v57 = vld [vmem:[#allocation4 + $0x8] sm:$0x7c]  ;;  %11533 = vmatpush3.bf16.msra.mxu1 %v12518_v11 }
 0xa05   : > { %v9081_v33 = vrot.slane %v9079_v12, 3  ;;  %v9084_v7 = vrot.slane %v9082_v16, 4  ;;  %v8724_v6 = vld [vmem:[#allocation4 + $0x30] sm:$0x7c]  ;;  %v9045_v62 = vrot.slane %v8733_v55, 3  ;;  %v8959_v53 = vshrl.u32 %v8719_v57, 16  ;;  %11534 = vmatprep.subr.bf16.mxu1 %v12519_v34 }
 0xa06   : > { %v8873_v37 = vrot.slane %v8871_v43, 1  ;;  %v8962_v49 = vshll.u32 %v8719_v57, 16  ;;  %v8687_v21 = vld [vmem:[#allocation4 + $0x8] sm:$0x1f]  ;;  %v8701_v63 = vld [vmem:[#allocation4 + $0x38] sm:$0x1e] }
 0xa07   : > { %8844 = vrot.lane.b32.xlu1 %v8833_v45, %s15704_s11  ;;  %8850 = vrot.lane.b32.xlu0 %v8836_v38, %s15704_s11  ;;  %v9085_v41 = vor.u32 %v9084_v7, %v9081_v33  ;;  %v8876_v28 = vrot.slane %v8874_v26, 2  ;;  %v8999_v47 = vshrl.u32 %v8724_v6, 16  ;;  %v9002_v42 = vshll.u32 %v8724_v6, 16  ;;  %v8692_v20 = vld [vmem:[#allocation4 + $0x30] sm:$0x1f]  ;;  %v12521_v15 = vld [vmem:[%s15701_s24 + $0x68] sm:$0xff]  }
 0xa08   : > { %11732 = vmatmul.mubr.msk.bf16.gmra.mrb[80].mxu0 %vm1055_vm0, %v11005_v58  ;;  %v8760_v22 = vshll.u32 %v8687_v21, 16  ;;  %v8837_v14 = vrot.slane %v8701_v63, 1  ;;  %v8961_v54 = vrot.slane %v8959_v53, 2  ;;  %v8964_v31 = vrot.slane %v8962_v49, 3  ;;  %v8735_v0 = vld [vmem:[#allocation4 + $0x8] sm:$0xf8]  ;;  %11535 = vmatpush3.bf16.msra.mxu1 %v12520_v25 }
 0xa09   : > { %v8877_v29 = vor.u32 %v8876_v28, %v8873_v37  ;;  %v9001_v48 = vrot.slane %v8999_v47, 2  ;;  %v9004_v59 = vrot.slane %v9002_v42, 3  ;;  %v8795_v18 = vshll.u32 %v8692_v20, 16  ;;  %v8740_v1 = vld [vmem:[#allocation4 + $0x30] sm:$0xf8]  ;;  %v12522_v3 = vld [vmem:[%s15701_s24 + $0x28] sm:$0xff]   ;;  %11536 = vmatprep.subr.bf16.mxu1 %v12521_v15 }
 0xa0a   : > { %v12523_v61 = vld [vmem:[%s15701_s24 + $0x70] sm:$0xff]   ;;  %v8762_v17 = vrot.slane %v8760_v22, 1  ;;  %v9071_v5 = vshrl.u32 %v8735_v0, 16  ;;  %v9074_v2 = vshll.u32 %v8735_v0, 16  ;;  %v9111_v45 = vshrl.u32 %v8740_v1, 16  ;;  %v12525_v58 = vld [vmem:[%s15701_s24 + $0x78] sm:$0xff]  }
 0xa0b   : > { %9056 = vrot.lane.b32.xlu1 %v9043_v56, %s15704_s11  ;;  %9018 = vrot.lane.b32.xlu0 %v8973_v35, %s12647_s3  ;;  %v9114_v8 = vshll.u32 %v8740_v1, 16  ;;  %v8965_v38 = vor.u32 %v8964_v31, %v8961_v54  ;;  %v9005_v36 = vor.u32 %v9004_v59, %v9001_v48  ;;  %v8758_v13 = vshrl.u32 %v8687_v21, 16  ;;  %v8703_v44 = vld [vmem:[#allocation4 + $0x8] sm:$0x3e]  ;;  %v12524_v24 = vld [vmem:[%s15701_s24 + $0x30] sm:$0xff]   ;;  %v12526_v55 = vld [vmem:[%s15701_s24 + $0x38] sm:$0xff]  }
 0xa0c   : > { %v8797_v9 = vrot.slane %v8795_v18, 1  ;;  %11537 = vmatpush3.bf16.msra.mxu1 %v12522_v3  ;;  %v8708_v40 = vld [vmem:[#allocation4 + $0x30] sm:$0x3e]  ;;  %v8793_v56 = vshrl.u32 %v8692_v20, 16  ;;  %v9073_v51 = vrot.slane %v9071_v5, 3  ;;  %v9076_v35 = vrot.slane %v9074_v2, 4 }
 0xa0d   : > { %11538 = vmatprep.subr.bf16.mxu1 %v12523_v61  ;;  %v8763_v60 = vor.u32 %v8762_v17, %v8758_v13  ;;  %v9113_v32 = vrot.slane %v9111_v45, 3  ;;  %v9116_v12 = vrot.slane %v9114_v8, 4  ;;  %v8863_v16 = vshrl.u32 %v8703_v44, 16  ;;  %v8689_v34 = vld [vmem:[#allocation4 + $0x18] sm:$0x1f] }
 0xa0e   : > { %v8798_v10 = vor.u32 %v8797_v9, %v8793_v56  ;;  %v8866_v52 = vshll.u32 %v8703_v44, 16  ;;  %v8903_v30 = vshrl.u32 %v8708_v40, 16  ;;  %v8906_v19 = vshll.u32 %v8708_v40, 16  ;;  %v8705_v25 = vld [vmem:[#allocation4 + $0x18] sm:$0x3e] }
 0xa0f   : > { %8848 = vrot.lane.b32.xlu1 %v8835_v50, %s15704_s11  ;;  %8810 = vrot.lane.b32.xlu0 %v8770_v46, %s12647_s3  ;;  %v8721_v50 = vld [vmem:[#allocation4 + $0x18] sm:$0x7c]  ;;  %v9077_v43 = vor.u32 %v9076_v35, %v9073_v51  ;;  %v9117_v46 = vor.u32 %v9116_v12, %v9113_v32  ;;  %v8865_v33 = vrot.slane %v8863_v16, 1  ;;  %v8772_v20 = vshrl.u32 %v8689_v34, 16  ;;  %v8723_v0 = vld [vmem:[#allocation4 + $0x28] sm:$0x7c] }
 0xa10   : > { %11539 = vmatpush3.bf16.msra.mxu1 %v12524_v24  ;;  %v8975_v7 = vshrl.u32 %v8721_v50, 16  ;;  %v8868_v26 = vrot.slane %v8866_v52, 2  ;;  %v8905_v57 = vrot.slane %v8903_v30, 1  ;;  %v8908_v11 = vrot.slane %v8906_v19, 2  ;;  %v8691_v3 = vld [vmem:[#allocation4 + $0x28] sm:$0x1f] }
 0xa11   : > { %11540 = vmatprep.subr.bf16.mxu1 %v12525_v58  ;;  %v8978_v6 = vshll.u32 %v8721_v50, 16  ;;  %v8879_v15 = vshrl.u32 %v8705_v25, 16  ;;  %v8882_v31 = vshll.u32 %v8705_v25, 16  ;;  %v8994_v1 = vshll.u32 %v8723_v0, 16  ;;  %v8739_v8 = vld [vmem:[#allocation4 + $0x28] sm:$0xf8] }
 0xa12   : > { %v8869_v37 = vor.u32 %v8868_v26, %v8865_v33  ;;  %v8909_v53 = vor.u32 %v8908_v11, %v8905_v57  ;;  %v8977_v49 = vrot.slane %v8975_v7, 2  ;;  %v8788_v45 = vshll.u32 %v8691_v3, 16  ;;  %v8707_v24 = vld [vmem:[#allocation4 + $0x28] sm:$0x3e]  ;;  %v8725_v12 = vld [vmem:[#allocation4 + $0x38] sm:$0x7c] }
 0xa13   : > { %9060 = vrot.lane.b32.xlu1 %v9045_v62, %s15704_s11  ;;  %9130 = vrot.lane.b32.xlu0 %v9085_v41, %s12646_s1  ;;  %v8774_v62 = vshll.u32 %v8689_v34, 16  ;;  %v8980_v21 = vrot.slane %v8978_v6, 3  ;;  %v8737_v41 = vld [vmem:[#allocation4 + $0x18] sm:$0xf8]  ;;  %v8881_v59 = vrot.slane %v8879_v15, 1  ;;  %v8884_v18 = vrot.slane %v8882_v31, 2 }
 0xa14   : > { %11541 = vmatpush3.bf16.msra.mxu1 %v12526_v55  ;;  %v9087_v47 = vshrl.u32 %v8737_v41, 16  ;;  %v9090_v42 = vshll.u32 %v8737_v41, 16  ;;  %v8996_v2 = vrot.slane %v8994_v1, 3  ;;  %v8790_v13 = vrot.slane %v8788_v45, 1  ;;  %v8693_v50 = vld [vmem:[#allocation4 + $0x38] sm:$0x1f] }
 0xa15   : > { %v8981_v63 = vor.u32 %v8980_v21, %v8977_v49  ;;  %v8776_v28 = vrot.slane %v8774_v62, 1  ;;  %v8885_v17 = vor.u32 %v8884_v18, %v8881_v59  ;;  %v9103_v9 = vshrl.u32 %v8739_v8, 16  ;;  %v8741_v26 = vld [vmem:[#allocation4 + $0x38] sm:$0xf8] }
 0xa16   : > { %v9092_v54 = vrot.slane %v9090_v42, 4  ;;  %v9106_v44 = vshll.u32 %v8739_v8, 16  ;;  %v8786_v40 = vshrl.u32 %v8691_v3, 16  ;;  %v8895_v58 = vshrl.u32 %v8707_v24, 16 }
 0xa17   : > { %8852 = vrot.lane.b32.xlu1 %v8837_v14, %s15704_s11  ;;  %8922 = vrot.lane.b32.xlu0 %v8877_v29, %s12646_s1  ;;  %s15705_s11 = sld [smem:[#allocation18_spill]]  ;;  %v8777_v22 = vor.u32 %v8776_v28, %v8772_v20  ;;  %v9089_v14 = vrot.slane %v9087_v47, 3  ;;  %v8991_v29 = vshrl.u32 %v8723_v0, 16  ;;  %v9105_v51 = vrot.slane %v9103_v9, 3  ;;  %v8710_v9 = vld [vmem:[#allocation4] sm:$0x3c] }
 0xa18   : > { %v8791_v56 = vor.u32 %v8790_v13, %v8786_v40  ;;  %v9108_v35 = vrot.slane %v9106_v44, 4  ;;  %v8898_v32 = vshll.u32 %v8707_v24, 16  ;;  %v8897_v16 = vrot.slane %v8895_v58, 1  ;;  %v8711_v44 = vld [vmem:[#allocation4 + $0x8] sm:$0x3c] }
 0xa19   : > { %v9093_v48 = vor.u32 %v9092_v54, %v9089_v14  ;;  %v8993_v5 = vrot.slane %v8991_v29, 2  ;;  %v9007_v30 = vshrl.u32 %v8725_v12, 16  ;;  %v9010_v19 = vshll.u32 %v8725_v12, 16  ;;  %v8678_v12 = vld [vmem:[#allocation4] sm:$0xf] }
 0xa1a   : > { %v8900_v52 = vrot.slane %v8898_v32, 2  ;;  %v8802_v7 = vshll.u32 %v8693_v50, 16  ;;  %v9119_v34 = vshrl.u32 %v8741_v26, 16  ;;  %v9122_v62 = vshll.u32 %v8741_v26, 16 }
 0xa1b   : > { %9016 = vrot.lane.b32.xlu1 %v8965_v38, %s12647_s3  ;;  %9026 = vrot.lane.b32.xlu0 %v9005_v36, %s12647_s3  ;;  %v15331_v38 = vpop.permute.xlu0 %9046  ;;  %v8997_v36 = vor.u32 %v8996_v2, %v8993_v5  ;;  %v9012_v33 = vrot.slane %v9010_v19, 3  ;;  %v8942_v58 = vrot.slane %v8710_v9, 2 }
 0xa1c   : > { %v8804_v6 = vrot.slane %v8802_v7, 1  ;;  %v9121_v41 = vrot.slane %v9119_v34, 3 }
 0xa1d   : > { %v15327_v61 = vld [vmem:[%s15705_s11] sm:$0xff]  }
 0xa1e   : > { %11735 = vmatprep.subr.bf16.mxu1 %v15327_v61 }
 0xa1f   : > { %8808 = vrot.lane.b32.xlu1 %v8763_v60, %s12647_s3  ;;  %8818 = vrot.lane.b32.xlu0 %v8798_v10, %s12647_s3  ;;  %v15335_v60 = vpop.permute.xlu0 %8838  ;;  %v9109_v10 = vor.u32 %v9108_v35, %v9105_v51 }
 0xa23   : > { %9128 = vrot.lane.b32.xlu1 %v9077_v43, %s12646_s1  ;;  %9138 = vrot.lane.b32.xlu0 %v9117_v46, %s12646_s1  ;;  %v15338_v55 = vpop.permute.xlu0 %9054  ;;  %v8901_v43 = vor.u32 %v8900_v52, %v8897_v16  ;;  %v9009_v46 = vrot.slane %v9007_v30, 2  ;;  %v8679_v52 = vld [vmem:[#allocation4 + $0x8] sm:$0xf] }
 0xa25   : > { %v9013_v11 = vor.u32 %v9012_v33, %v9009_v46 }
 0xa27   : > { %8920 = vrot.lane.b32.xlu1 %v8869_v37, %s12646_s1  ;;  %8930 = vrot.lane.b32.xlu0 %v8909_v53, %s12646_s1  ;;  %v15342_v57 = vpop.permute.xlu0 %8846  ;;  %v8709_v37 = vld [vmem:[#allocation4 + $0x38] sm:$0x3e]  ;;  %v8800_v53 = vshrl.u32 %v8693_v50, 16 }
 0xa28   : > { %v8911_v49 = vshrl.u32 %v8709_v37, 16  ;;  %v8914_v28 = vshll.u32 %v8709_v37, 16 }
 0xa29   : > { %v8805_v21 = vor.u32 %v8804_v6, %v8800_v53  ;;  %v12528_v53 = vld [vmem:[%s15705_s11 + $0x8] sm:$0xff]  }
 0xa2a   : > { %v8913_v25 = vrot.slane %v8911_v49, 1  ;;  %v8916_v20 = vrot.slane %v8914_v28, 2  ;;  %v8712_v49 = vld [vmem:[#allocation4 + $0x10] sm:$0x3c] }
 0xa2b   : > { %9020 = vrot.lane.b32.xlu1 %v8981_v63, %s12647_s3  ;;  %v9124_v63 = vrot.slane %v9122_v62, 4  ;;  %v9015_v47 = vpop.permute.xlu0 %9014 }
 0xa2c   : > { %v9217_v35 = vsel %vm1055_vm0, %v8942_v58, %v9015_v47 }
 0xa2d   : > { %v9125_v42 = vor.u32 %v9124_v63, %v9121_v41  ;;  %v9240_v16 = vsel %vm2233_vm7, %v9217_v35, %v15331_v38  ;;  %v8944_v63 = vrot.slane %v8712_v49, 2 }
 0xa2f   : > { %8812 = vrot.lane.b32.xlu1 %v8777_v22, %s12647_s3  ;;  %v8807_v15 = vpop.permute.xlu0 %8806  ;;  %v8917_v22 = vor.u32 %v8916_v20, %v8913_v25 }
 0xa30   : > { %v9160_v50 = vsel %vm1055_vm0, %v8678_v12, %v8807_v15  ;;  %v12530_v15 = vld [vmem:[%s15705_s11 + $0x18] sm:$0xff]  }
 0xa31   : > { %v9183_v26 = vsel %vm2233_vm7, %v9160_v50, %v15335_v60  ;;  %v12529_v60 = vld [vmem:[%s15705_s11 + $0x10] sm:$0xff]  }
 0xa33   : > { %9132 = vrot.lane.b32.xlu1 %v9093_v48, %s12646_s1  ;;  %v9127_v14 = vpop.permute.xlu0 %9126 }
 0xa37   : > { %8924 = vrot.lane.b32.xlu1 %v8885_v17, %s12646_s1  ;;  %v8919_v54 = vpop.permute.xlu0 %8918 }
 0xa38   : > { %v9200_v6 = vsel %vm9198_vm4, %v9183_v26, %v8919_v54  ;;  %v8681_v54 = vld [vmem:[#allocation4 + $0x18] sm:$0xf]  ;;  %v8682_v26 = vld [vmem:[#allocation4 + $0x20] sm:$0xf] }
 0xa3b   : > { %9024 = vrot.lane.b32.xlu1 %v8997_v36, %s12647_s3  ;;  %v15348_v31 = vpop.permute.xlu0 %9022 }
 0xa3f   : > { %8816 = vrot.lane.b32.xlu1 %v8791_v56, %s12647_s3  ;;  %v15350_v0 = vpop.permute.xlu0 %8814  ;;  %v8943_v56 = vrot.slane %v8711_v44, 2 }
 0xa43   : > { %9136 = vrot.lane.b32.xlu1 %v9109_v10, %s12646_s1  ;;  %v15352_v59 = vpop.permute.xlu0 %9134 }
 0xa47   : > { %8928 = vrot.lane.b32.xlu1 %v8901_v43, %s12646_s1  ;;  %v15354_v1 = vpop.permute.xlu0 %8926  ;;  %v9256_v43 = vsel %vm9198_vm4, %v9240_v16, %v9127_v14 }
 0xa4b   : > { %9028 = vrot.lane.b32.xlu1 %v9013_v11, %s12647_s3 }
 0xa4f   : > { %8820 = vrot.lane.b32.xlu1 %v8805_v21, %s12647_s3  ;;  %v8713_v21 = vld [vmem:[#allocation4 + $0x18] sm:$0x3c]  ;;  %s15706_s3 = sld [smem:[#allocation22_spill]] }
 0xa50   : > { %v8945_v28 = vrot.slane %v8713_v21, 2 }
 0xa53   : > { %9140 = vrot.lane.b32.xlu1 %v9125_v42, %s12646_s1 }
 0xa57   : > { %8932 = vrot.lane.b32.xlu1 %v8917_v22, %s12646_s1  ;;  %v8680_v22 = vld [vmem:[#allocation4 + $0x10] sm:$0xf]  ;;  %s15707_s1 = sld [smem:[#allocation21_spill]] }
 0xa6d   : > { %v9049_v29 = vpop.permute.xlu1 %9048  ;;  %v9051_v17 = vpop.permute.xlu0 %9050 }
 0xa71   : > { %v8841_v48 = vpop.permute.xlu1 %8840  ;;  %v15362_v45 = vpop.permute.xlu0 %8842 }
 0xa75   : > { %v9053_v18 = vpop.permute.xlu1 %9052  ;;  %v15366_v36 = vpop.permute.xlu0 %9058 }
 0xa79   : > { %v15356_v3 = vpop.permute.xlu1 %8844  ;;  %v15370_v40 = vpop.permute.xlu0 %8850 }
 0xa7d   : > { %v15358_v5 = vpop.permute.xlu1 %9056  ;;  %v9019_v10 = vpop.permute.xlu0 %9018 }
 0xa7e   : > { %v9223_v25 = vsel %vm1055_vm0, %v8944_v63, %v9019_v10  ;;  %v12532_v10 = vld [vmem:[%s15705_s11 + $0x28] sm:$0xff]  }
 0xa7f   : > { %v9244_v14 = vsel %vm2233_vm7, %v9223_v25, %v9051_v17 }
 0xa81   : > { %v15360_v2 = vpop.permute.xlu1 %8848  ;;  %v8811_v62 = vpop.permute.xlu0 %8810 }
 0xa85   : > { %v15364_v8 = vpop.permute.xlu1 %9060  ;;  %v9131_v47 = vpop.permute.xlu0 %9130 }
 0xa86   : > { %v9260_v9 = vsel %vm9198_vm4, %v9244_v14, %v9131_v47  ;;  %v8717_v47 = vld [vmem:[#allocation4 + $0x38] sm:$0x3c]  ;;  %v8684_v14 = vld [vmem:[#allocation4 + $0x30] sm:$0xf] }
 0xa89   : > { %v15368_v13 = vpop.permute.xlu1 %8852  ;;  %v8923_v58 = vpop.permute.xlu0 %8922 }
 0xa8d   : > { %v9017_v24 = vpop.permute.xlu1 %9016 }
 0xa8e   : > { %v9220_v32 = vsel %vm1055_vm0, %v8943_v56, %v9017_v24 }
 0xa8f   : > { %v9242_v30 = vsel %vm2233_vm7, %v9220_v32, %v9049_v29 }
 0xa91   : > { %v8809_v51 = vpop.permute.xlu1 %8808 }
 0xa92   : > { %v9163_v46 = vsel %vm1055_vm0, %v8679_v52, %v8809_v51  ;;  %v12531_v51 = vld [vmem:[%s15705_s11 + $0x20] sm:$0xff]  }
 0xa93   : > { %v9185_v38 = vsel %vm2233_vm7, %v9163_v46, %v8841_v48  ;;  %v9166_v48 = vsel %vm1055_vm0, %v8680_v22, %v8811_v62  ;;  %v8714_v52 = vld [vmem:[#allocation4 + $0x20] sm:$0x3c] }
 0xa94   : > { %v9187_v17 = vsel %vm2233_vm7, %v9166_v48, %v15362_v45  ;;  %v12533_v45 = vld [vmem:[%s15705_s11 + $0x30] sm:$0xff]   ;;  %v8946_v50 = vrot.slane %v8714_v52, 2 }
 0xa95   : > { %v9129_v19 = vpop.permute.xlu1 %9128  ;;  %v9204_v32 = vsel %vm9198_vm4, %v9187_v17, %v8923_v58 }
 0xa96   : > { %v9258_v33 = vsel %vm9198_vm4, %v9242_v30, %v9129_v19  ;;  %v8715_v30 = vld [vmem:[#allocation4 + $0x28] sm:$0x3c]  ;;  %v9229_v46 = vsel %vm1055_vm0, %v8946_v50, %v15348_v31  ;;  %v10993_v50 = vld [vmem:[%s15707_s1] ss:$0 sm:$0xff]  ;;  %s15708_s1 = sld [smem:[#allocation19_spill]] }
 0xa97   : > { %v10995_v7 = vcombine.low %v9256_v43, %v9258_v33  ;;  %v8947_v43 = vrot.slane %v8715_v30, 2 }
 0xa99   : > { %v8921_v11 = vpop.permute.xlu1 %8920  ;;  %9526 = vmatprep.mubr.bf16.mxu1 %v10995_v7  ;;  %v12534_v7 = vld [vmem:[%s15705_s11 + $0x38] sm:$0xff]  }
 0xa9a   : > { %v9202_v34 = vsel %vm9198_vm4, %v9185_v38, %v8921_v11  ;;  %v9248_v38 = vsel %vm2233_vm7, %v9229_v46, %v15338_v55  ;;  %v9027_v11 = vpop.permute.xlu0 %9026 }
 0xa9b   : > { %v10994_v37 = vcombine.low %v9200_v6, %v9202_v34  ;;  %v8683_v6 = vld [vmem:[#allocation4 + $0x28] sm:$0xf]  ;;  %v9264_v31 = vsel %vm9198_vm4, %v9248_v38, %v15352_v59 }
 0xa9d   : > { %v9021_v41 = vpop.permute.xlu1 %9020  ;;  %9527 = vmatmul.mubr.bf16.vlgmr.msra.gmra.mrb[184].mxu1 %v10994_v37  ;;  %v9172_v37 = vsel %vm1055_vm0, %v8682_v26, %v15350_v0 }
 0xa9e   : > { %11736 = vmatpush3.bf16.msra.mxu1 %v15327_v61  ;;  %v9226_v20 = vsel %vm1055_vm0, %v8945_v28, %v9021_v41  ;;  %v9191_v55 = vsel %vm2233_vm7, %v9172_v37, %v15342_v57  ;;  %v8716_v28 = vld [vmem:[#allocation4 + $0x30] sm:$0x3c] }
 0xa9f   : > { %11737 = vmatprep.subr.bf16.mxu1 %v12528_v53  ;;  %v9246_v61 = vsel %vm2233_vm7, %v9226_v20, %v9053_v18  ;;  %v9208_v0 = vsel %vm9198_vm4, %v9191_v55, %v15354_v1  ;;  %v8948_v25 = vrot.slane %v8716_v28, 2  ;;  %v8949_v20 = vrot.slane %v8717_v47, 2 }
 0xaa1   : > { %v8813_v42 = vpop.permute.xlu1 %8812 }
 0xaa2   : > { %11738 = vmatpush3.bf16.msra.mxu1 %v12528_v53  ;;  %v9169_v44 = vsel %vm1055_vm0, %v8681_v54, %v8813_v42  ;;  %v8685_v54 = vld [vmem:[#allocation4 + $0x38] sm:$0xf] }
 0xaa3   : > { %11739 = vmatprep.subr.bf16.mxu1 %v12529_v60  ;;  %v9189_v35 = vsel %vm2233_vm7, %v9169_v44, %v15356_v3 }
 0xaa5   : > { %v9133_v29 = vpop.permute.xlu1 %9132 }
 0xaa6   : > { %v9262_v24 = vsel %vm9198_vm4, %v9246_v61, %v9133_v29  ;;  %11740 = vmatpush3.bf16.msra.mxu1 %v12529_v60  ;;  %v8819_v60 = vpop.permute.xlu0 %8818 }
 0xaa7   : > { %v10998_v56 = vcombine.low %v9260_v9, %v9262_v24  ;;  %11741 = vmatprep.subr.bf16.mxu1 %v12530_v15  ;;  %v9178_v48 = vsel %vm1055_vm0, %v8684_v14, %v8819_v60 }
 0xaa9   : > { %v8925_v18 = vpop.permute.xlu1 %8924  ;;  %9534 = vmatprep.mubr.bf16.mxu1 %v10998_v56 }
 0xaaa   : > { %v9206_v12 = vsel %vm9198_vm4, %v9189_v35, %v8925_v18  ;;  %11742 = vmatpush3.bf16.msra.mxu1 %v12530_v15  ;;  %v9139_v57 = vpop.permute.xlu0 %9138 }
 0xaab   : > { %v10997_v16 = vcombine.low %v9204_v32, %v9206_v12  ;;  %11743 = vmatprep.subr.bf16.mxu1 %v12531_v51 }
 0xaad   : > { %v9025_v19 = vpop.permute.xlu1 %9024  ;;  %9535 = vmatmul.mubr.bf16.gmra.mrb[188].mxu1 %v10997_v16 }
 0xaae   : > { %11744 = vmatpush3.bf16.msra.mxu1 %v12531_v51  ;;  %v9232_v33 = vsel %vm1055_vm0, %v8947_v43, %v9025_v19  ;;  %v8931_v58 = vpop.permute.xlu0 %8930  ;;  %v9195_v51 = vsel %vm2233_vm7, %v9178_v48, %v15370_v40  ;;  %v12535_v19 = vld [vmem:[%s15706_s3] sm:$0xff]  }
 0xaaf   : > { %11745 = vmatprep.subr.bf16.mxu1 %v12532_v10  ;;  %v9250_v34 = vsel %vm2233_vm7, %v9232_v33, %v15358_v5 }
 0xab1   : > { %v8817_v3 = vpop.permute.xlu1 %8816 }
 0xab2   : > { %11746 = vmatpush3.bf16.msra.mxu1 %v12532_v10  ;;  %v9175_v53 = vsel %vm1055_vm0, %v8683_v6, %v8817_v3 }
 0xab3   : > { %11747 = vmatprep.subr.bf16.mxu1 %v12533_v45  ;;  %v9193_v5 = vsel %vm2233_vm7, %v9175_v53, %v15360_v2  ;;  %v9235_v2 = vsel %vm1055_vm0, %v8948_v25, %v9027_v11 }
 0xab4   : > { %v9252_v1 = vsel %vm2233_vm7, %v9235_v2, %v15366_v36 }
 0xab5   : > { %v9137_v62 = vpop.permute.xlu1 %9136  ;;  %v9268_v9 = vsel %vm9198_vm4, %v9252_v1, %v9139_v57 }
 0xab6   : > { %v9266_v49 = vsel %vm9198_vm4, %v9250_v34, %v9137_v62  ;;  %11748 = vmatpush3.bf16.msra.mxu1 %v12533_v45 }
 0xab7   : > { %v11001_v21 = vcombine.low %v9264_v31, %v9266_v49  ;;  %11749 = vmatprep.subr.bf16.mxu1 %v12534_v7 }
 0xab9   : > { %v8929_v41 = vpop.permute.xlu1 %8928  ;;  %9542 = vmatprep.mubr.bf16.mxu1 %v11001_v21 }
 0xaba   : > { %v9210_v59 = vsel %vm9198_vm4, %v9193_v5, %v8929_v41  ;;  %11750 = vmatpush3.bf16.msra.mxu1 %v12534_v7 }
 0xabb   : > { %v11000_v63 = vcombine.low %v9208_v0, %v9210_v59 }
 0xabd   : > { %v9029_v42 = vpop.permute.xlu1 %9028  ;;  %9543 = vmatmul.mubr.bf16.gmra.mrb[192].mxu1 %v11000_v63 }
 0xabe   : > { %v9238_v22 = vsel %vm1055_vm0, %v8949_v20, %v9029_v42 }
 0xabf   : > { %v9254_v61 = vsel %vm2233_vm7, %v9238_v22, %v15364_v8  ;;  %v9212_v8 = vsel %vm9198_vm4, %v9195_v51, %v8931_v58 }
 0xac1   : > { %v8821_v15 = vpop.permute.xlu1 %8820 }
 0xac2   : > { %v9181_v44 = vsel %vm1055_vm0, %v8685_v54, %v8821_v15  ;;  %v11028_v54 = vld [vmem:[%s15708_s1] ss:$0 sm:$0xff]  ;;  %s15709_s1 = sld [smem:[#allocation23_spill]] }
 0xac3   : > { %v9197_v36 = vsel %vm2233_vm7, %v9181_v44, %v15368_v13 }
 0xac5   : > { %v9141_v29 = vpop.permute.xlu1 %9140 }
 0xac6   : > { %v9270_v24 = vsel %vm9198_vm4, %v9254_v61, %v9141_v29 }
 0xac7   : > { %v11004_v56 = vcombine.low %v9268_v9, %v9270_v24 }
 0xac9   : > { %v8933_v17 = vpop.permute.xlu1 %8932  ;;  %9550 = vmatprep.mubr.bf16.mxu1 %v11004_v56 }
 0xaca   : > { %v9214_v18 = vsel %vm9198_vm4, %v9197_v36, %v8933_v17 }
 0xacb   : > { %v11003_v35 = vcombine.low %v9212_v8, %v9214_v18 }
 0xacd   : > { %9551 = vmatmul.mubr.bf16.gmra.mrb[196].mxu1 %v11003_v35 }
 0xace   : > { %11751 = vmatprep.mubr.bf16.mxu1 %v15124_v4 }
 0xad3   : > { %v11729_v32 = vpop.f32.mrb[76].mxu0 }
 0xad4   : > { %v9593_v12 = vpop.f32.mrb[77].mxu0 }
 0xad5   : > { %11752 = vmatmul.mubr.bf16.vlgmr.msra.gmra.mrb[200].mxu1 %v15122_v39  ;;  %v11730_v40 = vpop.f32.mrb[78].mxu0 }
 0xad6   : > { %11755 = vmatprep.mubr.bf16.mxu1 %v15135_v27  ;;  %v9596_v13 = vpop.f32.mrb[79].mxu0 }
 0xadb   : > { %v11733_v16 = vpop.f32.mrb[80].mxu0 }
 0xadc   : > { %v9609_v10 = vpop.f32.mrb[81].mxu0 }
 0xadd   : > { %11756 = vmatmul.mubr.bf16.gmra.mrb[204].mxu1 %v15133_v23  ;;  %v11734_v52 = vpop.f32.mrb[82].mxu0 }
 0xade   : > { %v9612_v30 = vpop.f32.mrb[83].mxu0  ;;  %11767 = vmatprep.mubr.msk.bf16.mxu1 %vm2233_vm7, %v12535_v19 }
 0xb70   : > { %v11542_v45 = vpop.f32.mrb[184].mxu1 }
 0xb71   : > { %v11543_v4 = vpop.f32.mrb[185].mxu1 }
 0xb72   : > { %v11544_v43 = vadd.f32 %v11543_v4, %v11542_v45  ;;  %v11545_v3 = vpop.f32.mrb[186].mxu1 }
 0xb73   : > { %v11546_v46 = vpop.f32.mrb[187].mxu1 }
 0xb74   : > { %v9529_v39 = vadd.f32 %v11544_v43, %v10993_v50  ;;  %v11547_v33 = vadd.f32 %v11546_v46, %v11545_v3 }
 0xb76   : > { %v9532_v7 = vadd.f32 %v11547_v33, %v10993_v50  ;;  %v9594_v27 = vadd.f32 %v9593_v12, %v9529_v39 }
 0xb78   : > { %v9597_v26 = vadd.f32 %v9596_v13, %v9532_v7 }
 0xb7a   : > { %v11893_v56 = vadd.f32 %v11028_v54, %v9597_v26 }
 0xb80   : > { %v11548_v38 = vpop.f32.mrb[188].mxu1 }
 0xb81   : > { %v11549_v11 = vpop.f32.mrb[189].mxu1 }
 0xb82   : > { %v11550_v6 = vadd.f32 %v11549_v11, %v11548_v38  ;;  %v11551_v23 = vpop.f32.mrb[190].mxu1 }
 0xb83   : > { %v11552_v34 = vpop.f32.mrb[191].mxu1 }
 0xb84   : > { %v9537_v62 = vadd.f32 %v11550_v6, %v10993_v50  ;;  %v11553_v37 = vadd.f32 %v11552_v34, %v11551_v23  ;;  %v12536_v23 = vld [vmem:[%s15706_s3 + $0x8] sm:$0xff]   ;;  %v12648_v34 = vmov 0.0   ;;  %s15711_s3 = sld [smem:[#allocation26_spill]] }
 0xb86   : > { %v9540_v31 = vadd.f32 %v11553_v37, %v10993_v50  ;;  %v9602_v53 = vadd.f32 %v11729_v32, %v9537_v62 }
 0xb88   : > { %v9605_v49 = vadd.f32 %v11730_v40, %v9540_v31 }
 0xb8a   : > { %v11890_v44 = vadd.f32 %v11028_v54, %v9605_v49 }
 0xb90   : > { %v11554_v21 = vpop.f32.mrb[192].mxu1 }
 0xb91   : > { %v11555_v55 = vpop.f32.mrb[193].mxu1 }
 0xb92   : > { %v11556_v5 = vadd.f32 %v11555_v55, %v11554_v21  ;;  %v11557_v41 = vpop.f32.mrb[194].mxu1  ;;  %v9851_v55 = vld [vmem:[%s15709_s1] sm:$0xf]  ;;  %s11052_s1 = sshll.u32 %s12830_s0, 4  ;;  %s12650_s0 = smov [#allocation6]  }
 0xb93   : > { %v11558_v0 = vpop.f32.mrb[195].mxu1  ;;  %s12554_s11 = sshll.u32 %s12650_s0, 4  ;;  %s12555_s11 = int_to_ptr.vmem [resolvable:$false] %s12554_s11 }
 0xb94   : > { %v9545_v59 = vadd.f32 %v11556_v5, %v10993_v50  ;;  %v11559_v60 = vadd.f32 %v11558_v0, %v11557_v41  ;;  %v12537_v5 = vld [vmem:[%s15710_s5] sm:$0xff]   ;;  %v12538_v41 = vld [vmem:[%s15710_s5 + $0x8] sm:$0xff]   ;;  %s15490_s5 = scalar_lea.hbm %s12802_s4, %s11052_s1 }
 0xb96   : > { %v9548_v63 = vadd.f32 %v11559_v60, %v10993_v50  ;;  %v9610_v28 = vadd.f32 %v9609_v10, %v9545_v59 }
 0xb98   : > { %v9613_v47 = vadd.f32 %v9612_v30, %v9548_v63 }
 0xb9a   : > { %v11905_v3 = vadd.f32 %v11028_v54, %v9613_v47  ;;  %v12539_v47 = vld [vmem:[%s15711_s3] sm:$0xff]  }
 0xba0   : > { %v11560_v42 = vpop.f32.mrb[196].mxu1 }
 0xba1   : > { %v11561_v25 = vpop.f32.mrb[197].mxu1 }
 0xba2   : > { %v11562_v20 = vadd.f32 %v11561_v25, %v11560_v42  ;;  %v11563_v57 = vpop.f32.mrb[198].mxu1  ;;  %v11042_v42 = vld [vmem:[%s15712_s6] ss:$0 sm:$0xff]  ;;  %s15714_s6 = sshll.u32 %s12882_s7, 3  ;;  %s939_s7 = sand.u32 1, %s12604_s15  }
 0xba3   : > { %v11564_v15 = vpop.f32.mrb[199].mxu1  ;;  %s960_s3 = scalar_lea.vmem %s15713_s12, %s15714_s6  ;;  %s940_s6 = scalar_lea.vmem [#allocation6], %s939_s7 }
 0xba4   : > { %v9553_v2 = vadd.f32 %v11562_v20, %v10993_v50  ;;  %v11565_v22 = vadd.f32 %v11564_v15, %v11563_v57  ;;  %s10121_s8 = scalar_lea.sflag [#allocation7], %s939_s7  ;;  %s12556_s12 = scalar_lea.vmem %s12555_s11, 32 }
 0xba6   : > { %v9556_v14 = vadd.f32 %v11565_v22, %v10993_v50  ;;  %v9618_v1 = vadd.f32 %v11733_v16, %v9553_v2 }
 0xba8   : > { %v11753_v61 = vpop.f32.mrb[200].mxu1  ;;  %v9621_v29 = vadd.f32 %v11734_v52, %v9556_v14  ;;  %v11896_v16 = vadd.f32 %v11028_v54, %v9618_v1  ;;  %v11899_v52 = vadd.f32 %v11028_v54, %v9610_v28  ;;  %v11046_v1 = vld [vmem:[#allocation5] ss:$0 sm:$0xff] }
 0xba9   : > { %v11884_v48 = vadd.f32 %v11753_v61, %v9602_v53  ;;  %v9729_v9 = vpop.f32.mrb[201].mxu1 }
 0xbaa   : > { %v11887_v24 = vadd.f32 %v9729_v9, %v9594_v27  ;;  %v11754_v58 = vpop.f32.mrb[202].mxu1  ;;  %v11902_v50 = vadd.f32 %v11028_v54, %v9621_v29 }
 0xbab   : > { %v11885_v51 = vadd.f32 %v11884_v48, %v11028_v54  ;;  %v11891_v36 = vadd.f32 %v11890_v44, %v11754_v58  ;;  %v9732_v17 = vpop.f32.mrb[203].mxu1 }
 0xbac   : > { %v11888_v8 = vadd.f32 %v11887_v24, %v11028_v54  ;;  %v11894_v18 = vadd.f32 %v11893_v56, %v9732_v17 }
 0xbad   : > { %v9770_v35 = vmax.f32 %v11885_v51, 0.0  ;;  %v9771_v32 = vmax.f32 %v11891_v36, 0.0 }
 0xbae   : > { %v9768_v12 = vmax.f32 %v11888_v8, 0.0  ;;  %v9769_v40 = vmax.f32 %v11894_v18, 0.0 }
 0xbaf   : > { %v9777_v13 = vpack.c.bf16 %v9771_v32, %v9770_v35 }
 0xbb0   : > { %v9776_v10 = vpack.c.bf16 %v9769_v40, %v9768_v12  ;;  %v11757_v30 = vpop.f32.mrb[204].mxu1 }
 0xbb1   : > { %v11897_v19 = vadd.f32 %v11896_v16, %v11757_v30  ;;  %v9745_v45 = vpop.f32.mrb[205].mxu1 }
 0xbb2   : > { %v11900_v4 = vadd.f32 %v11899_v52, %v9745_v45  ;;  %v11758_v43 = vpop.f32.mrb[206].mxu1  ;;  %11759 = vmatprep.subr.bf16.mxu1 %v9776_v10  ;;  %v12540_v45 = vld [vmem:[%s12792_s20] sm:$0xff]  }
 0xbb3   : > { %v11903_v46 = vadd.f32 %v11902_v50, %v11758_v43  ;;  %v9748_v39 = vpop.f32.mrb[207].mxu1  ;;  %11760 = vmatpush3.bf16.msra.mxu1 %v9776_v10  ;;  %v9774_v7 = vmax.f32 %v11897_v19, 0.0  ;;  %v12541_v50 = vld [vmem:[%s12792_s20 + $0x8] sm:$0xff]  }
 0xbb4   : > { %v11906_v33 = vadd.f32 %v11905_v3, %v9748_v39  ;;  %11761 = vmatprep.subr.bf16.mxu1 %v9777_v13  ;;  %v9772_v26 = vmax.f32 %v11900_v4, 0.0 }
 0xbb5   : > { %v9775_v27 = vmax.f32 %v11903_v46, 0.0 }
 0xbb6   : > { %v9773_v38 = vmax.f32 %v11906_v33, 0.0 }
 0xbb7   : > { %v9779_v11 = vpack.c.bf16 %v9775_v27, %v9774_v7  ;;  %11762 = vmatpush3.bf16.msra.mxu1 %v9777_v13 }
 0xbb8   : > { %v9778_v6 = vpack.c.bf16 %v9773_v38, %v9772_v26 }
 0xbba   : > { %11763 = vmatprep.subr.bf16.mxu1 %v9778_v6 }
 0xbbb   : > { %11764 = vmatpush3.bf16.msra.mxu1 %v9778_v6 }
 0xbbc   : > { %11765 = vmatprep.subr.bf16.mxu1 %v9779_v11 }
 0xbbf   : > { %11766 = vmatpush3.bf16.msra.mxu1 %v9779_v11  ;;  %v10061_v11 = vld [vmem:[%s12797_s27] sm:$0x1] }
 0xbc0   : > { %11771 = vmatprep.subr.bf16.mxu1 %v12648_v34 }
 0xbc2   : > { %11768 = vmatmul.mubr.msk.bf16.vlgmr.msra.gmra.mrb[208].mxu1 %vm2233_vm7, %v12536_v23  ;;  %vm10023_vm7 = vcmask 7168  }
 0xbc3   : > { %11775 = vmatprep.mubr.msk.bf16.mxu1 %vm12649_vm5, %v12648_v34 }
 0xc95   : > { %v11769_v62 = vpop.f32.mrb[208].mxu1 }
 0xc96   : > { %v9834_v37 = vpop.f32.mrb[209].mxu1 }
 0xc97   : > { %v11770_v31 = vpop.f32.mrb[210].mxu1 }
 0xc98   : > { %v9850_v53 = vpack.c.bf16 %v11770_v31, %v11769_v62  ;;  %v9837_v49 = vpop.f32.mrb[211].mxu1 }
 0xc99   : > { %v9849_v21 = vpack.c.bf16 %v9837_v49, %v9834_v37 }
 0xc9b   : > { %11772 = vmatpush3.bf16.msra.mxu1 %v9849_v21 }
 0xc9c   : > { %11773 = vmatprep.subr.bf16.mxu1 %v12648_v34 }
 0xc9f   : > { %11774 = vmatpush3.bf16.msra.mxu1 %v9850_v53 }
 0xca0   : > { %11779 = vmatprep.subr.bf16.mxu1 %v12648_v34 }
 0xca2   : > { %11776 = vmatmul.mubr.msk.bf16.vlgmr.msra.gmra.mrb[212].mxu1 %vm1055_vm0, %v9851_v55 }
 0xca3   : > { %11780 = vmatpush3.bf16.msra.mxu1 %v12537_v5  ;;  %11783 = vmatprep.mubr.msk.bf16.mxu1 %vm12649_vm5, %v12648_v34 }
 0xca4   : > { %11781 = vmatprep.subr.bf16.mxu1 %v12648_v34 }
 0xca7   : > { %11782 = vmatpush3.bf16.msra.mxu1 %v12538_v41 }
 0xca8   : > { %11787 = vmatprep.subr.bf16.mxu1 %v12648_v34 }
 0xd75   : > { %v9889_v0 = vpop.f32.mrb[212].mxu1 }
 0xd76   : > { %v9895_v59 = vpack.c.bf16 %v9889_v0, %v9889_v0  ;;  %v11777_v60 = vpop.f32.mrb[213].mxu1 }
 0xd77   : > { %v9892_v63 = vpop.f32.mrb[214].mxu1 }
 0xd78   : > { %11784 = vmatmul.mubr.msk.bf16.vlgmr.msra.gmra.mrb[216].mxu1 %vm1055_vm0, %v9895_v59  ;;  %v11778_v28 = vpop.f32.mrb[215].mxu1 }
 0xd79   : > { %11789 = vmatprep.mubr.msk.bf16.mxu1 %vm12649_vm5, %v12648_v34  ;;  %11788 = vmatpush3.bf16.msra.mxu1 %v12539_v47 }
 0xd7a   : > { %11793 = vmatprep.subr.bf16.mxu1 %v12648_v34 }
 0xe4b   : > { %v9956_v25 = vpop.f32.mrb[216].mxu1 }
 0xe4c   : > { %v9957_v20 = vadd.f32 %v11042_v42, %v9956_v25  ;;  %v11785_v57 = vpop.f32.mrb[217].mxu1 }
 0xe4d   : > { %v9959_v15 = vpop.f32.mrb[218].mxu1 }
 0xe4e   : > { %12542 = vtanh.f32 %v9957_v20  ;;  %v11786_v2 = vpop.f32.mrb[219].mxu1 }
 0xe58   : > { %v12543_v22 = vpop.eup %12542 }
 0xe59   : > { %v9963_v14 = vpack.c.bf16 %v12543_v22, %v12543_v22 }
 0xe5b   : > { %11790 = vmatmul.mubr.msk.bf16.vlgmr.msra.gmra.mrb[220].mxu1 %vm9979_vm6, %v9963_v14 }
 0xe5c   : > { %11797 = vmatprep.mubr.msk.bf16.mxu1 %vm12649_vm5, %v12648_v34  ;;  %11794 = vmatpush3.bf16.msra.mxu1 %v12540_v45 }
 0xe5d   : > { %11795 = vmatprep.subr.bf16.mxu1 %v12648_v34 }
 0xe60   : > { %11796 = vmatpush3.bf16.msra.mxu1 %v12541_v50 }
 0xf2e   : > { %v10017_v54 = vpop.f32.mrb[220].mxu1 }
 0xf2f   : > { %v10018_v61 = vadd.f32 %v11046_v1, %v10017_v54  ;;  %v11791_v29 = vpop.f32.mrb[221].mxu1 }
 0xf30   : > { %v10020_v48 = vpop.f32.mrb[222].mxu1 }
 0xf31   : > { %v10024_v9 = vsel %vm10023_vm7, %v10018_v61, -inf  ;;  %v11792_v44 = vpop.f32.mrb[223].mxu1 }
 0xf32   : > { %v10025_v24 = vrot.slane %v10024_v9, 4 }
 0xf34   : > { %v10026_v58 = vmax.f32 %v10024_v9, %v10025_v24 }
 0xf36   : > { %v10027_v56 = vrot.slane %v10026_v58, 2 }
 0xf38   : > { %v10028_v51 = vmax.f32 %v10026_v58, %v10027_v56 }
 0xf3a   : > { %v10029_v36 = vrot.slane %v10028_v51, 1 }
 0xf3c   : > { %v10030_v17 = vmax.f32 %v10028_v51, %v10029_v36 }
 0xf3e   : > { %v10031_v8 = vsub.f32 %v10018_v61, %v10030_v17 }
 0xf40   : > { %v10032_v18 = vmul.f32 1.442695, %v10031_v8 }
 0xf42   : > { %12544 = vpow2.f32 %v10032_v18 }
 0xf4c   : > { %v12545_v35 = vpop.eup %12544 }
 0xf4d   : > { %v10034_v32 = vsel %vm10023_vm7, %v12545_v35, 0.0 }
 0xf4e   : > { %v10035_v12 = vrot.slane %v10034_v32, 4 }
 0xf50   : > { %v10036_v40 = vadd.f32 %v10035_v12, %v10034_v32 }
 0xf52   : > { %v10037_v13 = vrot.slane %v10036_v40, 2 }
 0xf54   : > { %v10038_v16 = vadd.f32 %v10037_v13, %v10036_v40 }
 0xf56   : > { %v10039_v10 = vrot.slane %v10038_v16, 1 }
 0xf58   : > { %v10040_v30 = vadd.f32 %v10039_v10, %v10038_v16 }
 0xf5a   : > { %12546 = vrcp.f32 %v10040_v30 }
 0xf64   : > { %v12547_v52 = vpop.eup %12546 }
 0xf65   : > { %v10042_v19 = vmul.f32 %v12547_v52, %v12545_v35 }
 0xf67   : > { %10119 = vst.msk [vmem:[%s960_s3] sm:$0xff] %vm10023_vm7, %v10042_v19  ;;  %10045 = vperm.xlu0 %12043, %v10042_v19   ;;  %s10137_s3 = sshll.u32 %s940_s6, 4  ;;  %s15492_s3 = int_to_ptr.vmem [resolvable:$true] %s10137_s3 }
 0xf68   : > { %s12550_s9 = scalar_lea.vmem %s15492_s3, 16  ;;  %p12557_p0 = scmp.lt.s32.totalorder %s15492_s3, %s12555_s11 }
 0xf69   : > { %p12551_p11 = scmp.ne.s32.totalorder %s15492_s3, %s12550_s9  ;;  %p12558_p1 = scmp.lt.s32.totalorder %s12556_s12, %s12550_s9 }
 0xf6b   : > { %p12552_p12 = pnand %p12551_p11, %p12847_p5  ;;  %p12559_p2 = por %p12558_p1, %p12557_p0 }
 0xf6d   : > { %p12553_p13 = pneg %p12552_p12 }
 0xf6f   : > { %p12560_p3 = pnand %p12559_p2, %p12553_p13 }
 0xfe6   : > { %v10046_v4 = vpop.permute.xlu0 %10045 }
 0xfe7   : > { %v10048_v43 = vmul.f32 %v10046_v4, %v9889_v0 }
 0xfe9   : > { %v10049_v3 = vsel %vm1055_vm0, %v10048_v43, 0.0 }
 0xfea   : > { %v10050_v46 = vrot.slane %v10049_v3, 4 }
 0xfec   : > { %v10051_v39 = vadd.f32 %v10050_v46, %v10049_v3 }
 0xfee   : > { %v10052_v33 = vrot.slane %v10051_v39, 2 }
 0xff0   : > { %v10053_v7 = vadd.f32 %v10052_v33, %v10051_v39 }
 0xff2   : > { %v10054_v27 = vrot.slane %v10053_v7, 1 }
 0xff4   : > { %v10055_v26 = vadd.f32 %v10054_v27, %v10053_v7 }
 0xff6   : > { %v10056_v38 = vpack.c.bf16 %v10055_v26, %v10055_v26 }
 0xff8   : > { %11798 = vmatmul.mubr.msk.bf16.vlgmr.msra.gmra.mrb[224].mxu1 %vm1055_vm0, %v10056_v38 }
0x10cb   : > { %v10111_v6 = vpop.f32.mrb[224].mxu1 }
0x10cc   : > { %v10112_v23 = vadd.f32 %v10111_v6, %v10061_v11  ;;  %v11799_v34 = vpop.f32.mrb[225].mxu1 }
0x10cd   : > { %v10114_v62 = vpop.f32.mrb[226].mxu1 }
0x10ce   : > { %v11800_v37 = vpop.f32.mrb[227].mxu1  ;;  %10118 = vst.msk [vmem:[%s940_s6] sm:$0x1] %vm10117_vm8, %v10112_v23 }
0x10cf   : > { %12563 = shalt.err (!%p12560_p3)
}
0x10d0   : > { %s12564_s7 = scalar_lea.hbm %s15490_s5, 16  ;;  %s12568_s1 = scalar_lea.hbm %s12802_s4, 32 }
0x10d1   : > { %p12565_p4 = scmp.ne.s32.totalorder %s15490_s5, %s12564_s7  ;;  %p12569_p9 = scmp.lt.u32.totalorder %s15490_s5, %s12802_s4 }
0x10d2   : > { %p12570_p10 = scmp.lt.u32.totalorder %s12568_s1, %s12564_s7  ;;  %p12572_p12 = scmp.lt.u32.totalorder %s12564_s7, %s15490_s5 }
0x10d3   : > { %p12566_p7 = pnand %p12565_p4, %p12847_p5 }
0x10d4   : > { %p12571_p11 = por %p12570_p10, %p12569_p9 }
0x10d5   : > { %p12567_p8 = pneg %p12566_p7 }
0x10d6   : > { %p12573_p0 = por %p12572_p12, %p12571_p11 }
0x10d8   : > { %p12574_p13 = pnand %p12573_p0, %p12567_p8 }
0x10da   : > { %12577 = shalt.err (!%p12574_p13)
}
0x10db   : > { %11968 = dma.vmem_to_hbm [thread:$0]  (%p12847_p5), %s15492_s3, 16, %s15490_s5, %s10121_s8  }
0x10dc PF: > { %p11974_p1 = scmp.ge.s32.totalorder %s12612_s23, 2  ;;  %s10152_s9 = sand.u32 1, %s12600_s16  }
0x10dd   : > { %s10153_s12 = scalar_lea.sflag [#allocation7], %s10152_s9 }
0x10de   : > { %p11971_p2 = pnand %p11974_p1, %p12851_p6 }
0x10e0   : > { %12595 = dma.done.wait (!%p11971_p2), %s10153_s12, 16  }
0x10e1   : > { %12597 = vsyncadd (!%p11971_p2), %s10153_s12, 4294967280  ;;  %p74_p3 = scmp.ge.s32.totalorder %s12834_s22, 4   ;;  %s15715_s16 = smov %s12604_s15 }
0x10e2   : > { %s15716_s15 = smov %s12608_s18  ;;  %s15717_s18 = smov %s12845_s28 }
0x10e3   : > { %s15718_s23 = smov %s12834_s22  ;;  %76 = sbr.rel (!%p74_p3) target bundleno = 54 (0x36), region = 237 }
0x10ea   :  { %10164 = vsyncpa [#allocation7], 1 }
0x10eb   :  { %10166 = vsyncpa [#allocation7 + $0x1], 1 }

</bundles_post_ra>
